<compile_context>
chip_gen: v6e
topology: v6e:2x2x1
jax: 0.10.0
libtpu: 0.0.40
codegen_flags: <defaults>
</compile_context>

<pallas_src>
import functools

import jax
import jax.numpy as jnp
from jax import lax
from jax.experimental import pallas as pl
from jax.experimental.pallas import tpu as pltpu


def _gating_kernel(inv_regions, txt_ref, img_ref, wt_ref, wi_ref, b_ref,
                   o_ref, acc_ref):
    """Blocks: txt (tm, T), img (tm, tr, D), wt (T, E), wi (D, E), b (1, E),
    out (tm, E); acc_ref is a (tm, D) f32 VMEM scratch (region-sum accumulator)."""
    r = pl.program_id(1)

    @pl.when(r == 0)
    def _init():
        acc_ref[...] = jnp.zeros_like(acc_ref)

    # Accumulate the per-row region sum in f32 (the image stream dominates HBM
    # traffic; this is a cheap sublane reduction on the VPU/XLU).
    acc_ref[...] += jnp.sum(img_ref[...].astype(jnp.float32), axis=1)

    @pl.when(r == pl.num_programs(1) - 1)
    def _finalize():
        img_mean = acc_ref[...] * inv_regions                     # (tm, D) f32
        # cat([text, img_mean]) @ W  ==  text @ W_text + img_mean @ W_img
        scores = jnp.dot(txt_ref[...], wt_ref[...],
                         preferred_element_type=jnp.float32,
                         precision=lax.Precision.HIGHEST)
        scores = scores + jnp.dot(img_mean.astype(wi_ref.dtype), wi_ref[...],
                                  preferred_element_type=jnp.float32,
                                  precision=lax.Precision.HIGHEST)
        scores = scores + b_ref[...].astype(jnp.float32)
        # Row softmax (dim=1), numerically stable, f32 throughout.
        m = jnp.max(scores, axis=-1, keepdims=True)
        e = jnp.exp(scores - m)
        probs = e / jnp.sum(e, axis=-1, keepdims=True)
        o_ref[...] = probs.astype(o_ref.dtype)


def gating_network_probs(text_features, image_features, fc1_weight, fc1_bias,
                         *, tm=256, tr=8, vmem_limit_bytes=48 << 20):
    """Fused GatingNetwork head.

    text_features:  (B, T)      pooled text-encoder output (T = 768)
    image_features: (B, R, D)   region features (D = 2048)
    fc1_weight:     (T + D, E)  nn.Linear weight, transposed to (in, out)
    fc1_bias:       (E,)
    returns:        (B, E)      softmax expert probabilities
    """
    B, T = text_features.shape
    Bi, R, D = image_features.shape
    assert Bi == B
    TD, E = fc1_weight.shape
    assert TD == T + D and fc1_bias.shape == (E,)

    w_text = fc1_weight[:T]                       # (T, E): multiplies text features
    w_img = fc1_weight[T:]                        # (D, E): multiplies pooled image features
    b2d = fc1_bias.reshape(1, E)

    # ---- batch (row) tiling: biggest useful tile; single tile for toy sizes ----
    if B <= tm:
        tm_eff, Bp = B, B                         # block == full dim is legal
        txt, img = text_features, image_features
    else:
        tm_eff = tm
        Bp = pl.cdiv(B, tm) * tm
        txt = jnp.pad(text_features, ((0, Bp - B), (0, 0)))
        img = jnp.pad(image_features, ((0, Bp - B), (0, 0), (0, 0)))

    # ---- region (reduction) tiling keeps the image block within VMEM budget ----
    if R <= tr:
        tr_eff, Rp = R, R
    else:
        tr_eff = tr
        Rp = pl.cdiv(R, tr) * tr
        if Rp != R:                               # zero-padded regions add 0 to the sum
            img = jnp.pad(img, ((0, 0), (0, Rp - R), (0, 0)))

    grid = (Bp // tm_eff, Rp // tr_eff)

    itemsize = jnp.dtype(text_features.dtype).itemsize
    w_itemsize = jnp.dtype(fc1_weight.dtype).itemsize
    cost = pl.CostEstimate(
        flops=int(2 * Bp * E * (T + D) + Bp * Rp * D),
        transcendentals=int(Bp * E),              # exp in the softmax
        bytes_accessed=int((txt.size + img.size + Bp * E) * itemsize
                           + (w_text.size + w_img.size + b2d.size) * w_itemsize),
    )

    out = pl.pallas_call(
        functools.partial(_gating_kernel, 1.0 / R),
        out_shape=jax.ShapeDtypeStruct((Bp, E), text_features.dtype),
        grid_spec=pltpu.PrefetchScalarGridSpec(
            num_scalar_prefetch=0,
            grid=grid,
            in_specs=[
                pl.BlockSpec((tm_eff, T), lambda i, r: (i, 0)),             # text rows
                pl.BlockSpec((tm_eff, tr_eff, D), lambda i, r: (i, r, 0)),  # image rows x region chunk
                pl.BlockSpec((T, E), lambda i, r: (0, 0)),                  # resident W_text
                pl.BlockSpec((D, E), lambda i, r: (0, 0)),                  # resident W_img
                pl.BlockSpec((1, E), lambda i, r: (0, 0)),                  # resident bias
            ],
            out_specs=pl.BlockSpec((tm_eff, E), lambda i, r: (i, 0)),
            scratch_shapes=[pltpu.VMEM((tm_eff, D), jnp.float32)],
        ),
        compiler_params=pltpu.CompilerParams(
            dimension_semantics=("parallel", "arbitrary"),
            vmem_limit_bytes=vmem_limit_bytes,
        ),
        cost_estimate=cost,
    )(txt, img, w_text, w_img, b2d)

    return out[:B]


if __name__ == "__main__":
    # Module-implied dims: text pooled output = 768, image region features = 2048
    # (fc1 = nn.Linear(768 + 2048, num_experts)).  Batch / regions / experts small.
    batch, regions, text_dim, image_dim, num_experts = 2, 8, 768, 2048, 4

    key = jax.random.PRNGKey(0)
    k_t, k_i, k_w, k_b = jax.random.split(key, 4)

    # TODO(synk): build_text_encoder(...) (a full BERT) is not translated to
    # Pallas; the kernel consumes its pooled (B, 768) output directly.
    text_features = jax.random.normal(k_t, (batch, text_dim), jnp.float32)
    image_features = jax.random.normal(k_i, (batch, regions, image_dim), jnp.float32)

    # fc1 parameters, weight stored transposed as (in_dim, num_experts).
    fc1_weight = (
        jax.random.normal(k_w, (text_dim + image_dim, num_experts), jnp.float32)
        * 0.02
    )
    fc1_bias = jax.random.normal(k_b, (num_experts,), jnp.float32) * 0.02

    probs = gating_network_probs(text_features, image_features, fc1_weight, fc1_bias)
    probs = jax.block_until_ready(probs)

    # Plain-JAX reference of the PyTorch forward (post text-encoder).
    img_avg = jnp.mean(image_features, axis=1)
    combined = jnp.concatenate([text_features, img_avg], axis=1)
    scores_ref = jnp.dot(combined, fc1_weight, precision=lax.Precision.HIGHEST) + fc1_bias
    ref = jax.nn.softmax(scores_ref, axis=1)

    assert probs.shape == (batch, num_experts)
    # Loose-ish tolerance as a safety net for matmul precision-path differences
    # (actual error with HIGHEST precision on both sides is ~1e-6).
    assert jnp.allclose(probs, ref, atol=2e-3, rtol=2e-3)
    assert jnp.allclose(jnp.sum(probs, axis=1), 1.0, atol=1e-5)

    print("KERNEL_OK")
</pallas_src>

<mosaic_0001>
module attributes {stable_mosaic.version = 11 : i64} {
  func.func @_gating_kernel(%arg0: i32, %arg1: i32, %arg2: memref<2x768xf32, #tpu.memory_space<vmem>>, %arg3: memref<2x8x2048xf32, #tpu.memory_space<vmem>>, %arg4: memref<768x4xf32, #tpu.memory_space<vmem>>, %arg5: memref<2048x4xf32, #tpu.memory_space<vmem>>, %arg6: memref<1x4xf32, #tpu.memory_space<vmem>>, %arg7: memref<2x4xf32, #tpu.memory_space<vmem>>, %arg8: memref<2x2048xf32, #tpu.memory_space<vmem>>) attributes {dimension_semantics = [#tpu.dimension_semantics<parallel>, #tpu.dimension_semantics<arbitrary>], iteration_bounds = array<i64: 1, 1>, scalar_prefetch = 0 : i64, scratch_operands = 1 : i64, tpu.core_type = #tpu.core_type<tc>, window_params = [{transform_indices = @transform_0, window_bounds = array<i64: 2, 768>}, {transform_indices = @transform_1, window_bounds = array<i64: 2, 8, 2048>}, {pipeline_mode = #tpu.pipeline_mode<synchronous>, transform_indices = @transform_2, window_bounds = array<i64: 768, 4>}, {pipeline_mode = #tpu.pipeline_mode<synchronous>, transform_indices = @transform_3, window_bounds = array<i64: 2048, 4>}, {pipeline_mode = #tpu.pipeline_mode<synchronous>, transform_indices = @transform_4, window_bounds = array<i64: 1, 4>}, {transform_indices = @transform_5, window_bounds = array<i64: 2, 4>}]} {
    %c0_i32 = arith.constant 0 : i32
    %0 = arith.cmpi eq, %arg1, %c0_i32 : i32
    %1 = arith.extui %0 : i1 to i32
    %c0_i32_0 = arith.constant 0 : i32
    %2 = arith.cmpi ne, %1, %c0_i32_0 : i32
    scf.if %2 {
      %cst_9 = arith.constant 0.000000e+00 : f32
      %11 = vector.broadcast %cst_9 : f32 to vector<2x2048xf32>
      %c0_10 = arith.constant 0 : index
      %c0_11 = arith.constant 0 : index
      %12 = vector.load %arg8[%c0_10, %c0_11] : memref<2x2048xf32, #tpu.memory_space<vmem>>, vector<2x2048xf32>
      tpu.vector_store %arg8[%c0_10, %c0_11], %11 {strides = array<i32>} : memref<2x2048xf32, #tpu.memory_space<vmem>>, vector<2x2048xf32>,
    } else {
    }
    %c0 = arith.constant 0 : index
    %c0_1 = arith.constant 0 : index
    %3 = vector.load %arg8[%c0, %c0_1] : memref<2x2048xf32, #tpu.memory_space<vmem>>, vector<2x2048xf32>
    %c0_2 = arith.constant 0 : index
    %c0_3 = arith.constant 0 : index
    %c0_4 = arith.constant 0 : index
    %4 = vector.load %arg3[%c0_2, %c0_3, %c0_4] : memref<2x8x2048xf32, #tpu.memory_space<vmem>>, vector<2x8x2048xf32>
    %cst = arith.constant dense<0.000000e+00> : vector<2x2048xf32>
    %5 = vector.multi_reduction <add>, %4, %cst [1] : vector<2x8x2048xf32> to vector<2x2048xf32>
    %6 = arith.addf %3, %5 : vector<2x2048xf32>
    %c0_5 = arith.constant 0 : index
    %c0_6 = arith.constant 0 : index
    %7 = vector.load %arg8[%c0_5, %c0_6] : memref<2x2048xf32, #tpu.memory_space<vmem>>, vector<2x2048xf32>
    tpu.vector_store %arg8[%c0_5, %c0_6], %6 {strides = array<i32>} : memref<2x2048xf32, #tpu.memory_space<vmem>>, vector<2x2048xf32>,
    %c0_i32_7 = arith.constant 0 : i32
    %8 = arith.cmpi eq, %arg1, %c0_i32_7 : i32
    %9 = arith.extui %8 : i1 to i32
    %c0_i32_8 = arith.constant 0 : i32
    %10 = arith.cmpi ne, %9, %c0_i32_8 : i32
    scf.if %10 {
      %c0_9 = arith.constant 0 : index
      %c0_10 = arith.constant 0 : index
      %11 = vector.load %arg8[%c0_9, %c0_10] : memref<2x2048xf32, #tpu.memory_space<vmem>>, vector<2x2048xf32>
      %cst_11 = arith.constant 1.250000e-01 : f32
      %12 = vector.broadcast %cst_11 : f32 to vector<2x2048xf32>
      %13 = arith.mulf %11, %12 : vector<2x2048xf32>
      %c0_12 = arith.constant 0 : index
      %c0_13 = arith.constant 0 : index
      %14 = vector.load %arg2[%c0_12, %c0_13] : memref<2x768xf32, #tpu.memory_space<vmem>>, vector<2x768xf32>
      %c0_14 = arith.constant 0 : index
      %c0_15 = arith.constant 0 : index
      %15 = vector.load %arg4[%c0_14, %c0_15] : memref<768x4xf32, #tpu.memory_space<vmem>>, vector<768x4xf32>
      %cst_16 = arith.constant dense<0.000000e+00> : vector<2x4xf32>
      %16 = tpu.matmul %14, %15, %cst_16 {dimension_numbers = #tpu.dot_dimension_numbers<[1], [0], [0], [1], [0, 0, 1, 1], [], []>, precision = #tpu.contract_precision<fp32>} : vector<2x768xf32>, vector<768x4xf32>, vector<2x4xf32> -> vector<2x4xf32>
      %c0_17 = arith.constant 0 : index
      %c0_18 = arith.constant 0 : index
      %17 = vector.load %arg5[%c0_17, %c0_18] : memref<2048x4xf32, #tpu.memory_space<vmem>>, vector<2048x4xf32>
      %cst_19 = arith.constant dense<0.000000e+00> : vector<2x4xf32>
      %18 = tpu.matmul %13, %17, %cst_19 {dimension_numbers = #tpu.dot_dimension_numbers<[1], [0], [0], [1], [0, 0, 1, 1], [], []>, precision = #tpu.contract_precision<fp32>} : vector<2x2048xf32>, vector<2048x4xf32>, vector<2x4xf32> -> vector<2x4xf32>
      %19 = arith.addf %16, %18 : vector<2x4xf32>
      %c0_20 = arith.constant 0 : index
      %c0_21 = arith.constant 0 : index
      %20 = vector.load %arg6[%c0_20, %c0_21] : memref<1x4xf32, #tpu.memory_space<vmem>>, vector<1x4xf32>
      %21 = vector.broadcast %20 : vector<1x4xf32> to vector<2x4xf32>
      %22 = arith.addf %19, %21 : vector<2x4xf32>
      %cst_22 = arith.constant dense<0xFF800000> : vector<2xf32>
      %23 = vector.multi_reduction <maximumf>, %22, %cst_22 [1] : vector<2x4xf32> to vector<2xf32>
      %24 = vector.shape_cast %23 : vector<2xf32> to vector<2x1xf32>
      %25 = vector.broadcast %24 : vector<2x1xf32> to vector<2x4xf32>
      %26 = arith.subf %22, %25 : vector<2x4xf32>
      %27 = math.exp %26 : vector<2x4xf32>
      %cst_23 = arith.constant dense<0.000000e+00> : vector<2xf32>
      %28 = vector.multi_reduction <add>, %27, %cst_23 [1] : vector<2x4xf32> to vector<2xf32>
      %29 = vector.shape_cast %28 : vector<2xf32> to vector<2x1xf32>
      %30 = vector.broadcast %29 : vector<2x1xf32> to vector<2x4xf32>
      %31 = arith.divf %27, %30 : vector<2x4xf32>
      %c0_24 = arith.constant 0 : index
      %c0_25 = arith.constant 0 : index
      %32 = vector.load %arg7[%c0_24, %c0_25] : memref<2x4xf32, #tpu.memory_space<vmem>>, vector<2x4xf32>
      tpu.vector_store %arg7[%c0_24, %c0_25], %31 {strides = array<i32>} : memref<2x4xf32, #tpu.memory_space<vmem>>, vector<2x4xf32>,
    } else {
    }
    return
  }
  func.func @transform_0(%arg0: i32, %arg1: i32) -> (i32, i32) {
    %c0_i32 = arith.constant 0 : i32
    %c0_i32_0 = arith.constant 0 : i32
    return %arg0, %c0_i32 : i32, i32
  }
  func.func @transform_1(%arg0: i32, %arg1: i32) -> (i32, i32, i32) {
    %c0_i32 = arith.constant 0 : i32
    %c0_i32_0 = arith.constant 0 : i32
    return %arg0, %arg1, %c0_i32 : i32, i32, i32
  }
  func.func @transform_2(%arg0: i32, %arg1: i32) -> (i32, i32) {
    %c0_i32 = arith.constant 0 : i32
    %c0_i32_0 = arith.constant 0 : i32
    %c0_i32_1 = arith.constant 0 : i32
    return %c0_i32, %c0_i32_0 : i32, i32
  }
  func.func @transform_3(%arg0: i32, %arg1: i32) -> (i32, i32) {
    %c0_i32 = arith.constant 0 : i32
    %c0_i32_0 = arith.constant 0 : i32
    %c0_i32_1 = arith.constant 0 : i32
    return %c0_i32, %c0_i32_0 : i32, i32
  }
  func.func @transform_4(%arg0: i32, %arg1: i32) -> (i32, i32) {
    %c0_i32 = arith.constant 0 : i32
    %c0_i32_0 = arith.constant 0 : i32
    %c0_i32_1 = arith.constant 0 : i32
    return %c0_i32, %c0_i32_0 : i32, i32
  }
  func.func @transform_5(%arg0: i32, %arg1: i32) -> (i32, i32) {
    %c0_i32 = arith.constant 0 : i32
    %c0_i32_0 = arith.constant 0 : i32
    return %arg0, %c0_i32 : i32, i32
  }
}

</mosaic_0001>

<bundles_post_ra>
// kernel: tpu_custom_call.1
= control target key start
LH: loop header
LB: loop body
LE: loop exit
PB: predicated region body
PF: predicated region fallthrough
CT: control target
= control target key end

     0   :  { %v12815_v16 = vmov 1983009808   ;;  %s20408_s0 = inlined_call_operand.vmem [shape: f32[2,768], index: 0, kind: input, shape index: {}]   ;;  %s20409_s1 = inlined_call_operand.vmem [shape: f32[2,8,2048], index: 1, kind: input, shape index: {}]   ;;  %s20410_s2 = inlined_call_operand.vmem [shape: f32[768,4], index: 2, kind: input, shape index: {}]   ;;  %s20411_s3 = inlined_call_operand.vmem [shape: f32[2048,4], index: 3, kind: input, shape index: {}]   ;;  %s20412_s4 = inlined_call_operand.vmem [shape: f32[1,4], index: 4, kind: input, shape index: {}]   ;;  %s20413_s5 = inlined_call_operand.hbm [shape: f32[2,4], index: 5, kind: output, shape index: {}]  }
   0x1   :  { %v611_v0 = vld [vmem:[%s20411_s3 + $0xf8] sm:$0xff]  ;;  %v610_v2 = vld [vmem:[%s20411_s3 + $0xf0] sm:$0xff]  ;;  %v609_v7 = vld [vmem:[%s20411_s3 + $0xe8] sm:$0xff]  ;;  %v12886_v17 = vunpack.c.l.s4 %v12815_v16 }
   0x2   :  { %v595_v1 = vld [vmem:[%s20411_s3 + $0x78] sm:$0xff]  ;;  %v12856_v3 = vand.u32 4294901760, %v611_v0  ;;  %v12860_v5 = vand.u32 4294901760, %v610_v2  ;;  %v594_v6 = vld [vmem:[%s20411_s3 + $0x70] sm:$0xff]  ;;  %v593_v8 = vld [vmem:[%s20411_s3 + $0x68] sm:$0xff]  ;;  %v12873_v11 = vand.u32 4294901760, %v609_v7 }
   0x3   :  { %v12858_v4 = vand.u32 4294901760, %v595_v1  ;;  %v12871_v10 = vand.u32 4294901760, %v594_v6  ;;  %v12875_v12 = vand.u32 4294901760, %v593_v8  ;;  %v608_v13 = vld [vmem:[%s20411_s3 + $0xe0] sm:$0xff]  ;;  %v607_v15 = vld [vmem:[%s20411_s3 + $0xd8] sm:$0xff]  ;;  %v606_v43 = vld [vmem:[%s20411_s3 + $0xd0] sm:$0xff] }
   0x4   :  { %v592_v14 = vld [vmem:[%s20411_s3 + $0x60] sm:$0xff]  ;;  %10476 = vmatprep.subr.mxu0 %v12856_v3  ;;  %v12890_v18 = vsub.f32 %v611_v0, %v12856_v3  ;;  %v12896_v20 = vsub.f32 %v610_v2, %v12860_v5  ;;  %v12898_v21 = vand.u32 4294901760, %v608_v13  ;;  %v12905_v23 = vsub.f32 %v609_v7, %v12873_v11  ;;  %v591_v26 = vld [vmem:[%s20411_s3 + $0x58] sm:$0xff]  ;;  %v590_v44 = vld [vmem:[%s20411_s3 + $0x50] sm:$0xff] }
   0x5   :  { %v12893_v19 = vsub.f32 %v595_v1, %v12858_v4  ;;  %10477 = vmatpush3.msra.mxu0 %v12858_v4  ;;  %v12902_v22 = vsub.f32 %v594_v6, %v12871_v10  ;;  %v12907_v24 = vand.u32 4294901760, %v592_v14  ;;  %v12910_v25 = vsub.f32 %v593_v8, %v12875_v12  ;;  %v605_v49 = vld [vmem:[%s20411_s3 + $0xc8] sm:$0xff]  ;;  %v604_v59 = vld [vmem:[%s20411_s3 + $0xc0] sm:$0xff]  ;;  %v603_v8 = vld [vmem:[%s20411_s3 + $0xb8] sm:$0xff] }
   0x6   :  { %21185 = vst [vmem:[#allocation6_spill] sm:$0xff] %v12890_v18  ;;  %10478 = vmatprep.subr.mxu0 %v12860_v5  ;;  %v20432_v27 = vand.u32 4294901760, %v12890_v18  ;;  %v20429_v29 = vand.u32 4294901760, %v12896_v20  ;;  %v12919_v30 = vand.u32 4294901760, %v607_v15  ;;  %v20426_v32 = vand.u32 4294901760, %v12905_v23  ;;  %v589_v50 = vld [vmem:[%s20411_s3 + $0x48] sm:$0xff] }
   0x7   :  { %v20430_v28 = vand.u32 4294901760, %v12893_v19  ;;  %10479 = vmatpush3.msra.mxu0 %v12871_v10  ;;  %v20427_v31 = vand.u32 4294901760, %v12902_v22  ;;  %v20424_v33 = vand.u32 4294901760, %v12910_v25  ;;  %v12926_v34 = vsub.f32 %v608_v13, %v12898_v21  ;;  %v588_v60 = vld [vmem:[%s20411_s3 + $0x40] sm:$0xff] }
   0x8   :  { %v1152_v35 = vsub.f32 %v12890_v18, %v20432_v27  ;;  %10480 = vmatprep.subr.mxu0 %v12873_v11  ;;  %v1159_v37 = vsub.f32 %v12896_v20, %v20429_v29  ;;  %v12938_v38 = vand.u32 4294901760, %v591_v26  ;;  %v1166_v40 = vsub.f32 %v12905_v23, %v20426_v32 }
   0x9   :  { %v1040_v36 = vsub.f32 %v12893_v19, %v20430_v28  ;;  %10481 = vmatpush3.msra.mxu0 %v12875_v12  ;;  %v1047_v39 = vsub.f32 %v12902_v22, %v20427_v31  ;;  %v1054_v41 = vsub.f32 %v12910_v25, %v20424_v33  ;;  %v20422_v42 = vand.u32 4294901760, %v12926_v34 }
   0xa   :  { %v1153_v45 = vand.u32 4294901760, %v1152_v35  ;;  %v1160_v47 = vand.u32 4294901760, %v1159_v37  ;;  %10482 = vmatprep.subr.mxu0 %v12898_v21  ;;  %v12959_v48 = vsub.f32 %v592_v14, %v12907_v24  ;;  %v1167_v52 = vand.u32 4294901760, %v1166_v40 }
   0xb   :  { %v1041_v46 = vand.u32 4294901760, %v1040_v36  ;;  %v1048_v51 = vand.u32 4294901760, %v1047_v39  ;;  %10483 = vmatpush3.msra.mxu0 %v12907_v24  ;;  %v1055_v53 = vand.u32 4294901760, %v1054_v41  ;;  %v1173_v54 = vsub.f32 %v12926_v34, %v20422_v42  ;;  %v587_v39 = vld [vmem:[%s20411_s3 + $0x38] sm:$0xff] }
   0xc   :  { %10511 = vmatprep.subr.mxu1 %v1153_v45  ;;  %10484 = vmatprep.subr.mxu0 %v12919_v30  ;;  %v20421_v55 = vand.u32 4294901760, %v12959_v48  ;;  %v12973_v56 = vand.u32 4294901760, %v606_v43  ;;  %v12976_v57 = vsub.f32 %v607_v15, %v12919_v30  ;;  %v12978_v58 = vand.u32 4294901760, %v590_v44 }
   0xd   :  { %10512 = vmatpush3.msra.mxu1 %v1041_v46  ;;  %v1174_v61 = vand.u32 4294901760, %v1173_v54  ;;  %10485 = vmatpush3.msra.mxu0 %v12938_v38  ;;  %v12988_v62 = vsub.f32 %v591_v26, %v12938_v38  ;;  %v12990_v63 = vand.u32 4294901760, %v605_v49  ;;  %v12992_v0 = vand.u32 4294901760, %v589_v50 }
   0xe   :  { %10513 = vmatprep.subr.mxu1 %v1160_v47  ;;  %v1061_v1 = vsub.f32 %v12959_v48, %v20421_v55  ;;  %10486 = vmatprep.subr.mxu0 %v12973_v56  ;;  %v20420_v2 = vand.u32 4294901760, %v12976_v57  ;;  %v13000_v6 = vsub.f32 %v606_v43, %v12973_v56  ;;  %v13003_v7 = vsub.f32 %v590_v44, %v12978_v58 }
   0xf   :  { %10514 = vmatpush3.msra.mxu1 %v1048_v51  ;;  %10487 = vmatpush3.msra.mxu0 %v12978_v58  ;;  %v20418_v13 = vand.u32 4294901760, %v12988_v62  ;;  %v13010_v14 = vand.u32 4294901760, %v604_v59  ;;  %v13013_v15 = vsub.f32 %v605_v49, %v12990_v63  ;;  %v13015_v16 = vand.u32 4294901760, %v588_v60 }
  0x10   :  { %21186 = vst [vmem:[#allocation7_spill] sm:$0xff] %v13000_v6  ;;  %21187 = vst [vmem:[#allocation8_spill] sm:$0xff] %v13003_v7  ;;  %10515 = vmatprep.subr.mxu1 %v1167_v52  ;;  %v1062_v26 = vand.u32 4294901760, %v1061_v1  ;;  %v1180_v35 = vsub.f32 %v12976_v57, %v20420_v2  ;;  %10488 = vmatprep.subr.mxu0 %v12990_v63  ;;  %v20417_v36 = vand.u32 4294901760, %v13000_v6  ;;  %v20415_v37 = vand.u32 4294901760, %v13003_v7 }
  0x11   :  { %21188 = vst [vmem:[#allocation9_spill] sm:$0xff] %v13013_v15 }
  0x12   :  { %10 = vsyncpa [#allocation4], 0  ;;  %10516 = vmatpush3.msra.mxu1 %v1055_v53  ;;  %v1068_v40 = vsub.f32 %v12988_v62, %v20418_v13  ;;  %10489 = vmatpush3.msra.mxu0 %v12992_v0  ;;  %v20414_v41 = vand.u32 4294901760, %v13013_v15  ;;  %v13032_v43 = vsub.f32 %v589_v50, %v12992_v0  ;;  %v13034_v44 = vand.u32 4294901760, %v603_v8  ;;  %v602_v50 = vld [vmem:[%s20411_s3 + $0xb0] sm:$0xff]  ;;  %s12816_s19 = smov [#allocation3]  }
  0x13   :  { %10517 = vmatprep.subr.mxu1 %v1174_v61  ;;  %v1181_v45 = vand.u32 4294901760, %v1180_v35  ;;  %v1187_v46 = vsub.f32 %v13000_v6, %v20417_v36  ;;  %v1075_v47 = vsub.f32 %v13003_v7, %v20415_v37  ;;  %10490 = vmatprep.subr.mxu0 %v13010_v14  ;;  %v13044_v49 = vsub.f32 %v604_v59, %v13010_v14  ;;  %v586_v59 = vld [vmem:[%s20411_s3 + $0x30] sm:$0xff]  ;;  %s10466_s20 = sshll.u32 %s12816_s19, 4  ;;  %s10467_s20 = int_to_ptr.vmem [resolvable:$true] %s10466_s20 }
  0x14   :  { %21189 = vst [vmem:[#allocation10_spill] sm:$0xff] %v13032_v43  ;;  %10518 = vmatpush3.msra.mxu1 %v1062_v26  ;;  %v1069_v51 = vand.u32 4294901760, %v1068_v40  ;;  %v1194_v52 = vsub.f32 %v13013_v15, %v20414_v41  ;;  %10491 = vmatpush3.msra.mxu0 %v13015_v16  ;;  %v20416_v53 = vand.u32 4294901760, %v13032_v43  ;;  %v13054_v54 = vand.u32 4294901760, %v587_v39  ;;  %v601_v40 = vld [vmem:[%s20411_s3 + $0xa8] sm:$0xff]  ;;  %p12798_p1 = scmp.lt.s32.totalorder %s10467_s20, %s10467_s20 }
  0x15   :  { %21190 = vst [vmem:[#allocation11_spill] sm:$0xff] %v13044_v49  ;;  %10519 = vmatprep.subr.mxu1 %v1181_v45  ;;  %v1188_v61 = vand.u32 4294901760, %v1187_v46  ;;  %v1076_v1 = vand.u32 4294901760, %v1075_v47  ;;  %10492 = vmatprep.subr.mxu0 %v13034_v44  ;;  %v20419_v26 = vand.u32 4294901760, %v13044_v49  ;;  %v13062_v35 = vsub.f32 %v588_v60, %v13015_v16  ;;  %v585_v60 = vld [vmem:[%s20411_s3 + $0x28] sm:$0xff] }
  0x16   :  { %21191 = vst [vmem:[#allocation12_spill] sm:$0xff] %v13054_v54  ;;  %10520 = vmatpush3.msra.mxu1 %v1069_v51  ;;  %v1195_v41 = vand.u32 4294901760, %v1194_v52  ;;  %v1082_v37 = vsub.f32 %v13032_v43, %v20416_v53  ;;  %10493 = vmatpush3.msra.mxu0 %v13054_v54  ;;  %v13071_v45 = vand.u32 4294901760, %v602_v50  ;;  %v13074_v46 = vsub.f32 %v603_v8, %v13034_v44  ;;  %v600_v8 = vld [vmem:[%s20411_s3 + $0xa0] sm:$0xff] }
  0x17   :  { %21192 = vst [vmem:[#allocation13_spill] sm:$0xff] %v13062_v35  ;;  %10521 = vmatprep.subr.mxu1 %v1188_v61  ;;  %v1201_v47 = vsub.f32 %v13044_v49, %v20419_v26  ;;  %v20423_v51 = vand.u32 4294901760, %v13062_v35  ;;  %v13083_v52 = vand.u32 4294901760, %v586_v59  ;;  %v13086_v53 = vsub.f32 %v587_v39, %v13054_v54  ;;  %v584_v39 = vld [vmem:[%s20411_s3 + $0x20] sm:$0xff] }
  0x18   :  { %21193 = vst [vmem:[#allocation14_spill] sm:$0xff] %v13071_v45  ;;  %21194 = vst [vmem:[#allocation15_spill] sm:$0xff] %v13074_v46  ;;  %10522 = vmatpush3.msra.mxu1 %v1076_v1  ;;  %v1083_v36 = vand.u32 4294901760, %v1082_v37  ;;  %10494 = vmatprep.subr.mxu0 %v13071_v45  ;;  %v20425_v61 = vand.u32 4294901760, %v13074_v46  ;;  %v13093_v13 = vand.u32 4294901760, %v601_v40  ;;  %v13096_v26 = vsub.f32 %v602_v50, %v13071_v45 }
  0x19   :  { %21195 = vst [vmem:[#allocation16_spill] sm:$0xff] %v13083_v52  ;;  %21196 = vst [vmem:[#allocation17_spill] sm:$0xff] %v13086_v53  ;;  %10523 = vmatprep.subr.mxu1 %v1195_v41  ;;  %v1202_v2 = vand.u32 4294901760, %v1201_v47  ;;  %v1089_v1 = vsub.f32 %v13062_v35, %v20423_v51  ;;  %10495 = vmatpush3.msra.mxu0 %v13083_v52  ;;  %v20428_v37 = vand.u32 4294901760, %v13086_v53  ;;  %v13106_v55 = vand.u32 4294901760, %v585_v60  ;;  %v599_v51 = vld [vmem:[%s20411_s3 + $0x98] sm:$0xff] }
  0x1a   :  { %21197 = vst [vmem:[#allocation18_spill] sm:$0xff] %v13093_v13  ;;  %21198 = vst [vmem:[#allocation19_spill] sm:$0xff] %v13096_v26  ;;  %10524 = vmatpush3.msra.mxu1 %v1083_v36  ;;  %v1208_v50 = vsub.f32 %v13074_v46, %v20425_v61  ;;  %10496 = vmatprep.subr.mxu0 %v13093_v13  ;;  %v20431_v41 = vand.u32 4294901760, %v13096_v26  ;;  %v13114_v47 = vsub.f32 %v586_v59, %v13083_v52  ;;  %v583_v59 = vld [vmem:[%s20411_s3 + $0x18] sm:$0xff]  ;;  %v50_v35 = vld [vmem:[%s20409_s1 + $0x88] sm:$0xff]  ;;  %vm430_vm0 = vcmask 1041409  }
  0x1b   :  { %21199 = vst [vmem:[#allocation20_spill] sm:$0xff] %v13106_v55  ;;  %v13116_v42 = vand.u32 4294901760, %v600_v8  ;;  %10525 = vmatprep.subr.mxu1 %v1202_v2  ;;  %v1090_v33 = vand.u32 4294901760, %v1089_v1  ;;  %v1096_v36 = vsub.f32 %v13086_v53, %v20428_v37  ;;  %10497 = vmatpush3.msra.mxu0 %v13106_v55  ;;  %v13126_v61 = vsub.f32 %v601_v40, %v13093_v13  ;;  %v598_v40 = vld [vmem:[%s20411_s3 + $0x90] sm:$0xff] }
  0x1c   :  { %21200 = vst [vmem:[#allocation21_spill] sm:$0xff] %v13114_v47  ;;  %v13128_v32 = vand.u32 4294901760, %v584_v39  ;;  %v1209_v31 = vand.u32 4294901760, %v1208_v50  ;;  %v1215_v2 = vsub.f32 %v13096_v26, %v20431_v41  ;;  %v20435_v1 = vand.u32 4294901760, %v13114_v47 }
  0x1d   :  { %21201 = vst [vmem:[#allocation22_spill] sm:$0xff] %v13116_v42  ;;  %21202 = vst [vmem:[#allocation23_spill] sm:$0xff] %v13126_v61  ;;  %10498 = vmatprep.subr.mxu0 %v13116_v42  ;;  %v13139_v37 = vsub.f32 %v585_v60, %v13106_v55  ;;  %10526 = vmatpush3.msra.mxu1 %v1090_v33  ;;  %v1097_v29 = vand.u32 4294901760, %v1096_v36  ;;  %v20438_v28 = vand.u32 4294901760, %v13126_v61  ;;  %v13146_v50 = vand.u32 4294901760, %v599_v51  ;;  %v582_v60 = vld [vmem:[%s20411_s3 + $0x10] sm:$0xff] }
  0x1e   :  { %21203 = vst [vmem:[#allocation24_spill] sm:$0xff] %v13128_v32  ;;  %10499 = vmatpush3.msra.mxu0 %v13128_v32  ;;  %v13149_v41 = vsub.f32 %v600_v8, %v13116_v42  ;;  %10527 = vmatprep.subr.mxu1 %v1209_v31  ;;  %v1216_v27 = vand.u32 4294901760, %v1215_v2  ;;  %v1103_v33 = vsub.f32 %v13114_v47, %v20435_v1  ;;  %v13158_v9 = vand.u32 4294901760, %v583_v59  ;;  %v597_v1 = vld [vmem:[%s20411_s3 + $0x88] sm:$0xff] }
  0x1f   :  { %21204 = vst [vmem:[#allocation25_spill] sm:$0xff] %v13139_v37  ;;  %21205 = vst [vmem:[#allocation26_spill] sm:$0xff] %v13146_v50  ;;  %10528 = vmatpush3.msra.mxu1 %v1097_v29  ;;  %v1222_v8 = vsub.f32 %v13126_v61, %v20438_v28  ;;  %10500 = vmatprep.subr.mxu0 %v13146_v50  ;;  %v13166_v31 = vsub.f32 %v584_v39, %v13128_v32  ;;  %v13168_v2 = vand.u32 4294901760, %v598_v40  ;;  %v581_v39 = vld [vmem:[%s20411_s3 + $0x8] sm:$0xff]  ;;  %vm432_vm1 = vcmask 1043459  }
  0x20   :  { %21206 = vst [vmem:[#allocation27_spill] sm:$0xff] %v13149_v41  ;;  %21207 = vst [vmem:[#allocation28_spill] sm:$0xff] %v13158_v9  ;;  %10529 = vmatprep.subr.mxu1 %v1216_v27  ;;  %v1104_v36 = vand.u32 4294901760, %v1103_v33  ;;  %v21210_v29 = vand.u32 4294901760, %v13139_v37  ;;  %10501 = vmatpush3.msra.mxu0 %v13158_v9  ;;  %v13178_v28 = vsub.f32 %v599_v51, %v13146_v50  ;;  %v13180_v26 = vand.u32 4294901760, %v582_v60  ;;  %v13196_v51 = vld [vmem:[%s20411_s3 + $0x80] sm:$0xff] }
  0x21   :  { %21208 = vst [vmem:[#allocation29_spill] sm:$0xff] %v13166_v31  ;;  %21209 = vst [vmem:[#allocation30_spill] sm:$0xff] %v13168_v2  ;;  %v1223_v61 = vand.u32 4294901760, %v1222_v8  ;;  %v21213_v53 = vand.u32 4294901760, %v13149_v41  ;;  %10502 = vmatprep.subr.mxu0 %v13168_v2  ;;  %v13200_v50 = vand.u32 4294901760, %v597_v1  ;;  %v13214_v8 = vand.u32 4294901760, %v581_v39 }
  0x22   :  { %v1110_v47 = vsub.f32 %v13139_v37, %v21210_v29  ;;  %21211 = vst [vmem:[#allocation31_spill] sm:$0xff] %v13178_v28  ;;  %21212 = vst [vmem:[#allocation32_spill] sm:$0xff] %v13180_v26  ;;  %v13191_v29 = vsub.f32 %v583_v59, %v13158_v9  ;;  %10530 = vmatpush3.msra.mxu1 %v1104_v36  ;;  %10503 = vmatpush3.msra.mxu0 %v13180_v26  ;;  %v13208_v59 = vld [vmem:[%s20411_s3] sm:$0xff]  ;;  %v21219_v9 = vand.u32 4294901760, %v13178_v28  ;;  %vm434_vm2 = vcmask 1045509  }
  0x23   :  { %v1229_v27 = vsub.f32 %v13149_v41, %v21213_v53  ;;  %21215 = vst [vmem:[#allocation34_spill] sm:$0xff] %v13200_v50  ;;  %v13203_v53 = vsub.f32 %v598_v40, %v13168_v2  ;;  %10531 = vmatprep.subr.mxu1 %v1223_v61  ;;  %v21217_v41 = vand.u32 4294901760, %v13166_v31  ;;  %21218 = vst [vmem:[#allocation36_spill] sm:$0xff] %v13214_v8  ;;  %10504 = vmatprep.subr.mxu0 %v13200_v50  ;;  %vm436_vm3 = vcmask 1047559  }
  0x24   :  { %21214 = vst [vmem:[#allocation33_spill] sm:$0xff] %v13191_v29  ;;  %v1111_v37 = vand.u32 4294901760, %v1110_v47  ;;  %v20461_v36 = vand.u32 4294901760, %v13191_v29  ;;  %v1236_v40 = vsub.f32 %v13178_v28, %v21219_v9  ;;  %v13222_v61 = vsub.f32 %v582_v60, %v13180_v26  ;;  %10505 = vmatpush3.msra.mxu0 %v13214_v8 }
  0x25   :  { %21216 = vst [vmem:[#allocation35_spill] sm:$0xff] %v13203_v53  ;;  %v1230_v33 = vand.u32 4294901760, %v1229_v27  ;;  %v1117_v47 = vsub.f32 %v13166_v31, %v21217_v41  ;;  %v13225_v27 = vand.u32 4294901760, %v13196_v51  ;;  %v33_v41 = vld [vmem:[%s20409_s1] sm:$0xff]  ;;  %v13238_v60 = vsub.f32 %v597_v1, %v13200_v50  ;;  %v35_v31 = vld [vmem:[%s20409_s1 + $0x10] sm:$0xff]  ;;  %v36_v1 = vld [vmem:[%s20409_s1 + $0x18] sm:$0xff] }
  0x26   :  { %10532 = vmatpush3.msra.mxu1 %v1111_v37  ;;  %21220 = vst [vmem:[#allocation37_spill] sm:$0xff] %v13222_v61  ;;  %v34_v37 = vld [vmem:[%s20409_s1 + $0x8] sm:$0xff]  ;;  %v1124_v2 = vsub.f32 %v13191_v29, %v20461_v36  ;;  %v13241_v28 = vand.u32 4294901760, %v13208_v59  ;;  %v1237_v26 = vand.u32 4294901760, %v1236_v40  ;;  %v13252_v36 = vsub.f32 %v581_v39, %v13214_v8  ;;  %v49_v40 = vld [vmem:[%s20409_s1 + $0x80] sm:$0xff] }
  0x27   :  { %21221 = vst [vmem:[#allocation38_spill] sm:$0xff] %v13225_v27  ;;  %10533 = vmatprep.subr.mxu1 %v1230_v33  ;;  %v1118_v9 = vand.u32 4294901760, %v1117_v47  ;;  %21222 = vst [vmem:[#allocation39_spill] sm:$0xff] %v13238_v60  ;;  %v21223_v33 = vand.u32 4294901760, %v13203_v53  ;;  %10506 = vmatprep.subr.mxu0 %v13225_v27  ;;  %v20481_v50 = vand.u32 4294901760, %v13238_v60  ;;  %v71_v46 = vrot.slane %v34_v37, 4 }
  0x28   :  { %21224 = vst [vmem:[#allocation40_spill] sm:$0xff] %v13252_v36  ;;  %v1125_v29 = vand.u32 4294901760, %v1124_v2  ;;  %10507 = vmatpush3.msra.mxu0 %v13241_v28  ;;  %v21225_v39 = vand.u32 4294901760, %v13222_v61  ;;  %v20486_v32 = vand.u32 4294901760, %v13252_v36  ;;  %v83_v42 = vrot.slane %v36_v1, 4 }
  0x29   :  { %v1243_v47 = vsub.f32 %v13203_v53, %v21223_v33  ;;  %10534 = vmatpush3.msra.mxu1 %v1118_v9  ;;  %v65_v33 = vrot.slane %v33_v41, 4  ;;  %v77_v9 = vrot.slane %v35_v31, 4  ;;  %10546 = vmatprep.subr.mxu0 %v12890_v18  ;;  %v1250_v2 = vsub.f32 %v13238_v60, %v20481_v50  ;;  %v52_v60 = vld [vmem:[%s20409_s1 + $0x98] sm:$0xff] }
  0x2a   :  { %10535 = vmatprep.subr.mxu1 %v1237_v26  ;;  %v1131_v8 = vsub.f32 %v13222_v61, %v21225_v39  ;;  %v1138_v39 = vsub.f32 %v13252_v36, %v20486_v32  ;;  %v161_v61 = vrot.slane %v49_v40, 4  ;;  %v167_v55 = vrot.slane %v50_v35, 4 }
  0x2b   :  { %v1244_v53 = vand.u32 4294901760, %v1243_v47  ;;  %10536 = vmatpush3.msra.mxu1 %v1125_v29  ;;  %v66_v26 = vadd.f32 %v65_v33, %v33_v41  ;;  %v72_v47 = vadd.f32 %v71_v46, %v34_v37  ;;  %v51_v29 = vld [vmem:[%s20409_s1 + $0x90] sm:$0xff]  ;;  %v78_v18 = vadd.f32 %v77_v9, %v35_v31 }
  0x2c   :  { %v1132_v49 = vand.u32 4294901760, %v1131_v8  ;;  %v1251_v50 = vand.u32 4294901760, %v1250_v2  ;;  %v84_v37 = vadd.f32 %v83_v42, %v36_v1  ;;  %v1139_v8 = vand.u32 4294901760, %v1138_v39 }
  0x2d   :  { %10537 = vmatprep.subr.mxu1 %v1244_v53  ;;  %v67_v41 = vrot.slane %v66_v26, 2  ;;  %v73_v46 = vrot.slane %v72_v47, 2  ;;  %v79_v53 = vrot.slane %v78_v18, 2  ;;  %v162_v33 = vadd.f32 %v161_v61, %v49_v40 }
  0x2e   :  { %10538 = vmatpush3.msra.mxu1 %v1132_v49  ;;  %v85_v43 = vrot.slane %v84_v37, 2  ;;  %v173_v13 = vrot.slane %v51_v29, 4  ;;  %v168_v2 = vadd.f32 %v167_v55, %v50_v35  ;;  %v179_v15 = vrot.slane %v52_v60, 4 }
  0x2f   :  { %10539 = vmatprep.subr.mxu1 %v1251_v50  ;;  %v68_v32 = vadd.f32 %v67_v41, %v66_v26  ;;  %v74_v36 = vadd.f32 %v73_v46, %v72_v47  ;;  %v80_v31 = vadd.f32 %v79_v53, %v78_v18  ;;  %v163_v9 = vrot.slane %v162_v33, 2 }
  0x30   :  { %10540 = vmatpush3.msra.mxu1 %v1139_v8  ;;  %v86_v45 = vadd.f32 %v85_v43, %v84_v37  ;;  %v174_v6 = vadd.f32 %v173_v13, %v51_v29  ;;  %v169_v1 = vrot.slane %v168_v2, 2  ;;  %v180_v39 = vadd.f32 %v179_v15, %v52_v60 }
  0x31   :  { %v69_v52 = vrot.slane %v68_v32, 1  ;;  %v75_v7 = vrot.slane %v74_v36, 1  ;;  %v81_v42 = vrot.slane %v80_v31, 1  ;;  %v164_v49 = vadd.f32 %v163_v9, %v162_v33 }
  0x32   :  { %v87_v50 = vrot.slane %v86_v45, 1  ;;  %v175_v26 = vrot.slane %v174_v6, 2  ;;  %v170_v46 = vadd.f32 %v169_v1, %v168_v2  ;;  %v181_v8 = vrot.slane %v180_v39, 2 }
  0x33   :  { %v70_v61 = vadd.f32 %v69_v52, %v68_v32  ;;  %v76_v40 = vadd.f32 %v75_v7, %v74_v36  ;;  %v82_v47 = vadd.f32 %v81_v42, %v80_v31  ;;  %v165_v41 = vrot.slane %v164_v49, 1 }
  0x34   :  { %v88_v18 = vadd.f32 %v87_v50, %v86_v45  ;;  %v176_v53 = vadd.f32 %v175_v26, %v174_v6  ;;  %v293_v55 = vunpack.c.0.s8 %v12886_v17  ;;  %v171_v54 = vrot.slane %v170_v46, 1 }
  0x35   :  { %v166_v35 = vadd.f32 %v165_v41, %v164_v49  ;;  %v182_v43 = vadd.f32 %v181_v8, %v180_v39  ;;  %v21226_v13 = vlaneseq  ;;  %v289_v33 = vcombine.low %v70_v61, %v76_v40 }
  0x36   :  { %v177_v37 = vrot.slane %v176_v53, 1  ;;  %v172_v15 = vadd.f32 %v171_v54, %v170_v46  ;;  %v290_v7 = vcombine.low %v82_v47, %v88_v18  ;;  %v13288_v60 = vsub.f32 %v13196_v51, %v13225_v27 }
  0x37   :  { %v295_v29 = vshrl.u32 %v21226_v13, 7  ;;  %v183_v32 = vrot.slane %v182_v43, 1  ;;  %v13292_v17 = vsub.f32 %v13208_v59, %v13241_v28  ;;  %vm10447_vm4 = vcmask 25600  }
  0x38   :  { %v178_v36 = vadd.f32 %v177_v37, %v176_v53  ;;  %v357_v45 = vcombine.low %v166_v35, %v172_v15  ;;  %v20506_v31 = vand.u32 4294901760, %v13288_v60 }
  0x39   :  { %v13284_v52 = vsub.s32 %v293_v55, %v295_v29  ;;  %v184_v6 = vadd.f32 %v183_v32, %v182_v43  ;;  %v20505_v9 = vand.u32 4294901760, %v13292_v17 }
  0x3a   :  { %v1257_v51 = vsub.f32 %v13288_v60, %v20506_v31  ;;  %v21256_v31 = vld [vmem:[#allocation29_spill] sm:$0xff] }
  0x3b   :  { %21227 = vst [vmem:[#allocation41_spill] sm:$0xff] %v13284_v52  ;;  %v297_v54 = vrot.slane %v289_v33, %v13284_v52  ;;  %v304_v2 = vrot.slane %v290_v7, %v13284_v52  ;;  %v358_v42 = vcombine.low %v178_v36, %v184_v6  ;;  %v365_v49 = vrot.slane %v357_v45, %v13284_v52  ;;  %v21230_v6 = vld [vmem:[#allocation12_spill] sm:$0xff]  ;;  %v21231_v45 = vld [vmem:[#allocation7_spill] sm:$0xff] }
  0x3c   :  { %v1145_v59 = vsub.f32 %v13292_v17, %v20505_v9  ;;  %v1258_v39 = vand.u32 4294901760, %v1257_v51  ;;  %v21236_v51 = vld [vmem:[#allocation18_spill] sm:$0xff]  ;;  %v21255_v9 = vld [vmem:[#allocation36_spill] sm:$0xff] }
  0x3d   :  { %v372_v1 = vrot.slane %v358_v42, %v13284_v52  ;;  %v305_v40 = vcombine.low %v297_v54, %v304_v2  ;;  %v21232_v54 = vld [vmem:[#allocation14_spill] sm:$0xff]  ;;  %v21233_v2 = vld [vmem:[#allocation8_spill] sm:$0xff] }
  0x3e   :  { %v1146_v61 = vand.u32 4294901760, %v1145_v59  ;;  %10541 = vmatprep.subr.mxu1 %v1258_v39  ;;  %v21234_v42 = vld [vmem:[#allocation16_spill] sm:$0xff]  ;;  %v21237_v59 = vld [vmem:[#allocation10_spill] sm:$0xff]  ;;  %v21239_v39 = vld [vmem:[#allocation11_spill] sm:$0xff] }
  0x3f   :  { %v373_v50 = vcombine.low %v365_v49, %v372_v1  ;;  %v21235_v49 = vld [vmem:[#allocation9_spill] sm:$0xff]  ;;  %v21238_v1 = vld [vmem:[#allocation20_spill] sm:$0xff] }
  0x40   :  { %10542 = vmatpush3.msra.mxu1 %v1146_v61  ;;  %v21240_v61 = vld [vmem:[#allocation22_spill] sm:$0xff] }
  0x41   :  { %v429_v26 = vrot.slane %v373_v50, 7  ;;  %10581 = vmatprep.subr.mxu1 %v12856_v3  ;;  %v21242_v50 = vld [vmem:[#allocation24_spill] sm:$0xff] }
  0x43   :  { %v431_v47 = vsel %vm430_vm0, %v429_v26, %v305_v40  ;;  %v21241_v40 = vld [vmem:[#allocation13_spill] sm:$0xff] }
  0x44   :  { %v433_v41 = vsel %vm432_vm1, %v429_v26, %v431_v47  ;;  %v21244_v47 = vld [vmem:[#allocation26_spill] sm:$0xff] }
  0x45   :  { %v435_v46 = vsel %vm434_vm2, %v429_v26, %v433_v41  ;;  %v21245_v41 = vld [vmem:[#allocation17_spill] sm:$0xff] }
  0x46   :  { %v437_v8 = vsel %vm436_vm3, %v429_v26, %v435_v46  ;;  %v21243_v26 = vld [vmem:[#allocation15_spill] sm:$0xff]  ;;  %v21246_v46 = vld [vmem:[#allocation28_spill] sm:$0xff] }
  0x47   :  { %v13311_v18 = vmul.f32 0.125, %v437_v8  ;;  %v21247_v8 = vld [vmem:[#allocation19_spill] sm:$0xff] }
  0x49   :  { %21228 = vst [vmem:[#allocation42_spill] sm:$0xff] %v13311_v18  ;;  %v847_v53 = vrot.slane %v13311_v18, %v13284_v52  ;;  %v21258_v52 = vld [vmem:[#allocation33_spill] sm:$0xff]  ;;  %v21260_v18 = vld [vmem:[#allocation35_spill] sm:$0xff] }
  0x4b   :  { %v855_v55 = vcombine.high %v847_v53, %v847_v53  ;;  %v13315_v35 = vand.u32 4294901760, %v847_v53 }
  0x4d   :  { %21229 = vst [vmem:[#allocation43_spill] sm:$0xff] %v13315_v35  ;;  %v13317_v43 = vand.u32 4294901760, %v855_v55  ;;  %v13320_v13 = vsub.f32 %v847_v53, %v13315_v35  ;;  %v21248_v53 = vld [vmem:[#allocation30_spill] sm:$0xff] }
  0x4f   :  { %v1021_v29 = vsub.f32 %v855_v55, %v13317_v43  ;;  %v20507_v37 = vand.u32 4294901760, %v13320_v13  ;;  %1261 = vmatprep.mubr.f32.mxu1 %v13317_v43  ;;  %v21249_v55 = vld [vmem:[#allocation21_spill] sm:$0xff] }
  0x50   :  { %1263 = vmatmul.mubr.f32.vlgmr.msra.gmra.mxu1 %v13315_v35  ;;  %v21259_v35 = vand.u32 4294901760, %v13320_v13 }
  0x51   :  { %v1022_v33 = vand.u32 4294901760, %v1021_v29  ;;  %v1029_v15 = vsub.f32 %v13320_v13, %v20507_v37  ;;  %10582 = vmatpush3.msra.mxu1 %v12858_v4  ;;  %v21257_v37 = vld [vmem:[#allocation31_spill] sm:$0xff] }
  0x52   :  { %10583 = vmatprep.subr.mxu1 %v12860_v5 }
  0x53   :  { %v1023_v32 = vsub.f32 %v1021_v29, %v1022_v33  ;;  %10584 = vmatpush3.msra.mxu1 %v12871_v10  ;;  %1505 = vmatprep.mubr.f32.mxu1 %v1022_v33  ;;  %v1030_v7 = vand.u32 4294901760, %v1029_v15  ;;  %v21250_v33 = vld [vmem:[#allocation32_spill] sm:$0xff]  ;;  %v21251_v15 = vld [vmem:[#allocation23_spill] sm:$0xff] }
  0x54   :  { %10585 = vmatprep.subr.mxu1 %v12873_v11 }
  0x55   :  { %v1024_v36 = vand.u32 4294901760, %v1023_v32  ;;  %10586 = vmatpush3.msra.mxu1 %v12875_v12  ;;  %v21252_v32 = vld [vmem:[#allocation34_spill] sm:$0xff] }
  0x56   :  { %10587 = vmatprep.subr.mxu1 %v12898_v21 }
  0x57   :  { %1025 = vmatprep.mubr.f32.mxu0 %v1024_v36  ;;  %10588 = vmatpush3.msra.mxu1 %v12907_v24  ;;  %v21254_v36 = vld [vmem:[#allocation27_spill] sm:$0xff] }
  0x58   :  { %1031 = vmatmul.mubr.f32.vlgmr.msra.gmra.mxu0 %v1030_v7  ;;  %10589 = vmatprep.subr.mxu1 %v12919_v30  ;;  %v21253_v7 = vld [vmem:[#allocation25_spill] sm:$0xff] }
  0x59   :  { %10547 = vmatpush3.msra.mxu0 %v12893_v19  ;;  %10590 = vmatpush3.msra.mxu1 %v12938_v38 }
  0x5a   :  { %10548 = vmatprep.subr.mxu0 %v12896_v20  ;;  %10591 = vmatprep.subr.mxu1 %v12973_v56 }
  0x5b   :  { %10549 = vmatpush3.msra.mxu0 %v12902_v22  ;;  %10592 = vmatpush3.msra.mxu1 %v12978_v58 }
  0x5c   :  { %10550 = vmatprep.subr.mxu0 %v12905_v23  ;;  %10593 = vmatprep.subr.mxu1 %v12990_v63 }
  0x5d   :  { %10551 = vmatpush3.msra.mxu0 %v12910_v25  ;;  %10594 = vmatpush3.msra.mxu1 %v12992_v0 }
  0x5e   :  { %10552 = vmatprep.subr.mxu0 %v12926_v34  ;;  %10595 = vmatprep.subr.mxu1 %v13010_v14 }
  0x5f   :  { %10553 = vmatpush3.msra.mxu0 %v12959_v48  ;;  %10596 = vmatpush3.msra.mxu1 %v13015_v16 }
  0x60   :  { %10554 = vmatprep.subr.mxu0 %v12976_v57  ;;  %10597 = vmatprep.subr.mxu1 %v13034_v44 }
  0x61   :  { %10555 = vmatpush3.msra.mxu0 %v12988_v62  ;;  %10598 = vmatpush3.msra.mxu1 %v21230_v6 }
  0x62   :  { %10556 = vmatprep.subr.mxu0 %v21231_v45  ;;  %10599 = vmatprep.subr.mxu1 %v21232_v54 }
  0x63   :  { %10557 = vmatpush3.msra.mxu0 %v21233_v2  ;;  %10600 = vmatpush3.msra.mxu1 %v21234_v42 }
  0x64   :  { %10558 = vmatprep.subr.mxu0 %v21235_v49  ;;  %10601 = vmatprep.subr.mxu1 %v21236_v51 }
  0x65   :  { %10559 = vmatpush3.msra.mxu0 %v21237_v59  ;;  %10602 = vmatpush3.msra.mxu1 %v21238_v1 }
  0x66   :  { %10560 = vmatprep.subr.mxu0 %v21239_v39  ;;  %10603 = vmatprep.subr.mxu1 %v21240_v61 }
  0x67   :  { %10561 = vmatpush3.msra.mxu0 %v21241_v40  ;;  %10604 = vmatpush3.msra.mxu1 %v21242_v50 }
  0x68   :  { %10562 = vmatprep.subr.mxu0 %v21243_v26  ;;  %10605 = vmatprep.subr.mxu1 %v21244_v47 }
  0x69   :  { %10563 = vmatpush3.msra.mxu0 %v21245_v41  ;;  %10606 = vmatpush3.msra.mxu1 %v21246_v46 }
  0x6a   :  { %10564 = vmatprep.subr.mxu0 %v21247_v8  ;;  %10607 = vmatprep.subr.mxu1 %v21248_v53 }
  0x6b   :  { %10565 = vmatpush3.msra.mxu0 %v21249_v55  ;;  %10608 = vmatpush3.msra.mxu1 %v21250_v33 }
  0x6c   :  { %10566 = vmatprep.subr.mxu0 %v21251_v15  ;;  %10609 = vmatprep.subr.mxu1 %v21252_v32 }
  0x6d   :  { %10567 = vmatpush3.msra.mxu0 %v21253_v7  ;;  %1398 = vmatprep.mubr.f32.mxu0 %v1021_v29  ;;  %v21261_v29 = vld [vmem:[#allocation37_spill] sm:$0xff] }
  0x6e   :  { %10568 = vmatprep.subr.mxu0 %v21254_v36  ;;  %10610 = vmatpush3.msra.mxu1 %v21255_v9  ;;  %v21262_v9 = vld [vmem:[#allocation39_spill] sm:$0xff] }
  0x6f   :  { %10569 = vmatpush3.msra.mxu0 %v21256_v31  ;;  %10611 = vmatprep.subr.mxu1 %v13225_v27  ;;  %v21263_v27 = vld [vmem:[#allocation40_spill] sm:$0xff] }
  0x70   :  { %10570 = vmatprep.subr.mxu0 %v21257_v37  ;;  %10612 = vmatpush3.msra.mxu1 %v13241_v28 }
  0x71   :  { %10571 = vmatpush3.msra.mxu0 %v21258_v52  ;;  %1509 = vmatmul.mubr.f32.vlgmr.msra.gmra.mxu1 %v21259_v35  ;;  %v21266_v35 = vand.u32 4294901760, %v12893_v19  ;;  %v21269_v19 = vand.u32 4294901760, %v12905_v23  ;;  %v626_v23 = vld [vmem:[%s20411_s3 + $0x170] sm:$0xff] }
  0x72   :  { %10572 = vmatprep.subr.mxu0 %v21260_v18  ;;  %10651 = vmatprep.subr.mxu1 %v12856_v3  ;;  %v21264_v3 = vld [vmem:[#allocation6_spill] sm:$0xff] }
  0x73   :  { %10573 = vmatpush3.msra.mxu0 %v21261_v29  ;;  %10652 = vmatpush3.msra.mxu1 %v12858_v4  ;;  %v21265_v4 = vand.u32 4294901760, %v21264_v3  ;;  %v21270_v3 = vand.u32 4294901760, %v12910_v25 }
  0x74   :  { %10574 = vmatprep.subr.mxu0 %v21262_v9  ;;  %10653 = vmatprep.subr.mxu1 %v12860_v5  ;;  %v643_v5 = vld [vmem:[%s20411_s3 + $0x1f8] sm:$0xff] }
  0x75   :  { %10575 = vmatpush3.msra.mxu0 %v21263_v27  ;;  %10654 = vmatpush3.msra.mxu1 %v12871_v10  ;;  %v627_v10 = vld [vmem:[%s20411_s3 + $0x178] sm:$0xff] }
  0x76   :  { %10576 = vmatprep.subr.mxu0 %v13288_v60  ;;  %10655 = vmatprep.subr.mxu1 %v12873_v11  ;;  %v21267_v11 = vand.u32 4294901760, %v12896_v20  ;;  %v642_v20 = vld [vmem:[%s20411_s3 + $0x1f0] sm:$0xff] }
  0x77   :  { %10577 = vmatpush3.msra.mxu0 %v13292_v17  ;;  %10656 = vmatpush3.msra.mxu1 %v12875_v12  ;;  %v21268_v12 = vand.u32 4294901760, %v12902_v22  ;;  %v21271_v22 = vand.u32 4294901760, %v12926_v34  ;;  %v21273_v34 = vand.u32 4294901760, %v12976_v57  ;;  %v624_v57 = vld [vmem:[%s20411_s3 + $0x160] sm:$0xff] }
  0x78   :  { %1401 = vmatmul.mubr.f32.vlgmr.msra.gmra.mxu0 %v13320_v13  ;;  %10616 = vmatprep.subr.mxu0 %v21265_v4  ;;  %v13417_v13 = vand.u32 4294901760, %v643_v5 }
  0x79   :  { %10617 = vmatpush3.msra.mxu0 %v21266_v35  ;;  %10657 = vmatprep.subr.mxu1 %v12898_v21  ;;  %v13422_v21 = vand.u32 4294901760, %v627_v10 }
  0x7a   :  { %10618 = vmatprep.subr.mxu0 %v21267_v11  ;;  %10658 = vmatpush3.msra.mxu1 %v12907_v24  ;;  %v21272_v24 = vand.u32 4294901760, %v12959_v48  ;;  %v13440_v25 = vsub.f32 %v643_v5, %v13417_v13  ;;  %v625_v48 = vld [vmem:[%s20411_s3 + $0x168] sm:$0xff]  ;;  %v21277_v5 = vand.u32 4294901760, %v21233_v2  ;;  %v13488_v11 = vand.u32 4294901760, %v624_v57 }
  0x7b   :  { %10619 = vmatpush3.msra.mxu0 %v21268_v12  ;;  %10659 = vmatprep.subr.mxu1 %v12919_v30  ;;  %v641_v30 = vld [vmem:[%s20411_s3 + $0x1e8] sm:$0xff]  ;;  %v13476_v35 = vand.u32 4294901760, %v625_v48  ;;  %v21281_v12 = vand.u32 4294901760, %v21237_v59 }
  0x7c   :  { %10620 = vmatprep.subr.mxu0 %v21269_v19  ;;  %10660 = vmatpush3.msra.mxu1 %v12938_v38  ;;  %v13449_v38 = vsub.f32 %v627_v10, %v13422_v21  ;;  %v13467_v4 = vand.u32 4294901760, %v641_v30  ;;  %21280 = vst [vmem:[#allocation14_spill] sm:$0xff] %v13488_v11  ;;  %v638_v19 = vld [vmem:[%s20411_s3 + $0x1d0] sm:$0xff] }
  0x7d   :  { %10621 = vmatpush3.msra.mxu0 %v21270_v3  ;;  %10661 = vmatprep.subr.mxu1 %v12973_v56  ;;  %v13451_v56 = vand.u32 4294901760, %v642_v20  ;;  %21278 = vst [vmem:[#allocation7_spill] sm:$0xff] %v13476_v35  ;;  %v21283_v3 = vand.u32 4294901760, %v21239_v39 }
  0x7e   :  { %10622 = vmatprep.subr.mxu0 %v21271_v22  ;;  %10662 = vmatpush3.msra.mxu1 %v12978_v58  ;;  %v21274_v58 = vand.u32 4294901760, %v12988_v62  ;;  %21276 = vst [vmem:[#allocation12_spill] sm:$0xff] %v13467_v4  ;;  %v640_v62 = vld [vmem:[%s20411_s3 + $0x1e0] sm:$0xff]  ;;  %v20516_v10 = vand.u32 4294901760, %v13449_v38  ;;  %v21285_v22 = vand.u32 4294901760, %v21241_v40 }
  0x7f   :  { %10623 = vmatpush3.msra.mxu0 %v21272_v24  ;;  %10663 = vmatprep.subr.mxu1 %v12990_v63  ;;  %v13459_v63 = vand.u32 4294901760, %v626_v23  ;;  %v13486_v2 = vsub.f32 %v642_v20, %v13451_v56  ;;  %v13508_v20 = vsub.f32 %v641_v30, %v13467_v4  ;;  %v621_v24 = vld [vmem:[%s20411_s3 + $0x148] sm:$0xff]  ;;  %v21287_v30 = vand.u32 4294901760, %v21243_v26 }
  0x80   :  { %10624 = vmatprep.subr.mxu0 %v21273_v34  ;;  %10664 = vmatpush3.msra.mxu1 %v12992_v0  ;;  %v21275_v0 = vand.u32 4294901760, %v21231_v45  ;;  %v623_v45 = vld [vmem:[%s20411_s3 + $0x158] sm:$0xff]  ;;  %v13541_v34 = vsub.f32 %v624_v57, %v13488_v11  ;;  %v21290_v26 = vand.u32 4294901760, %v21245_v41  ;;  %v21292_v57 = vand.u32 4294901760, %v21247_v8  ;;  %v21314_v8 = vld [vmem:[#allocation38_spill] sm:$0xff] }
  0x81   :  { %10625 = vmatpush3.msra.mxu0 %v21274_v58  ;;  %10665 = vmatprep.subr.mxu1 %v13010_v14  ;;  %v20519_v14 = vand.u32 4294901760, %v13440_v25  ;;  %v13510_v59 = vand.u32 4294901760, %v623_v45  ;;  %v20514_v40 = vand.u32 4294901760, %v13486_v2  ;;  %v637_v58 = vld [vmem:[%s20411_s3 + $0x1c8] sm:$0xff]  ;;  %v13564_v41 = vand.u32 4294901760, %v621_v24 }
  0x82   :  { %10626 = vmatprep.subr.mxu0 %v21275_v0  ;;  %10666 = vmatpush3.msra.mxu1 %v13015_v16  ;;  %v21279_v16 = vand.u32 4294901760, %v21235_v49  ;;  %v13497_v49 = vsub.f32 %v626_v23, %v13459_v63  ;;  %21288 = vst [vmem:[#allocation18_spill] sm:$0xff] %v13541_v34 }
  0x83   :  { %10627 = vmatpush3.msra.mxu0 %v21277_v5  ;;  %10667 = vmatprep.subr.mxu1 %v13034_v44  ;;  %v639_v44 = vld [vmem:[%s20411_s3 + $0x1d8] sm:$0xff]  ;;  %21284 = vst [vmem:[#allocation16_spill] sm:$0xff] %v13510_v59  ;;  %v13521_v39 = vsub.f32 %v13440_v25, %v20519_v14  ;;  %21294 = vst [vmem:[#allocation22_spill] sm:$0xff] %v13564_v41 }
  0x84   :  { %10628 = vmatprep.subr.mxu0 %v21279_v16  ;;  %10668 = vmatpush3.msra.mxu1 %v21230_v6  ;;  %v13499_v6 = vand.u32 4294901760, %v640_v62  ;;  %v13526_v23 = vand.u32 4294901760, %v639_v44  ;;  %v20517_v16 = vand.u32 4294901760, %v13508_v20  ;;  %v21311_v14 = vld [vmem:[#allocation36_spill] sm:$0xff] }
  0x85   :  { %10629 = vmatpush3.msra.mxu0 %v21281_v12  ;;  %10669 = vmatprep.subr.mxu1 %v21232_v54  ;;  %v622_v54 = vld [vmem:[%s20411_s3 + $0x150] sm:$0xff]  ;;  %v13562_v12 = vsub.f32 %v623_v45, %v13510_v59  ;;  %v13577_v45 = vand.u32 4294901760, %v637_v58 }
  0x86   :  { %21282 = vst [vmem:[#allocation8_spill] sm:$0xff] %v13499_v6  ;;  %10630 = vmatprep.subr.mxu0 %v21283_v3  ;;  %10670 = vmatpush3.msra.mxu1 %v21234_v42  ;;  %v13524_v42 = vsub.f32 %v625_v48, %v13476_v35  ;;  %21286 = vst [vmem:[#allocation9_spill] sm:$0xff] %v13526_v23  ;;  %v13543_v48 = vand.u32 4294901760, %v638_v19  ;;  %v13553_v0 = vsub.f32 %v640_v62, %v13499_v6 }
  0x87   :  { %10631 = vmatpush3.msra.mxu0 %v21285_v22  ;;  %10671 = vmatprep.subr.mxu1 %v21236_v51  ;;  %v13537_v51 = vsub.f32 %v13449_v38, %v20516_v10  ;;  %v13555_v5 = vand.u32 4294901760, %v622_v54  ;;  %21293 = vst [vmem:[#allocation11_spill] sm:$0xff] %v13562_v12  ;;  %v21295_v62 = vand.u32 4294901760, %v21249_v55  ;;  %v13575_v3 = vsub.f32 %v639_v44, %v13526_v23  ;;  %v636_v22 = vld [vmem:[%s20411_s3 + $0x1c0] sm:$0xff] }
  0x88   :  { %10632 = vmatprep.subr.mxu0 %v21287_v30  ;;  %10672 = vmatpush3.msra.mxu1 %v21238_v1  ;;  %21289 = vst [vmem:[#allocation10_spill] sm:$0xff] %v13543_v48  ;;  %v20515_v1 = vand.u32 4294901760, %v13497_v49  ;;  %21297 = vst [vmem:[#allocation24_spill] sm:$0xff] %v13577_v45  ;;  %v21298_v30 = vand.u32 4294901760, %v21251_v15  ;;  %v13589_v55 = vsub.f32 %v13486_v2, %v20514_v40  ;;  %v20520_v44 = vand.u32 4294901760, %v13541_v34  ;;  %v619_v40 = vld [vmem:[%s20411_s3 + $0x138] sm:$0xff] }
  0x89   :  { %10633 = vmatpush3.msra.mxu0 %v21290_v26  ;;  %10673 = vmatprep.subr.mxu1 %v21240_v61  ;;  %21291 = vst [vmem:[#allocation20_spill] sm:$0xff] %v13555_v5  ;;  %v620_v61 = vld [vmem:[%s20411_s3 + $0x140] sm:$0xff]  ;;  %21296 = vst [vmem:[#allocation13_spill] sm:$0xff] %v13575_v3  ;;  %v13593_v26 = vsub.f32 %v638_v19, %v13543_v48  ;;  %v21300_v15 = vand.u32 4294901760, %v21253_v7  ;;  %v21303_v7 = vand.u32 4294901760, %v21254_v36  ;;  %v21306_v10 = vand.u32 4294901760, %v21256_v31 }
  0x8a   :  { %10634 = vmatprep.subr.mxu0 %v21292_v57  ;;  %10674 = vmatpush3.msra.mxu1 %v21242_v50  ;;  %v20518_v50 = vand.u32 4294901760, %v13524_v42  ;;  %v635_v57 = vld [vmem:[%s20411_s3 + $0x1b8] sm:$0xff]  ;;  %v13610_v19 = vand.u32 4294901760, %v620_v61  ;;  %v20522_v36 = vand.u32 4294901760, %v13575_v3  ;;  %v2022_v31 = vand.u32 4294901760, %v13589_v55 }
  0x8b   :  { %10635 = vmatpush3.msra.mxu0 %v21295_v62  ;;  %10675 = vmatprep.subr.mxu1 %v21244_v47  ;;  %21299 = vst [vmem:[#allocation15_spill] sm:$0xff] %v13593_v26  ;;  %v20523_v62 = vand.u32 4294901760, %v13553_v0  ;;  %v21313_v47 = vand.u32 4294901760, %v21260_v18  ;;  %v21316_v18 = vand.u32 4294901760, %v21261_v29  ;;  %v21318_v29 = vld [vmem:[#allocation42_spill] sm:$0xff] }
  0x8c   :  { %10636 = vmatprep.subr.mxu0 %v21298_v30  ;;  %10676 = vmatpush3.msra.mxu1 %v21246_v46  ;;  %v13604_v46 = vsub.f32 %v13497_v49, %v20515_v1  ;;  %v13608_v30 = vsub.f32 %v622_v54, %v13555_v5  ;;  %21302 = vst [vmem:[#allocation17_spill] sm:$0xff] %v13610_v19  ;;  %v13627_v1 = vand.u32 4294901760, %v636_v22 }
  0x8d   :  { %10637 = vmatpush3.msra.mxu0 %v21300_v15  ;;  %10677 = vmatprep.subr.mxu1 %v21248_v53  ;;  %v13621_v53 = vsub.f32 %v13508_v20, %v20517_v16  ;;  %v20521_v15 = vand.u32 4294901760, %v13562_v12  ;;  %v13625_v54 = vsub.f32 %v621_v24, %v13564_v41  ;;  %v13641_v16 = vand.u32 4294901760, %v635_v57 }
  0x8e   :  { %21301 = vst [vmem:[#allocation26_spill] sm:$0xff] %v13608_v30  ;;  %10638 = vmatprep.subr.mxu0 %v21303_v7  ;;  %10678 = vmatpush3.msra.mxu1 %v21250_v33  ;;  %21305 = vst [vmem:[#allocation19_spill] sm:$0xff] %v13627_v1  ;;  %v13635_v33 = vsub.f32 %v13524_v42, %v20518_v50  ;;  %v13639_v7 = vsub.f32 %v637_v58, %v13577_v45  ;;  %v21308_v24 = vand.u32 4294901760, %v21257_v37 }
  0x8f   :  { %21304 = vst [vmem:[#allocation28_spill] sm:$0xff] %v13625_v54  ;;  %10639 = vmatpush3.msra.mxu0 %v21306_v10  ;;  %10679 = vmatprep.subr.mxu1 %v21252_v32  ;;  %v13650_v32 = vsub.f32 %v13541_v34, %v20520_v44  ;;  %v20524_v10 = vand.u32 4294901760, %v13593_v26  ;;  %v13653_v50 = vand.u32 4294901760, %v619_v40  ;;  %v21310_v58 = vand.u32 4294901760, %v21258_v52 }
  0x90   :  { %21307 = vst [vmem:[#allocation30_spill] sm:$0xff] %v13639_v7  ;;  %10640 = vmatprep.subr.mxu0 %v21308_v24  ;;  %1675 = vmatprep.mubr.f32.mxu0 %v13317_v43  ;;  %v1910_v37 = vand.u32 4294901760, %v13604_v46  ;;  %v13662_v55 = vsub.f32 %v13553_v0, %v20523_v62  ;;  %v20525_v24 = vand.u32 4294901760, %v13608_v30  ;;  %v13666_v44 = vsub.f32 %v620_v61, %v13610_v19  ;;  %v634_v61 = vld [vmem:[%s20411_s3 + $0x1b0] sm:$0xff]  ;;  %v633_v62 = vld [vmem:[%s20411_s3 + $0x1a8] sm:$0xff] }
  0x91   :  { %21309 = vst [vmem:[#allocation21_spill] sm:$0xff] %v13653_v50  ;;  %10641 = vmatpush3.msra.mxu0 %v21310_v58  ;;  %10680 = vmatpush3.msra.mxu1 %v21311_v14  ;;  %v2029_v52 = vand.u32 4294901760, %v13621_v53  ;;  %v13675_v14 = vsub.f32 %v13562_v12, %v20521_v15  ;;  %v20528_v46 = vand.u32 4294901760, %v13625_v54  ;;  %v13679_v58 = vsub.f32 %v636_v22, %v13627_v1  ;;  %v618_v15 = vld [vmem:[%s20411_s3 + $0x130] sm:$0xff] }
  0x92   :  { %21312 = vst [vmem:[#allocation32_spill] sm:$0xff] %v13666_v44  ;;  %10642 = vmatprep.subr.mxu0 %v21313_v47  ;;  %10681 = vmatprep.subr.mxu1 %v21314_v8  ;;  %v1917_v8 = vand.u32 4294901760, %v13635_v33  ;;  %v13691_v47 = vsub.f32 %v13575_v3, %v20522_v36  ;;  %v13695_v22 = vsub.f32 %v635_v57, %v13641_v16  ;;  %v617_v33 = vld [vmem:[%s20411_s3 + $0x128] sm:$0xff]  ;;  %v13743_v53 = vand.u32 4294901760, %v618_v15 }
  0x93   :  { %21315 = vst [vmem:[#allocation23_spill] sm:$0xff] %v13679_v58  ;;  %10643 = vmatpush3.msra.mxu0 %v21316_v18  ;;  %10682 = vmatpush3.msra.mxu1 %v13241_v28  ;;  %v840_v18 = vcombine.high %v21318_v29, %v21318_v29  ;;  %v21319_v28 = vand.u32 4294901760, %v21262_v9  ;;  %v13709_v36 = vsub.f32 %v13593_v26, %v20524_v10  ;;  %v21321_v29 = vand.u32 4294901760, %v21263_v27  ;;  %v21322_v9 = vld [vmem:[#allocation43_spill] sm:$0xff] }
  0x94   :  { %21317 = vst [vmem:[#allocation34_spill] sm:$0xff] %v13695_v22  ;;  %1779 = vmatprep.mubr.f32.mxu1 %v13317_v43  ;;  %v13712_v57 = vsub.f32 %v619_v40, %v13653_v50  ;;  %v2036_v43 = vand.u32 4294901760, %v13662_v55  ;;  %v13727_v40 = vand.u32 4294901760, %v634_v61  ;;  %v21323_v27 = vand.u32 4294901760, %v13288_v60 }
  0x95   :  { %10644 = vmatprep.subr.mxu0 %v21319_v28  ;;  %1781 = vmatmul.mubr.f32.vlgmr.msra.gmra.mxu1 %v21322_v9  ;;  %v13724_v28 = vsub.f32 %v13608_v30, %v20525_v24  ;;  %v13740_v24 = vsub.f32 %v13625_v54, %v20528_v46  ;;  %v632_v30 = vld [vmem:[%s20411_s3 + $0x1a0] sm:$0xff]  ;;  %v21325_v60 = vand.u32 4294901760, %v13292_v17  ;;  %v13759_v10 = vand.u32 4294901760, %v633_v62 }
  0x96   :  { %21320 = vst [vmem:[#allocation25_spill] sm:$0xff] %v13712_v57  ;;  %10645 = vmatpush3.msra.mxu0 %v21321_v29  ;;  %v21324_v29 = vand.u32 4294901760, %v13521_v39  ;;  %v21326_v39 = vand.u32 4294901760, %v13537_v51  ;;  %v616_v54 = vld [vmem:[%s20411_s3 + $0x120] sm:$0xff]  ;;  %v2050_v17 = vand.u32 4294901760, %v13709_v36  ;;  %v21329_v55 = vand.u32 4294901760, %v13666_v44 }
  0x97   :  { %10646 = vmatprep.subr.mxu0 %v21323_v27  ;;  %v2043_v27 = vand.u32 4294901760, %v13691_v47  ;;  %v13768_v47 = vand.u32 4294901760, %v617_v33  ;;  %v13784_v51 = vsub.f32 %v634_v61, %v13727_v40  ;;  %v13801_v61 = vand.u32 4294901760, %v616_v54 }
  0x98   :  { %10721 = vmatprep.subr.mxu1 %v21324_v29  ;;  %10647 = vmatpush3.msra.mxu0 %v21325_v60  ;;  %v21327_v29 = vand.u32 4294901760, %v13639_v7  ;;  %v631_v60 = vld [vmem:[%s20411_s3 + $0x198] sm:$0xff]  ;;  %v13781_v36 = vsub.f32 %v13666_v44, %v21329_v55  ;;  %v13799_v55 = vsub.f32 %v618_v15, %v13743_v53  ;;  %v630_v44 = vld [vmem:[%s20411_s3 + $0x190] sm:$0xff]  ;;  %v21337_v3 = vand.u32 4294901760, %v13650_v32 }
  0x99   :  { %10722 = vmatpush3.msra.mxu1 %v21326_v39  ;;  %1677 = vmatmul.mubr.f32.vlgmr.msra.gmra.mxu0 %v21322_v9  ;;  %v21328_v39 = vld [vmem:[#allocation41_spill] sm:$0xff]  ;;  %v1938_v9 = vand.u32 4294901760, %v13724_v28  ;;  %21330 = vst [vmem:[#allocation27_spill] sm:$0xff] %v13784_v51  ;;  %v21331_v28 = vand.u32 4294901760, %v13679_v58  ;;  %v13816_v15 = vand.u32 4294901760, %v631_v60 }
  0x9a   :  { %v13756_v46 = vsub.f32 %v13639_v7, %v21327_v29  ;;  %10686 = vmatprep.subr.mxu0 %v13417_v13  ;;  %v13774_v29 = vrot.slane %v840_v18, %v21328_v39  ;;  %10723 = vmatprep.subr.mxu1 %v2022_v31  ;;  %v13786_v7 = vand.u32 4294901760, %v632_v30  ;;  %v615_v18 = vld [vmem:[%s20411_s3 + $0x118] sm:$0xff]  ;;  %21332 = vst [vmem:[#allocation29_spill] sm:$0xff] %v13799_v55  ;;  %v21333_v31 = vand.u32 4294901760, %v13695_v22 }
  0x9b   :  { %10687 = vmatpush3.msra.mxu0 %v13422_v21  ;;  %10724 = vmatpush3.msra.mxu1 %v1910_v37  ;;  %v13796_v39 = vsub.f32 %v13679_v58, %v21331_v28  ;;  %v13814_v28 = vsub.f32 %v633_v62, %v13759_v10  ;;  %v614_v58 = vld [vmem:[%s20411_s3 + $0x110] sm:$0xff]  ;;  %v629_v62 = vld [vmem:[%s20411_s3 + $0x188] sm:$0xff]  ;;  %v13862_v32 = vsub.f32 %v631_v60, %v13816_v15  ;;  %v612_v60 = vld [vmem:[%s20411_s3 + $0x100] sm:$0xff] }
  0x9c   :  { %10688 = vmatprep.subr.mxu0 %v13451_v56  ;;  %10725 = vmatprep.subr.mxu1 %v2029_v52  ;;  %v2057_v37 = vand.u32 4294901760, %v13756_v46  ;;  %v13811_v26 = vsub.f32 %v13695_v22, %v21333_v31  ;;  %v21335_v52 = vand.u32 4294901760, %v13712_v57  ;;  %v13828_v31 = vsub.f32 %v617_v33, %v13768_v47 }
  0x9d   :  { %10689 = vmatpush3.msra.mxu0 %v13459_v63  ;;  %21334 = vst [vmem:[#allocation31_spill] sm:$0xff] %v13814_v28  ;;  %10726 = vmatpush3.msra.mxu1 %v1917_v8  ;;  %v13830_v22 = vand.u32 4294901760, %v615_v18  ;;  %v856_v12 = vcombine.high %v13774_v29, %v13774_v29  ;;  %v1952_v8 = vand.u32 4294901760, %v13781_v36  ;;  %v13843_v33 = vand.u32 4294901760, %v630_v44 }
  0x9e   :  { %10690 = vmatprep.subr.mxu0 %v13467_v4  ;;  %v13825_v46 = vsub.f32 %v13712_v57, %v21335_v52  ;;  %21336 = vst [vmem:[#allocation33_spill] sm:$0xff] %v13828_v31  ;;  %10727 = vmatprep.subr.mxu1 %v2036_v43  ;;  %v13841_v57 = vsub.f32 %v632_v30, %v13786_v7  ;;  %v2064_v34 = vand.u32 4294901760, %v13796_v39  ;;  %v13853_v36 = vand.u32 4294901760, %v614_v58  ;;  %v613_v30 = vld [vmem:[%s20411_s3 + $0x108] sm:$0xff] }
  0x9f   :  { %10691 = vmatpush3.msra.mxu0 %v13476_v35  ;;  %10728 = vmatpush3.msra.mxu1 %v21337_v3  ;;  %v13851_v43 = vsub.f32 %v616_v54, %v13801_v61  ;;  %v2071_v52 = vand.u32 4294901760, %v13811_v26  ;;  %v13864_v39 = vand.u32 4294901760, %v629_v62  ;;  %v628_v54 = vld [vmem:[%s20411_s3 + $0x180] sm:$0xff]  ;;  %v21338_v4 = vand.u32 4294901760, %v13675_v14 }
  0xa0   :  { %10692 = vmatprep.subr.mxu0 %v13499_v6  ;;  %10729 = vmatprep.subr.mxu1 %v2043_v27  ;;  %v1959_v27 = vand.u32 4294901760, %v13825_v46  ;;  %v13875_v3 = vsub.f32 %v615_v18, %v13830_v22  ;;  %v13888_v46 = vsub.f32 %v630_v44, %v13843_v33  ;;  %v13890_v18 = vand.u32 4294901760, %v613_v30 }
  0xa1   :  { %10693 = vmatpush3.msra.mxu0 %v13488_v11  ;;  %10730 = vmatpush3.msra.mxu1 %v21338_v4  ;;  %v13880_v11 = vand.u32 4294901760, %v856_v12  ;;  %v21341_v26 = vand.u32 4294901760, %v13799_v55  ;;  %v21342_v44 = vand.u32 4294901760, %v13814_v28 }
  0xa2   :  { %10694 = vmatprep.subr.mxu0 %v13526_v23  ;;  %10731 = vmatprep.subr.mxu1 %v2050_v17  ;;  %v21340_v23 = vand.u32 4294901760, %v13784_v51  ;;  %v21345_v17 = vand.u32 4294901760, %v13828_v31 }
  0xa3   :  { %21339 = vst [vmem:[#allocation35_spill] sm:$0xff] %v13880_v11  ;;  %10695 = vmatpush3.msra.mxu0 %v13510_v59  ;;  %10732 = vmatpush3.msra.mxu1 %v1938_v9  ;;  %v1965_v6 = vsub.f32 %v13799_v55, %v21341_v26  ;;  %v13898_v59 = vsub.f32 %v614_v58, %v13853_v36  ;;  %v13910_v26 = vand.u32 4294901760, %v612_v60  ;;  %v21344_v58 = vand.u32 4294901760, %v13740_v24 }
  0xa4   :  { %v2077_v4 = vsub.f32 %v13784_v51, %v21340_v23  ;;  %10696 = vmatprep.subr.mxu0 %v13543_v48  ;;  %v13900_v23 = vand.u32 4294901760, %v628_v54  ;;  %10733 = vmatprep.subr.mxu1 %v2057_v37  ;;  %v2084_v14 = vsub.f32 %v13814_v28, %v21342_v44  ;;  %v13908_v51 = vsub.f32 %v629_v62, %v13864_v39 }
  0xa5   :  { %10697 = vmatpush3.msra.mxu0 %v13555_v5  ;;  %21343 = vst [vmem:[#allocation37_spill] sm:$0xff] %v13910_v26  ;;  %10734 = vmatpush3.msra.mxu1 %v21344_v58  ;;  %v1972_v37 = vsub.f32 %v13828_v31, %v21345_v17  ;;  %v13920_v44 = vsub.f32 %v856_v12, %v13880_v11  ;;  %v13923_v9 = vand.u32 4294901760, %v13774_v29  ;;  %v21347_v28 = vand.u32 4294901760, %v13841_v57 }
  0xa6   :  { %10698 = vmatprep.subr.mxu0 %v13577_v45  ;;  %10735 = vmatprep.subr.mxu1 %v2064_v34  ;;  %v2078_v62 = vand.u32 4294901760, %v2077_v4  ;;  %v13931_v17 = vsub.f32 %v613_v30, %v13890_v18  ;;  %v1966_v12 = vand.u32 4294901760, %v1965_v6  ;;  %v21348_v55 = vand.u32 4294901760, %v13851_v43 }
  0xa7   :  { %21346 = vst [vmem:[#allocation39_spill] sm:$0xff] %v13923_v9  ;;  %10699 = vmatpush3.msra.mxu0 %v13564_v41  ;;  %v2091_v24 = vsub.f32 %v13841_v57, %v21347_v28  ;;  %10736 = vmatpush3.msra.mxu1 %v1952_v8  ;;  %v13939_v4 = vsub.f32 %v628_v54, %v13900_v23  ;;  %v2085_v28 = vand.u32 4294901760, %v2084_v14  ;;  %v21349_v30 = vand.u32 4294901760, %v13862_v32 }
  0xa8   :  { %10700 = vmatprep.subr.mxu0 %v13627_v1  ;;  %v1979_v31 = vsub.f32 %v13851_v43, %v21348_v55  ;;  %10737 = vmatprep.subr.mxu1 %v2071_v52  ;;  %v13947_v6 = vsub.f32 %v612_v60, %v13910_v26  ;;  %v1973_v55 = vand.u32 4294901760, %v1972_v37  ;;  %v21350_v54 = vand.u32 4294901760, %v13875_v3 }
  0xa9   :  { %10701 = vmatpush3.msra.mxu0 %v13610_v19  ;;  %v2098_v58 = vsub.f32 %v13862_v32, %v21349_v30  ;;  %10738 = vmatpush3.msra.mxu1 %v1959_v27  ;;  %v13956_v14 = vsub.f32 %v13774_v29, %v13923_v9  ;;  %v2092_v30 = vand.u32 4294901760, %v2091_v24  ;;  %v21351_v60 = vand.u32 4294901760, %v13888_v46 }
  0xaa   :  { %10702 = vmatprep.subr.mxu0 %v13641_v16  ;;  %v1986_v34 = vsub.f32 %v13875_v3, %v21350_v54  ;;  %10739 = vmatprep.subr.mxu1 %v2078_v62  ;;  %v1980_v37 = vand.u32 4294901760, %v1979_v31  ;;  %v21352_v54 = vand.u32 4294901760, %v13898_v59  ;;  %v21353_v24 = vand.u32 4294901760, %v13908_v51 }
  0xab   :  { %10703 = vmatpush3.msra.mxu0 %v13653_v50  ;;  %v2105_v8 = vsub.f32 %v13888_v46, %v21351_v60  ;;  %10740 = vmatpush3.msra.mxu1 %v1966_v12  ;;  %v2099_v62 = vand.u32 4294901760, %v2098_v58  ;;  %v21354_v12 = vand.u32 4294901760, %v13920_v44  ;;  %v21357_v29 = vand.u32 4294901760, %v13947_v6 }
  0xac   :  { %10704 = vmatprep.subr.mxu0 %v13727_v40  ;;  %v1993_v52 = vsub.f32 %v13898_v59, %v21352_v54  ;;  %10741 = vmatprep.subr.mxu1 %v2085_v28  ;;  %v2112_v60 = vsub.f32 %v13908_v51, %v21353_v24  ;;  %v1987_v31 = vand.u32 4294901760, %v1986_v34  ;;  %v21355_v28 = vand.u32 4294901760, %v13931_v17 }
  0xad   :  { %10705 = vmatpush3.msra.mxu0 %v13743_v53  ;;  %10742 = vmatpush3.msra.mxu1 %v1973_v55  ;;  %v1885_v54 = vsub.f32 %v13920_v44, %v21354_v12  ;;  %v2106_v58 = vand.u32 4294901760, %v2105_v8  ;;  %v21356_v34 = vand.u32 4294901760, %v13939_v4  ;;  %v2007_v8 = vsub.f32 %v13947_v6, %v21357_v29 }
  0xae   :  { %10706 = vmatprep.subr.mxu0 %v13759_v10  ;;  %10743 = vmatprep.subr.mxu1 %v2092_v30  ;;  %v2000_v24 = vsub.f32 %v13931_v17, %v21355_v28  ;;  %v1994_v27 = vand.u32 4294901760, %v1993_v52  ;;  %v2113_v12 = vand.u32 4294901760, %v2112_v60  ;;  %v21358_v28 = vand.u32 4294901760, %v13956_v14 }
  0xaf   :  { %10707 = vmatpush3.msra.mxu0 %v13768_v47  ;;  %10744 = vmatpush3.msra.mxu1 %v1980_v37  ;;  %v2119_v55 = vsub.f32 %v13939_v4, %v21356_v34  ;;  %v1886_v30 = vand.u32 4294901760, %v1885_v54  ;;  %v2008_v29 = vand.u32 4294901760, %v2007_v8  ;;  %v21361_v54 = vld [vmem:[#allocation13_spill] sm:$0xff]  ;;  %v21364_v34 = vld [vmem:[#allocation14_spill] sm:$0xff] }
  0xb0   :  { %10708 = vmatprep.subr.mxu0 %v13786_v7  ;;  %10745 = vmatprep.subr.mxu1 %v2099_v62  ;;  %v1891_v52 = vsub.f32 %v13956_v14, %v21358_v28  ;;  %v2001_v37 = vand.u32 4294901760, %v2000_v24  ;;  %v21363_v24 = vld [vmem:[#allocation11_spill] sm:$0xff]  ;;  %v21367_v8 = vld [vmem:[#allocation26_spill] sm:$0xff] }
  0xb1   :  { %10709 = vmatpush3.msra.mxu0 %v13801_v61  ;;  %10746 = vmatpush3.msra.mxu1 %v1987_v31  ;;  %v2120_v62 = vand.u32 4294901760, %v2119_v55  ;;  %v21360_v31 = vld [vmem:[#allocation18_spill] sm:$0xff]  ;;  %v21365_v55 = vld [vmem:[#allocation15_spill] sm:$0xff] }
  0xb2   :  { %10710 = vmatprep.subr.mxu0 %v13816_v15  ;;  %10747 = vmatprep.subr.mxu1 %v2106_v58  ;;  %v1892_v60 = vand.u32 4294901760, %v1891_v52  ;;  %v21362_v58 = vld [vmem:[#allocation8_spill] sm:$0xff]  ;;  %v21369_v28 = vld [vmem:[#allocation30_spill] sm:$0xff] }
  0xb3   :  { %10711 = vmatpush3.msra.mxu0 %v13830_v22  ;;  %10748 = vmatpush3.msra.mxu1 %v1994_v27  ;;  %v21359_v27 = vld [vmem:[#allocation12_spill] sm:$0xff]  ;;  %v53_v52 = vld [vmem:[%s20409_s1 + $0xa0] sm:$0xff] }
  0xb4   :  { %10712 = vmatprep.subr.mxu0 %v13843_v33  ;;  %10749 = vmatprep.subr.mxu1 %v2113_v12  ;;  %v21366_v12 = vld [vmem:[#allocation9_spill] sm:$0xff] }
  0xb5   :  { %10713 = vmatpush3.msra.mxu0 %v13853_v36  ;;  %1887 = vmatprep.mubr.f32.mxu0 %v1886_v30  ;;  %v21368_v30 = vld [vmem:[#allocation16_spill] sm:$0xff] }
  0xb6   :  { %10714 = vmatprep.subr.mxu0 %v13864_v39  ;;  %10750 = vmatpush3.msra.mxu1 %v2001_v37  ;;  %v21370_v37 = vld [vmem:[#allocation28_spill] sm:$0xff] }
  0xb7   :  { %10715 = vmatpush3.msra.mxu0 %v13890_v18  ;;  %10751 = vmatprep.subr.mxu1 %v2120_v62  ;;  %v54_v62 = vld [vmem:[%s20409_s1 + $0xa8] sm:$0xff] }
  0xb8   :  { %10716 = vmatprep.subr.mxu0 %v13900_v23  ;;  %10752 = vmatpush3.msra.mxu1 %v2008_v29  ;;  %v55_v29 = vld [vmem:[%s20409_s1 + $0xb0] sm:$0xff] }
  0xb9   :  { %10717 = vmatpush3.msra.mxu0 %v13910_v26  ;;  %2123 = vmatprep.mubr.f32.mxu1 %v13880_v11  ;;  %v21372_v11 = vld [vmem:[#allocation32_spill] sm:$0xff] }
  0xba   :  { %1893 = vmatmul.mubr.f32.vlgmr.msra.gmra.mxu0 %v1892_v60  ;;  %10756 = vmatprep.subr.mxu0 %v13440_v25  ;;  %v56_v60 = vld [vmem:[%s20409_s1 + $0xb8] sm:$0xff] }
  0xbb   :  { %10757 = vmatpush3.msra.mxu0 %v13449_v38  ;;  %2125 = vmatmul.mubr.f32.vlgmr.msra.gmra.mxu1 %v13923_v9  ;;  %v21371_v9 = vld [vmem:[#allocation23_spill] sm:$0xff] }
  0xbc   :  { %10758 = vmatprep.subr.mxu0 %v13486_v2  ;;  %10791 = vmatprep.subr.mxu1 %v13417_v13 }
  0xbd   :  { %10759 = vmatpush3.msra.mxu0 %v13497_v49  ;;  %10792 = vmatpush3.msra.mxu1 %v13422_v21 }
  0xbe   :  { %10760 = vmatprep.subr.mxu0 %v13508_v20  ;;  %10793 = vmatprep.subr.mxu1 %v13451_v56 }
  0xbf   :  { %10761 = vmatpush3.msra.mxu0 %v13524_v42  ;;  %10794 = vmatpush3.msra.mxu1 %v13459_v63 }
  0xc0   :  { %10762 = vmatprep.subr.mxu0 %v13553_v0  ;;  %10795 = vmatprep.subr.mxu1 %v21359_v27 }
  0xc1   :  { %10763 = vmatpush3.msra.mxu0 %v21360_v31  ;;  %10796 = vmatpush3.msra.mxu1 %v13476_v35 }
  0xc2   :  { %10764 = vmatprep.subr.mxu0 %v21361_v54  ;;  %10797 = vmatprep.subr.mxu1 %v21362_v58 }
  0xc3   :  { %10765 = vmatpush3.msra.mxu0 %v21363_v24  ;;  %10798 = vmatpush3.msra.mxu1 %v21364_v34 }
  0xc4   :  { %10766 = vmatprep.subr.mxu0 %v21365_v55  ;;  %10799 = vmatprep.subr.mxu1 %v21366_v12  ;;  %v21376_v12 = vld [vmem:[#allocation29_spill] sm:$0xff] }
  0xc5   :  { %10767 = vmatpush3.msra.mxu0 %v21367_v8  ;;  %10800 = vmatpush3.msra.mxu1 %v21368_v30  ;;  %v38_v30 = vld [vmem:[%s20409_s1 + $0x28] sm:$0xff] }
  0xc6   :  { %10768 = vmatprep.subr.mxu0 %v21369_v28  ;;  %10801 = vmatprep.subr.mxu1 %v13543_v48  ;;  %v21373_v48 = vld [vmem:[#allocation34_spill] sm:$0xff]  ;;  %v21375_v8 = vld [vmem:[#allocation27_spill] sm:$0xff]  ;;  %v95_v34 = vrot.slane %v38_v30, 4 }
  0xc7   :  { %10769 = vmatpush3.msra.mxu0 %v21370_v37  ;;  %10802 = vmatpush3.msra.mxu1 %v13555_v5  ;;  %v185_v37 = vrot.slane %v53_v52, 4  ;;  %v37_v28 = vld [vmem:[%s20409_s1 + $0x20] sm:$0xff]  ;;  %v197_v5 = vrot.slane %v55_v29, 4 }
  0xc8   :  { %10770 = vmatprep.subr.mxu0 %v21371_v9  ;;  %10803 = vmatprep.subr.mxu1 %v13577_v45  ;;  %v39_v9 = vld [vmem:[%s20409_s1 + $0x30] sm:$0xff]  ;;  %v191_v45 = vrot.slane %v54_v62, 4  ;;  %v89_v55 = vrot.slane %v37_v28, 4 }
  0xc9   :  { %10771 = vmatpush3.msra.mxu0 %v21372_v11  ;;  %10804 = vmatpush3.msra.mxu1 %v13564_v41  ;;  %v203_v11 = vrot.slane %v56_v60, 4  ;;  %v21374_v41 = vld [vmem:[#allocation25_spill] sm:$0xff]  ;;  %v101_v24 = vrot.slane %v39_v9, 4  ;;  %v186_v58 = vadd.f32 %v185_v37, %v53_v52  ;;  %v198_v35 = vadd.f32 %v197_v5, %v55_v29 }
  0xca   :  { %10772 = vmatprep.subr.mxu0 %v21373_v48  ;;  %10805 = vmatprep.subr.mxu1 %v13627_v1  ;;  %v40_v48 = vld [vmem:[%s20409_s1 + $0x38] sm:$0xff]  ;;  %v21377_v1 = vld [vmem:[#allocation31_spill] sm:$0xff]  ;;  %v192_v54 = vadd.f32 %v191_v45, %v54_v62  ;;  %v90_v52 = vadd.f32 %v89_v55, %v37_v28  ;;  %v96_v37 = vadd.f32 %v95_v34, %v38_v30 }
  0xcb   :  { %10773 = vmatpush3.msra.mxu0 %v21374_v41  ;;  %10806 = vmatpush3.msra.mxu1 %v13610_v19  ;;  %v107_v41 = vrot.slane %v40_v48, 4  ;;  %v204_v31 = vadd.f32 %v203_v11, %v56_v60  ;;  %v21378_v19 = vld [vmem:[#allocation33_spill] sm:$0xff]  ;;  %v199_v45 = vrot.slane %v198_v35, 2 }
  0xcc   :  { %10774 = vmatprep.subr.mxu0 %v21375_v8  ;;  %10807 = vmatprep.subr.mxu1 %v13641_v16  ;;  %v193_v5 = vrot.slane %v192_v54, 2 }
  0xcd   :  { %10775 = vmatpush3.msra.mxu0 %v21376_v12  ;;  %10808 = vmatpush3.msra.mxu1 %v13653_v50  ;;  %v102_v50 = vadd.f32 %v101_v24, %v39_v9  ;;  %v108_v11 = vadd.f32 %v107_v41, %v40_v48  ;;  %v205_v62 = vrot.slane %v204_v31, 2  ;;  %v91_v9 = vrot.slane %v90_v52, 2 }
  0xce   :  { %10776 = vmatprep.subr.mxu0 %v21377_v1  ;;  %10809 = vmatprep.subr.mxu1 %v13727_v40  ;;  %v187_v1 = vrot.slane %v186_v58, 2  ;;  %v97_v24 = vrot.slane %v96_v37, 2  ;;  %v194_v41 = vadd.f32 %v193_v5, %v192_v54  ;;  %v200_v30 = vadd.f32 %v199_v45, %v198_v35 }
  0xcf   :  { %10777 = vmatpush3.msra.mxu0 %v21378_v19  ;;  %10810 = vmatpush3.msra.mxu1 %v13743_v53  ;;  %v103_v34 = vrot.slane %v102_v50, 2  ;;  %v109_v48 = vrot.slane %v108_v11, 2  ;;  %v206_v28 = vadd.f32 %v205_v62, %v204_v31  ;;  %v21379_v45 = vand.u32 4294901760, %v13440_v25 }
  0xd0   :  { %10778 = vmatprep.subr.mxu0 %v13841_v57  ;;  %10811 = vmatprep.subr.mxu1 %v13759_v10  ;;  %v188_v55 = vadd.f32 %v187_v1, %v186_v58  ;;  %v92_v1 = vadd.f32 %v91_v9, %v90_v52  ;;  %v98_v58 = vadd.f32 %v97_v24, %v96_v37  ;;  %v195_v31 = vrot.slane %v194_v41, 1 }
  0xd1   :  { %10779 = vmatpush3.msra.mxu0 %v13851_v43  ;;  %10812 = vmatpush3.msra.mxu1 %v13768_v47  ;;  %v104_v29 = vadd.f32 %v103_v34, %v102_v50  ;;  %v110_v35 = vadd.f32 %v109_v48, %v108_v11  ;;  %v201_v54 = vrot.slane %v200_v30, 1  ;;  %v207_v5 = vrot.slane %v206_v28, 1 }
  0xd2   :  { %10780 = vmatprep.subr.mxu0 %v13862_v32  ;;  %10813 = vmatprep.subr.mxu1 %v13786_v7  ;;  %v189_v60 = vrot.slane %v188_v55, 1  ;;  %v21380_v50 = vand.u32 4294901760, %v13920_v44  ;;  %v21381_v52 = vand.u32 4294901760, %v13449_v38  ;;  %v93_v37 = vrot.slane %v92_v1, 1 }
  0xd3   :  { %10781 = vmatpush3.msra.mxu0 %v13875_v3  ;;  %10814 = vmatpush3.msra.mxu1 %v13801_v61  ;;  %v99_v11 = vrot.slane %v98_v58, 1  ;;  %v105_v62 = vrot.slane %v104_v29, 1  ;;  %v21382_v24 = vand.u32 4294901760, %v13956_v14  ;;  %v21383_v34 = vand.u32 4294901760, %v13486_v2 }
  0xd4   :  { %10782 = vmatprep.subr.mxu0 %v13888_v46  ;;  %10815 = vmatprep.subr.mxu1 %v13816_v15  ;;  %v190_v9 = vadd.f32 %v189_v60, %v188_v55  ;;  %v111_v25 = vrot.slane %v110_v35, 1  ;;  %v196_v48 = vadd.f32 %v195_v31, %v194_v41  ;;  %v21385_v38 = vand.u32 4294901760, %v13508_v20  ;;  %v674_v20 = vld [vmem:[%s20411_s3 + $0x2f0] sm:$0xff] }
  0xd5   :  { %10783 = vmatpush3.msra.mxu0 %v13898_v59  ;;  %10816 = vmatpush3.msra.mxu1 %v13830_v22  ;;  %v21386_v2 = vand.u32 4294901760, %v13524_v42  ;;  %v100_v55 = vadd.f32 %v99_v11, %v98_v58  ;;  %v106_v41 = vadd.f32 %v105_v62, %v104_v29  ;;  %v21390_v58 = vld [vmem:[#allocation7_spill] sm:$0xff]  ;;  %v21393_v31 = vld [vmem:[#allocation8_spill] sm:$0xff]  ;;  %v21399_v62 = vld [vmem:[#allocation41_spill] sm:$0xff] }
  0xd6   :  { %10784 = vmatprep.subr.mxu0 %v13908_v51  ;;  %10817 = vmatprep.subr.mxu1 %v13843_v33 }
  0xd7   :  { %10785 = vmatpush3.msra.mxu0 %v13931_v17  ;;  %10818 = vmatpush3.msra.mxu1 %v13853_v36 }
  0xd8   :  { %10786 = vmatprep.subr.mxu0 %v13939_v4  ;;  %10819 = vmatprep.subr.mxu1 %v13864_v39 }
  0xd9   :  { %10787 = vmatpush3.msra.mxu0 %v13947_v6  ;;  %2260 = vmatprep.mubr.f32.mxu0 %v13920_v44  ;;  %v21384_v44 = vand.u32 4294901760, %v13497_v49  ;;  %v94_v49 = vadd.f32 %v93_v37, %v92_v1 }
  0xda   :  { %10820 = vmatpush3.msra.mxu1 %v13890_v18  ;;  %2263 = vmatmul.mubr.f32.vlgmr.msra.gmra.mxu0 %v13956_v14  ;;  %v675_v14 = vld [vmem:[%s20411_s3 + $0x2f8] sm:$0xff] }
  0xdb   :  { %10821 = vmatprep.subr.mxu1 %v13900_v23  ;;  %10826 = vmatprep.subr.mxu0 %v21379_v45  ;;  %v202_v45 = vadd.f32 %v201_v54, %v200_v30  ;;  %v374_v30 = vcombine.low %v190_v9, %v196_v48  ;;  %v14127_v1 = vand.u32 4294901760, %v675_v14  ;;  %v21394_v54 = vld [vmem:[#allocation11_spill] sm:$0xff] }
  0xdc   :  { %10822 = vmatpush3.msra.mxu1 %v13910_v26  ;;  %2367 = vmatprep.mubr.f32.mxu1 %v21380_v50  ;;  %v208_v26 = vadd.f32 %v207_v5, %v206_v28  ;;  %v21388_v28 = vld [vmem:[#allocation18_spill] sm:$0xff]  ;;  %v306_v5 = vcombine.low %v94_v49, %v100_v55 }
  0xdd   :  { %10827 = vmatpush3.msra.mxu0 %v21381_v52  ;;  %2371 = vmatmul.mubr.f32.vlgmr.msra.gmra.mxu1 %v21382_v24  ;;  %v21389_v60 = vand.u32 4294901760, %v21388_v28  ;;  %v21396_v50 = vld [vmem:[#allocation14_spill] sm:$0xff]  ;;  %v21397_v52 = vld [vmem:[#allocation15_spill] sm:$0xff]  ;;  %v382_v9 = vrot.slane %v374_v30, %v21399_v62  ;;  %v21409_v28 = vld [vmem:[#allocation20_spill] sm:$0xff] }
  0xde   :  { %10828 = vmatprep.subr.mxu0 %v21383_v34  ;;  %10861 = vmatprep.subr.mxu1 %v13417_v13  ;;  %v659_v13 = vld [vmem:[%s20411_s3 + $0x278] sm:$0xff]  ;;  %v375_v42 = vcombine.low %v202_v45, %v208_v26  ;;  %v14137_v26 = vand.u32 4294901760, %v674_v20  ;;  %v21398_v37 = vand.u32 4294901760, %v21397_v52  ;;  %v14151_v45 = vsub.f32 %v675_v14, %v14127_v1  ;;  %v672_v52 = vld [vmem:[%s20411_s3 + $0x2e0] sm:$0xff] }
  0xdf   :  { %10829 = vmatpush3.msra.mxu0 %v21384_v44  ;;  %10862 = vmatpush3.msra.mxu1 %v13422_v21  ;;  %v21387_v21 = vand.u32 4294901760, %v13553_v0  ;;  %v14132_v0 = vand.u32 4294901760, %v659_v13  ;;  %v21400_v34 = vld [vmem:[#allocation9_spill] sm:$0xff]  ;;  %v673_v44 = vld [vmem:[%s20411_s3 + $0x2e8] sm:$0xff] }
  0xe0   :  { %10830 = vmatprep.subr.mxu0 %v21385_v38  ;;  %10863 = vmatprep.subr.mxu1 %v13451_v56  ;;  %v112_v56 = vadd.f32 %v111_v25, %v110_v35  ;;  %v21395_v35 = vand.u32 4294901760, %v21394_v54  ;;  %v389_v24 = vrot.slane %v375_v42, %v21399_v62  ;;  %v21401_v25 = vld [vmem:[#allocation26_spill] sm:$0xff]  ;;  %v21403_v38 = vld [vmem:[#allocation16_spill] sm:$0xff]  ;;  %v14168_v14 = vsub.f32 %v674_v20, %v14137_v26 }
  0xe1   :  { %10831 = vmatpush3.msra.mxu0 %v21386_v2  ;;  %10864 = vmatpush3.msra.mxu1 %v13459_v63  ;;  %v21391_v63 = vld [vmem:[#allocation13_spill] sm:$0xff]  ;;  %v21402_v48 = vand.u32 4294901760, %v21401_v25  ;;  %v21404_v2 = vld [vmem:[#allocation30_spill] sm:$0xff]  ;;  %v14160_v55 = vsub.f32 %v659_v13, %v14132_v0  ;;  %v14176_v13 = vand.u32 4294901760, %v673_v44  ;;  %v21412_v54 = vld [vmem:[#allocation24_spill] sm:$0xff] }
  0xe2   :  { %10832 = vmatprep.subr.mxu0 %v21387_v21  ;;  %10865 = vmatprep.subr.mxu1 %v21359_v27  ;;  %v21392_v29 = vand.u32 4294901760, %v21391_v63  ;;  %v658_v27 = vld [vmem:[%s20411_s3 + $0x270] sm:$0xff]  ;;  %v307_v11 = vcombine.low %v106_v41, %v112_v56  ;;  %v21405_v49 = vand.u32 4294901760, %v21404_v2  ;;  %v21406_v21 = vld [vmem:[#allocation10_spill] sm:$0xff]  ;;  %v314_v63 = vrot.slane %v306_v5, %v21399_v62  ;;  %v21419_v2 = vld [vmem:[#allocation25_spill] sm:$0xff] }
  0xe3   :  { %10833 = vmatpush3.msra.mxu0 %v21389_v60  ;;  %10866 = vmatpush3.msra.mxu1 %v21390_v58  ;;  %v14162_v41 = vand.u32 4294901760, %v658_v27  ;;  %v21407_v56 = vld [vmem:[#allocation28_spill] sm:$0xff]  ;;  %v657_v42 = vld [vmem:[%s20411_s3 + $0x268] sm:$0xff] }
  0xe4   :  { %10834 = vmatprep.subr.mxu0 %v21392_v29  ;;  %10867 = vmatprep.subr.mxu1 %v21393_v31  ;;  %v21408_v30 = vand.u32 4294901760, %v21407_v56  ;;  %v21410_v60 = vld [vmem:[#allocation23_spill] sm:$0xff]  ;;  %v321_v29 = vrot.slane %v307_v11, %v21399_v62  ;;  %v390_v31 = vcombine.low %v382_v9, %v389_v24  ;;  %v21413_v20 = vld [vmem:[#allocation32_spill] sm:$0xff]  ;;  %v20582_v11 = vand.u32 4294901760, %v14160_v55  ;;  %v656_v24 = vld [vmem:[%s20411_s3 + $0x260] sm:$0xff] }
  0xe5   :  { %10835 = vmatpush3.msra.mxu0 %v21395_v35  ;;  %10868 = vmatpush3.msra.mxu1 %v21396_v50  ;;  %v21411_v58 = vand.u32 4294901760, %v21410_v60  ;;  %v21414_v35 = vand.u32 4294901760, %v21413_v20  ;;  %v20583_v50 = vand.u32 4294901760, %v14151_v45  ;;  %v14191_v5 = vsub.f32 %v658_v27, %v14162_v41  ;;  %v655_v60 = vld [vmem:[%s20411_s3 + $0x258] sm:$0xff] }
  0xe6   :  { %10836 = vmatprep.subr.mxu0 %v21398_v37  ;;  %10869 = vmatprep.subr.mxu1 %v21400_v34  ;;  %v21415_v37 = vld [vmem:[#allocation22_spill] sm:$0xff]  ;;  %v14194_v9 = vand.u32 4294901760, %v657_v42  ;;  %v20581_v27 = vand.u32 4294901760, %v14168_v14  ;;  %v21422_v56 = vand.u32 4294901760, %v21375_v8  ;;  %v21424_v20 = vand.u32 4294901760, %v21376_v12 }
  0xe7   :  { %10837 = vmatpush3.msra.mxu0 %v21402_v48  ;;  %10870 = vmatpush3.msra.mxu1 %v21403_v38  ;;  %v21416_v34 = vld [vmem:[#allocation34_spill] sm:$0xff]  ;;  %v671_v48 = vld [vmem:[%s20411_s3 + $0x2d8] sm:$0xff]  ;;  %v21418_v38 = vld [vmem:[#allocation19_spill] sm:$0xff]  ;;  %v14225_v8 = vsub.f32 %v14151_v45, %v20583_v50  ;;  %v14240_v12 = vsub.f32 %v14160_v55, %v20582_v11 }
  0xe8   :  { %10838 = vmatprep.subr.mxu0 %v21405_v49  ;;  %10871 = vmatprep.subr.mxu1 %v21406_v21  ;;  %v21417_v25 = vand.u32 4294901760, %v21416_v34  ;;  %v21420_v49 = vand.u32 4294901760, %v21419_v2  ;;  %v21421_v21 = vld [vmem:[#allocation17_spill] sm:$0xff]  ;;  %v20580_v34 = vand.u32 4294901760, %v14191_v5  ;;  %v14255_v2 = vsub.f32 %v14168_v14, %v20581_v27 }
  0xe9   :  { %10839 = vmatpush3.msra.mxu0 %v21408_v30  ;;  %10872 = vmatpush3.msra.mxu1 %v21409_v28  ;;  %v14209_v30 = vand.u32 4294901760, %v672_v52  ;;  %v14212_v28 = vsub.f32 %v673_v44, %v14176_v13  ;;  %v14229_v44 = vand.u32 4294901760, %v671_v48  ;;  %v651_v27 = vld [vmem:[%s20411_s3 + $0x238] sm:$0xff] }
  0xea   :  { %10840 = vmatprep.subr.mxu0 %v21411_v58  ;;  %10873 = vmatprep.subr.mxu1 %v21412_v54  ;;  %v322_v58 = vcombine.low %v314_v63, %v321_v29  ;;  %v14217_v54 = vrot.slane %v390_v31, 7  ;;  %v670_v63 = vld [vmem:[%s20411_s3 + $0x2d0] sm:$0xff]  ;;  %v21427_v29 = vld [vmem:[#allocation21_spill] sm:$0xff] }
  0xeb   :  { %10841 = vmatpush3.msra.mxu0 %v21414_v35  ;;  %10874 = vmatpush3.msra.mxu1 %v21415_v37  ;;  %21423 = vst [vmem:[#allocation40_spill] sm:$0xff] %v14209_v30  ;;  %v14227_v35 = vand.u32 4294901760, %v656_v24  ;;  %21426 = vst [vmem:[#allocation36_spill] sm:$0xff] %v14229_v44  ;;  %v21428_v31 = vld [vmem:[#allocation31_spill] sm:$0xff]  ;;  %v14243_v37 = vsub.f32 %v657_v42, %v14194_v9 }
  0xec   :  { %10842 = vmatprep.subr.mxu0 %v21417_v25  ;;  %10875 = vmatprep.subr.mxu1 %v21418_v38  ;;  %v654_v25 = vld [vmem:[%s20411_s3 + $0x250] sm:$0xff]  ;;  %v21430_v38 = vand.u32 4294901760, %v21378_v19  ;;  %v669_v42 = vld [vmem:[%s20411_s3 + $0x2c8] sm:$0xff]  ;;  %v14267_v19 = vsub.f32 %v672_v52, %v14209_v30  ;;  %v14284_v52 = vsub.f32 %v671_v48, %v14229_v44 }
  0xed   :  { %10843 = vmatpush3.msra.mxu0 %v21420_v49  ;;  %10876 = vmatpush3.msra.mxu1 %v21421_v21  ;;  %21425 = vst [vmem:[#allocation6_spill] sm:$0xff] %v14227_v35  ;;  %v14257_v49 = vand.u32 4294901760, %v655_v60  ;;  %v21432_v21 = vand.u32 4294901760, %v13841_v57  ;;  %v2877_v57 = vand.u32 4294901760, %v14225_v8  ;;  %v20585_v48 = vand.u32 4294901760, %v14243_v37 }
  0xee   :  { %10844 = vmatprep.subr.mxu0 %v21422_v56  ;;  %10877 = vmatprep.subr.mxu1 %v13641_v16  ;;  %v21429_v16 = vand.u32 4294901760, %v21428_v31  ;;  %v14269_v56 = vand.u32 4294901760, %v670_v63  ;;  %v14281_v31 = vsub.f32 %v656_v24, %v14227_v35  ;;  %21435 = vst [vmem:[#allocation43_spill] sm:$0xff] %v14284_v52  ;;  %v14298_v24 = vsub.f32 %v14191_v5, %v20580_v34  ;;  %v667_v34 = vld [vmem:[%s20411_s3 + $0x2b8] sm:$0xff] }
  0xef   :  { %10845 = vmatpush3.msra.mxu0 %v21424_v20  ;;  %10878 = vmatpush3.msra.mxu1 %v21427_v29  ;;  %21431 = vst [vmem:[#allocation38_spill] sm:$0xff] %v14257_v49  ;;  %v653_v20 = vld [vmem:[%s20411_s3 + $0x248] sm:$0xff]  ;;  %v441_v29 = vsel %vm430_vm0, %v14217_v54, %v322_v58  ;;  %v14301_v58 = vand.u32 4294901760, %v669_v42  ;;  %v21463_v8 = vand.u32 4294901760, %v14240_v12  ;;  %v21465_v12 = vand.u32 4294901760, %v14255_v2 }
  0xf0   :  { %10846 = vmatprep.subr.mxu0 %v21429_v16  ;;  %10879 = vmatprep.subr.mxu1 %v13727_v40  ;;  %v20584_v40 = vand.u32 4294901760, %v14212_v28  ;;  %21433 = vst [vmem:[#allocation42_spill] sm:$0xff] %v14269_v56  ;;  %v14286_v16 = vand.u32 4294901760, %v654_v25  ;;  %v14333_v11 = vsub.f32 %v670_v63, %v14269_v56  ;;  %v21447_v63 = vand.u32 4294901760, %v13908_v51 }
  0xf1   :  { %10847 = vmatpush3.msra.mxu0 %v21430_v38  ;;  %10880 = vmatpush3.msra.mxu1 %v13743_v53  ;;  %v21434_v53 = vand.u32 4294901760, %v13851_v43  ;;  %v652_v38 = vld [vmem:[%s20411_s3 + $0x240] sm:$0xff]  ;;  %21438 = vst [vmem:[#allocation27_spill] sm:$0xff] %v14301_v58  ;;  %v14366_v51 = vsub.f32 %v14243_v37, %v20585_v48  ;;  %v21467_v2 = vand.u32 4294901760, %v14298_v24  ;;  %v662_v24 = vld [vmem:[%s20411_s3 + $0x290] sm:$0xff] }
  0xf2   :  { %10848 = vmatprep.subr.mxu0 %v21432_v21  ;;  %10881 = vmatprep.subr.mxu1 %v13759_v10  ;;  %21436 = vst [vmem:[#allocation12_spill] sm:$0xff] %v14286_v16  ;;  %v21437_v10 = vand.u32 4294901760, %v13862_v32  ;;  %v668_v21 = vld [vmem:[%s20411_s3 + $0x2c0] sm:$0xff]  ;;  %21443 = vst [vmem:[#allocation18_spill] sm:$0xff] %v14333_v11  ;;  %v14335_v50 = vand.u32 4294901760, %v652_v38  ;;  %v14351_v32 = vsub.f32 %v669_v42, %v14301_v58 }
  0xf3   :  { %10849 = vmatpush3.msra.mxu0 %v21434_v53  ;;  %10882 = vmatpush3.msra.mxu1 %v13768_v47  ;;  %v21439_v47 = vand.u32 4294901760, %v13875_v3  ;;  %v14311_v53 = vsub.f32 %v655_v60, %v14257_v49  ;;  %v21442_v3 = vand.u32 4294901760, %v13888_v46  ;;  %v14329_v60 = vsub.f32 %v14212_v28, %v20584_v40 }
  0xf4   :  { %10850 = vmatprep.subr.mxu0 %v21437_v10  ;;  %10883 = vmatprep.subr.mxu1 %v13786_v7  ;;  %v14313_v10 = vand.u32 4294901760, %v653_v20  ;;  %v442_v7 = vsel %vm432_vm1, %v14217_v54, %v441_v29  ;;  %v21444_v29 = vand.u32 4294901760, %v13898_v59  ;;  %v20587_v46 = vand.u32 4294901760, %v14284_v52  ;;  %21448 = vst [vmem:[#allocation8_spill] sm:$0xff] %v14351_v32 }
  0xf5   :  { %10851 = vmatpush3.msra.mxu0 %v21439_v47  ;;  %21440 = vst [vmem:[#allocation29_spill] sm:$0xff] %v14311_v53  ;;  %10884 = vmatpush3.msra.mxu1 %v13801_v61  ;;  %v20586_v47 = vand.u32 4294901760, %v14267_v19  ;;  %v20588_v61 = vand.u32 4294901760, %v14281_v31  ;;  %v14345_v40 = vand.u32 4294901760, %v668_v21  ;;  %v14355_v59 = vand.u32 4294901760, %v651_v27 }
  0xf6   :  { %21441 = vst [vmem:[#allocation33_spill] sm:$0xff] %v14313_v10  ;;  %10852 = vmatprep.subr.mxu0 %v21442_v3  ;;  %10885 = vmatprep.subr.mxu1 %v13816_v15  ;;  %v14343_v3 = vsub.f32 %v654_v25, %v14286_v16  ;;  %v14353_v15 = vand.u32 4294901760, %v667_v34  ;;  %v21449_v25 = vand.u32 4294901760, %v13931_v17  ;;  %v20589_v42 = vand.u32 4294901760, %v14311_v53 }
  0xf7   :  { %10853 = vmatpush3.msra.mxu0 %v21444_v29  ;;  %21446 = vst [vmem:[#allocation13_spill] sm:$0xff] %v14345_v40  ;;  %10886 = vmatpush3.msra.mxu1 %v13830_v22  ;;  %v443_v29 = vsel %vm434_vm2, %v14217_v54, %v442_v7  ;;  %v21451_v7 = vand.u32 4294901760, %v13939_v4  ;;  %v14379_v17 = vsub.f32 %v14267_v19, %v20586_v47 }
  0xf8   :  { %21445 = vst [vmem:[#allocation7_spill] sm:$0xff] %v14343_v3  ;;  %10854 = vmatprep.subr.mxu0 %v21447_v63  ;;  %10887 = vmatprep.subr.mxu1 %v13843_v33  ;;  %v14370_v63 = vsub.f32 %v653_v20, %v14313_v10  ;;  %v14383_v48 = vsub.f32 %v652_v38, %v14335_v50  ;;  %v666_v20 = vld [vmem:[%s20411_s3 + $0x2b0] sm:$0xff] }
  0xf9   :  { %10855 = vmatpush3.msra.mxu0 %v21449_v25  ;;  %10888 = vmatpush3.msra.mxu1 %v13853_v36  ;;  %v20590_v25 = vand.u32 4294901760, %v14333_v11  ;;  %v21453_v36 = vand.u32 4294901760, %v13947_v6  ;;  %v14394_v4 = vsub.f32 %v14281_v31, %v20588_v61  ;;  %v14398_v47 = vsub.f32 %v668_v21, %v14345_v40  ;;  %v21455_v33 = vld [vmem:[#allocation35_spill] sm:$0xff] }
  0xfa   :  { %21450 = vst [vmem:[#allocation11_spill] sm:$0xff] %v14370_v63  ;;  %10856 = vmatprep.subr.mxu0 %v21451_v7  ;;  %21452 = vst [vmem:[#allocation14_spill] sm:$0xff] %v14383_v48  ;;  %10889 = vmatprep.subr.mxu1 %v13864_v39  ;;  %v20591_v7 = vand.u32 4294901760, %v14343_v3  ;;  %v444_v38 = vsel %vm436_vm3, %v14217_v54, %v443_v29  ;;  %v14407_v39 = vsub.f32 %v14284_v52, %v20587_v46  ;;  %v650_v54 = vld [vmem:[%s20411_s3 + $0x230] sm:$0xff] }
  0xfb   :  { %10857 = vmatpush3.msra.mxu0 %v21453_v36  ;;  %21454 = vst [vmem:[#allocation15_spill] sm:$0xff] %v14398_v47  ;;  %2537 = vmatprep.mubr.f32.mxu0 %v21455_v33  ;;  %v20592_v6 = vand.u32 4294901760, %v14351_v32  ;;  %v14411_v36 = vsub.f32 %v651_v27, %v14355_v59  ;;  %v14414_v21 = vsub.f32 %v667_v34, %v14353_v15  ;;  %v21458_v29 = vld [vmem:[#allocation39_spill] sm:$0xff]  ;;  %v14428_v61 = vand.u32 4294901760, %v666_v20  ;;  %v21459_v34 = vld [vmem:[#allocation37_spill] sm:$0xff] }
  0xfc   :  { %10890 = vmatpush3.msra.mxu1 %v13890_v18  ;;  %2539 = vmatmul.mubr.f32.vlgmr.msra.gmra.mxu0 %v21458_v29  ;;  %v2779_v18 = vand.u32 4294901760, %v14366_v51  ;;  %v14425_v46 = vsub.f32 %v14311_v53, %v20589_v42  ;;  %v2898_v22 = vand.u32 4294901760, %v14379_v17  ;;  %v665_v42 = vld [vmem:[%s20411_s3 + $0x2a8] sm:$0xff]  ;;  %v14442_v43 = vmul.f32 0.125, %v444_v38  ;;  %v664_v27 = vld [vmem:[%s20411_s3 + $0x2a0] sm:$0xff] }
  0xfd   :  { %21456 = vst [vmem:[#allocation9_spill] sm:$0xff] %v14411_v36  ;;  %21457 = vst [vmem:[#allocation26_spill] sm:$0xff] %v14414_v21  ;;  %10891 = vmatprep.subr.mxu1 %v13900_v23  ;;  %10896 = vmatprep.subr.mxu0 %v14127_v1  ;;  %v14436_v23 = vsub.f32 %v14333_v11, %v20590_v25  ;;  %v14450_v17 = vsub.f32 %v14343_v3, %v20591_v7  ;;  %v14453_v51 = vand.u32 4294901760, %v650_v54  ;;  %v649_v38 = vld [vmem:[%s20411_s3 + $0x228] sm:$0xff]  ;;  %v648_v7 = vld [vmem:[%s20411_s3 + $0x220] sm:$0xff] }
  0xfe   :  { %10892 = vmatpush3.msra.mxu1 %v21459_v34  ;;  %21460 = vst [vmem:[#allocation16_spill] sm:$0xff] %v14442_v43  ;;  %2641 = vmatprep.mubr.f32.mxu1 %v21455_v33  ;;  %v2786_v34 = vand.u32 4294901760, %v14394_v4  ;;  %v2905_v33 = vand.u32 4294901760, %v14407_v39  ;;  %v14464_v4 = vsub.f32 %v14351_v32, %v20592_v6  ;;  %v2793_v39 = vand.u32 4294901760, %v14425_v46  ;;  %v644_v53 = vld [vmem:[%s20411_s3 + $0x200] sm:$0xff] }
  0xff   :  { %10897 = vmatpush3.msra.mxu0 %v14132_v0  ;;  %2643 = vmatmul.mubr.f32.vlgmr.msra.gmra.mxu1 %v21458_v29  ;;  %v21461_v29 = vand.u32 4294901760, %v14370_v63  ;;  %v14480_v32 = vand.u32 4294901760, %v665_v42  ;;  %v14483_v25 = vsub.f32 %v666_v20, %v14428_v61  ;;  %v21464_v46 = vand.u32 4294901760, %v14383_v48  ;;  %v663_v20 = vld [vmem:[%s20411_s3 + $0x298] sm:$0xff] }
 0x100   :  { %10898 = vmatprep.subr.mxu0 %v14137_v26  ;;  %10931 = vmatprep.subr.mxu1 %v2877_v57  ;;  %v2912_v57 = vand.u32 4294901760, %v14436_v23  ;;  %v14504_v3 = vrot.slane %v14442_v43, %v21399_v62  ;;  %v2800_v23 = vand.u32 4294901760, %v14450_v17  ;;  %v14518_v11 = vand.u32 4294901760, %v664_v27  ;;  %v647_v62 = vld [vmem:[%s20411_s3 + $0x218] sm:$0xff] }
 0x101   :  { %10899 = vmatpush3.msra.mxu0 %v14162_v41  ;;  %v14478_v6 = vsub.f32 %v14370_v63, %v21461_v29  ;;  %21462 = vst [vmem:[#allocation30_spill] sm:$0xff] %v14483_v25  ;;  %10932 = vmatpush3.msra.mxu1 %v21463_v8  ;;  %v14495_v29 = vsub.f32 %v14383_v48, %v21464_v46  ;;  %v14497_v63 = vand.u32 4294901760, %v649_v38  ;;  %v21466_v8 = vand.u32 4294901760, %v14398_v47 }
 0x102   :  { %10900 = vmatprep.subr.mxu0 %v14176_v13  ;;  %10933 = vmatprep.subr.mxu1 %v21465_v12  ;;  %v14516_v48 = vsub.f32 %v650_v54, %v14453_v51  ;;  %v2919_v17 = vand.u32 4294901760, %v14464_v4  ;;  %v21468_v12 = vand.u32 4294901760, %v14414_v21  ;;  %v21469_v54 = vand.u32 4294901760, %v14411_v36 }
 0x103   :  { %10901 = vmatpush3.msra.mxu0 %v14194_v9  ;;  %v14513_v46 = vsub.f32 %v14398_v47, %v21466_v8  ;;  %10934 = vmatpush3.msra.mxu1 %v21467_v2  ;;  %v14537_v47 = vand.u32 4294901760, %v648_v7  ;;  %v21470_v2 = vand.u32 4294901760, %v14329_v60  ;;  %v2807_v4 = vand.u32 4294901760, %v14478_v6 }
 0x104   :  { %10902 = vmatprep.subr.mxu0 %v14209_v30  ;;  %v14530_v8 = vsub.f32 %v14414_v21, %v21468_v12  ;;  %v14535_v43 = vsub.f32 %v14411_v36, %v21469_v54  ;;  %v14548_v21 = vsub.f32 %v665_v42, %v14480_v32  ;;  %v14550_v54 = vand.u32 4294901760, %v663_v20  ;;  %v646_v36 = vld [vmem:[%s20411_s3 + $0x210] sm:$0xff]  ;;  %v661_v42 = vld [vmem:[%s20411_s3 + $0x288] sm:$0xff] }
 0x105   :  { %10935 = vmatprep.subr.mxu1 %v21470_v2  ;;  %10903 = vmatpush3.msra.mxu0 %v14227_v35  ;;  %v2814_v60 = vand.u32 4294901760, %v14495_v29  ;;  %v14558_v2 = vsub.f32 %v649_v38, %v14497_v63  ;;  %v14560_v6 = vand.u32 4294901760, %v647_v62  ;;  %v872_v12 = vcombine.high %v14504_v3, %v14504_v3  ;;  %v645_v35 = vld [vmem:[%s20411_s3 + $0x208] sm:$0xff] }
 0x106   :  { %10936 = vmatpush3.msra.mxu1 %v2779_v18  ;;  %10904 = vmatprep.subr.mxu0 %v14229_v44  ;;  %v2926_v18 = vand.u32 4294901760, %v14513_v46  ;;  %v14571_v29 = vsub.f32 %v664_v27, %v14518_v11  ;;  %v14573_v38 = vand.u32 4294901760, %v662_v24  ;;  %v14582_v46 = vsub.f32 %v648_v7, %v14537_v47  ;;  %v660_v27 = vld [vmem:[%s20411_s3 + $0x280] sm:$0xff] }
 0x107   :  { %10937 = vmatprep.subr.mxu1 %v2898_v22  ;;  %10905 = vmatpush3.msra.mxu0 %v14257_v49  ;;  %v2933_v22 = vand.u32 4294901760, %v14530_v8  ;;  %v2821_v49 = vand.u32 4294901760, %v14535_v43  ;;  %v14584_v44 = vand.u32 4294901760, %v646_v36  ;;  %v14595_v43 = vsub.f32 %v663_v20, %v14550_v54 }
 0x108   :  { %21471 = vst [vmem:[#allocation10_spill] sm:$0xff] %v14573_v38  ;;  %10938 = vmatpush3.msra.mxu1 %v2786_v34  ;;  %10906 = vmatprep.subr.mxu0 %v14269_v56  ;;  %v21473_v34 = vand.u32 4294901760, %v14483_v25  ;;  %v14597_v7 = vand.u32 4294901760, %v661_v42  ;;  %v14609_v8 = vand.u32 4294901760, %v872_v12  ;;  %v14629_v20 = vand.u32 4294901760, %v644_v53 }
 0x109   :  { %21472 = vst [vmem:[#allocation28_spill] sm:$0xff] %v14584_v44  ;;  %10939 = vmatprep.subr.mxu1 %v2905_v33  ;;  %10907 = vmatpush3.msra.mxu0 %v14286_v16  ;;  %v14605_v16 = vsub.f32 %v647_v62, %v14560_v6  ;;  %v21480_v62 = vand.u32 4294901760, %v14516_v48  ;;  %v21481_v30 = vand.u32 4294901760, %v14548_v21 }
 0x10a   :  { %v2939_v56 = vsub.f32 %v14483_v25, %v21473_v34  ;;  %21474 = vst [vmem:[#allocation20_spill] sm:$0xff] %v14597_v7  ;;  %10940 = vmatpush3.msra.mxu1 %v2793_v39  ;;  %10908 = vmatprep.subr.mxu0 %v14301_v58  ;;  %v14607_v34 = vand.u32 4294901760, %v645_v35  ;;  %21476 = vst [vmem:[#allocation24_spill] sm:$0xff] %v14609_v8  ;;  %v14614_v25 = vsub.f32 %v662_v24, %v14573_v38 }
 0x10b   :  { %10941 = vmatprep.subr.mxu1 %v2912_v57  ;;  %10909 = vmatpush3.msra.mxu0 %v14313_v10  ;;  %v14616_v39 = vand.u32 4294901760, %v660_v27  ;;  %v14619_v58 = vand.u32 4294901760, %v14504_v3  ;;  %v2827_v33 = vsub.f32 %v14516_v48, %v21480_v62  ;;  %v14627_v10 = vsub.f32 %v646_v36, %v14584_v44 }
 0x10c   :  { %21475 = vst [vmem:[#allocation23_spill] sm:$0xff] %v14607_v34  ;;  %21477 = vst [vmem:[#allocation32_spill] sm:$0xff] %v14614_v25  ;;  %10942 = vmatpush3.msra.mxu1 %v2800_v23  ;;  %10910 = vmatprep.subr.mxu0 %v14345_v40  ;;  %v2940_v24 = vand.u32 4294901760, %v2939_v56  ;;  %v2946_v23 = vsub.f32 %v14548_v21, %v21481_v30  ;;  %v14637_v52 = vsub.f32 %v661_v42, %v14597_v7 }
 0x10d   :  { %21478 = vst [vmem:[#allocation22_spill] sm:$0xff] %v14616_v39  ;;  %21479 = vst [vmem:[#allocation34_spill] sm:$0xff] %v14619_v58  ;;  %10943 = vmatprep.subr.mxu1 %v2919_v17  ;;  %10911 = vmatpush3.msra.mxu0 %v14335_v50  ;;  %v21482_v36 = vand.u32 4294901760, %v14558_v2  ;;  %v14645_v56 = vsub.f32 %v645_v35, %v14607_v34  ;;  %v14648_v57 = vsub.f32 %v872_v12, %v14609_v8 }
 0x10e   :  { %10944 = vmatpush3.msra.mxu1 %v2807_v4  ;;  %10912 = vmatprep.subr.mxu0 %v14353_v15  ;;  %v21484_v30 = vand.u32 4294901760, %v14571_v29  ;;  %v14660_v17 = vsub.f32 %v660_v27, %v14616_v39  ;;  %v2828_v35 = vand.u32 4294901760, %v2827_v33  ;;  %v21485_v12 = vand.u32 4294901760, %v14582_v46 }
 0x10f   :  { %v2834_v62 = vsub.f32 %v14558_v2, %v21482_v36  ;;  %21483 = vst [vmem:[#allocation19_spill] sm:$0xff] %v14648_v57  ;;  %10945 = vmatprep.subr.mxu1 %v2926_v18  ;;  %10913 = vmatpush3.msra.mxu0 %v14355_v59  ;;  %v14657_v36 = vsub.f32 %v14504_v3, %v14619_v58  ;;  %v2947_v3 = vand.u32 4294901760, %v2946_v23  ;;  %v21487_v27 = vand.u32 4294901760, %v14595_v43 }
 0x110   :  { %v2953_v4 = vsub.f32 %v14571_v29, %v21484_v30  ;;  %10946 = vmatpush3.msra.mxu1 %v2814_v60  ;;  %10914 = vmatprep.subr.mxu0 %v14428_v61  ;;  %v2841_v18 = vsub.f32 %v14582_v46, %v21485_v12  ;;  %v14668_v30 = vsub.f32 %v644_v53, %v14629_v20  ;;  %v21488_v12 = vand.u32 4294901760, %v14605_v16 }
 0x111   :  { %10947 = vmatprep.subr.mxu1 %v2933_v22  ;;  %10915 = vmatpush3.msra.mxu0 %v14453_v51  ;;  %v2960_v60 = vsub.f32 %v14595_v43, %v21487_v27  ;;  %v2835_v33 = vand.u32 4294901760, %v2834_v62  ;;  %v21489_v27 = vand.u32 4294901760, %v14614_v25  ;;  %v21490_v53 = vand.u32 4294901760, %v14627_v10 }
 0x112   :  { %21486 = vst [vmem:[#allocation25_spill] sm:$0xff] %v14668_v30  ;;  %10948 = vmatpush3.msra.mxu1 %v2821_v49  ;;  %10916 = vmatprep.subr.mxu0 %v14480_v32  ;;  %v2848_v40 = vsub.f32 %v14605_v16, %v21488_v12  ;;  %v2954_v23 = vand.u32 4294901760, %v2953_v4  ;;  %v2842_v12 = vand.u32 4294901760, %v2841_v18  ;;  %v21492_v18 = vand.u32 4294901760, %v14648_v57 }
 0x113   :  { %10949 = vmatprep.subr.mxu1 %v2940_v24  ;;  %10917 = vmatpush3.msra.mxu0 %v14497_v63  ;;  %v2967_v42 = vsub.f32 %v14614_v25, %v21489_v27  ;;  %v2855_v22 = vsub.f32 %v14627_v10, %v21490_v53  ;;  %v2961_v4 = vand.u32 4294901760, %v2960_v60  ;;  %v21491_v27 = vand.u32 4294901760, %v14637_v52 }
 0x114   :  { %10950 = vmatpush3.msra.mxu1 %v2828_v35  ;;  %10918 = vmatprep.subr.mxu0 %v14518_v11  ;;  %v2849_v35 = vand.u32 4294901760, %v2848_v40  ;;  %v2747_v62 = vsub.f32 %v14648_v57, %v21492_v18  ;;  %v21493_v53 = vand.u32 4294901760, %v14645_v56  ;;  %v21494_v60 = vand.u32 4294901760, %v14657_v36 }
 0x115   :  { %10951 = vmatprep.subr.mxu1 %v2947_v3  ;;  %10919 = vmatpush3.msra.mxu0 %v14537_v47  ;;  %v2974_v49 = vsub.f32 %v14637_v52, %v21491_v27  ;;  %v2968_v3 = vand.u32 4294901760, %v2967_v42  ;;  %v2856_v18 = vand.u32 4294901760, %v2855_v22  ;;  %v21496_v57 = vand.u32 4294901760, %v14668_v30 }
 0x116   :  { %10952 = vmatpush3.msra.mxu1 %v2835_v33  ;;  %10920 = vmatprep.subr.mxu0 %v14550_v54  ;;  %v2862_v24 = vsub.f32 %v14645_v56, %v21493_v53  ;;  %v2753_v27 = vsub.f32 %v14657_v36, %v21494_v60  ;;  %v21495_v33 = vand.u32 4294901760, %v14660_v17 }
 0x117   :  { %10953 = vmatprep.subr.mxu1 %v2954_v23  ;;  %10921 = vmatpush3.msra.mxu0 %v14560_v6  ;;  %v2869_v53 = vsub.f32 %v14668_v30, %v21496_v57  ;;  %v2975_v42 = vand.u32 4294901760, %v2974_v49  ;;  %v2748_v23 = vand.u32 4294901760, %v2747_v62  ;;  %v21497_v57 = vld [vmem:[#allocation43_spill] sm:$0xff]  ;;  %v21498_v49 = vld [vmem:[#allocation40_spill] sm:$0xff]  ;;  %v21499_v62 = vld [vmem:[#allocation29_spill] sm:$0xff] }
 0x118   :  { %v2981_v40 = vsub.f32 %v14660_v17, %v21495_v33  ;;  %10954 = vmatpush3.msra.mxu1 %v2842_v12  ;;  %10922 = vmatprep.subr.mxu0 %v14573_v38  ;;  %v2863_v60 = vand.u32 4294901760, %v2862_v24  ;;  %v2754_v12 = vand.u32 4294901760, %v2753_v27  ;;  %v21500_v24 = vld [vmem:[#allocation6_spill] sm:$0xff] }
 0x119   :  { %10955 = vmatprep.subr.mxu1 %v2961_v4  ;;  %10923 = vmatpush3.msra.mxu0 %v14584_v44  ;;  %v2870_v22 = vand.u32 4294901760, %v2869_v53  ;;  %v21501_v4 = vld [vmem:[#allocation18_spill] sm:$0xff]  ;;  %v21507_v53 = vld [vmem:[#allocation11_spill] sm:$0xff] }
 0x11a   :  { %10956 = vmatpush3.msra.mxu1 %v2849_v35  ;;  %10924 = vmatprep.subr.mxu0 %v14597_v7  ;;  %v2982_v33 = vand.u32 4294901760, %v2981_v40  ;;  %v21502_v35 = vld [vmem:[#allocation36_spill] sm:$0xff]  ;;  %v21504_v27 = vld [vmem:[#allocation38_spill] sm:$0xff] }
 0x11b   :  { %10957 = vmatprep.subr.mxu1 %v2968_v3  ;;  %10925 = vmatpush3.msra.mxu0 %v14607_v34  ;;  %v21503_v3 = vld [vmem:[#allocation7_spill] sm:$0xff]  ;;  %v21505_v40 = vld [vmem:[#allocation8_spill] sm:$0xff] }
 0x11c   :  { %10958 = vmatpush3.msra.mxu1 %v2856_v18  ;;  %10926 = vmatprep.subr.mxu0 %v14616_v39  ;;  %v21506_v18 = vld [vmem:[#allocation42_spill] sm:$0xff] }
 0x11d   :  { %10959 = vmatprep.subr.mxu1 %v2975_v42  ;;  %10927 = vmatpush3.msra.mxu0 %v14629_v20  ;;  %v21508_v42 = vld [vmem:[#allocation12_spill] sm:$0xff] }
 0x11e   :  { %2749 = vmatprep.mubr.f32.mxu0 %v2748_v23  ;;  %10960 = vmatpush3.msra.mxu1 %v2863_v60  ;;  %v21509_v23 = vld [vmem:[#allocation15_spill] sm:$0xff] }
 0x11f   :  { %2755 = vmatmul.mubr.f32.vlgmr.msra.gmra.mxu0 %v2754_v12  ;;  %10961 = vmatprep.subr.mxu1 %v2982_v33  ;;  %v21510_v60 = vld [vmem:[#allocation27_spill] sm:$0xff]  ;;  %v21511_v12 = vld [vmem:[#allocation14_spill] sm:$0xff]  ;;  %v21512_v33 = vld [vmem:[#allocation33_spill] sm:$0xff] }
 0x120   :  { %10966 = vmatprep.subr.mxu0 %v14151_v45  ;;  %10962 = vmatpush3.msra.mxu1 %v2870_v22  ;;  %v21513_v22 = vld [vmem:[#allocation26_spill] sm:$0xff] }
 0x121   :  { %2985 = vmatprep.mubr.f32.mxu1 %v14609_v8  ;;  %10967 = vmatpush3.msra.mxu0 %v14160_v55  ;;  %v21515_v8 = vld [vmem:[#allocation9_spill] sm:$0xff] }
 0x122   :  { %2987 = vmatmul.mubr.f32.vlgmr.msra.gmra.mxu1 %v14619_v58  ;;  %10968 = vmatprep.subr.mxu0 %v14168_v14  ;;  %v21514_v58 = vld [vmem:[#allocation13_spill] sm:$0xff] }
 0x123   :  { %11001 = vmatprep.subr.mxu1 %v14127_v1  ;;  %10969 = vmatpush3.msra.mxu0 %v14191_v5 }
 0x124   :  { %11002 = vmatpush3.msra.mxu1 %v14132_v0  ;;  %10970 = vmatprep.subr.mxu0 %v14212_v28 }
 0x125   :  { %11003 = vmatprep.subr.mxu1 %v14137_v26  ;;  %10971 = vmatpush3.msra.mxu0 %v14243_v37 }
 0x126   :  { %11004 = vmatpush3.msra.mxu1 %v14162_v41  ;;  %10972 = vmatprep.subr.mxu0 %v14267_v19 }
 0x127   :  { %11005 = vmatprep.subr.mxu1 %v14176_v13  ;;  %10973 = vmatpush3.msra.mxu0 %v14281_v31 }
 0x128   :  { %11006 = vmatpush3.msra.mxu1 %v14194_v9  ;;  %10974 = vmatprep.subr.mxu0 %v21497_v57 }
 0x129   :  { %11007 = vmatprep.subr.mxu1 %v21498_v49  ;;  %10975 = vmatpush3.msra.mxu0 %v21499_v62 }
 0x12a   :  { %11008 = vmatpush3.msra.mxu1 %v21500_v24  ;;  %10976 = vmatprep.subr.mxu0 %v21501_v4 }
 0x12b   :  { %11009 = vmatprep.subr.mxu1 %v21502_v35  ;;  %10977 = vmatpush3.msra.mxu0 %v21503_v3 }
 0x12c   :  { %11010 = vmatpush3.msra.mxu1 %v21504_v27  ;;  %10978 = vmatprep.subr.mxu0 %v21505_v40 }
 0x12d   :  { %11011 = vmatprep.subr.mxu1 %v21506_v18  ;;  %10979 = vmatpush3.msra.mxu0 %v21507_v53  ;;  %v21516_v18 = vld [vmem:[#allocation30_spill] sm:$0xff] }
 0x12e   :  { %11012 = vmatpush3.msra.mxu1 %v21508_v42  ;;  %10980 = vmatprep.subr.mxu0 %v21509_v23 }
 0x12f   :  { %11013 = vmatprep.subr.mxu1 %v21510_v60  ;;  %10981 = vmatpush3.msra.mxu0 %v21511_v12 }
 0x130   :  { %11014 = vmatpush3.msra.mxu1 %v21512_v33  ;;  %10982 = vmatprep.subr.mxu0 %v21513_v22 }
 0x131   :  { %11015 = vmatprep.subr.mxu1 %v21514_v58  ;;  %10983 = vmatpush3.msra.mxu0 %v21515_v8 }
 0x132   :  { %11016 = vmatpush3.msra.mxu1 %v14335_v50  ;;  %10984 = vmatprep.subr.mxu0 %v21516_v18 }
 0x133   :  { %11017 = vmatprep.subr.mxu1 %v14353_v15  ;;  %10985 = vmatpush3.msra.mxu0 %v14516_v48 }
 0x134   :  { %11018 = vmatpush3.msra.mxu1 %v14355_v59  ;;  %10986 = vmatprep.subr.mxu0 %v14548_v21 }
 0x135   :  { %11019 = vmatprep.subr.mxu1 %v14428_v61  ;;  %10987 = vmatpush3.msra.mxu0 %v14558_v2 }
 0x136   :  { %11020 = vmatpush3.msra.mxu1 %v14453_v51  ;;  %10988 = vmatprep.subr.mxu0 %v14571_v29 }
 0x137   :  { %11021 = vmatprep.subr.mxu1 %v14480_v32  ;;  %10989 = vmatpush3.msra.mxu0 %v14582_v46 }
 0x138   :  { %11022 = vmatpush3.msra.mxu1 %v14497_v63  ;;  %10990 = vmatprep.subr.mxu0 %v14595_v43 }
 0x139   :  { %11023 = vmatprep.subr.mxu1 %v14518_v11  ;;  %10991 = vmatpush3.msra.mxu0 %v14605_v16 }
 0x13a   :  { %11024 = vmatpush3.msra.mxu1 %v14537_v47  ;;  %10992 = vmatprep.subr.mxu0 %v14614_v25  ;;  %v21517_v25 = vld [vmem:[#allocation19_spill] sm:$0xff] }
 0x13b   :  { %11025 = vmatprep.subr.mxu1 %v14550_v54  ;;  %10993 = vmatpush3.msra.mxu0 %v14627_v10 }
 0x13c   :  { %11026 = vmatpush3.msra.mxu1 %v14560_v6  ;;  %10994 = vmatprep.subr.mxu0 %v14637_v52 }
 0x13d   :  { %11027 = vmatprep.subr.mxu1 %v14573_v38  ;;  %10995 = vmatpush3.msra.mxu0 %v14645_v56  ;;  %v21518_v38 = vand.u32 4294901760, %v14151_v45  ;;  %v21524_v45 = vand.u32 4294901760, %v14212_v28 }
 0x13e   :  { %11028 = vmatpush3.msra.mxu1 %v14584_v44  ;;  %10996 = vmatprep.subr.mxu0 %v14660_v17  ;;  %v21519_v44 = vand.u32 4294901760, %v21517_v25 }
 0x13f   :  { %11029 = vmatprep.subr.mxu1 %v14597_v7  ;;  %10997 = vmatpush3.msra.mxu0 %v14668_v30  ;;  %v21520_v7 = vand.u32 4294901760, %v14160_v55  ;;  %v21521_v30 = vand.u32 4294901760, %v14657_v36  ;;  %v21525_v55 = vand.u32 4294901760, %v14243_v37  ;;  %v21531_v37 = vand.u32 4294901760, %v21503_v3 }
 0x140   :  { %3122 = vmatprep.mubr.f32.mxu0 %v21517_v25  ;;  %11030 = vmatpush3.msra.mxu1 %v14607_v34  ;;  %v21522_v34 = vand.u32 4294901760, %v14168_v14  ;;  %v707_v14 = vld [vmem:[%s20411_s3 + $0x3f8] sm:$0xff] }
 0x141   :  { %3125 = vmatmul.mubr.f32.vlgmr.msra.gmra.mxu0 %v14657_v36  ;;  %11031 = vmatprep.subr.mxu1 %v14616_v39  ;;  %v21523_v39 = vand.u32 4294901760, %v14191_v5  ;;  %v21528_v5 = vand.u32 4294901760, %v21497_v57  ;;  %v14821_v28 = vand.u32 4294901760, %v707_v14 }
 0x142   :  { %11036 = vmatprep.subr.mxu0 %v21518_v38  ;;  %11032 = vmatpush3.msra.mxu1 %v14629_v20 }
 0x143   :  { %3229 = vmatprep.mubr.f32.mxu1 %v21519_v44  ;;  %11037 = vmatpush3.msra.mxu0 %v21520_v7  ;;  %v14846_v38 = vsub.f32 %v707_v14, %v14821_v28  ;;  %v705_v7 = vld [vmem:[%s20411_s3 + $0x3e8] sm:$0xff] }
 0x144   :  { %3233 = vmatmul.mubr.f32.vlgmr.msra.gmra.mxu1 %v21521_v30  ;;  %11038 = vmatprep.subr.mxu0 %v21522_v34  ;;  %v21533_v34 = vld [vmem:[#allocation42_spill] sm:$0xff]  ;;  %v21535_v30 = vand.u32 4294901760, %v21509_v23 }
 0x145   :  { %11071 = vmatprep.subr.mxu1 %v14127_v1  ;;  %11039 = vmatpush3.msra.mxu0 %v21523_v39  ;;  %v21526_v1 = vand.u32 4294901760, %v14267_v19  ;;  %v690_v19 = vld [vmem:[%s20411_s3 + $0x370] sm:$0xff]  ;;  %v21534_v39 = vand.u32 4294901760, %v21507_v53  ;;  %v20655_v3 = vand.u32 4294901760, %v14846_v38  ;;  %v21538_v53 = vand.u32 4294901760, %v21515_v8  ;;  %v687_v8 = vld [vmem:[%s20411_s3 + $0x358] sm:$0xff] }
 0x146   :  { %11072 = vmatpush3.msra.mxu1 %v14132_v0  ;;  %11040 = vmatprep.subr.mxu0 %v21524_v45  ;;  %v691_v0 = vld [vmem:[%s20411_s3 + $0x378] sm:$0xff]  ;;  %v14860_v57 = vand.u32 4294901760, %v690_v19 }
 0x147   :  { %11073 = vmatprep.subr.mxu1 %v14137_v26  ;;  %11041 = vmatpush3.msra.mxu0 %v21525_v55  ;;  %v21527_v26 = vand.u32 4294901760, %v14281_v31  ;;  %v14826_v44 = vand.u32 4294901760, %v691_v0  ;;  %v21532_v31 = vand.u32 4294901760, %v21505_v40  ;;  %v688_v40 = vld [vmem:[%s20411_s3 + $0x360] sm:$0xff]  ;;  %v21544_v55 = vand.u32 4294901760, %v14548_v21 }
 0x148   :  { %11074 = vmatpush3.msra.mxu1 %v14162_v41  ;;  %11042 = vmatprep.subr.mxu0 %v21526_v1  ;;  %v21529_v41 = vand.u32 4294901760, %v21499_v62  ;;  %v21536_v62 = vand.u32 4294901760, %v21511_v12  ;;  %v21540_v12 = vand.u32 4294901760, %v21516_v18  ;;  %v702_v18 = vld [vmem:[%s20411_s3 + $0x3d0] sm:$0xff] }
 0x149   :  { %11075 = vmatprep.subr.mxu1 %v14176_v13  ;;  %11043 = vmatpush3.msra.mxu0 %v21527_v26  ;;  %v706_v13 = vld [vmem:[%s20411_s3 + $0x3f0] sm:$0xff]  ;;  %v14855_v36 = vsub.f32 %v691_v0, %v14826_v44  ;;  %v14939_v26 = vand.u32 4294901760, %v687_v8 }
 0x14a   :  { %11076 = vmatpush3.msra.mxu1 %v14194_v9  ;;  %11044 = vmatprep.subr.mxu0 %v21528_v5  ;;  %v21530_v9 = vand.u32 4294901760, %v21501_v4  ;;  %v14843_v25 = vand.u32 4294901760, %v706_v13  ;;  %v704_v4 = vld [vmem:[%s20411_s3 + $0x3e0] sm:$0xff]  ;;  %v686_v1 = vld [vmem:[%s20411_s3 + $0x350] sm:$0xff]  ;;  %v701_v5 = vld [vmem:[%s20411_s3 + $0x3c8] sm:$0xff] }
 0x14b   :  { %11077 = vmatprep.subr.mxu1 %v21498_v49  ;;  %11045 = vmatpush3.msra.mxu0 %v21529_v41  ;;  %v689_v49 = vld [vmem:[%s20411_s3 + $0x368] sm:$0xff]  ;;  %21547 = vst [vmem:[#allocation39_spill] sm:$0xff] %v14939_v26 }
 0x14c   :  { %11078 = vmatpush3.msra.mxu1 %v21500_v24  ;;  %11046 = vmatprep.subr.mxu0 %v21530_v9  ;;  %v14868_v24 = vand.u32 4294901760, %v705_v7  ;;  %v14887_v23 = vand.u32 4294901760, %v689_v49  ;;  %v685_v9 = vld [vmem:[%s20411_s3 + $0x348] sm:$0xff] }
 0x14d   :  { %11079 = vmatprep.subr.mxu1 %v21502_v35  ;;  %11047 = vmatpush3.msra.mxu0 %v21531_v37  ;;  %v21537_v35 = vand.u32 4294901760, %v21513_v22  ;;  %v21542_v22 = vand.u32 4294901760, %v14516_v48  ;;  %v21550_v37 = vand.u32 4294901760, %v14582_v46 }
 0x14e   :  { %11080 = vmatpush3.msra.mxu1 %v21504_v27  ;;  %11048 = vmatprep.subr.mxu0 %v21532_v31  ;;  %v14878_v27 = vsub.f32 %v706_v13, %v14843_v25  ;;  %21539 = vst [vmem:[#allocation17_spill] sm:$0xff] %v14887_v23  ;;  %v14907_v45 = vsub.f32 %v705_v7, %v14868_v24  ;;  %v14951_v13 = vand.u32 4294901760, %v702_v18  ;;  %v684_v31 = vld [vmem:[%s20411_s3 + $0x340] sm:$0xff]  ;;  %v21553_v7 = vand.u32 4294901760, %v14595_v43  ;;  %v681_v43 = vld [vmem:[%s20411_s3 + $0x328] sm:$0xff] }
 0x14f   :  { %11081 = vmatprep.subr.mxu1 %v21533_v34  ;;  %11049 = vmatpush3.msra.mxu0 %v21534_v39  ;;  %v14937_v0 = vsub.f32 %v689_v49, %v14887_v23  ;;  %v14980_v39 = vand.u32 4294901760, %v701_v5 }
 0x150   :  { %11082 = vmatpush3.msra.mxu1 %v21508_v42  ;;  %11050 = vmatprep.subr.mxu0 %v21535_v30  ;;  %v20654_v42 = vand.u32 4294901760, %v14855_v36  ;;  %v20652_v48 = vand.u32 4294901760, %v14878_v27  ;;  %21549 = vst [vmem:[#allocation37_spill] sm:$0xff] %v14951_v13  ;;  %v700_v30 = vld [vmem:[%s20411_s3 + $0x3c0] sm:$0xff] }
 0x151   :  { %11083 = vmatprep.subr.mxu1 %v21510_v60  ;;  %11051 = vmatpush3.msra.mxu0 %v21536_v62  ;;  %v703_v60 = vld [vmem:[%s20411_s3 + $0x3d8] sm:$0xff]  ;;  %21555 = vst [vmem:[#allocation6_spill] sm:$0xff] %v14980_v39  ;;  %v20648_v49 = vand.u32 4294901760, %v14937_v0  ;;  %v14991_v62 = vsub.f32 %v687_v8, %v14939_v26  ;;  %v15013_v8 = vand.u32 4294901760, %v684_v31 }
 0x152   :  { %11084 = vmatpush3.msra.mxu1 %v21512_v33  ;;  %11052 = vmatprep.subr.mxu0 %v21537_v35  ;;  %v14896_v33 = vsub.f32 %v690_v19, %v14860_v57  ;;  %v14923_v14 = vand.u32 4294901760, %v703_v60  ;;  %v14934_v21 = vsub.f32 %v14855_v36, %v20654_v42  ;;  %v14963_v19 = vand.u32 4294901760, %v686_v1  ;;  %v699_v35 = vld [vmem:[%s20411_s3 + $0x3b8] sm:$0xff]  ;;  %v21582_v42 = vld [vmem:[#allocation34_spill] sm:$0xff] }
 0x153   :  { %11085 = vmatprep.subr.mxu1 %v21514_v58  ;;  %11053 = vmatpush3.msra.mxu0 %v21538_v53  ;;  %v14898_v58 = vand.u32 4294901760, %v704_v4  ;;  %v14975_v46 = vsub.f32 %v14878_v27, %v20652_v48  ;;  %21557 = vst [vmem:[#allocation18_spill] sm:$0xff] %v14991_v62  ;;  %v21579_v48 = vld [vmem:[#allocation23_spill] sm:$0xff] }
 0x154   :  { %11086 = vmatpush3.msra.mxu1 %v14335_v50  ;;  %11054 = vmatprep.subr.mxu0 %v21540_v12  ;;  %v14909_v50 = vand.u32 4294901760, %v688_v40  ;;  %21545 = vst [vmem:[#allocation35_spill] sm:$0xff] %v14923_v14  ;;  %21552 = vst [vmem:[#allocation40_spill] sm:$0xff] %v14963_v19  ;;  %v14978_v34 = vsub.f32 %v703_v60, %v14923_v14  ;;  %v15011_v12 = vsub.f32 %v702_v18, %v14951_v13 }
 0x155   :  { %21541 = vst [vmem:[#allocation21_spill] sm:$0xff] %v14898_v58  ;;  %11087 = vmatprep.subr.mxu1 %v14353_v15  ;;  %11055 = vmatpush3.msra.mxu0 %v21542_v22  ;;  %v14920_v15 = vsub.f32 %v14846_v38, %v20655_v3  ;;  %v14949_v41 = vsub.f32 %v704_v4, %v14898_v58  ;;  %v14993_v4 = vand.u32 4294901760, %v685_v9  ;;  %v21562_v22 = vand.u32 4294901760, %v14627_v10 }
 0x156   :  { %21543 = vst [vmem:[#allocation31_spill] sm:$0xff] %v14909_v50  ;;  %11088 = vmatpush3.msra.mxu1 %v14355_v59  ;;  %11056 = vmatprep.subr.mxu0 %v21544_v55  ;;  %v21546_v59 = vand.u32 4294901760, %v14558_v2  ;;  %v20651_v2 = vand.u32 4294901760, %v14896_v33  ;;  %21554 = vst [vmem:[#allocation29_spill] sm:$0xff] %v14978_v34  ;;  %v21565_v18 = vand.u32 4294901760, %v14637_v52  ;;  %v20656_v10 = vand.u32 4294901760, %v14978_v34 }
 0x157   :  { %11089 = vmatprep.subr.mxu1 %v14428_v61  ;;  %v21548_v61 = vand.u32 4294901760, %v14571_v29  ;;  %v14961_v29 = vsub.f32 %v688_v40, %v14909_v50  ;;  %21558 = vst [vmem:[#allocation36_spill] sm:$0xff] %v14993_v4  ;;  %v20649_v60 = vand.u32 4294901760, %v14949_v41  ;;  %21561 = vst [vmem:[#allocation7_spill] sm:$0xff] %v15011_v12  ;;  %v15047_v52 = vsub.f32 %v14937_v0, %v20648_v49 }
 0x158   :  { %11057 = vmatpush3.msra.mxu0 %v21546_v59  ;;  %11090 = vmatpush3.msra.mxu1 %v14453_v51  ;;  %v20650_v51 = vand.u32 4294901760, %v14907_v45  ;;  %v15007_v53 = vsub.f32 %v14896_v33, %v20651_v2  ;;  %v15025_v59 = vsub.f32 %v686_v1, %v14963_v19  ;;  %v21569_v1 = vand.u32 4294901760, %v14645_v56  ;;  %v21578_v2 = vld [vmem:[#allocation24_spill] sm:$0xff] }
 0x159   :  { %11058 = vmatprep.subr.mxu0 %v21548_v61  ;;  %11091 = vmatprep.subr.mxu1 %v14480_v32  ;;  %21551 = vst [vmem:[#allocation43_spill] sm:$0xff] %v14961_v29  ;;  %v3739_v32 = vand.u32 4294901760, %v14920_v15  ;;  %v20653_v55 = vand.u32 4294901760, %v14961_v29  ;;  %v15027_v61 = vand.u32 4294901760, %v700_v30  ;;  %v3641_v3 = vand.u32 4294901760, %v15047_v52  ;;  %v21584_v56 = vld [vmem:[#allocation16_spill] sm:$0xff] }
 0x15a   :  { %11059 = vmatpush3.msra.mxu0 %v21550_v37  ;;  %11092 = vmatpush3.msra.mxu1 %v14497_v63  ;;  %v21556_v63 = vand.u32 4294901760, %v14605_v16  ;;  %v21559_v16 = vld [vmem:[#allocation32_spill] sm:$0xff]  ;;  %21563 = vst [vmem:[#allocation38_spill] sm:$0xff] %v15025_v59  ;;  %v15036_v37 = vand.u32 4294901760, %v699_v35  ;;  %v21586_v15 = vand.u32 4294901760, %v14934_v21  ;;  %v21589_v21 = vand.u32 4294901760, %v14975_v46 }
 0x15b   :  { %11060 = vmatprep.subr.mxu0 %v21553_v7  ;;  %11093 = vmatprep.subr.mxu1 %v14518_v11  ;;  %v683_v11 = vld [vmem:[%s20411_s3 + $0x338] sm:$0xff]  ;;  %v21560_v40 = vand.u32 4294901760, %v21559_v16  ;;  %21564 = vst [vmem:[#allocation8_spill] sm:$0xff] %v15027_v61  ;;  %v857_v16 = vcombine.high %v21584_v56, %v21584_v56  ;;  %v680_v56 = vld [vmem:[%s20411_s3 + $0x320] sm:$0xff]  ;;  %v21591_v46 = vand.u32 4294901760, %v15007_v53  ;;  %v694_v53 = vld [vmem:[%s20411_s3 + $0x390] sm:$0xff] }
 0x15c   :  { %11061 = vmatpush3.msra.mxu0 %v21556_v63  ;;  %11094 = vmatpush3.msra.mxu1 %v14537_v47  ;;  %v15021_v47 = vsub.f32 %v14907_v45, %v20650_v51  ;;  %v15038_v7 = vand.u32 4294901760, %v683_v11  ;;  %v21568_v63 = vld [vmem:[#allocation10_spill] sm:$0xff]  ;;  %v20659_v51 = vand.u32 4294901760, %v15025_v59 }
 0x15d   :  { %11062 = vmatprep.subr.mxu0 %v21560_v40  ;;  %11095 = vmatprep.subr.mxu1 %v14550_v54  ;;  %v15034_v54 = vsub.f32 %v701_v5, %v14980_v39  ;;  %v15051_v5 = vsub.f32 %v685_v9, %v14993_v4  ;;  %v21571_v40 = vld [vmem:[#allocation28_spill] sm:$0xff] }
 0x15e   :  { %11063 = vmatpush3.msra.mxu0 %v21562_v22  ;;  %11096 = vmatpush3.msra.mxu1 %v14560_v6  ;;  %21567 = vst [vmem:[#allocation12_spill] sm:$0xff] %v15038_v7  ;;  %v20657_v6 = vand.u32 4294901760, %v14991_v62  ;;  %v21572_v22 = vand.u32 4294901760, %v14660_v17  ;;  %v698_v9 = vld [vmem:[%s20411_s3 + $0x3b0] sm:$0xff]  ;;  %v21575_v17 = vld [vmem:[#allocation25_spill] sm:$0xff] }
 0x15f   :  { %11064 = vmatprep.subr.mxu0 %v21565_v18  ;;  %21566 = vst [vmem:[#allocation11_spill] sm:$0xff] %v15034_v54  ;;  %11097 = vmatprep.subr.mxu1 %v21568_v63  ;;  %21570 = vst [vmem:[#allocation15_spill] sm:$0xff] %v15051_v5  ;;  %v15060_v18 = vsub.f32 %v14949_v41, %v20649_v60  ;;  %v20658_v63 = vand.u32 4294901760, %v15011_v12  ;;  %v15076_v60 = vsub.f32 %v14961_v29, %v20653_v55 }
 0x160   :  { %11065 = vmatpush3.msra.mxu0 %v21569_v1  ;;  %11098 = vmatpush3.msra.mxu1 %v21571_v40  ;;  %v15064_v1 = vsub.f32 %v684_v31, %v15013_v8  ;;  %v21574_v40 = vld [vmem:[#allocation20_spill] sm:$0xff]  ;;  %v15080_v31 = vsub.f32 %v700_v30, %v15027_v61  ;;  %v15094_v55 = vsub.f32 %v699_v35, %v15036_v37  ;;  %v15108_v49 = vand.u32 4294901760, %v698_v9 }
 0x161   :  { %11066 = vmatprep.subr.mxu0 %v21572_v22  ;;  %11099 = vmatprep.subr.mxu1 %v21574_v40  ;;  %v21576_v22 = vand.u32 4294901760, %v21575_v17  ;;  %v15087_v40 = vsub.f32 %v14978_v34, %v20656_v10  ;;  %v20660_v17 = vand.u32 4294901760, %v15034_v54  ;;  %v682_v30 = vld [vmem:[%s20411_s3 + $0x330] sm:$0xff]  ;;  %v15105_v10 = vsub.f32 %v14991_v62, %v20657_v6  ;;  %v697_v6 = vld [vmem:[%s20411_s3 + $0x3a8] sm:$0xff]  ;;  %v676_v62 = vld [vmem:[%s20411_s3 + $0x300] sm:$0xff] }
 0x162   :  { %21573 = vst [vmem:[#allocation27_spill] sm:$0xff] %v15064_v1  ;;  %21577 = vst [vmem:[#allocation14_spill] sm:$0xff] %v15080_v31  ;;  %3399 = vmatprep.mubr.f32.mxu0 %v21578_v2  ;;  %11100 = vmatpush3.msra.mxu1 %v21579_v48  ;;  %v21583_v48 = vld [vmem:[#allocation22_spill] sm:$0xff]  ;;  %v3760_v35 = vand.u32 4294901760, %v15060_v18  ;;  %v15130_v18 = vsub.f32 %v15025_v59, %v20659_v51  ;;  %v15133_v52 = vand.u32 4294901760, %v682_v30 }
 0x163   :  { %11067 = vmatpush3.msra.mxu0 %v21576_v22  ;;  %v15091_v22 = vsub.f32 %v683_v11, %v15038_v7  ;;  %21581 = vst [vmem:[#allocation26_spill] sm:$0xff] %v15094_v55  ;;  %11101 = vmatprep.subr.mxu1 %v21583_v48  ;;  %v20661_v11 = vand.u32 4294901760, %v15051_v5  ;;  %v15116_v48 = vsub.f32 %v15011_v12, %v20658_v63  ;;  %v696_v63 = vld [vmem:[%s20411_s3 + $0x3a0] sm:$0xff] }
 0x164   :  { %3401 = vmatmul.mubr.f32.vlgmr.msra.gmra.mxu0 %v21582_v42  ;;  %11106 = vmatprep.subr.mxu0 %v14821_v28  ;;  %v15163_v51 = vsub.f32 %v698_v9, %v15108_v49  ;;  %v695_v9 = vld [vmem:[%s20411_s3 + $0x398] sm:$0xff]  ;;  %v15197_v12 = vand.u32 4294901760, %v696_v63 }
 0x165   :  { %21580 = vst [vmem:[#allocation33_spill] sm:$0xff] %v15091_v22  ;;  %11102 = vmatpush3.msra.mxu1 %v14629_v20  ;;  %3503 = vmatprep.mubr.f32.mxu1 %v21578_v2  ;;  %v3648_v20 = vand.u32 4294901760, %v15076_v60  ;;  %v3767_v2 = vand.u32 4294901760, %v15087_v40  ;;  %v15144_v60 = vsub.f32 %v15034_v54, %v20660_v17  ;;  %v15158_v40 = vsub.f32 %v15051_v5, %v20661_v11  ;;  %v21588_v54 = vld [vmem:[#allocation41_spill] sm:$0xff] }
 0x166   :  { %11107 = vmatpush3.msra.mxu0 %v14826_v44  ;;  %3505 = vmatmul.mubr.f32.vlgmr.msra.gmra.mxu1 %v21582_v42  ;;  %v3655_v42 = vand.u32 4294901760, %v15105_v10  ;;  %v15160_v17 = vand.u32 4294901760, %v697_v6  ;;  %21585 = vst [vmem:[#allocation13_spill] sm:$0xff] %v15163_v51  ;;  %v21587_v10 = vand.u32 4294901760, %v15064_v1  ;;  %v15177_v5 = vand.u32 4294901760, %v681_v43 }
 0x167   :  { %11108 = vmatprep.subr.mxu0 %v14843_v25  ;;  %11141 = vmatprep.subr.mxu1 %v3739_v32  ;;  %v3774_v32 = vand.u32 4294901760, %v15116_v48  ;;  %v15183_v59 = vrot.slane %v857_v16, %v21588_v54  ;;  %v3662_v48 = vand.u32 4294901760, %v15130_v18  ;;  %v679_v16 = vld [vmem:[%s20411_s3 + $0x318] sm:$0xff]  ;;  %v3781_v18 = vand.u32 4294901760, %v15144_v60 }
 0x168   :  { %11109 = vmatpush3.msra.mxu0 %v14860_v57  ;;  %11142 = vmatpush3.msra.mxu1 %v21586_v15  ;;  %v15175_v11 = vsub.f32 %v15064_v1, %v21587_v10  ;;  %v21590_v15 = vand.u32 4294901760, %v15080_v31  ;;  %v15195_v1 = vsub.f32 %v682_v30, %v15133_v52  ;;  %v21593_v30 = vand.u32 4294901760, %v15091_v22 }
 0x169   :  { %11110 = vmatprep.subr.mxu0 %v14868_v24  ;;  %11143 = vmatprep.subr.mxu1 %v21589_v21  ;;  %v21592_v21 = vand.u32 4294901760, %v15094_v55  ;;  %v3669_v60 = vand.u32 4294901760, %v15158_v40  ;;  %v15239_v40 = vand.u32 4294901760, %v679_v16 }
 0x16a   :  { %11111 = vmatpush3.msra.mxu0 %v14887_v23  ;;  %v15192_v10 = vsub.f32 %v15080_v31, %v21590_v15  ;;  %11144 = vmatpush3.msra.mxu1 %v21591_v46  ;;  %v15214_v54 = vsub.f32 %v15091_v22, %v21593_v30  ;;  %v15216_v31 = vand.u32 4294901760, %v680_v56  ;;  %v21594_v46 = vand.u32 4294901760, %v15021_v47  ;;  %v678_v22 = vld [vmem:[%s20411_s3 + $0x310] sm:$0xff] }
 0x16b   :  { %11112 = vmatprep.subr.mxu0 %v14898_v58  ;;  %v15209_v15 = vsub.f32 %v15094_v55, %v21592_v21  ;;  %v15227_v55 = vsub.f32 %v697_v6, %v15160_v17  ;;  %v15229_v30 = vand.u32 4294901760, %v695_v9  ;;  %v3676_v47 = vand.u32 4294901760, %v15175_v11  ;;  %v693_v6 = vld [vmem:[%s20411_s3 + $0x388] sm:$0xff] }
 0x16c   :  { %11145 = vmatprep.subr.mxu1 %v21594_v46  ;;  %11113 = vmatpush3.msra.mxu0 %v14909_v50  ;;  %v15237_v46 = vsub.f32 %v681_v43, %v15177_v5  ;;  %v873_v21 = vcombine.high %v15183_v59, %v15183_v59  ;;  %v15250_v11 = vsub.f32 %v696_v63, %v15197_v12  ;;  %v15252_v43 = vand.u32 4294901760, %v694_v53  ;;  %v677_v50 = vld [vmem:[%s20411_s3 + $0x308] sm:$0xff]  ;;  %v692_v63 = vld [vmem:[%s20411_s3 + $0x380] sm:$0xff] }
 0x16d   :  { %21595 = vst [vmem:[#allocation9_spill] sm:$0xff] %v15227_v55  ;;  %11146 = vmatpush3.msra.mxu1 %v3641_v3  ;;  %11114 = vmatprep.subr.mxu0 %v14923_v14  ;;  %v3788_v3 = vand.u32 4294901760, %v15192_v10  ;;  %v15261_v10 = vsub.f32 %v680_v56, %v15216_v31  ;;  %v15263_v14 = vand.u32 4294901760, %v678_v22  ;;  %v15276_v56 = vand.u32 4294901760, %v693_v6 }
 0x16e   :  { %11147 = vmatprep.subr.mxu1 %v3760_v35  ;;  %11115 = vmatpush3.msra.mxu0 %v14939_v26  ;;  %v3795_v35 = vand.u32 4294901760, %v15209_v15  ;;  %v3683_v26 = vand.u32 4294901760, %v15214_v54  ;;  %v15274_v54 = vsub.f32 %v695_v9, %v15229_v30  ;;  %v15288_v15 = vand.u32 4294901760, %v873_v21 }
 0x16f   :  { %11148 = vmatpush3.msra.mxu1 %v3648_v20  ;;  %11116 = vmatprep.subr.mxu0 %v14951_v13  ;;  %v21596_v20 = vand.u32 4294901760, %v15163_v51  ;;  %v15308_v9 = vand.u32 4294901760, %v676_v62  ;;  %v21601_v58 = vand.u32 4294901760, %v15227_v55  ;;  %v15316_v34 = vsub.f32 %v693_v6, %v15276_v56 }
 0x170   :  { %11149 = vmatprep.subr.mxu1 %v3767_v2  ;;  %11117 = vmatpush3.msra.mxu0 %v14963_v19  ;;  %v15284_v19 = vsub.f32 %v679_v16, %v15239_v40  ;;  %21597 = vst [vmem:[#allocation30_spill] sm:$0xff] %v15288_v15  ;;  %v21599_v16 = vand.u32 4294901760, %v15195_v1 }
 0x171   :  { %v3801_v13 = vsub.f32 %v15163_v51, %v21596_v20  ;;  %11150 = vmatpush3.msra.mxu1 %v3655_v42  ;;  %11118 = vmatprep.subr.mxu0 %v14980_v39  ;;  %v15286_v20 = vand.u32 4294901760, %v677_v50  ;;  %v15293_v51 = vsub.f32 %v694_v53, %v15252_v43  ;;  %v15295_v42 = vand.u32 4294901760, %v692_v63  ;;  %21600 = vst [vmem:[#allocation42_spill] sm:$0xff] %v15308_v9 }
 0x172   :  { %11151 = vmatprep.subr.mxu1 %v3774_v32  ;;  %11119 = vmatpush3.msra.mxu0 %v14993_v4  ;;  %v15298_v39 = vand.u32 4294901760, %v15183_v59  ;;  %v3689_v2 = vsub.f32 %v15195_v1, %v21599_v16  ;;  %v15306_v4 = vsub.f32 %v678_v22, %v15263_v14  ;;  %21602 = vst [vmem:[#allocation32_spill] sm:$0xff] %v15316_v34  ;;  %v21603_v22 = vand.u32 4294901760, %v15237_v46 }
 0x173   :  { %11152 = vmatpush3.msra.mxu1 %v3662_v48  ;;  %11120 = vmatprep.subr.mxu0 %v15027_v61  ;;  %v3802_v53 = vand.u32 4294901760, %v3801_v13  ;;  %v3808_v48 = vsub.f32 %v15227_v55, %v21601_v58  ;;  %v15324_v13 = vsub.f32 %v677_v50, %v15286_v20  ;;  %v15327_v32 = vsub.f32 %v873_v21, %v15288_v15 }
 0x174   :  { %21598 = vst [vmem:[#allocation19_spill] sm:$0xff] %v15298_v39  ;;  %11153 = vmatprep.subr.mxu1 %v3781_v18  ;;  %11121 = vmatpush3.msra.mxu0 %v15013_v8  ;;  %v3696_v16 = vsub.f32 %v15237_v46, %v21603_v22  ;;  %v21605_v58 = vand.u32 4294901760, %v15250_v11  ;;  %v15336_v22 = vsub.f32 %v15183_v59, %v15298_v39  ;;  %v3690_v50 = vand.u32 4294901760, %v3689_v2 }
 0x175   :  { %11154 = vmatpush3.msra.mxu1 %v3669_v60  ;;  %11122 = vmatprep.subr.mxu0 %v15036_v37  ;;  %21604 = vst [vmem:[#allocation10_spill] sm:$0xff] %v15327_v32  ;;  %v15339_v18 = vsub.f32 %v692_v63, %v15295_v42  ;;  %v21606_v21 = vand.u32 4294901760, %v15261_v10  ;;  %v3809_v59 = vand.u32 4294901760, %v3808_v48  ;;  %v21607_v63 = vand.u32 4294901760, %v15274_v54 }
 0x176   :  { %11155 = vmatprep.subr.mxu1 %v3788_v3  ;;  %11123 = vmatpush3.msra.mxu0 %v15038_v7  ;;  %v3815_v60 = vsub.f32 %v15250_v11, %v21605_v58  ;;  %v15347_v58 = vsub.f32 %v676_v62, %v15308_v9  ;;  %v3697_v2 = vand.u32 4294901760, %v3696_v16  ;;  %v21610_v62 = vand.u32 4294901760, %v15306_v4 }
 0x177   :  { %11156 = vmatpush3.msra.mxu1 %v3676_v47  ;;  %11124 = vmatprep.subr.mxu0 %v15108_v49  ;;  %v3703_v3 = vsub.f32 %v15261_v10, %v21606_v21  ;;  %v3822_v47 = vsub.f32 %v15274_v54, %v21607_v63  ;;  %v21608_v21 = vand.u32 4294901760, %v15284_v19  ;;  %v21609_v63 = vand.u32 4294901760, %v15293_v51 }
 0x178   :  { %11157 = vmatprep.subr.mxu1 %v3795_v35  ;;  %11125 = vmatpush3.msra.mxu0 %v15133_v52  ;;  %v3816_v48 = vand.u32 4294901760, %v3815_v60  ;;  %v3717_v35 = vsub.f32 %v15306_v4, %v21610_v62  ;;  %v21613_v62 = vand.u32 4294901760, %v15324_v13 }
 0x179   :  { %11158 = vmatpush3.msra.mxu1 %v3683_v26  ;;  %11126 = vmatprep.subr.mxu0 %v15160_v17  ;;  %v3710_v61 = vsub.f32 %v15284_v19, %v21608_v21  ;;  %v3829_v6 = vsub.f32 %v15293_v51, %v21609_v63  ;;  %v3704_v21 = vand.u32 4294901760, %v3703_v3  ;;  %v3823_v60 = vand.u32 4294901760, %v3822_v47 }
 0x17a   :  { %11159 = vmatprep.subr.mxu1 %v3802_v53  ;;  %11127 = vmatpush3.msra.mxu0 %v15177_v5  ;;  %v21611_v63 = vand.u32 4294901760, %v15316_v34  ;;  %v21612_v3 = vand.u32 4294901760, %v15327_v32  ;;  %v3724_v53 = vsub.f32 %v15324_v13, %v21613_v62  ;;  %v21614_v47 = vand.u32 4294901760, %v15336_v22 }
 0x17b   :  { %11160 = vmatpush3.msra.mxu1 %v3690_v50  ;;  %11128 = vmatprep.subr.mxu0 %v15197_v12  ;;  %v3711_v50 = vand.u32 4294901760, %v3710_v61 }
 0x17c   :  { %11161 = vmatprep.subr.mxu1 %v3809_v59  ;;  %11129 = vmatpush3.msra.mxu0 %v15216_v31  ;;  %v3836_v26 = vsub.f32 %v15316_v34, %v21611_v63  ;;  %v3609_v16 = vsub.f32 %v15327_v32, %v21612_v3  ;;  %v3830_v59 = vand.u32 4294901760, %v3829_v6  ;;  %v3615_v63 = vsub.f32 %v15336_v22, %v21614_v47 }
 0x17d   :  { %11162 = vmatpush3.msra.mxu1 %v3697_v2  ;;  %11130 = vmatprep.subr.mxu0 %v15229_v30  ;;  %v21615_v2 = vand.u32 4294901760, %v15339_v18  ;;  %v3718_v3 = vand.u32 4294901760, %v3717_v35  ;;  %v21616_v32 = vand.u32 4294901760, %v15347_v58  ;;  %v3725_v47 = vand.u32 4294901760, %v3724_v53  ;;  %v21620_v53 = vld [vmem:[#allocation31_spill] sm:$0xff] }
 0x17e   :  { %11163 = vmatprep.subr.mxu1 %v3816_v48  ;;  %11131 = vmatpush3.msra.mxu0 %v15239_v40  ;;  %v3837_v6 = vand.u32 4294901760, %v3836_v26  ;;  %v3610_v48 = vand.u32 4294901760, %v3609_v16  ;;  %v21618_v26 = vld [vmem:[#allocation21_spill] sm:$0xff]  ;;  %v21619_v16 = vld [vmem:[#allocation18_spill] sm:$0xff] }
 0x17f   :  { %v3843_v61 = vsub.f32 %v15339_v18, %v21615_v2  ;;  %11164 = vmatpush3.msra.mxu1 %v3704_v21  ;;  %11132 = vmatprep.subr.mxu0 %v15252_v43  ;;  %v3731_v62 = vsub.f32 %v15347_v58, %v21616_v32  ;;  %v3616_v21 = vand.u32 4294901760, %v3615_v63  ;;  %v21617_v32 = vld [vmem:[#allocation29_spill] sm:$0xff]  ;;  %v21624_v63 = vld [vmem:[#allocation39_spill] sm:$0xff] }
 0x180   :  { %11165 = vmatprep.subr.mxu1 %v3823_v60  ;;  %11133 = vmatpush3.msra.mxu0 %v15263_v14  ;;  %v21621_v60 = vld [vmem:[#allocation7_spill] sm:$0xff] }
 0x181   :  { %11166 = vmatpush3.msra.mxu1 %v3711_v50  ;;  %11134 = vmatprep.subr.mxu0 %v15276_v56  ;;  %v3844_v2 = vand.u32 4294901760, %v3843_v61  ;;  %v3732_v35 = vand.u32 4294901760, %v3731_v62  ;;  %v21622_v50 = vld [vmem:[#allocation35_spill] sm:$0xff]  ;;  %v21626_v62 = vld [vmem:[#allocation37_spill] sm:$0xff] }
 0x182   :  { %11167 = vmatprep.subr.mxu1 %v3830_v59  ;;  %11135 = vmatpush3.msra.mxu0 %v15286_v20  ;;  %v21623_v59 = vld [vmem:[#allocation38_spill] sm:$0xff]  ;;  %v21625_v61 = vld [vmem:[#allocation11_spill] sm:$0xff] }
 0x183   :  { %11168 = vmatpush3.msra.mxu1 %v3718_v3  ;;  %11136 = vmatprep.subr.mxu0 %v15295_v42  ;;  %v57_v3 = vld [vmem:[%s20409_s1 + $0xc0] sm:$0xff] }
 0x184   :  { %11169 = vmatprep.subr.mxu1 %v3837_v6  ;;  %11137 = vmatpush3.msra.mxu0 %v15308_v9  ;;  %v21627_v6 = vld [vmem:[#allocation15_spill] sm:$0xff] }
 0x185   :  { %3611 = vmatprep.mubr.f32.mxu0 %v3610_v48  ;;  %11170 = vmatpush3.msra.mxu1 %v3725_v47  ;;  %v58_v48 = vld [vmem:[%s20409_s1 + $0xc8] sm:$0xff]  ;;  %v59_v47 = vld [vmem:[%s20409_s1 + $0xd0] sm:$0xff] }
 0x186   :  { %3617 = vmatmul.mubr.f32.vlgmr.msra.gmra.mxu0 %v3616_v21  ;;  %11171 = vmatprep.subr.mxu1 %v3844_v2  ;;  %v60_v21 = vld [vmem:[%s20409_s1 + $0xd8] sm:$0xff] }
 0x187   :  { %11176 = vmatprep.subr.mxu0 %v14846_v38  ;;  %11172 = vmatpush3.msra.mxu1 %v3732_v35  ;;  %v21628_v2 = vld [vmem:[#allocation40_spill] sm:$0xff]  ;;  %v21629_v35 = vld [vmem:[#allocation14_spill] sm:$0xff] }
 0x188   :  { %3847 = vmatprep.mubr.f32.mxu1 %v15288_v15  ;;  %11177 = vmatpush3.msra.mxu0 %v14855_v36  ;;  %v21631_v15 = vld [vmem:[#allocation27_spill] sm:$0xff] }
 0x189   :  { %3849 = vmatmul.mubr.f32.vlgmr.msra.gmra.mxu1 %v15298_v39  ;;  %11178 = vmatprep.subr.mxu0 %v14878_v27  ;;  %v21630_v39 = vld [vmem:[#allocation6_spill] sm:$0xff] }
 0x18a   :  { %11211 = vmatprep.subr.mxu1 %v14821_v28  ;;  %11179 = vmatpush3.msra.mxu0 %v14896_v33 }
 0x18b   :  { %11212 = vmatpush3.msra.mxu1 %v14826_v44  ;;  %11180 = vmatprep.subr.mxu0 %v14907_v45 }
 0x18c   :  { %11213 = vmatprep.subr.mxu1 %v14843_v25  ;;  %11181 = vmatpush3.msra.mxu0 %v14937_v0 }
 0x18d   :  { %11214 = vmatpush3.msra.mxu1 %v14860_v57  ;;  %11182 = vmatprep.subr.mxu0 %v14949_v41 }
 0x18e   :  { %11215 = vmatprep.subr.mxu1 %v14868_v24  ;;  %11183 = vmatpush3.msra.mxu0 %v14961_v29 }
 0x18f   :  { %11216 = vmatpush3.msra.mxu1 %v14887_v23  ;;  %11184 = vmatprep.subr.mxu0 %v21617_v32 }
 0x190   :  { %11217 = vmatprep.subr.mxu1 %v21618_v26  ;;  %11185 = vmatpush3.msra.mxu0 %v21619_v16 }
 0x191   :  { %11218 = vmatpush3.msra.mxu1 %v21620_v53  ;;  %11186 = vmatprep.subr.mxu0 %v21621_v60  ;;  %v21636_v60 = vld [vmem:[#allocation13_spill] sm:$0xff] }
 0x192   :  { %11219 = vmatprep.subr.mxu1 %v21622_v50  ;;  %11187 = vmatpush3.msra.mxu0 %v21623_v59  ;;  %v42_v59 = vld [vmem:[%s20409_s1 + $0x48] sm:$0xff]  ;;  %v21634_v50 = vld [vmem:[#allocation8_spill] sm:$0xff] }
 0x193   :  { %11220 = vmatpush3.msra.mxu1 %v21624_v63  ;;  %11188 = vmatprep.subr.mxu0 %v21625_v61  ;;  %v21633_v61 = vld [vmem:[#allocation26_spill] sm:$0xff]  ;;  %v119_v16 = vrot.slane %v42_v59, 4 }
 0x194   :  { %11221 = vmatprep.subr.mxu1 %v21626_v62  ;;  %11189 = vmatpush3.msra.mxu0 %v21627_v6  ;;  %v209_v6 = vrot.slane %v57_v3, 4  ;;  %v21632_v62 = vld [vmem:[#allocation36_spill] sm:$0xff]  ;;  %v41_v63 = vld [vmem:[%s20409_s1 + $0x40] sm:$0xff] }
 0x195   :  { %11222 = vmatpush3.msra.mxu1 %v21628_v2  ;;  %11190 = vmatprep.subr.mxu0 %v21629_v35  ;;  %v43_v35 = vld [vmem:[%s20409_s1 + $0x50] sm:$0xff]  ;;  %v221_v2 = vrot.slane %v59_v47, 4  ;;  %v113_v53 = vrot.slane %v41_v63, 4 }
 0x196   :  { %11223 = vmatprep.subr.mxu1 %v21630_v39  ;;  %11191 = vmatpush3.msra.mxu0 %v21631_v15  ;;  %v215_v39 = vrot.slane %v58_v48, 4  ;;  %v227_v15 = vrot.slane %v60_v21, 4  ;;  %v125_v26 = vrot.slane %v43_v35, 4  ;;  %v210_v32 = vadd.f32 %v209_v6, %v57_v3 }
 0x197   :  { %11224 = vmatpush3.msra.mxu1 %v21632_v62  ;;  %11192 = vmatprep.subr.mxu0 %v21633_v61  ;;  %v21635_v62 = vld [vmem:[#allocation33_spill] sm:$0xff]  ;;  %v222_v23 = vadd.f32 %v221_v2, %v59_v47  ;;  %v114_v3 = vadd.f32 %v113_v53, %v41_v63  ;;  %v120_v6 = vadd.f32 %v119_v16, %v42_v59 }
 0x198   :  { %11225 = vmatprep.subr.mxu1 %v21634_v50  ;;  %11193 = vmatpush3.msra.mxu0 %v21635_v62  ;;  %v44_v61 = vld [vmem:[%s20409_s1 + $0x58] sm:$0xff]  ;;  %v216_v50 = vadd.f32 %v215_v39, %v58_v48  ;;  %v228_v29 = vadd.f32 %v227_v15, %v60_v21 }
 0x199   :  { %11226 = vmatpush3.msra.mxu1 %v15013_v8  ;;  %11194 = vmatprep.subr.mxu0 %v21636_v60  ;;  %v131_v62 = vrot.slane %v44_v61, 4  ;;  %v223_v48 = vrot.slane %v222_v23, 2  ;;  %v121_v16 = vrot.slane %v120_v6, 2 }
 0x19a   :  { %11227 = vmatprep.subr.mxu1 %v15036_v37  ;;  %11195 = vmatpush3.msra.mxu0 %v15195_v1  ;;  %v217_v15 = vrot.slane %v216_v50, 2  ;;  %v229_v47 = vrot.slane %v228_v29, 2 }
 0x19b   :  { %11228 = vmatpush3.msra.mxu1 %v15038_v7  ;;  %11196 = vmatprep.subr.mxu0 %v15227_v55  ;;  %v126_v7 = vadd.f32 %v125_v26, %v43_v35  ;;  %v211_v55 = vrot.slane %v210_v32, 2  ;;  %v132_v39 = vadd.f32 %v131_v62, %v44_v61  ;;  %v115_v26 = vrot.slane %v114_v3, 2 }
 0x19c   :  { %11229 = vmatprep.subr.mxu1 %v15108_v49  ;;  %11197 = vmatpush3.msra.mxu0 %v15237_v46  ;;  %v218_v61 = vadd.f32 %v217_v15, %v216_v50  ;;  %v224_v62 = vadd.f32 %v223_v48, %v222_v23  ;;  %v230_v21 = vadd.f32 %v229_v47, %v228_v29  ;;  %v21638_v48 = vand.u32 4294901760, %v14846_v38 }
 0x19d   :  { %11230 = vmatpush3.msra.mxu1 %v15133_v52  ;;  %11198 = vmatprep.subr.mxu0 %v15250_v11  ;;  %v127_v53 = vrot.slane %v126_v7, 2  ;;  %v212_v59 = vadd.f32 %v211_v55, %v210_v32  ;;  %v133_v63 = vrot.slane %v132_v39, 2  ;;  %v116_v55 = vadd.f32 %v115_v26, %v114_v3 }
 0x19e   :  { %11231 = vmatprep.subr.mxu1 %v15160_v17  ;;  %11199 = vmatpush3.msra.mxu0 %v15261_v10  ;;  %v122_v32 = vadd.f32 %v121_v16, %v120_v6  ;;  %v219_v29 = vrot.slane %v218_v61, 1  ;;  %v225_v50 = vrot.slane %v224_v62, 1  ;;  %v231_v15 = vrot.slane %v230_v21, 1 }
 0x19f   :  { %11232 = vmatpush3.msra.mxu1 %v15177_v5  ;;  %11200 = vmatprep.subr.mxu0 %v15274_v54  ;;  %v128_v2 = vadd.f32 %v127_v53, %v126_v7  ;;  %v213_v35 = vrot.slane %v212_v59, 1  ;;  %v134_v23 = vadd.f32 %v133_v63, %v132_v39  ;;  %v21640_v3 = vand.u32 4294901760, %v14855_v36 }
 0x1a0   :  { %11233 = vmatprep.subr.mxu1 %v15197_v12  ;;  %11201 = vmatpush3.msra.mxu0 %v15284_v19  ;;  %v117_v6 = vrot.slane %v116_v55, 1  ;;  %v123_v39 = vrot.slane %v122_v32, 1  ;;  %v21641_v16 = vand.u32 4294901760, %v15336_v22  ;;  %v21642_v53 = vand.u32 4294901760, %v14878_v27 }
 0x1a1   :  { %11234 = vmatpush3.msra.mxu1 %v15216_v31  ;;  %11202 = vmatprep.subr.mxu0 %v15293_v51  ;;  %v129_v47 = vrot.slane %v128_v2, 1  ;;  %v214_v26 = vadd.f32 %v213_v35, %v212_v59  ;;  %v135_v38 = vrot.slane %v134_v23, 1  ;;  %v220_v63 = vadd.f32 %v219_v29, %v218_v61  ;;  %v21652_v29 = vld [vmem:[#allocation21_spill] sm:$0xff] }
 0x1a2   :  { %11235 = vmatprep.subr.mxu1 %v15229_v30  ;;  %11203 = vmatpush3.msra.mxu0 %v15306_v4  ;;  %v21644_v36 = vand.u32 4294901760, %v14907_v45  ;;  %v21645_v27 = vand.u32 4294901760, %v14937_v0  ;;  %v124_v59 = vadd.f32 %v123_v39, %v122_v32  ;;  %v738_v45 = vld [vmem:[%s20411_s3 + $0x4f0] sm:$0xff]  ;;  %v21649_v32 = vld [vmem:[#allocation17_spill] sm:$0xff] }
 0x1a3   :  { %11236 = vmatpush3.msra.mxu1 %v15239_v40  ;;  %11204 = vmatprep.subr.mxu0 %v15316_v34  ;;  %v21637_v34 = vld [vmem:[#allocation10_spill] sm:$0xff]  ;;  %v130_v61 = vadd.f32 %v129_v47, %v128_v2  ;;  %v21658_v47 = vld [vmem:[#allocation41_spill] sm:$0xff] }
 0x1a4   :  { %11237 = vmatprep.subr.mxu1 %v15252_v43  ;;  %11205 = vmatpush3.msra.mxu0 %v15324_v13  ;;  %v21639_v7 = vand.u32 4294901760, %v21637_v34 }
 0x1a5   :  { %11238 = vmatpush3.msra.mxu1 %v15263_v14  ;;  %11206 = vmatprep.subr.mxu0 %v15339_v18 }
 0x1a6   :  { %11239 = vmatprep.subr.mxu1 %v15276_v56  ;;  %11207 = vmatpush3.msra.mxu0 %v15347_v58 }
 0x1a7   :  { %3984 = vmatprep.mubr.f32.mxu0 %v21637_v34  ;;  %11240 = vmatpush3.msra.mxu1 %v15286_v20  ;;  %v21643_v34 = vand.u32 4294901760, %v14896_v33  ;;  %v118_v33 = vadd.f32 %v117_v6, %v116_v55 }
 0x1a8   :  { %3987 = vmatmul.mubr.f32.vlgmr.msra.gmra.mxu0 %v15336_v22  ;;  %11241 = vmatprep.subr.mxu1 %v15295_v42  ;;  %v739_v22 = vld [vmem:[%s20411_s3 + $0x4f8] sm:$0xff] }
 0x1a9   :  { %11246 = vmatprep.subr.mxu0 %v21638_v48  ;;  %11242 = vmatpush3.msra.mxu1 %v15308_v9  ;;  %v226_v48 = vadd.f32 %v225_v50, %v224_v62  ;;  %v232_v9 = vadd.f32 %v231_v15, %v230_v21  ;;  %v391_v62 = vcombine.low %v214_v26, %v220_v63  ;;  %v21647_v21 = vld [vmem:[#allocation43_spill] sm:$0xff]  ;;  %v15524_v55 = vand.u32 4294901760, %v739_v22  ;;  %v21653_v50 = vld [vmem:[#allocation18_spill] sm:$0xff] }
 0x1aa   :  { %4091 = vmatprep.mubr.f32.mxu1 %v21639_v7  ;;  %11247 = vmatpush3.msra.mxu0 %v21640_v3  ;;  %v21648_v35 = vand.u32 4294901760, %v21647_v21  ;;  %v323_v15 = vcombine.low %v118_v33, %v124_v59  ;;  %v21655_v7 = vld [vmem:[#allocation31_spill] sm:$0xff]  ;;  %v21668_v21 = vld [vmem:[#allocation40_spill] sm:$0xff] }
 0x1ab   :  { %4095 = vmatmul.mubr.f32.vlgmr.msra.gmra.mxu1 %v21641_v16  ;;  %11248 = vmatprep.subr.mxu0 %v21642_v53  ;;  %v392_v0 = vcombine.low %v226_v48, %v232_v9  ;;  %v15534_v9 = vand.u32 4294901760, %v738_v45  ;;  %v21656_v3 = vld [vmem:[#allocation7_spill] sm:$0xff]  ;;  %v399_v26 = vrot.slane %v391_v62, %v21658_v47  ;;  %v15548_v48 = vsub.f32 %v739_v22, %v15524_v55 }
 0x1ac   :  { %11281 = vmatprep.subr.mxu1 %v14821_v28  ;;  %11249 = vmatpush3.msra.mxu0 %v21643_v34  ;;  %v723_v28 = vld [vmem:[%s20411_s3 + $0x478] sm:$0xff]  ;;  %v21657_v6 = vand.u32 4294901760, %v21656_v3  ;;  %v21659_v53 = vld [vmem:[#allocation35_spill] sm:$0xff]  ;;  %v736_v3 = vld [vmem:[%s20411_s3 + $0x4e0] sm:$0xff] }
 0x1ad   :  { %11282 = vmatpush3.msra.mxu1 %v14826_v44  ;;  %11250 = vmatprep.subr.mxu0 %v21644_v36  ;;  %v21646_v44 = vand.u32 4294901760, %v14949_v41  ;;  %v15529_v41 = vand.u32 4294901760, %v723_v28  ;;  %v406_v16 = vrot.slane %v392_v0, %v21658_v47  ;;  %v737_v34 = vld [vmem:[%s20411_s3 + $0x4e8] sm:$0xff]  ;;  %v15565_v22 = vsub.f32 %v738_v45, %v15534_v9 }
 0x1ae   :  { %11283 = vmatprep.subr.mxu1 %v14843_v25  ;;  %11251 = vmatpush3.msra.mxu0 %v21645_v27  ;;  %v136_v25 = vadd.f32 %v135_v38, %v134_v23  ;;  %v21654_v23 = vand.u32 4294901760, %v21653_v50  ;;  %v21660_v38 = vld [vmem:[#allocation38_spill] sm:$0xff]  ;;  %v21662_v36 = vld [vmem:[#allocation39_spill] sm:$0xff] }
 0x1af   :  { %11284 = vmatpush3.msra.mxu1 %v14860_v57  ;;  %11252 = vmatprep.subr.mxu0 %v21646_v44  ;;  %v21650_v57 = vld [vmem:[#allocation29_spill] sm:$0xff]  ;;  %v21661_v63 = vand.u32 4294901760, %v21660_v38  ;;  %v21663_v27 = vld [vmem:[#allocation11_spill] sm:$0xff]  ;;  %v15557_v59 = vsub.f32 %v723_v28, %v15529_v41  ;;  %v15573_v28 = vand.u32 4294901760, %v737_v34  ;;  %v21671_v50 = vld [vmem:[#allocation6_spill] sm:$0xff] }
 0x1b0   :  { %11285 = vmatprep.subr.mxu1 %v14868_v24  ;;  %11253 = vmatpush3.msra.mxu0 %v21648_v35  ;;  %v21651_v2 = vand.u32 4294901760, %v21650_v57  ;;  %v722_v24 = vld [vmem:[%s20411_s3 + $0x470] sm:$0xff]  ;;  %v324_v39 = vcombine.low %v130_v61, %v136_v25  ;;  %v21664_v33 = vand.u32 4294901760, %v21663_v27  ;;  %v21665_v44 = vld [vmem:[#allocation37_spill] sm:$0xff]  ;;  %v721_v0 = vld [vmem:[%s20411_s3 + $0x468] sm:$0xff]  ;;  %v331_v57 = vrot.slane %v323_v15, %v21658_v47 }
 0x1b1   :  { %11286 = vmatpush3.msra.mxu1 %v21649_v32  ;;  %v15559_v61 = vand.u32 4294901760, %v722_v24  ;;  %v21666_v25 = vld [vmem:[#allocation15_spill] sm:$0xff]  ;;  %v21669_v35 = vld [vmem:[#allocation14_spill] sm:$0xff]  ;;  %v21678_v27 = vld [vmem:[#allocation33_spill] sm:$0xff] }
 0x1b2   :  { %11254 = vmatprep.subr.mxu0 %v21651_v2  ;;  %11287 = vmatprep.subr.mxu1 %v21652_v29  ;;  %v21667_v62 = vand.u32 4294901760, %v21666_v25  ;;  %v21670_v32 = vand.u32 4294901760, %v21669_v35  ;;  %v338_v2 = vrot.slane %v324_v39, %v21658_v47  ;;  %v407_v29 = vcombine.low %v399_v26, %v406_v16  ;;  %v21672_v45 = vld [vmem:[#allocation27_spill] sm:$0xff]  ;;  %v720_v16 = vld [vmem:[%s20411_s3 + $0x460] sm:$0xff] }
 0x1b3   :  { %11255 = vmatpush3.msra.mxu0 %v21654_v23  ;;  %11288 = vmatpush3.msra.mxu1 %v21655_v7  ;;  %v21673_v23 = vand.u32 4294901760, %v21672_v45  ;;  %v20718_v7 = vand.u32 4294901760, %v15548_v48  ;;  %v15588_v15 = vsub.f32 %v722_v24, %v15559_v61  ;;  %v20716_v39 = vand.u32 4294901760, %v15557_v59 }
 0x1b4   :  { %11256 = vmatprep.subr.mxu0 %v21657_v6  ;;  %11289 = vmatprep.subr.mxu1 %v21659_v53  ;;  %v21674_v6 = vld [vmem:[#allocation36_spill] sm:$0xff]  ;;  %v21675_v53 = vld [vmem:[#allocation26_spill] sm:$0xff]  ;;  %v15591_v26 = vand.u32 4294901760, %v721_v0  ;;  %v20715_v24 = vand.u32 4294901760, %v15565_v22  ;;  %v15606_v25 = vand.u32 4294901760, %v736_v3  ;;  %v339_v35 = vcombine.low %v331_v57, %v338_v2 }
 0x1b5   :  { %11257 = vmatpush3.msra.mxu0 %v21661_v63  ;;  %11290 = vmatpush3.msra.mxu1 %v21662_v36  ;;  %v21676_v38 = vand.u32 4294901760, %v21675_v53  ;;  %v735_v63 = vld [vmem:[%s20411_s3 + $0x4d8] sm:$0xff]  ;;  %v734_v57 = vld [vmem:[%s20411_s3 + $0x4d0] sm:$0xff]  ;;  %v21688_v53 = vand.u32 4294901760, %v15237_v46 }
 0x1b6   :  { %11258 = vmatprep.subr.mxu0 %v21664_v33  ;;  %11291 = vmatprep.subr.mxu1 %v21665_v44  ;;  %v21677_v36 = vld [vmem:[#allocation8_spill] sm:$0xff]  ;;  %v21679_v33 = vand.u32 4294901760, %v21678_v27  ;;  %v21680_v44 = vand.u32 4294901760, %v21636_v60  ;;  %21681 = vst [vmem:[#allocation28_spill] sm:$0xff] %v15606_v25  ;;  %v15624_v60 = vand.u32 4294901760, %v720_v16  ;;  %v15640_v45 = vsub.f32 %v721_v0, %v15591_v26  ;;  %v733_v0 = vld [vmem:[%s20411_s3 + $0x4c8] sm:$0xff] }
 0x1b7   :  { %11259 = vmatpush3.msra.mxu0 %v21667_v62  ;;  %11292 = vmatpush3.msra.mxu1 %v21668_v21  ;;  %v15609_v62 = vsub.f32 %v737_v34, %v15573_v28  ;;  %v719_v21 = vld [vmem:[%s20411_s3 + $0x458] sm:$0xff]  ;;  %v15626_v34 = vand.u32 4294901760, %v735_v63  ;;  %v21690_v27 = vand.u32 4294901760, %v15250_v11  ;;  %v15664_v46 = vsub.f32 %v736_v3, %v15606_v25 }
 0x1b8   :  { %11260 = vmatprep.subr.mxu0 %v21670_v32  ;;  %11293 = vmatprep.subr.mxu1 %v21671_v50  ;;  %v15614_v32 = vrot.slane %v407_v29, 7  ;;  %v21682_v50 = vand.u32 4294901760, %v15195_v1  ;;  %21683 = vst [vmem:[#allocation20_spill] sm:$0xff] %v15624_v60  ;;  %v21685_v2 = vld [vmem:[#allocation12_spill] sm:$0xff]  ;;  %v21686_v29 = vld [vmem:[#allocation9_spill] sm:$0xff]  ;;  %v15637_v1 = vsub.f32 %v15557_v59, %v20716_v39 }
 0x1b9   :  { %11261 = vmatpush3.msra.mxu0 %v21673_v23  ;;  %11294 = vmatpush3.msra.mxu1 %v21674_v6  ;;  %21684 = vst [vmem:[#allocation25_spill] sm:$0xff] %v15626_v34  ;;  %v20714_v23 = vand.u32 4294901760, %v15588_v15  ;;  %v718_v6 = vld [vmem:[%s20411_s3 + $0x450] sm:$0xff]  ;;  %v15681_v3 = vsub.f32 %v735_v63, %v15626_v34  ;;  %v20719_v63 = vand.u32 4294901760, %v15640_v45 }
 0x1ba   :  { %11262 = vmatprep.subr.mxu0 %v21676_v38  ;;  %11295 = vmatprep.subr.mxu1 %v21677_v36  ;;  %v15652_v38 = vsub.f32 %v15565_v22, %v20715_v24  ;;  %v15654_v36 = vand.u32 4294901760, %v719_v21 }
 0x1bb   :  { %11263 = vmatpush3.msra.mxu0 %v21679_v33  ;;  %11296 = vmatpush3.msra.mxu1 %v15013_v8  ;;  %v15622_v8 = vsub.f32 %v15548_v48, %v20718_v7  ;;  %v15666_v33 = vand.u32 4294901760, %v734_v57  ;;  %21693 = vst [vmem:[#allocation34_spill] sm:$0xff] %v15681_v3 }
 0x1bc   :  { %11264 = vmatprep.subr.mxu0 %v21680_v44  ;;  %11297 = vmatprep.subr.mxu1 %v15036_v37  ;;  %v21687_v37 = vand.u32 4294901760, %v21686_v29  ;;  %21689 = vst [vmem:[#allocation24_spill] sm:$0xff] %v15654_v36  ;;  %v717_v44 = vld [vmem:[%s20411_s3 + $0x448] sm:$0xff]  ;;  %v15683_v29 = vand.u32 4294901760, %v718_v6 }
 0x1bd   :  { %11265 = vmatpush3.msra.mxu0 %v21682_v50  ;;  %11298 = vmatpush3.msra.mxu1 %v21685_v2  ;;  %21691 = vst [vmem:[#allocation23_spill] sm:$0xff] %v15666_v33  ;;  %v448_v50 = vsel %vm430_vm0, %v15614_v32, %v339_v35  ;;  %v4601_v11 = vand.u32 4294901760, %v15622_v8  ;;  %v15678_v2 = vsub.f32 %v720_v16, %v15624_v60  ;;  %v15698_v35 = vand.u32 4294901760, %v733_v0 }
 0x1be   :  { %11266 = vmatprep.subr.mxu0 %v21687_v37  ;;  %11299 = vmatprep.subr.mxu1 %v15108_v49  ;;  %v20717_v49 = vand.u32 4294901760, %v15609_v62  ;;  %21694 = vst [vmem:[#allocation22_spill] sm:$0xff] %v15683_v29  ;;  %v716_v37 = vld [vmem:[%s20411_s3 + $0x440] sm:$0xff]  ;;  %v15695_v16 = vsub.f32 %v15588_v15, %v20714_v23  ;;  %v715_v23 = vld [vmem:[%s20411_s3 + $0x438] sm:$0xff]  ;;  %v15730_v24 = vsub.f32 %v734_v57, %v15666_v33  ;;  %v21722_v8 = vand.u32 4294901760, %v15637_v1 }
 0x1bf   :  { %11267 = vmatpush3.msra.mxu0 %v21688_v53  ;;  %11300 = vmatpush3.msra.mxu1 %v15133_v52  ;;  %v21692_v52 = vand.u32 4294901760, %v15261_v10  ;;  %21696 = vst [vmem:[#allocation16_spill] sm:$0xff] %v15698_v35  ;;  %v732_v53 = vld [vmem:[%s20411_s3 + $0x4c0] sm:$0xff]  ;;  %v15732_v39 = vand.u32 4294901760, %v716_v37  ;;  %v21705_v57 = vld [vmem:[#allocation32_spill] sm:$0xff]  ;;  %v21724_v1 = vand.u32 4294901760, %v15652_v38 }
 0x1c0   :  { %11268 = vmatprep.subr.mxu0 %v21690_v27  ;;  %11301 = vmatprep.subr.mxu1 %v15160_v17  ;;  %v21695_v17 = vand.u32 4294901760, %v15274_v54  ;;  %v15708_v27 = vsub.f32 %v719_v21, %v15654_v36  ;;  %v15726_v21 = vsub.f32 %v15609_v62, %v20717_v49  ;;  %21701 = vst [vmem:[#allocation43_spill] sm:$0xff] %v15730_v24  ;;  %v15742_v49 = vand.u32 4294901760, %v732_v53 }
 0x1c1   :  { %11269 = vmatpush3.msra.mxu0 %v21692_v52  ;;  %11302 = vmatpush3.msra.mxu1 %v15177_v5  ;;  %v21697_v5 = vand.u32 4294901760, %v15284_v19  ;;  %v15710_v52 = vand.u32 4294901760, %v717_v44  ;;  %v21700_v19 = vand.u32 4294901760, %v15293_v51  ;;  %v20722_v51 = vand.u32 4294901760, %v15678_v2 }
 0x1c2   :  { %11270 = vmatprep.subr.mxu0 %v21695_v17  ;;  %11303 = vmatprep.subr.mxu1 %v15197_v12  ;;  %21698 = vst [vmem:[#allocation13_spill] sm:$0xff] %v15708_v27  ;;  %v731_v17 = vld [vmem:[%s20411_s3 + $0x4b8] sm:$0xff]  ;;  %v449_v12 = vsel %vm432_vm1, %v15614_v32, %v448_v50  ;;  %v21702_v50 = vand.u32 4294901760, %v15306_v4  ;;  %21704 = vst [vmem:[#allocation29_spill] sm:$0xff] %v15742_v49  ;;  %v21706_v7 = vand.u32 4294901760, %v21705_v57  ;;  %v15752_v4 = vand.u32 4294901760, %v715_v23 }
 0x1c3   :  { %11271 = vmatpush3.msra.mxu0 %v21697_v5  ;;  %21699 = vst [vmem:[#allocation10_spill] sm:$0xff] %v15710_v52  ;;  %11304 = vmatpush3.msra.mxu1 %v15216_v31  ;;  %v20720_v5 = vand.u32 4294901760, %v15664_v46  ;;  %v20721_v31 = vand.u32 4294901760, %v15681_v3  ;;  %v15748_v54 = vsub.f32 %v733_v0, %v15698_v35  ;;  %v20723_v0 = vand.u32 4294901760, %v15708_v27 }
 0x1c4   :  { %11272 = vmatprep.subr.mxu0 %v21700_v19  ;;  %11305 = vmatprep.subr.mxu1 %v15229_v30  ;;  %v15740_v19 = vsub.f32 %v718_v6, %v15683_v29  ;;  %v15750_v30 = vand.u32 4294901760, %v731_v17  ;;  %v21708_v6 = vand.u32 4294901760, %v15324_v13  ;;  %v15767_v57 = vsub.f32 %v717_v44, %v15710_v52  ;;  %v730_v44 = vld [vmem:[%s20411_s3 + $0x4b0] sm:$0xff] }
 0x1c5   :  { %11273 = vmatpush3.msra.mxu0 %v21702_v50  ;;  %11306 = vmatpush3.msra.mxu1 %v15239_v40  ;;  %21707 = vst [vmem:[#allocation21_spill] sm:$0xff] %v15748_v54  ;;  %v450_v50 = vsel %vm434_vm2, %v15614_v32, %v449_v12  ;;  %v21710_v12 = vand.u32 4294901760, %v15339_v18  ;;  %v15776_v13 = vsub.f32 %v15664_v46, %v20720_v5  ;;  %v21726_v38 = vand.u32 4294901760, %v15695_v16  ;;  %v726_v16 = vld [vmem:[%s20411_s3 + $0x490] sm:$0xff] }
 0x1c6   :  { %21703 = vst [vmem:[#allocation17_spill] sm:$0xff] %v15740_v19  ;;  %11274 = vmatprep.subr.mxu0 %v21706_v7  ;;  %11307 = vmatprep.subr.mxu1 %v15252_v43  ;;  %v15763_v7 = vsub.f32 %v15640_v45, %v20719_v63  ;;  %21709 = vst [vmem:[#allocation18_spill] sm:$0xff] %v15767_v57  ;;  %v15780_v63 = vsub.f32 %v716_v37, %v15732_v39  ;;  %v21714_v43 = vld [vmem:[#allocation30_spill] sm:$0xff] }
 0x1c7   :  { %11275 = vmatpush3.msra.mxu0 %v21708_v6  ;;  %11308 = vmatpush3.msra.mxu1 %v15263_v14  ;;  %v20724_v6 = vand.u32 4294901760, %v15730_v24  ;;  %v21712_v14 = vand.u32 4294901760, %v15347_v58  ;;  %v15791_v18 = vsub.f32 %v15678_v2, %v20722_v51  ;;  %v15795_v5 = vsub.f32 %v732_v53, %v15742_v49 }
 0x1c8   :  { %11276 = vmatprep.subr.mxu0 %v21710_v12  ;;  %21711 = vst [vmem:[#allocation31_spill] sm:$0xff] %v15780_v63  ;;  %11309 = vmatprep.subr.mxu1 %v15276_v56  ;;  %v20725_v12 = vand.u32 4294901760, %v15740_v19  ;;  %v451_v37 = vsel %vm436_vm3, %v15614_v32, %v450_v50  ;;  %v15804_v56 = vsub.f32 %v15681_v3, %v20721_v31  ;;  %v20726_v58 = vand.u32 4294901760, %v15748_v54  ;;  %v714_v32 = vld [vmem:[%s20411_s3 + $0x430] sm:$0xff] }
 0x1c9   :  { %11277 = vmatpush3.msra.mxu0 %v21712_v14  ;;  %21713 = vst [vmem:[#allocation7_spill] sm:$0xff] %v15795_v5  ;;  %4261 = vmatprep.mubr.f32.mxu0 %v21714_v43  ;;  %v15808_v14 = vsub.f32 %v715_v23, %v15752_v4  ;;  %v15811_v53 = vsub.f32 %v731_v17, %v15750_v30  ;;  %v21717_v50 = vld [vmem:[#allocation19_spill] sm:$0xff]  ;;  %v15825_v51 = vand.u32 4294901760, %v730_v44  ;;  %v21718_v17 = vld [vmem:[#allocation42_spill] sm:$0xff]  ;;  %v4622_v40 = vand.u32 4294901760, %v15776_v13 }
 0x1ca   :  { %11310 = vmatpush3.msra.mxu1 %v15286_v20  ;;  %4263 = vmatmul.mubr.f32.vlgmr.msra.gmra.mxu0 %v21717_v50  ;;  %v4503_v20 = vand.u32 4294901760, %v15763_v7  ;;  %v15822_v31 = vsub.f32 %v15708_v27, %v20723_v0  ;;  %v729_v0 = vld [vmem:[%s20411_s3 + $0x4a8] sm:$0xff]  ;;  %v15839_v10 = vmul.f32 0.125, %v451_v37  ;;  %v15847_v13 = vsub.f32 %v15740_v19, %v20725_v12  ;;  %v728_v23 = vld [vmem:[%s20411_s3 + $0x4a0] sm:$0xff] }
 0x1cb   :  { %21715 = vst [vmem:[#allocation35_spill] sm:$0xff] %v15808_v14  ;;  %21716 = vst [vmem:[#allocation38_spill] sm:$0xff] %v15811_v53  ;;  %11311 = vmatprep.subr.mxu1 %v15295_v42  ;;  %11316 = vmatprep.subr.mxu0 %v15524_v55  ;;  %v15833_v42 = vsub.f32 %v15730_v24, %v20724_v6  ;;  %v15850_v7 = vand.u32 4294901760, %v714_v32  ;;  %v713_v37 = vld [vmem:[%s20411_s3 + $0x428] sm:$0xff]  ;;  %v15880_v6 = vsub.f32 %v730_v44, %v15825_v51  ;;  %v712_v12 = vld [vmem:[%s20411_s3 + $0x420] sm:$0xff] }
 0x1cc   :  { %11312 = vmatpush3.msra.mxu1 %v21718_v17  ;;  %21719 = vst [vmem:[#allocation39_spill] sm:$0xff] %v15839_v10  ;;  %4365 = vmatprep.mubr.f32.mxu1 %v21714_v43  ;;  %v4510_v17 = vand.u32 4294901760, %v15791_v18  ;;  %v4629_v43 = vand.u32 4294901760, %v15804_v56  ;;  %v15861_v18 = vsub.f32 %v15748_v54, %v20726_v58  ;;  %v4517_v56 = vand.u32 4294901760, %v15822_v31  ;;  %v727_v44 = vld [vmem:[%s20411_s3 + $0x498] sm:$0xff]  ;;  %v708_v27 = vld [vmem:[%s20411_s3 + $0x400] sm:$0xff] }
 0x1cd   :  { %11317 = vmatpush3.msra.mxu0 %v15529_v41  ;;  %4367 = vmatmul.mubr.f32.vlgmr.msra.gmra.mxu1 %v21717_v50  ;;  %v21720_v50 = vand.u32 4294901760, %v15767_v57  ;;  %v15877_v54 = vand.u32 4294901760, %v729_v0  ;;  %21721 = vst [vmem:[#allocation11_spill] sm:$0xff] %v15880_v6  ;;  %v21723_v31 = vand.u32 4294901760, %v15780_v63  ;;  %v15901_v19 = vrot.slane %v15839_v10, %v21658_v47  ;;  %v711_v47 = vld [vmem:[%s20411_s3 + $0x418] sm:$0xff] }
 0x1ce   :  { %11318 = vmatprep.subr.mxu0 %v15534_v9  ;;  %11351 = vmatprep.subr.mxu1 %v4601_v11  ;;  %v4636_v11 = vand.u32 4294901760, %v15833_v42  ;;  %v4524_v42 = vand.u32 4294901760, %v15847_v13  ;;  %v15915_v24 = vand.u32 4294901760, %v728_v23  ;;  %v4643_v13 = vand.u32 4294901760, %v15861_v18 }
 0x1cf   :  { %11319 = vmatpush3.msra.mxu0 %v15559_v61  ;;  %v15875_v58 = vsub.f32 %v15767_v57, %v21720_v50  ;;  %11352 = vmatpush3.msra.mxu1 %v21722_v8  ;;  %v15892_v50 = vsub.f32 %v15780_v63, %v21723_v31  ;;  %v15894_v57 = vand.u32 4294901760, %v713_v37  ;;  %v21725_v8 = vand.u32 4294901760, %v15795_v5 }
 0x1d0   :  { %11320 = vmatprep.subr.mxu0 %v15573_v28  ;;  %11353 = vmatprep.subr.mxu1 %v21724_v1  ;;  %v15913_v63 = vsub.f32 %v714_v32, %v15850_v7  ;;  %v21727_v1 = vand.u32 4294901760, %v15811_v53  ;;  %v21728_v32 = vand.u32 4294901760, %v15808_v14 }
 0x1d1   :  { %11321 = vmatpush3.msra.mxu0 %v15591_v26  ;;  %v15910_v31 = vsub.f32 %v15795_v5, %v21725_v8  ;;  %11354 = vmatpush3.msra.mxu1 %v21726_v38  ;;  %v15934_v5 = vand.u32 4294901760, %v712_v12  ;;  %v21729_v38 = vand.u32 4294901760, %v15726_v21  ;;  %v4531_v18 = vand.u32 4294901760, %v15875_v58 }
 0x1d2   :  { %11322 = vmatprep.subr.mxu0 %v15606_v25  ;;  %v15927_v8 = vsub.f32 %v15811_v53, %v21727_v1  ;;  %v15932_v10 = vsub.f32 %v15808_v14, %v21728_v32  ;;  %v15945_v53 = vsub.f32 %v729_v0, %v15877_v54  ;;  %v15947_v32 = vand.u32 4294901760, %v727_v44  ;;  %v710_v14 = vld [vmem:[%s20411_s3 + $0x410] sm:$0xff]  ;;  %v725_v0 = vld [vmem:[%s20411_s3 + $0x488] sm:$0xff] }
 0x1d3   :  { %11355 = vmatprep.subr.mxu1 %v21729_v38  ;;  %11323 = vmatpush3.msra.mxu0 %v15624_v60  ;;  %v4538_v21 = vand.u32 4294901760, %v15892_v50  ;;  %v15955_v38 = vsub.f32 %v713_v37, %v15894_v57  ;;  %v15957_v58 = vand.u32 4294901760, %v711_v47  ;;  %v889_v1 = vcombine.high %v15901_v19, %v15901_v19  ;;  %v709_v60 = vld [vmem:[%s20411_s3 + $0x408] sm:$0xff] }
 0x1d4   :  { %11356 = vmatpush3.msra.mxu1 %v4503_v20  ;;  %11324 = vmatprep.subr.mxu0 %v15626_v34  ;;  %v4650_v20 = vand.u32 4294901760, %v15910_v31  ;;  %v15968_v50 = vsub.f32 %v728_v23, %v15915_v24  ;;  %v15970_v37 = vand.u32 4294901760, %v726_v16  ;;  %v15979_v31 = vsub.f32 %v712_v12, %v15934_v5  ;;  %v724_v23 = vld [vmem:[%s20411_s3 + $0x480] sm:$0xff] }
 0x1d5   :  { %11357 = vmatprep.subr.mxu1 %v4622_v40  ;;  %11325 = vmatpush3.msra.mxu0 %v15654_v36  ;;  %v4657_v40 = vand.u32 4294901760, %v15927_v8  ;;  %v4545_v36 = vand.u32 4294901760, %v15932_v10  ;;  %v15981_v34 = vand.u32 4294901760, %v710_v14  ;;  %v15992_v10 = vsub.f32 %v727_v44, %v15947_v32 }
 0x1d6   :  { %21730 = vst [vmem:[#allocation37_spill] sm:$0xff] %v15970_v37  ;;  %11358 = vmatpush3.msra.mxu1 %v4510_v17  ;;  %11326 = vmatprep.subr.mxu0 %v15666_v33  ;;  %v21732_v17 = vand.u32 4294901760, %v15880_v6  ;;  %v15994_v12 = vand.u32 4294901760, %v725_v0  ;;  %v16006_v8 = vand.u32 4294901760, %v889_v1  ;;  %v16026_v44 = vand.u32 4294901760, %v708_v27 }
 0x1d7   :  { %21731 = vst [vmem:[#allocation15_spill] sm:$0xff] %v15981_v34  ;;  %11359 = vmatprep.subr.mxu1 %v4629_v43  ;;  %11327 = vmatpush3.msra.mxu0 %v15683_v29  ;;  %v16002_v29 = vsub.f32 %v711_v47, %v15957_v58  ;;  %v21739_v47 = vand.u32 4294901760, %v15913_v63  ;;  %v21740_v25 = vand.u32 4294901760, %v15945_v53 }
 0x1d8   :  { %v4663_v33 = vsub.f32 %v15880_v6, %v21732_v17  ;;  %21733 = vst [vmem:[#allocation40_spill] sm:$0xff] %v15994_v12  ;;  %11360 = vmatpush3.msra.mxu1 %v4517_v56  ;;  %11328 = vmatprep.subr.mxu0 %v15698_v35  ;;  %v16004_v17 = vand.u32 4294901760, %v709_v60  ;;  %21735 = vst [vmem:[#allocation6_spill] sm:$0xff] %v16006_v8  ;;  %v16011_v6 = vsub.f32 %v726_v16, %v15970_v37 }
 0x1d9   :  { %11361 = vmatprep.subr.mxu1 %v4636_v11  ;;  %11329 = vmatpush3.msra.mxu0 %v15710_v52  ;;  %v16013_v56 = vand.u32 4294901760, %v724_v23  ;;  %v16016_v35 = vand.u32 4294901760, %v15901_v19  ;;  %v4551_v43 = vsub.f32 %v15913_v63, %v21739_v47  ;;  %v16024_v52 = vsub.f32 %v710_v14, %v15981_v34 }
 0x1da   :  { %21734 = vst [vmem:[#allocation14_spill] sm:$0xff] %v16004_v17  ;;  %21736 = vst [vmem:[#allocation27_spill] sm:$0xff] %v16011_v6  ;;  %11362 = vmatpush3.msra.mxu1 %v4524_v42  ;;  %11330 = vmatprep.subr.mxu0 %v15742_v49  ;;  %v4664_v16 = vand.u32 4294901760, %v4663_v33  ;;  %v4670_v42 = vsub.f32 %v15945_v53, %v21740_v25  ;;  %v16034_v3 = vsub.f32 %v725_v0, %v15994_v12 }
 0x1db   :  { %21737 = vst [vmem:[#allocation36_spill] sm:$0xff] %v16013_v56  ;;  %21738 = vst [vmem:[#allocation26_spill] sm:$0xff] %v16016_v35  ;;  %11363 = vmatprep.subr.mxu1 %v4643_v13  ;;  %11331 = vmatpush3.msra.mxu0 %v15732_v39  ;;  %v21741_v14 = vand.u32 4294901760, %v15955_v38  ;;  %v16042_v33 = vsub.f32 %v709_v60, %v16004_v17  ;;  %v16045_v11 = vsub.f32 %v889_v1, %v16006_v8 }
 0x1dc   :  { %11364 = vmatpush3.msra.mxu1 %v4531_v18  ;;  %11332 = vmatprep.subr.mxu0 %v15750_v30  ;;  %v21743_v25 = vand.u32 4294901760, %v15968_v50  ;;  %v16057_v13 = vsub.f32 %v724_v23, %v16013_v56  ;;  %v4552_v60 = vand.u32 4294901760, %v4551_v43  ;;  %v21744_v1 = vand.u32 4294901760, %v15979_v31 }
 0x1dd   :  { %v4558_v47 = vsub.f32 %v15955_v38, %v21741_v14  ;;  %21742 = vst [vmem:[#allocation8_spill] sm:$0xff] %v16045_v11  ;;  %11365 = vmatprep.subr.mxu1 %v4650_v20  ;;  %11333 = vmatpush3.msra.mxu0 %v15752_v4  ;;  %v16054_v14 = vsub.f32 %v15901_v19, %v16016_v35  ;;  %v4671_v19 = vand.u32 4294901760, %v4670_v42  ;;  %v21746_v23 = vand.u32 4294901760, %v15992_v10 }
 0x1de   :  { %v4677_v18 = vsub.f32 %v15968_v50, %v21743_v25  ;;  %11366 = vmatpush3.msra.mxu1 %v4538_v21  ;;  %11334 = vmatprep.subr.mxu0 %v15825_v51  ;;  %v4565_v20 = vsub.f32 %v15979_v31, %v21744_v1  ;;  %v16065_v25 = vsub.f32 %v708_v27, %v16026_v44  ;;  %v21747_v1 = vand.u32 4294901760, %v16002_v29 }
 0x1df   :  { %11367 = vmatprep.subr.mxu1 %v4657_v40  ;;  %11335 = vmatpush3.msra.mxu0 %v15850_v7  ;;  %v4684_v21 = vsub.f32 %v15992_v10, %v21746_v23  ;;  %v4559_v43 = vand.u32 4294901760, %v4558_v47  ;;  %v21748_v23 = vand.u32 4294901760, %v16011_v6  ;;  %v21749_v27 = vand.u32 4294901760, %v16024_v52 }
 0x1e0   :  { %21745 = vst [vmem:[#allocation33_spill] sm:$0xff] %v16065_v25  ;;  %11368 = vmatpush3.msra.mxu1 %v4545_v36  ;;  %11336 = vmatprep.subr.mxu0 %v15877_v54  ;;  %v4572_v49 = vsub.f32 %v16002_v29, %v21747_v1  ;;  %v4678_v42 = vand.u32 4294901760, %v4677_v18  ;;  %v4566_v1 = vand.u32 4294901760, %v4565_v20  ;;  %v21751_v20 = vand.u32 4294901760, %v16045_v11 }
 0x1e1   :  { %11369 = vmatprep.subr.mxu1 %v4664_v16  ;;  %11337 = vmatpush3.msra.mxu0 %v15894_v57  ;;  %v4691_v0 = vsub.f32 %v16011_v6, %v21748_v23  ;;  %v4579_v40 = vsub.f32 %v16024_v52, %v21749_v27  ;;  %v4685_v18 = vand.u32 4294901760, %v4684_v21  ;;  %v21750_v23 = vand.u32 4294901760, %v16034_v3 }
 0x1e2   :  { %11370 = vmatpush3.msra.mxu1 %v4552_v60  ;;  %11338 = vmatprep.subr.mxu0 %v15915_v24  ;;  %v4573_v60 = vand.u32 4294901760, %v4572_v49  ;;  %v4471_v47 = vsub.f32 %v16045_v11, %v21751_v20  ;;  %v21752_v27 = vand.u32 4294901760, %v16042_v33  ;;  %v21753_v21 = vand.u32 4294901760, %v16054_v14 }
 0x1e3   :  { %11371 = vmatprep.subr.mxu1 %v4671_v19  ;;  %11339 = vmatpush3.msra.mxu0 %v15934_v5  ;;  %v4698_v36 = vsub.f32 %v16034_v3, %v21750_v23  ;;  %v4692_v19 = vand.u32 4294901760, %v4691_v0  ;;  %v4580_v20 = vand.u32 4294901760, %v4579_v40  ;;  %v21755_v11 = vand.u32 4294901760, %v16065_v25 }
 0x1e4   :  { %11372 = vmatpush3.msra.mxu1 %v4559_v43  ;;  %11340 = vmatprep.subr.mxu0 %v15947_v32  ;;  %v4586_v16 = vsub.f32 %v16042_v33, %v21752_v27  ;;  %v4477_v23 = vsub.f32 %v16054_v14, %v21753_v21  ;;  %v21754_v43 = vand.u32 4294901760, %v16057_v13 }
 0x1e5   :  { %11373 = vmatprep.subr.mxu1 %v4678_v42  ;;  %11341 = vmatpush3.msra.mxu0 %v15957_v58  ;;  %v4593_v27 = vsub.f32 %v16065_v25, %v21755_v11  ;;  %v4699_v0 = vand.u32 4294901760, %v4698_v36  ;;  %v4472_v42 = vand.u32 4294901760, %v4471_v47  ;;  %v21756_v11 = vld [vmem:[#allocation34_spill] sm:$0xff]  ;;  %v21757_v36 = vld [vmem:[#allocation28_spill] sm:$0xff]  ;;  %v21758_v47 = vld [vmem:[#allocation13_spill] sm:$0xff] }
 0x1e6   :  { %v4705_v49 = vsub.f32 %v16057_v13, %v21754_v43  ;;  %11374 = vmatpush3.msra.mxu1 %v4566_v1  ;;  %11342 = vmatprep.subr.mxu0 %v15970_v37  ;;  %v4587_v21 = vand.u32 4294901760, %v4586_v16  ;;  %v4478_v1 = vand.u32 4294901760, %v4477_v23  ;;  %v21759_v16 = vld [vmem:[#allocation20_spill] sm:$0xff] }
 0x1e7   :  { %11375 = vmatprep.subr.mxu1 %v4685_v18  ;;  %11343 = vmatpush3.msra.mxu0 %v15981_v34  ;;  %v4594_v40 = vand.u32 4294901760, %v4593_v27  ;;  %v21760_v18 = vld [vmem:[#allocation43_spill] sm:$0xff]  ;;  %v21763_v23 = vld [vmem:[#allocation24_spill] sm:$0xff]  ;;  %v21766_v27 = vld [vmem:[#allocation18_spill] sm:$0xff] }
 0x1e8   :  { %11376 = vmatpush3.msra.mxu1 %v4573_v60  ;;  %11344 = vmatprep.subr.mxu0 %v15994_v12  ;;  %v4706_v43 = vand.u32 4294901760, %v4705_v49  ;;  %v21761_v60 = vld [vmem:[#allocation25_spill] sm:$0xff] }
 0x1e9   :  { %11377 = vmatprep.subr.mxu1 %v4692_v19  ;;  %11345 = vmatpush3.msra.mxu0 %v16004_v17  ;;  %v21762_v19 = vld [vmem:[#allocation17_spill] sm:$0xff] }
 0x1ea   :  { %11378 = vmatpush3.msra.mxu1 %v4580_v20  ;;  %11346 = vmatprep.subr.mxu0 %v16013_v56  ;;  %v21764_v49 = vld [vmem:[#allocation21_spill] sm:$0xff]  ;;  %v21765_v20 = vld [vmem:[#allocation23_spill] sm:$0xff] }
 0x1eb   :  { %11379 = vmatprep.subr.mxu1 %v4699_v0  ;;  %11347 = vmatpush3.msra.mxu0 %v16026_v44  ;;  %v21767_v0 = vld [vmem:[#allocation22_spill] sm:$0xff] }
 0x1ec   :  { %4473 = vmatprep.mubr.f32.mxu0 %v4472_v42  ;;  %11380 = vmatpush3.msra.mxu1 %v4587_v21  ;;  %v21768_v42 = vld [vmem:[#allocation7_spill] sm:$0xff]  ;;  %v21769_v21 = vld [vmem:[#allocation16_spill] sm:$0xff] }
 0x1ed   :  { %4479 = vmatmul.mubr.f32.vlgmr.msra.gmra.mxu0 %v4478_v1  ;;  %11381 = vmatprep.subr.mxu1 %v4706_v43  ;;  %v21770_v1 = vld [vmem:[#allocation31_spill] sm:$0xff]  ;;  %v21771_v43 = vld [vmem:[#allocation10_spill] sm:$0xff] }
 0x1ee   :  { %11386 = vmatprep.subr.mxu0 %v15548_v48  ;;  %11382 = vmatpush3.msra.mxu1 %v4594_v40  ;;  %v21772_v40 = vld [vmem:[#allocation38_spill] sm:$0xff] }
 0x1ef   :  { %4709 = vmatprep.mubr.f32.mxu1 %v16006_v8  ;;  %11387 = vmatpush3.msra.mxu0 %v15557_v59  ;;  %v21774_v8 = vld [vmem:[#allocation35_spill] sm:$0xff] }
 0x1f0   :  { %4711 = vmatmul.mubr.f32.vlgmr.msra.gmra.mxu1 %v16016_v35  ;;  %11388 = vmatprep.subr.mxu0 %v15565_v22  ;;  %v21773_v35 = vld [vmem:[#allocation29_spill] sm:$0xff] }
 0x1f1   :  { %11421 = vmatprep.subr.mxu1 %v15524_v55  ;;  %11389 = vmatpush3.msra.mxu0 %v15588_v15 }
 0x1f2   :  { %11422 = vmatpush3.msra.mxu1 %v15529_v41  ;;  %11390 = vmatprep.subr.mxu0 %v15609_v62 }
 0x1f3   :  { %11423 = vmatprep.subr.mxu1 %v15534_v9  ;;  %11391 = vmatpush3.msra.mxu0 %v15640_v45 }
 0x1f4   :  { %11424 = vmatpush3.msra.mxu1 %v15559_v61  ;;  %11392 = vmatprep.subr.mxu0 %v15664_v46 }
 0x1f5   :  { %11425 = vmatprep.subr.mxu1 %v15573_v28  ;;  %11393 = vmatpush3.msra.mxu0 %v15678_v2 }
 0x1f6   :  { %11426 = vmatpush3.msra.mxu1 %v15591_v26  ;;  %11394 = vmatprep.subr.mxu0 %v21756_v11 }
 0x1f7   :  { %11427 = vmatprep.subr.mxu1 %v21757_v36  ;;  %11395 = vmatpush3.msra.mxu0 %v21758_v47 }
 0x1f8   :  { %11428 = vmatpush3.msra.mxu1 %v21759_v16  ;;  %11396 = vmatprep.subr.mxu0 %v21760_v18 }
 0x1f9   :  { %11429 = vmatprep.subr.mxu1 %v21761_v60  ;;  %11397 = vmatpush3.msra.mxu0 %v21762_v19 }
 0x1fa   :  { %11430 = vmatpush3.msra.mxu1 %v21763_v23  ;;  %11398 = vmatprep.subr.mxu0 %v21764_v49 }
 0x1fb   :  { %11431 = vmatprep.subr.mxu1 %v21765_v20  ;;  %11399 = vmatpush3.msra.mxu0 %v21766_v27  ;;  %v21775_v20 = vld [vmem:[#allocation11_spill] sm:$0xff] }
 0x1fc   :  { %11432 = vmatpush3.msra.mxu1 %v21767_v0  ;;  %11400 = vmatprep.subr.mxu0 %v21768_v42 }
 0x1fd   :  { %11433 = vmatprep.subr.mxu1 %v21769_v21  ;;  %11401 = vmatpush3.msra.mxu0 %v21770_v1 }
 0x1fe   :  { %11434 = vmatpush3.msra.mxu1 %v21771_v43  ;;  %11402 = vmatprep.subr.mxu0 %v21772_v40 }
 0x1ff   :  { %11435 = vmatprep.subr.mxu1 %v21773_v35  ;;  %11403 = vmatpush3.msra.mxu0 %v21774_v8 }
 0x200   :  { %11436 = vmatpush3.msra.mxu1 %v15732_v39  ;;  %11404 = vmatprep.subr.mxu0 %v21775_v20 }
 0x201   :  { %11437 = vmatprep.subr.mxu1 %v15750_v30  ;;  %11405 = vmatpush3.msra.mxu0 %v15913_v63 }
 0x202   :  { %11438 = vmatpush3.msra.mxu1 %v15752_v4  ;;  %11406 = vmatprep.subr.mxu0 %v15945_v53 }
 0x203   :  { %11439 = vmatprep.subr.mxu1 %v15825_v51  ;;  %11407 = vmatpush3.msra.mxu0 %v15955_v38 }
 0x204   :  { %11440 = vmatpush3.msra.mxu1 %v15850_v7  ;;  %11408 = vmatprep.subr.mxu0 %v15968_v50 }
 0x205   :  { %11441 = vmatprep.subr.mxu1 %v15877_v54  ;;  %11409 = vmatpush3.msra.mxu0 %v15979_v31 }
 0x206   :  { %11442 = vmatpush3.msra.mxu1 %v15894_v57  ;;  %11410 = vmatprep.subr.mxu0 %v15992_v10 }
 0x207   :  { %11443 = vmatprep.subr.mxu1 %v15915_v24  ;;  %11411 = vmatpush3.msra.mxu0 %v16002_v29 }
 0x208   :  { %11444 = vmatpush3.msra.mxu1 %v15934_v5  ;;  %11412 = vmatprep.subr.mxu0 %v16011_v6  ;;  %v21776_v6 = vld [vmem:[#allocation8_spill] sm:$0xff] }
 0x209   :  { %11445 = vmatprep.subr.mxu1 %v15947_v32  ;;  %11413 = vmatpush3.msra.mxu0 %v16024_v52 }
 0x20a   :  { %11446 = vmatpush3.msra.mxu1 %v15957_v58  ;;  %11414 = vmatprep.subr.mxu0 %v16034_v3 }
 0x20b   :  { %11447 = vmatprep.subr.mxu1 %v15970_v37  ;;  %11415 = vmatpush3.msra.mxu0 %v16042_v33  ;;  %v21777_v37 = vand.u32 4294901760, %v15548_v48  ;;  %v21783_v48 = vand.u32 4294901760, %v15609_v62 }
 0x20c   :  { %11448 = vmatpush3.msra.mxu1 %v15981_v34  ;;  %11416 = vmatprep.subr.mxu0 %v16057_v13  ;;  %v21778_v34 = vand.u32 4294901760, %v21776_v6 }
 0x20d   :  { %11449 = vmatprep.subr.mxu1 %v15994_v12  ;;  %11417 = vmatpush3.msra.mxu0 %v16065_v25  ;;  %v21779_v12 = vand.u32 4294901760, %v15557_v59  ;;  %v21780_v25 = vand.u32 4294901760, %v16054_v14  ;;  %v21784_v59 = vand.u32 4294901760, %v15640_v45  ;;  %v21790_v45 = vand.u32 4294901760, %v21762_v19 }
 0x20e   :  { %4846 = vmatprep.mubr.f32.mxu0 %v21776_v6  ;;  %11450 = vmatpush3.msra.mxu1 %v16004_v17  ;;  %v21781_v17 = vand.u32 4294901760, %v15565_v22  ;;  %v771_v22 = vld [vmem:[%s20411_s3 + $0x5f8] sm:$0xff] }
 0x20f   :  { %4849 = vmatmul.mubr.f32.vlgmr.msra.gmra.mxu0 %v16054_v14  ;;  %11451 = vmatprep.subr.mxu1 %v16013_v56  ;;  %v21782_v56 = vand.u32 4294901760, %v15588_v15  ;;  %v21787_v15 = vand.u32 4294901760, %v21756_v11  ;;  %v16218_v62 = vand.u32 4294901760, %v771_v22 }
 0x210   :  { %11456 = vmatprep.subr.mxu0 %v21777_v37  ;;  %11452 = vmatpush3.msra.mxu1 %v16026_v44 }
 0x211   :  { %4953 = vmatprep.mubr.f32.mxu1 %v21778_v34  ;;  %11457 = vmatpush3.msra.mxu0 %v21779_v12  ;;  %v16243_v37 = vsub.f32 %v771_v22, %v16218_v62  ;;  %v769_v12 = vld [vmem:[%s20411_s3 + $0x5e8] sm:$0xff] }
 0x212   :  { %4957 = vmatmul.mubr.f32.vlgmr.msra.gmra.mxu1 %v21780_v25  ;;  %11458 = vmatprep.subr.mxu0 %v21781_v17  ;;  %v21792_v17 = vld [vmem:[#allocation23_spill] sm:$0xff]  ;;  %v21794_v25 = vand.u32 4294901760, %v21768_v42 }
 0x213   :  { %11491 = vmatprep.subr.mxu1 %v15524_v55  ;;  %11459 = vmatpush3.msra.mxu0 %v21782_v56  ;;  %v21785_v55 = vand.u32 4294901760, %v15664_v46  ;;  %v754_v46 = vld [vmem:[%s20411_s3 + $0x570] sm:$0xff]  ;;  %v21793_v56 = vand.u32 4294901760, %v21766_v27  ;;  %v20789_v19 = vand.u32 4294901760, %v16243_v37  ;;  %v21797_v27 = vand.u32 4294901760, %v21774_v8  ;;  %v751_v8 = vld [vmem:[%s20411_s3 + $0x558] sm:$0xff] }
 0x214   :  { %11492 = vmatpush3.msra.mxu1 %v15529_v41  ;;  %11460 = vmatprep.subr.mxu0 %v21783_v48  ;;  %v755_v41 = vld [vmem:[%s20411_s3 + $0x578] sm:$0xff]  ;;  %v16257_v11 = vand.u32 4294901760, %v754_v46 }
 0x215   :  { %11493 = vmatprep.subr.mxu1 %v15534_v9  ;;  %11461 = vmatpush3.msra.mxu0 %v21784_v59  ;;  %v21786_v9 = vand.u32 4294901760, %v15678_v2  ;;  %v16223_v34 = vand.u32 4294901760, %v755_v41  ;;  %v21791_v2 = vand.u32 4294901760, %v21764_v49  ;;  %v752_v49 = vld [vmem:[%s20411_s3 + $0x560] sm:$0xff]  ;;  %v21803_v59 = vand.u32 4294901760, %v15945_v53 }
 0x216   :  { %11494 = vmatpush3.msra.mxu1 %v15559_v61  ;;  %11462 = vmatprep.subr.mxu0 %v21785_v55  ;;  %v21788_v61 = vand.u32 4294901760, %v21758_v47  ;;  %v21795_v47 = vand.u32 4294901760, %v21770_v1  ;;  %v21799_v1 = vand.u32 4294901760, %v21775_v20  ;;  %v766_v20 = vld [vmem:[%s20411_s3 + $0x5d0] sm:$0xff] }
 0x217   :  { %11495 = vmatprep.subr.mxu1 %v15573_v28  ;;  %11463 = vmatpush3.msra.mxu0 %v21786_v9  ;;  %v770_v28 = vld [vmem:[%s20411_s3 + $0x5f0] sm:$0xff]  ;;  %v16252_v14 = vsub.f32 %v755_v41, %v16223_v34  ;;  %v16336_v9 = vand.u32 4294901760, %v751_v8 }
 0x218   :  { %11496 = vmatpush3.msra.mxu1 %v15591_v26  ;;  %11464 = vmatprep.subr.mxu0 %v21787_v15  ;;  %v21789_v26 = vand.u32 4294901760, %v21760_v18  ;;  %v16240_v6 = vand.u32 4294901760, %v770_v28  ;;  %v768_v18 = vld [vmem:[%s20411_s3 + $0x5e0] sm:$0xff]  ;;  %v750_v55 = vld [vmem:[%s20411_s3 + $0x550] sm:$0xff]  ;;  %v765_v15 = vld [vmem:[%s20411_s3 + $0x5c8] sm:$0xff] }
 0x219   :  { %11497 = vmatprep.subr.mxu1 %v21757_v36  ;;  %11465 = vmatpush3.msra.mxu0 %v21788_v61  ;;  %v753_v36 = vld [vmem:[%s20411_s3 + $0x568] sm:$0xff]  ;;  %21806 = vst [vmem:[#allocation19_spill] sm:$0xff] %v16336_v9 }
 0x21a   :  { %11498 = vmatpush3.msra.mxu1 %v21759_v16  ;;  %11466 = vmatprep.subr.mxu0 %v21789_v26  ;;  %v16265_v16 = vand.u32 4294901760, %v769_v12  ;;  %v16284_v42 = vand.u32 4294901760, %v753_v36  ;;  %v749_v26 = vld [vmem:[%s20411_s3 + $0x548] sm:$0xff] }
 0x21b   :  { %11499 = vmatprep.subr.mxu1 %v21761_v60  ;;  %11467 = vmatpush3.msra.mxu0 %v21790_v45  ;;  %v21796_v60 = vand.u32 4294901760, %v21772_v40  ;;  %v21801_v40 = vand.u32 4294901760, %v15913_v63  ;;  %v21809_v45 = vand.u32 4294901760, %v15979_v31 }
 0x21c   :  { %11500 = vmatpush3.msra.mxu1 %v21763_v23  ;;  %11468 = vmatprep.subr.mxu0 %v21791_v2  ;;  %v16275_v23 = vsub.f32 %v770_v28, %v16240_v6  ;;  %21798 = vst [vmem:[#allocation12_spill] sm:$0xff] %v16284_v42  ;;  %v16304_v48 = vsub.f32 %v769_v12, %v16265_v16  ;;  %v16348_v28 = vand.u32 4294901760, %v766_v20  ;;  %v748_v2 = vld [vmem:[%s20411_s3 + $0x540] sm:$0xff]  ;;  %v21812_v12 = vand.u32 4294901760, %v15992_v10  ;;  %v745_v10 = vld [vmem:[%s20411_s3 + $0x528] sm:$0xff] }
 0x21d   :  { %11501 = vmatprep.subr.mxu1 %v21792_v17  ;;  %11469 = vmatpush3.msra.mxu0 %v21793_v56  ;;  %v16334_v41 = vsub.f32 %v753_v36, %v16284_v42  ;;  %v16377_v56 = vand.u32 4294901760, %v765_v15 }
 0x21e   :  { %11502 = vmatpush3.msra.mxu1 %v21767_v0  ;;  %11470 = vmatprep.subr.mxu0 %v21794_v25  ;;  %v20788_v0 = vand.u32 4294901760, %v16252_v14  ;;  %v20786_v63 = vand.u32 4294901760, %v16275_v23  ;;  %21808 = vst [vmem:[#allocation42_spill] sm:$0xff] %v16348_v28  ;;  %v764_v25 = vld [vmem:[%s20411_s3 + $0x5c0] sm:$0xff] }
 0x21f   :  { %11503 = vmatprep.subr.mxu1 %v21769_v21  ;;  %11471 = vmatpush3.msra.mxu0 %v21795_v47  ;;  %v767_v21 = vld [vmem:[%s20411_s3 + $0x5d8] sm:$0xff]  ;;  %21814 = vst [vmem:[#allocation20_spill] sm:$0xff] %v16377_v56  ;;  %v20782_v36 = vand.u32 4294901760, %v16334_v41  ;;  %v16388_v47 = vsub.f32 %v751_v8, %v16336_v9  ;;  %v16410_v8 = vand.u32 4294901760, %v748_v2 }
 0x220   :  { %11504 = vmatpush3.msra.mxu1 %v21771_v43  ;;  %11472 = vmatprep.subr.mxu0 %v21796_v60  ;;  %v16293_v43 = vsub.f32 %v754_v46, %v16257_v11  ;;  %v16320_v22 = vand.u32 4294901760, %v767_v21  ;;  %v16331_v53 = vsub.f32 %v16252_v14, %v20788_v0  ;;  %v16360_v46 = vand.u32 4294901760, %v750_v55  ;;  %v763_v60 = vld [vmem:[%s20411_s3 + $0x5b8] sm:$0xff]  ;;  %v21841_v0 = vld [vmem:[#allocation26_spill] sm:$0xff] }
 0x221   :  { %11505 = vmatprep.subr.mxu1 %v21773_v35  ;;  %11473 = vmatpush3.msra.mxu0 %v21797_v27  ;;  %v16295_v35 = vand.u32 4294901760, %v768_v18  ;;  %v16372_v31 = vsub.f32 %v16275_v23, %v20786_v63  ;;  %21816 = vst [vmem:[#allocation43_spill] sm:$0xff] %v16388_v47  ;;  %v21838_v63 = vld [vmem:[#allocation14_spill] sm:$0xff] }
 0x222   :  { %11506 = vmatpush3.msra.mxu1 %v15732_v39  ;;  %11474 = vmatprep.subr.mxu0 %v21799_v1  ;;  %v16306_v39 = vand.u32 4294901760, %v752_v49  ;;  %21804 = vst [vmem:[#allocation30_spill] sm:$0xff] %v16320_v22  ;;  %21811 = vst [vmem:[#allocation28_spill] sm:$0xff] %v16360_v46  ;;  %v16375_v17 = vsub.f32 %v767_v21, %v16320_v22  ;;  %v16408_v1 = vsub.f32 %v766_v20, %v16348_v28 }
 0x223   :  { %21800 = vst [vmem:[#allocation9_spill] sm:$0xff] %v16295_v35  ;;  %11507 = vmatprep.subr.mxu1 %v15750_v30  ;;  %11475 = vmatpush3.msra.mxu0 %v21801_v40  ;;  %v16317_v30 = vsub.f32 %v16243_v37, %v20789_v19  ;;  %v16346_v61 = vsub.f32 %v768_v18, %v16295_v35  ;;  %v16390_v18 = vand.u32 4294901760, %v749_v26  ;;  %v21821_v40 = vand.u32 4294901760, %v16024_v52 }
 0x224   :  { %21802 = vst [vmem:[#allocation32_spill] sm:$0xff] %v16306_v39  ;;  %11508 = vmatpush3.msra.mxu1 %v15752_v4  ;;  %11476 = vmatprep.subr.mxu0 %v21803_v59  ;;  %v21805_v4 = vand.u32 4294901760, %v15955_v38  ;;  %v20785_v38 = vand.u32 4294901760, %v16293_v43  ;;  %21813 = vst [vmem:[#allocation13_spill] sm:$0xff] %v16375_v17  ;;  %v21824_v20 = vand.u32 4294901760, %v16034_v3  ;;  %v20790_v52 = vand.u32 4294901760, %v16375_v17 }
 0x225   :  { %11509 = vmatprep.subr.mxu1 %v15825_v51  ;;  %v21807_v51 = vand.u32 4294901760, %v15968_v50  ;;  %v16358_v50 = vsub.f32 %v752_v49, %v16306_v39  ;;  %21817 = vst [vmem:[#allocation25_spill] sm:$0xff] %v16390_v18  ;;  %v20783_v21 = vand.u32 4294901760, %v16346_v61  ;;  %21820 = vst [vmem:[#allocation17_spill] sm:$0xff] %v16408_v1  ;;  %v16444_v3 = vsub.f32 %v16334_v41, %v20782_v36 }
 0x226   :  { %11477 = vmatpush3.msra.mxu0 %v21805_v4  ;;  %11510 = vmatpush3.msra.mxu1 %v15850_v7  ;;  %v20784_v7 = vand.u32 4294901760, %v16304_v48  ;;  %v16404_v27 = vsub.f32 %v16293_v43, %v20785_v38  ;;  %v16422_v4 = vsub.f32 %v750_v55, %v16360_v46  ;;  %v21828_v55 = vand.u32 4294901760, %v16042_v33  ;;  %v21837_v38 = vld [vmem:[#allocation6_spill] sm:$0xff]  ;;  %v21843_v33 = vld [vmem:[#allocation39_spill] sm:$0xff] }
 0x227   :  { %11478 = vmatprep.subr.mxu0 %v21807_v51  ;;  %11511 = vmatprep.subr.mxu1 %v15877_v54  ;;  %21810 = vst [vmem:[#allocation34_spill] sm:$0xff] %v16358_v50  ;;  %v5463_v54 = vand.u32 4294901760, %v16317_v30  ;;  %v20787_v59 = vand.u32 4294901760, %v16358_v50  ;;  %v16424_v51 = vand.u32 4294901760, %v764_v25  ;;  %v5365_v19 = vand.u32 4294901760, %v16444_v3 }
 0x228   :  { %11479 = vmatpush3.msra.mxu0 %v21809_v45  ;;  %11512 = vmatpush3.msra.mxu1 %v15894_v57  ;;  %v21815_v57 = vand.u32 4294901760, %v16002_v29  ;;  %v21818_v29 = vld [vmem:[#allocation27_spill] sm:$0xff]  ;;  %21822 = vst [vmem:[#allocation24_spill] sm:$0xff] %v16422_v4  ;;  %v16433_v45 = vand.u32 4294901760, %v763_v60  ;;  %v21845_v30 = vand.u32 4294901760, %v16331_v53  ;;  %v21848_v53 = vand.u32 4294901760, %v16372_v31 }
 0x229   :  { %11480 = vmatprep.subr.mxu0 %v21812_v12  ;;  %11513 = vmatprep.subr.mxu1 %v15915_v24  ;;  %v747_v24 = vld [vmem:[%s20411_s3 + $0x538] sm:$0xff]  ;;  %v21819_v49 = vand.u32 4294901760, %v21818_v29  ;;  %21823 = vst [vmem:[#allocation21_spill] sm:$0xff] %v16424_v51  ;;  %v874_v29 = vcombine.high %v21843_v33, %v21843_v33  ;;  %v744_v33 = vld [vmem:[%s20411_s3 + $0x520] sm:$0xff]  ;;  %v21850_v31 = vand.u32 4294901760, %v16404_v27  ;;  %v758_v27 = vld [vmem:[%s20411_s3 + $0x590] sm:$0xff] }
 0x22a   :  { %11481 = vmatpush3.msra.mxu0 %v21815_v57  ;;  %11514 = vmatpush3.msra.mxu1 %v15934_v5  ;;  %v16418_v5 = vsub.f32 %v16304_v48, %v20784_v7  ;;  %v16435_v12 = vand.u32 4294901760, %v747_v24  ;;  %v21827_v57 = vld [vmem:[#allocation37_spill] sm:$0xff]  ;;  %v20793_v7 = vand.u32 4294901760, %v16422_v4 }
 0x22b   :  { %11482 = vmatprep.subr.mxu0 %v21819_v49  ;;  %11515 = vmatprep.subr.mxu1 %v15947_v32  ;;  %v16431_v32 = vsub.f32 %v765_v15, %v16377_v56  ;;  %v16448_v15 = vsub.f32 %v749_v26, %v16390_v18  ;;  %v21830_v49 = vld [vmem:[#allocation15_spill] sm:$0xff] }
 0x22c   :  { %11483 = vmatpush3.msra.mxu0 %v21821_v40  ;;  %11516 = vmatpush3.msra.mxu1 %v15957_v58  ;;  %21826 = vst [vmem:[#allocation22_spill] sm:$0xff] %v16435_v12  ;;  %v20791_v58 = vand.u32 4294901760, %v16388_v47  ;;  %v21831_v40 = vand.u32 4294901760, %v16057_v13  ;;  %v762_v26 = vld [vmem:[%s20411_s3 + $0x5b0] sm:$0xff]  ;;  %v21834_v13 = vld [vmem:[#allocation33_spill] sm:$0xff] }
 0x22d   :  { %11484 = vmatprep.subr.mxu0 %v21824_v20  ;;  %21825 = vst [vmem:[#allocation18_spill] sm:$0xff] %v16431_v32  ;;  %11517 = vmatprep.subr.mxu1 %v21827_v57  ;;  %21829 = vst [vmem:[#allocation7_spill] sm:$0xff] %v16448_v15  ;;  %v16457_v20 = vsub.f32 %v16346_v61, %v20783_v21  ;;  %v20792_v57 = vand.u32 4294901760, %v16408_v1  ;;  %v16473_v21 = vsub.f32 %v16358_v50, %v20787_v59 }
 0x22e   :  { %11485 = vmatpush3.msra.mxu0 %v21828_v55  ;;  %11518 = vmatpush3.msra.mxu1 %v21830_v49  ;;  %v16461_v55 = vsub.f32 %v748_v2, %v16410_v8  ;;  %v21833_v49 = vld [vmem:[#allocation40_spill] sm:$0xff]  ;;  %v16477_v2 = vsub.f32 %v764_v25, %v16424_v51  ;;  %v16491_v59 = vsub.f32 %v763_v60, %v16433_v45  ;;  %v16505_v36 = vand.u32 4294901760, %v762_v26 }
 0x22f   :  { %11486 = vmatprep.subr.mxu0 %v21831_v40  ;;  %11519 = vmatprep.subr.mxu1 %v21833_v49  ;;  %v21835_v40 = vand.u32 4294901760, %v21834_v13  ;;  %v16484_v49 = vsub.f32 %v16375_v17, %v20790_v52  ;;  %v20794_v13 = vand.u32 4294901760, %v16431_v32  ;;  %v746_v25 = vld [vmem:[%s20411_s3 + $0x530] sm:$0xff]  ;;  %v16502_v52 = vsub.f32 %v16388_v47, %v20791_v58  ;;  %v761_v58 = vld [vmem:[%s20411_s3 + $0x5a8] sm:$0xff]  ;;  %v740_v47 = vld [vmem:[%s20411_s3 + $0x500] sm:$0xff] }
 0x230   :  { %21832 = vst [vmem:[#allocation16_spill] sm:$0xff] %v16461_v55  ;;  %21836 = vst [vmem:[#allocation31_spill] sm:$0xff] %v16477_v2  ;;  %5123 = vmatprep.mubr.f32.mxu0 %v21837_v38  ;;  %11520 = vmatpush3.msra.mxu1 %v21838_v63  ;;  %v21842_v63 = vld [vmem:[#allocation36_spill] sm:$0xff]  ;;  %v5484_v60 = vand.u32 4294901760, %v16457_v20  ;;  %v16527_v20 = vsub.f32 %v16422_v4, %v20793_v7  ;;  %v16530_v3 = vand.u32 4294901760, %v746_v25 }
 0x231   :  { %11487 = vmatpush3.msra.mxu0 %v21835_v40  ;;  %v16488_v40 = vsub.f32 %v747_v24, %v16435_v12  ;;  %21840 = vst [vmem:[#allocation38_spill] sm:$0xff] %v16491_v59  ;;  %11521 = vmatprep.subr.mxu1 %v21842_v63  ;;  %v20795_v24 = vand.u32 4294901760, %v16448_v15  ;;  %v16513_v63 = vsub.f32 %v16408_v1, %v20792_v57  ;;  %v760_v57 = vld [vmem:[%s20411_s3 + $0x5a0] sm:$0xff] }
 0x232   :  { %5125 = vmatmul.mubr.f32.vlgmr.msra.gmra.mxu0 %v21841_v0  ;;  %11526 = vmatprep.subr.mxu0 %v16218_v62  ;;  %v16560_v7 = vsub.f32 %v762_v26, %v16505_v36  ;;  %v759_v26 = vld [vmem:[%s20411_s3 + $0x598] sm:$0xff]  ;;  %v16594_v1 = vand.u32 4294901760, %v760_v57 }
 0x233   :  { %21839 = vst [vmem:[#allocation10_spill] sm:$0xff] %v16488_v40  ;;  %11522 = vmatpush3.msra.mxu1 %v16026_v44  ;;  %5227 = vmatprep.mubr.f32.mxu1 %v21837_v38  ;;  %v5372_v44 = vand.u32 4294901760, %v16473_v21  ;;  %v5491_v38 = vand.u32 4294901760, %v16484_v49  ;;  %v16541_v21 = vsub.f32 %v16431_v32, %v20794_v13  ;;  %v16555_v49 = vsub.f32 %v16448_v15, %v20795_v24  ;;  %v21847_v32 = vld [vmem:[#allocation41_spill] sm:$0xff] }
 0x234   :  { %11527 = vmatpush3.msra.mxu0 %v16223_v34  ;;  %5229 = vmatmul.mubr.f32.vlgmr.msra.gmra.mxu1 %v21841_v0  ;;  %v5379_v0 = vand.u32 4294901760, %v16502_v52  ;;  %v16557_v13 = vand.u32 4294901760, %v761_v58  ;;  %21844 = vst [vmem:[#allocation29_spill] sm:$0xff] %v16560_v7  ;;  %v21846_v52 = vand.u32 4294901760, %v16461_v55  ;;  %v16574_v15 = vand.u32 4294901760, %v745_v10 }
 0x235   :  { %11528 = vmatprep.subr.mxu0 %v16240_v6  ;;  %11561 = vmatprep.subr.mxu1 %v5463_v54  ;;  %v5498_v54 = vand.u32 4294901760, %v16513_v63  ;;  %v16580_v4 = vrot.slane %v874_v29, %v21847_v32  ;;  %v5386_v63 = vand.u32 4294901760, %v16527_v20  ;;  %v743_v29 = vld [vmem:[%s20411_s3 + $0x518] sm:$0xff]  ;;  %v5505_v20 = vand.u32 4294901760, %v16541_v21 }
 0x236   :  { %11529 = vmatpush3.msra.mxu0 %v16257_v11  ;;  %11562 = vmatpush3.msra.mxu1 %v21845_v30  ;;  %v16572_v24 = vsub.f32 %v16461_v55, %v21846_v52  ;;  %v21849_v30 = vand.u32 4294901760, %v16477_v2  ;;  %v16592_v55 = vsub.f32 %v746_v25, %v16530_v3  ;;  %v21852_v25 = vand.u32 4294901760, %v16488_v40 }
 0x237   :  { %11530 = vmatprep.subr.mxu0 %v16265_v16  ;;  %11563 = vmatprep.subr.mxu1 %v21848_v53  ;;  %v21851_v53 = vand.u32 4294901760, %v16491_v59  ;;  %v5393_v21 = vand.u32 4294901760, %v16555_v49  ;;  %v16636_v49 = vand.u32 4294901760, %v743_v29 }
 0x238   :  { %11531 = vmatpush3.msra.mxu0 %v16284_v42  ;;  %v16589_v52 = vsub.f32 %v16477_v2, %v21849_v30  ;;  %11564 = vmatpush3.msra.mxu1 %v21850_v31  ;;  %v16611_v32 = vsub.f32 %v16488_v40, %v21852_v25  ;;  %v16613_v2 = vand.u32 4294901760, %v744_v33  ;;  %v21853_v31 = vand.u32 4294901760, %v16418_v5  ;;  %v742_v40 = vld [vmem:[%s20411_s3 + $0x510] sm:$0xff] }
 0x239   :  { %11532 = vmatprep.subr.mxu0 %v16295_v35  ;;  %v16606_v30 = vsub.f32 %v16491_v59, %v21851_v53  ;;  %v16624_v59 = vsub.f32 %v761_v58, %v16557_v13  ;;  %v16626_v25 = vand.u32 4294901760, %v759_v26  ;;  %v5400_v5 = vand.u32 4294901760, %v16572_v24  ;;  %v757_v58 = vld [vmem:[%s20411_s3 + $0x588] sm:$0xff] }
 0x23a   :  { %11565 = vmatprep.subr.mxu1 %v21853_v31  ;;  %11533 = vmatpush3.msra.mxu0 %v16306_v39  ;;  %v16634_v31 = vsub.f32 %v745_v10, %v16574_v15  ;;  %v890_v53 = vcombine.high %v16580_v4, %v16580_v4  ;;  %v16647_v24 = vsub.f32 %v760_v57, %v16594_v1  ;;  %v16649_v10 = vand.u32 4294901760, %v758_v27  ;;  %v741_v39 = vld [vmem:[%s20411_s3 + $0x508] sm:$0xff]  ;;  %v756_v57 = vld [vmem:[%s20411_s3 + $0x580] sm:$0xff] }
 0x23b   :  { %21854 = vst [vmem:[#allocation35_spill] sm:$0xff] %v16624_v59  ;;  %11566 = vmatpush3.msra.mxu1 %v5365_v19  ;;  %11534 = vmatprep.subr.mxu0 %v16320_v22  ;;  %v5512_v19 = vand.u32 4294901760, %v16589_v52  ;;  %v16658_v52 = vsub.f32 %v744_v33, %v16613_v2  ;;  %v16660_v22 = vand.u32 4294901760, %v742_v40  ;;  %v16673_v33 = vand.u32 4294901760, %v757_v58 }
 0x23c   :  { %11567 = vmatprep.subr.mxu1 %v5484_v60  ;;  %11535 = vmatpush3.msra.mxu0 %v16336_v9  ;;  %v5519_v60 = vand.u32 4294901760, %v16606_v30  ;;  %v5407_v9 = vand.u32 4294901760, %v16611_v32  ;;  %v16671_v32 = vsub.f32 %v759_v26, %v16626_v25  ;;  %v16685_v30 = vand.u32 4294901760, %v890_v53 }
 0x23d   :  { %11568 = vmatpush3.msra.mxu1 %v5372_v44  ;;  %11536 = vmatprep.subr.mxu0 %v16348_v28  ;;  %v21855_v44 = vand.u32 4294901760, %v16560_v7  ;;  %v16705_v26 = vand.u32 4294901760, %v740_v47  ;;  %v21860_v35 = vand.u32 4294901760, %v16624_v59  ;;  %v16713_v17 = vsub.f32 %v757_v58, %v16673_v33 }
 0x23e   :  { %11569 = vmatprep.subr.mxu1 %v5491_v38  ;;  %11537 = vmatpush3.msra.mxu0 %v16360_v46  ;;  %v16681_v46 = vsub.f32 %v743_v29, %v16636_v49  ;;  %21856 = vst [vmem:[#allocation11_spill] sm:$0xff] %v16685_v30  ;;  %v21858_v29 = vand.u32 4294901760, %v16592_v55 }
 0x23f   :  { %v5525_v28 = vsub.f32 %v16560_v7, %v21855_v44  ;;  %11570 = vmatpush3.msra.mxu1 %v5379_v0  ;;  %11538 = vmatprep.subr.mxu0 %v16377_v56  ;;  %v16683_v44 = vand.u32 4294901760, %v741_v39  ;;  %v16690_v7 = vsub.f32 %v758_v27, %v16649_v10  ;;  %v16692_v0 = vand.u32 4294901760, %v756_v57  ;;  %21859 = vst [vmem:[#allocation23_spill] sm:$0xff] %v16705_v26 }
 0x240   :  { %11571 = vmatprep.subr.mxu1 %v5498_v54  ;;  %11539 = vmatpush3.msra.mxu0 %v16390_v18  ;;  %v16695_v56 = vand.u32 4294901760, %v16580_v4  ;;  %v5413_v38 = vsub.f32 %v16592_v55, %v21858_v29  ;;  %v16703_v18 = vsub.f32 %v742_v40, %v16660_v22  ;;  %21861 = vst [vmem:[#allocation27_spill] sm:$0xff] %v16713_v17  ;;  %v21862_v40 = vand.u32 4294901760, %v16634_v31 }
 0x241   :  { %11572 = vmatpush3.msra.mxu1 %v5386_v63  ;;  %11540 = vmatprep.subr.mxu0 %v16424_v51  ;;  %v5526_v27 = vand.u32 4294901760, %v5525_v28  ;;  %v5532_v63 = vsub.f32 %v16624_v59, %v21860_v35  ;;  %v16721_v28 = vsub.f32 %v741_v39, %v16683_v44  ;;  %v16724_v54 = vsub.f32 %v890_v53, %v16685_v30 }
 0x242   :  { %21857 = vst [vmem:[#allocation8_spill] sm:$0xff] %v16695_v56  ;;  %11573 = vmatprep.subr.mxu1 %v5505_v20  ;;  %11541 = vmatpush3.msra.mxu0 %v16410_v8  ;;  %v5420_v29 = vsub.f32 %v16634_v31, %v21862_v40  ;;  %v21864_v35 = vand.u32 4294901760, %v16647_v24  ;;  %v16733_v40 = vsub.f32 %v16580_v4, %v16695_v56  ;;  %v5414_v39 = vand.u32 4294901760, %v5413_v38 }
 0x243   :  { %11574 = vmatpush3.msra.mxu1 %v5393_v21  ;;  %11542 = vmatprep.subr.mxu0 %v16433_v45  ;;  %21863 = vst [vmem:[#allocation37_spill] sm:$0xff] %v16724_v54  ;;  %v16736_v20 = vsub.f32 %v756_v57, %v16692_v0  ;;  %v21865_v53 = vand.u32 4294901760, %v16658_v52  ;;  %v5533_v4 = vand.u32 4294901760, %v5532_v63  ;;  %v21866_v57 = vand.u32 4294901760, %v16671_v32 }
 0x244   :  { %11575 = vmatprep.subr.mxu1 %v5512_v19  ;;  %11543 = vmatpush3.msra.mxu0 %v16435_v12  ;;  %v5539_v21 = vsub.f32 %v16647_v24, %v21864_v35  ;;  %v16744_v35 = vsub.f32 %v740_v47, %v16705_v26  ;;  %v5421_v38 = vand.u32 4294901760, %v5420_v29  ;;  %v21869_v47 = vand.u32 4294901760, %v16703_v18 }
 0x245   :  { %11576 = vmatpush3.msra.mxu1 %v5400_v5  ;;  %11544 = vmatprep.subr.mxu0 %v16505_v36  ;;  %v5427_v19 = vsub.f32 %v16658_v52, %v21865_v53  ;;  %v5546_v5 = vsub.f32 %v16671_v32, %v21866_v57  ;;  %v21867_v53 = vand.u32 4294901760, %v16681_v46  ;;  %v21868_v57 = vand.u32 4294901760, %v16690_v7 }
 0x246   :  { %11577 = vmatprep.subr.mxu1 %v5519_v60  ;;  %11545 = vmatpush3.msra.mxu0 %v16530_v3  ;;  %v5540_v63 = vand.u32 4294901760, %v5539_v21  ;;  %v5441_v60 = vsub.f32 %v16703_v18, %v21869_v47  ;;  %v21872_v47 = vand.u32 4294901760, %v16721_v28 }
 0x247   :  { %11578 = vmatpush3.msra.mxu1 %v5407_v9  ;;  %11546 = vmatprep.subr.mxu0 %v16557_v13  ;;  %v5434_v51 = vsub.f32 %v16681_v46, %v21867_v53  ;;  %v5553_v58 = vsub.f32 %v16690_v7, %v21868_v57  ;;  %v5428_v53 = vand.u32 4294901760, %v5427_v19  ;;  %v5547_v21 = vand.u32 4294901760, %v5546_v5 }
 0x248   :  { %11579 = vmatprep.subr.mxu1 %v5526_v27  ;;  %11547 = vmatpush3.msra.mxu0 %v16574_v15  ;;  %v21870_v57 = vand.u32 4294901760, %v16713_v17  ;;  %v21871_v19 = vand.u32 4294901760, %v16724_v54  ;;  %v5448_v27 = vsub.f32 %v16721_v28, %v21872_v47  ;;  %v21873_v5 = vand.u32 4294901760, %v16733_v40 }
 0x249   :  { %11580 = vmatpush3.msra.mxu1 %v5414_v39  ;;  %11548 = vmatprep.subr.mxu0 %v16594_v1  ;;  %v5435_v39 = vand.u32 4294901760, %v5434_v51 }
 0x24a   :  { %11581 = vmatprep.subr.mxu1 %v5533_v4  ;;  %11549 = vmatpush3.msra.mxu0 %v16613_v2  ;;  %v5560_v9 = vsub.f32 %v16713_v17, %v21870_v57  ;;  %v5333_v29 = vsub.f32 %v16724_v54, %v21871_v19  ;;  %v5554_v4 = vand.u32 4294901760, %v5553_v58  ;;  %v5339_v57 = vsub.f32 %v16733_v40, %v21873_v5 }
 0x24b   :  { %11582 = vmatpush3.msra.mxu1 %v5421_v38  ;;  %11550 = vmatprep.subr.mxu0 %v16626_v25  ;;  %v21874_v38 = vand.u32 4294901760, %v16736_v20  ;;  %v5442_v19 = vand.u32 4294901760, %v5441_v60  ;;  %v21875_v54 = vand.u32 4294901760, %v16744_v35  ;;  %v5449_v5 = vand.u32 4294901760, %v5448_v27  ;;  %v21879_v27 = vld [vmem:[#allocation32_spill] sm:$0xff] }
 0x24c   :  { %11583 = vmatprep.subr.mxu1 %v5540_v63  ;;  %11551 = vmatpush3.msra.mxu0 %v16636_v49  ;;  %v5561_v58 = vand.u32 4294901760, %v5560_v9  ;;  %v5334_v63 = vand.u32 4294901760, %v5333_v29  ;;  %v21877_v9 = vld [vmem:[#allocation9_spill] sm:$0xff]  ;;  %v21878_v29 = vld [vmem:[#allocation43_spill] sm:$0xff] }
 0x24d   :  { %v5567_v51 = vsub.f32 %v16736_v20, %v21874_v38  ;;  %11584 = vmatpush3.msra.mxu1 %v5428_v53  ;;  %11552 = vmatprep.subr.mxu0 %v16649_v10  ;;  %v5455_v47 = vsub.f32 %v16744_v35, %v21875_v54  ;;  %v5340_v53 = vand.u32 4294901760, %v5339_v57  ;;  %v21876_v54 = vld [vmem:[#allocation13_spill] sm:$0xff]  ;;  %v21883_v57 = vld [vmem:[#allocation19_spill] sm:$0xff] }
 0x24e   :  { %11585 = vmatprep.subr.mxu1 %v5547_v21  ;;  %11553 = vmatpush3.msra.mxu0 %v16660_v22  ;;  %v21880_v21 = vld [vmem:[#allocation17_spill] sm:$0xff] }
 0x24f   :  { %11586 = vmatpush3.msra.mxu1 %v5435_v39  ;;  %11554 = vmatprep.subr.mxu0 %v16673_v33  ;;  %v5568_v38 = vand.u32 4294901760, %v5567_v51  ;;  %v5456_v60 = vand.u32 4294901760, %v5455_v47  ;;  %v21881_v39 = vld [vmem:[#allocation30_spill] sm:$0xff] }
 0x250   :  { %11587 = vmatprep.subr.mxu1 %v5554_v4  ;;  %11555 = vmatpush3.msra.mxu0 %v16683_v44  ;;  %v21882_v4 = vld [vmem:[#allocation24_spill] sm:$0xff]  ;;  %v21884_v51 = vld [vmem:[#allocation18_spill] sm:$0xff] }
 0x251   :  { %11588 = vmatpush3.msra.mxu1 %v5442_v19  ;;  %11556 = vmatprep.subr.mxu0 %v16692_v0  ;;  %v61_v19 = vld [vmem:[%s20409_s1 + $0xe0] sm:$0xff] }
 0x252   :  { %11589 = vmatprep.subr.mxu1 %v5561_v58  ;;  %11557 = vmatpush3.msra.mxu0 %v16705_v26  ;;  %v21885_v47 = vld [vmem:[#allocation42_spill] sm:$0xff]  ;;  %v21886_v58 = vld [vmem:[#allocation7_spill] sm:$0xff] }
 0x253   :  { %5335 = vmatprep.mubr.f32.mxu0 %v5334_v63  ;;  %11590 = vmatpush3.msra.mxu1 %v5449_v5  ;;  %v62_v63 = vld [vmem:[%s20409_s1 + $0xe8] sm:$0xff]  ;;  %v63_v5 = vld [vmem:[%s20409_s1 + $0xf0] sm:$0xff] }
 0x254   :  { %5341 = vmatmul.mubr.f32.vlgmr.msra.gmra.mxu0 %v5340_v53  ;;  %11591 = vmatprep.subr.mxu1 %v5568_v38  ;;  %v64_v53 = vld [vmem:[%s20409_s1 + $0xf8] sm:$0xff] }
 0x255   :  { %11596 = vmatprep.subr.mxu0 %v16243_v37  ;;  %11592 = vmatpush3.msra.mxu1 %v5456_v60  ;;  %v21887_v38 = vld [vmem:[#allocation28_spill] sm:$0xff]  ;;  %v21888_v60 = vld [vmem:[#allocation31_spill] sm:$0xff] }
 0x256   :  { %5571 = vmatprep.mubr.f32.mxu1 %v16685_v30  ;;  %11597 = vmatpush3.msra.mxu0 %v16252_v14  ;;  %v21890_v30 = vld [vmem:[#allocation16_spill] sm:$0xff] }
 0x257   :  { %5573 = vmatmul.mubr.f32.vlgmr.msra.gmra.mxu1 %v16695_v56  ;;  %11598 = vmatprep.subr.mxu0 %v16275_v23  ;;  %v21889_v56 = vld [vmem:[#allocation20_spill] sm:$0xff] }
 0x258   :  { %11631 = vmatprep.subr.mxu1 %v16218_v62  ;;  %11599 = vmatpush3.msra.mxu0 %v16293_v43 }
 0x259   :  { %11632 = vmatpush3.msra.mxu1 %v16223_v34  ;;  %11600 = vmatprep.subr.mxu0 %v16304_v48 }
 0x25a   :  { %11633 = vmatprep.subr.mxu1 %v16240_v6  ;;  %11601 = vmatpush3.msra.mxu0 %v16334_v41 }
 0x25b   :  { %11634 = vmatpush3.msra.mxu1 %v16257_v11  ;;  %11602 = vmatprep.subr.mxu0 %v16346_v61 }
 0x25c   :  { %11635 = vmatprep.subr.mxu1 %v16265_v16  ;;  %11603 = vmatpush3.msra.mxu0 %v16358_v50 }
 0x25d   :  { %11636 = vmatpush3.msra.mxu1 %v16284_v42  ;;  %11604 = vmatprep.subr.mxu0 %v21876_v54 }
 0x25e   :  { %11637 = vmatprep.subr.mxu1 %v21877_v9  ;;  %11605 = vmatpush3.msra.mxu0 %v21878_v29 }
 0x25f   :  { %11638 = vmatpush3.msra.mxu1 %v21879_v27  ;;  %11606 = vmatprep.subr.mxu0 %v21880_v21  ;;  %v21895_v21 = vld [vmem:[#allocation29_spill] sm:$0xff] }
 0x260   :  { %11639 = vmatprep.subr.mxu1 %v21881_v39  ;;  %11607 = vmatpush3.msra.mxu0 %v21882_v4  ;;  %v46_v4 = vld [vmem:[%s20409_s1 + $0x68] sm:$0xff]  ;;  %v21893_v39 = vld [vmem:[#allocation21_spill] sm:$0xff] }
 0x261   :  { %11640 = vmatpush3.msra.mxu1 %v21883_v57  ;;  %11608 = vmatprep.subr.mxu0 %v21884_v51  ;;  %v21892_v51 = vld [vmem:[#allocation38_spill] sm:$0xff]  ;;  %v143_v29 = vrot.slane %v46_v4, 4 }
 0x262   :  { %11641 = vmatprep.subr.mxu1 %v21885_v47  ;;  %11609 = vmatpush3.msra.mxu0 %v21886_v58  ;;  %v233_v58 = vrot.slane %v61_v19, 4  ;;  %v21891_v47 = vld [vmem:[#allocation25_spill] sm:$0xff] }
 0x263   :  { %11642 = vmatpush3.msra.mxu1 %v21887_v38  ;;  %11610 = vmatprep.subr.mxu0 %v21888_v60  ;;  %v45_v57 = vld [vmem:[%s20409_s1 + $0x60] sm:$0xff]  ;;  %v47_v60 = vld [vmem:[%s20409_s1 + $0x70] sm:$0xff]  ;;  %v245_v38 = vrot.slane %v63_v5, 4 }
 0x264   :  { %11643 = vmatprep.subr.mxu1 %v21889_v56  ;;  %11611 = vmatpush3.msra.mxu0 %v21890_v30  ;;  %v239_v56 = vrot.slane %v62_v63, 4  ;;  %v251_v30 = vrot.slane %v64_v53, 4  ;;  %v137_v27 = vrot.slane %v45_v57, 4  ;;  %v149_v9 = vrot.slane %v47_v60, 4 }
 0x265   :  { %11644 = vmatpush3.msra.mxu1 %v21891_v47  ;;  %11612 = vmatprep.subr.mxu0 %v21892_v51  ;;  %v21894_v47 = vld [vmem:[#allocation10_spill] sm:$0xff]  ;;  %v48_v51 = vld [vmem:[%s20409_s1 + $0x78] sm:$0xff]  ;;  %v234_v54 = vadd.f32 %v233_v58, %v61_v19  ;;  %v246_v42 = vadd.f32 %v245_v38, %v63_v5  ;;  %v144_v58 = vadd.f32 %v143_v29, %v46_v4 }
 0x266   :  { %11645 = vmatprep.subr.mxu1 %v21893_v39  ;;  %11613 = vmatpush3.msra.mxu0 %v21894_v47  ;;  %v155_v47 = vrot.slane %v48_v51, 4  ;;  %v240_v39 = vadd.f32 %v239_v56, %v62_v63  ;;  %v252_v50 = vadd.f32 %v251_v30, %v64_v53  ;;  %v138_v19 = vadd.f32 %v137_v27, %v45_v57 }
 0x267   :  { %11646 = vmatpush3.msra.mxu1 %v16410_v8  ;;  %11614 = vmatprep.subr.mxu0 %v21895_v21  ;;  %v247_v63 = vrot.slane %v246_v42, 2  ;;  %v145_v29 = vrot.slane %v144_v58, 2 }
 0x268   :  { %11647 = vmatprep.subr.mxu1 %v16433_v45  ;;  %11615 = vmatpush3.msra.mxu0 %v16592_v55  ;;  %v156_v56 = vadd.f32 %v155_v47, %v48_v51  ;;  %v241_v30 = vrot.slane %v240_v39, 2  ;;  %v253_v5 = vrot.slane %v252_v50, 2 }
 0x269   :  { %11648 = vmatpush3.msra.mxu1 %v16435_v12  ;;  %11616 = vmatprep.subr.mxu0 %v16624_v59  ;;  %v150_v12 = vadd.f32 %v149_v9, %v47_v60  ;;  %v235_v59 = vrot.slane %v234_v54, 2  ;;  %v139_v9 = vrot.slane %v138_v19, 2  ;;  %v248_v47 = vadd.f32 %v247_v63, %v246_v42 }
 0x26a   :  { %11649 = vmatprep.subr.mxu1 %v16505_v36  ;;  %11617 = vmatpush3.msra.mxu0 %v16634_v31  ;;  %v157_v57 = vrot.slane %v156_v56, 2  ;;  %v242_v51 = vadd.f32 %v241_v30, %v240_v39  ;;  %v254_v53 = vadd.f32 %v253_v5, %v252_v50  ;;  %v21897_v63 = vand.u32 4294901760, %v16243_v37 }
 0x26b   :  { %11650 = vmatpush3.msra.mxu1 %v16530_v3  ;;  %11618 = vmatprep.subr.mxu0 %v16647_v24  ;;  %v151_v27 = vrot.slane %v150_v12, 2  ;;  %v236_v4 = vadd.f32 %v235_v59, %v234_v54  ;;  %v140_v59 = vadd.f32 %v139_v9, %v138_v19  ;;  %v146_v54 = vadd.f32 %v145_v29, %v144_v58 }
 0x26c   :  { %11651 = vmatprep.subr.mxu1 %v16557_v13  ;;  %11619 = vmatpush3.msra.mxu0 %v16658_v52  ;;  %v158_v42 = vadd.f32 %v157_v57, %v156_v56  ;;  %v243_v50 = vrot.slane %v242_v51, 1  ;;  %v249_v39 = vrot.slane %v248_v47, 1  ;;  %v255_v30 = vrot.slane %v254_v53, 1 }
 0x26d   :  { %11652 = vmatpush3.msra.mxu1 %v16574_v15  ;;  %11620 = vmatprep.subr.mxu0 %v16671_v32  ;;  %v152_v38 = vadd.f32 %v151_v27, %v150_v12  ;;  %v237_v60 = vrot.slane %v236_v4, 1  ;;  %v21899_v19 = vand.u32 4294901760, %v16252_v14  ;;  %v141_v58 = vrot.slane %v140_v59, 1 }
 0x26e   :  { %11653 = vmatprep.subr.mxu1 %v16594_v1  ;;  %11621 = vmatpush3.msra.mxu0 %v16681_v46  ;;  %v147_v56 = vrot.slane %v146_v54, 1  ;;  %v21900_v29 = vand.u32 4294901760, %v16733_v40  ;;  %v21901_v27 = vand.u32 4294901760, %v16275_v23  ;;  %v159_v37 = vrot.slane %v158_v42, 1 }
 0x26f   :  { %11654 = vmatpush3.msra.mxu1 %v16613_v2  ;;  %11622 = vmatprep.subr.mxu0 %v16690_v7  ;;  %v153_v5 = vrot.slane %v152_v38, 1  ;;  %v238_v9 = vadd.f32 %v237_v60, %v236_v4  ;;  %v244_v57 = vadd.f32 %v243_v50, %v242_v51  ;;  %v21903_v14 = vand.u32 4294901760, %v16304_v48  ;;  %v802_v48 = vld [vmem:[%s20411_s3 + $0x6f0] sm:$0xff]  ;;  %v21911_v50 = vld [vmem:[#allocation9_spill] sm:$0xff] }
 0x270   :  { %11655 = vmatprep.subr.mxu1 %v16626_v25  ;;  %11623 = vmatpush3.msra.mxu0 %v16703_v18  ;;  %v21904_v23 = vand.u32 4294901760, %v16334_v41  ;;  %v148_v4 = vadd.f32 %v147_v56, %v146_v54  ;;  %v21908_v54 = vld [vmem:[#allocation12_spill] sm:$0xff] }
 0x271   :  { %11656 = vmatpush3.msra.mxu1 %v16636_v49  ;;  %11624 = vmatprep.subr.mxu0 %v16713_v17  ;;  %v21896_v17 = vld [vmem:[#allocation37_spill] sm:$0xff]  ;;  %v154_v51 = vadd.f32 %v153_v5, %v152_v38 }
 0x272   :  { %11657 = vmatprep.subr.mxu1 %v16649_v10  ;;  %11625 = vmatpush3.msra.mxu0 %v16721_v28  ;;  %v21898_v12 = vand.u32 4294901760, %v21896_v17  ;;  %v21917_v5 = vld [vmem:[#allocation41_spill] sm:$0xff] }
 0x273   :  { %11658 = vmatpush3.msra.mxu1 %v16660_v22  ;;  %11626 = vmatprep.subr.mxu0 %v16736_v20 }
 0x274   :  { %11659 = vmatprep.subr.mxu1 %v16673_v33  ;;  %11627 = vmatpush3.msra.mxu0 %v16744_v35 }
 0x275   :  { %5708 = vmatprep.mubr.f32.mxu0 %v21896_v17  ;;  %11660 = vmatpush3.msra.mxu1 %v16683_v44  ;;  %v21902_v17 = vand.u32 4294901760, %v16293_v43  ;;  %v142_v43 = vadd.f32 %v141_v58, %v140_v59 }
 0x276   :  { %5711 = vmatmul.mubr.f32.vlgmr.msra.gmra.mxu0 %v16733_v40  ;;  %11661 = vmatprep.subr.mxu1 %v16692_v0  ;;  %v803_v40 = vld [vmem:[%s20411_s3 + $0x6f8] sm:$0xff] }
 0x277   :  { %11666 = vmatprep.subr.mxu0 %v21897_v63  ;;  %11662 = vmatpush3.msra.mxu1 %v16705_v26  ;;  %v250_v63 = vadd.f32 %v249_v39, %v248_v47  ;;  %v256_v26 = vadd.f32 %v255_v30, %v254_v53  ;;  %v408_v47 = vcombine.low %v238_v9, %v244_v57  ;;  %v21906_v53 = vld [vmem:[#allocation34_spill] sm:$0xff]  ;;  %v16921_v59 = vand.u32 4294901760, %v803_v40  ;;  %v21912_v39 = vld [vmem:[#allocation43_spill] sm:$0xff] }
 0x278   :  { %5815 = vmatprep.mubr.f32.mxu1 %v21898_v12  ;;  %11667 = vmatpush3.msra.mxu0 %v21899_v19  ;;  %v21907_v60 = vand.u32 4294901760, %v21906_v53  ;;  %v340_v30 = vcombine.low %v142_v43, %v148_v4  ;;  %v21914_v12 = vld [vmem:[#allocation32_spill] sm:$0xff]  ;;  %v21915_v19 = vld [vmem:[#allocation17_spill] sm:$0xff] }
 0x279   :  { %5819 = vmatmul.mubr.f32.vlgmr.msra.gmra.mxu1 %v21900_v29  ;;  %11668 = vmatprep.subr.mxu0 %v21901_v27  ;;  %v409_v41 = vcombine.low %v250_v63, %v256_v26  ;;  %v16931_v26 = vand.u32 4294901760, %v802_v48  ;;  %v21916_v58 = vand.u32 4294901760, %v21915_v19  ;;  %v416_v9 = vrot.slane %v408_v47, %v21917_v5  ;;  %v21918_v27 = vld [vmem:[#allocation30_spill] sm:$0xff]  ;;  %v21927_v53 = vld [vmem:[#allocation28_spill] sm:$0xff] }
 0x27a   :  { %11701 = vmatprep.subr.mxu1 %v16218_v62  ;;  %11669 = vmatpush3.msra.mxu0 %v21902_v17  ;;  %v787_v62 = vld [vmem:[%s20411_s3 + $0x678] sm:$0xff]  ;;  %v16945_v63 = vsub.f32 %v803_v40, %v16921_v59  ;;  %v801_v17 = vld [vmem:[%s20411_s3 + $0x6e8] sm:$0xff]  ;;  %v800_v19 = vld [vmem:[%s20411_s3 + $0x6e0] sm:$0xff] }
 0x27b   :  { %11702 = vmatpush3.msra.mxu1 %v16223_v34  ;;  %11670 = vmatprep.subr.mxu0 %v21903_v14  ;;  %v21905_v34 = vand.u32 4294901760, %v16346_v61  ;;  %v16926_v61 = vand.u32 4294901760, %v787_v62  ;;  %v423_v29 = vrot.slane %v409_v41, %v21917_v5  ;;  %v21921_v14 = vld [vmem:[#allocation19_spill] sm:$0xff]  ;;  %v16962_v40 = vsub.f32 %v802_v48, %v16931_v26  ;;  %v21931_v48 = vld [vmem:[#allocation16_spill] sm:$0xff] }
 0x27c   :  { %11703 = vmatprep.subr.mxu1 %v16240_v6  ;;  %11671 = vmatpush3.msra.mxu0 %v21904_v23  ;;  %v160_v6 = vadd.f32 %v159_v37, %v158_v42  ;;  %v21913_v42 = vand.u32 4294901760, %v21912_v39  ;;  %v21919_v37 = vld [vmem:[#allocation24_spill] sm:$0xff]  ;;  %v21922_v23 = vld [vmem:[#allocation18_spill] sm:$0xff] }
 0x27d   :  { %11704 = vmatpush3.msra.mxu1 %v16257_v11  ;;  %11672 = vmatprep.subr.mxu0 %v21905_v34  ;;  %v21909_v11 = vld [vmem:[#allocation13_spill] sm:$0xff]  ;;  %v21920_v57 = vand.u32 4294901760, %v21919_v37  ;;  %v21923_v43 = vand.u32 4294901760, %v21922_v23  ;;  %v16954_v4 = vsub.f32 %v787_v62, %v16926_v61  ;;  %v21924_v34 = vld [vmem:[#allocation42_spill] sm:$0xff]  ;;  %v16970_v62 = vand.u32 4294901760, %v801_v17  ;;  %v21930_v39 = vld [vmem:[#allocation20_spill] sm:$0xff] }
 0x27e   :  { %11705 = vmatprep.subr.mxu1 %v16265_v16  ;;  %11673 = vmatpush3.msra.mxu0 %v21907_v60  ;;  %v21910_v38 = vand.u32 4294901760, %v21909_v11  ;;  %v786_v16 = vld [vmem:[%s20411_s3 + $0x670] sm:$0xff]  ;;  %v341_v56 = vcombine.low %v154_v51, %v160_v6  ;;  %v785_v41 = vld [vmem:[%s20411_s3 + $0x668] sm:$0xff]  ;;  %v348_v11 = vrot.slane %v340_v30, %v21917_v5 }
 0x27f   :  { %11706 = vmatpush3.msra.mxu1 %v21908_v54  ;;  %v16956_v51 = vand.u32 4294901760, %v786_v16  ;;  %v21925_v6 = vld [vmem:[#allocation7_spill] sm:$0xff]  ;;  %v21937_v23 = vld [vmem:[#allocation10_spill] sm:$0xff] }
 0x280   :  { %11674 = vmatprep.subr.mxu0 %v21910_v38  ;;  %11707 = vmatprep.subr.mxu1 %v21911_v50  ;;  %v21926_v47 = vand.u32 4294901760, %v21925_v6  ;;  %v21928_v60 = vld [vmem:[#allocation31_spill] sm:$0xff]  ;;  %v355_v38 = vrot.slane %v341_v56, %v21917_v5  ;;  %v424_v50 = vcombine.low %v416_v9, %v423_v29  ;;  %v20850_v56 = vand.u32 4294901760, %v16954_v4  ;;  %v784_v29 = vld [vmem:[%s20411_s3 + $0x660] sm:$0xff] }
 0x281   :  { %11675 = vmatpush3.msra.mxu0 %v21913_v42  ;;  %11708 = vmatpush3.msra.mxu1 %v21914_v12  ;;  %v21929_v54 = vand.u32 4294901760, %v21928_v60  ;;  %v21932_v42 = vand.u32 4294901760, %v21931_v48  ;;  %v20852_v12 = vand.u32 4294901760, %v16945_v63  ;;  %v16985_v30 = vsub.f32 %v786_v16, %v16956_v51 }
 0x282   :  { %11676 = vmatprep.subr.mxu0 %v21916_v58  ;;  %11709 = vmatprep.subr.mxu1 %v21918_v27  ;;  %v21933_v58 = vld [vmem:[#allocation25_spill] sm:$0xff]  ;;  %v21934_v27 = vld [vmem:[#allocation38_spill] sm:$0xff]  ;;  %v16988_v9 = vand.u32 4294901760, %v785_v41  ;;  %v20849_v16 = vand.u32 4294901760, %v16962_v40  ;;  %v17003_v6 = vand.u32 4294901760, %v800_v19  ;;  %v356_v60 = vcombine.low %v348_v11, %v355_v38  ;;  %v798_v11 = vld [vmem:[%s20411_s3 + $0x6d0] sm:$0xff] }
 0x283   :  { %11677 = vmatpush3.msra.mxu0 %v21920_v57  ;;  %11710 = vmatpush3.msra.mxu1 %v21921_v14  ;;  %v21935_v37 = vand.u32 4294901760, %v21934_v27  ;;  %v799_v57 = vld [vmem:[%s20411_s3 + $0x6d8] sm:$0xff]  ;;  %v21944_v38 = vld [vmem:[#allocation22_spill] sm:$0xff]  ;;  %v21947_v27 = vand.u32 4294901760, %v16634_v31 }
 0x284   :  { %11678 = vmatprep.subr.mxu0 %v21923_v43  ;;  %11711 = vmatprep.subr.mxu1 %v21924_v34  ;;  %v21936_v14 = vld [vmem:[#allocation21_spill] sm:$0xff]  ;;  %v21938_v43 = vand.u32 4294901760, %v21937_v23  ;;  %v21939_v34 = vand.u32 4294901760, %v21895_v21  ;;  %21940 = vst [vmem:[#allocation15_spill] sm:$0xff] %v17003_v6  ;;  %v17021_v21 = vand.u32 4294901760, %v784_v29  ;;  %v17037_v48 = vsub.f32 %v785_v41, %v16988_v9  ;;  %v797_v41 = vld [vmem:[%s20411_s3 + $0x6c8] sm:$0xff] }
 0x285   :  { %11679 = vmatpush3.msra.mxu0 %v21926_v47  ;;  %11712 = vmatpush3.msra.mxu1 %v21927_v53  ;;  %v17006_v47 = vsub.f32 %v801_v17, %v16970_v62  ;;  %v783_v53 = vld [vmem:[%s20411_s3 + $0x658] sm:$0xff]  ;;  %v17023_v17 = vand.u32 4294901760, %v799_v57  ;;  %v21949_v23 = vand.u32 4294901760, %v16647_v24  ;;  %v17061_v31 = vsub.f32 %v800_v19, %v17003_v6 }
 0x286   :  { %11680 = vmatprep.subr.mxu0 %v21929_v54  ;;  %11713 = vmatprep.subr.mxu1 %v21930_v39  ;;  %v17011_v54 = vrot.slane %v424_v50, 7  ;;  %v21941_v39 = vand.u32 4294901760, %v16592_v55  ;;  %21942 = vst [vmem:[#allocation40_spill] sm:$0xff] %v17021_v21  ;;  %v21945_v50 = vld [vmem:[#allocation35_spill] sm:$0xff]  ;;  %v17034_v55 = vsub.f32 %v16954_v4, %v20850_v56 }
 0x287   :  { %11681 = vmatpush3.msra.mxu0 %v21932_v42  ;;  %11714 = vmatpush3.msra.mxu1 %v21933_v58  ;;  %21943 = vst [vmem:[#allocation33_spill] sm:$0xff] %v17023_v17  ;;  %v20848_v42 = vand.u32 4294901760, %v16985_v30  ;;  %v782_v58 = vld [vmem:[%s20411_s3 + $0x650] sm:$0xff]  ;;  %v17078_v19 = vsub.f32 %v799_v57, %v17023_v17  ;;  %v20853_v57 = vand.u32 4294901760, %v17037_v48 }
 0x288   :  { %11682 = vmatprep.subr.mxu0 %v21935_v37  ;;  %11715 = vmatprep.subr.mxu1 %v21936_v14  ;;  %v17049_v37 = vsub.f32 %v16962_v40, %v20849_v16  ;;  %v17051_v14 = vand.u32 4294901760, %v783_v53 }
 0x289   :  { %11683 = vmatpush3.msra.mxu0 %v21938_v43  ;;  %11716 = vmatpush3.msra.mxu1 %v16410_v8  ;;  %v17019_v8 = vsub.f32 %v16945_v63, %v20852_v12  ;;  %v17063_v43 = vand.u32 4294901760, %v798_v11  ;;  %21952 = vst [vmem:[#allocation26_spill] sm:$0xff] %v17078_v19 }
 0x28a   :  { %11684 = vmatprep.subr.mxu0 %v21939_v34  ;;  %11717 = vmatprep.subr.mxu1 %v16433_v45  ;;  %v21946_v45 = vand.u32 4294901760, %v21945_v50  ;;  %21948 = vst [vmem:[#allocation6_spill] sm:$0xff] %v17051_v14  ;;  %v781_v34 = vld [vmem:[%s20411_s3 + $0x648] sm:$0xff]  ;;  %v17080_v50 = vand.u32 4294901760, %v782_v58 }
 0x28b   :  { %11685 = vmatpush3.msra.mxu0 %v21941_v39  ;;  %11718 = vmatpush3.msra.mxu1 %v21944_v38  ;;  %21950 = vst [vmem:[#allocation14_spill] sm:$0xff] %v17063_v43  ;;  %v455_v39 = vsel %vm430_vm0, %v17011_v54, %v356_v60  ;;  %v6325_v24 = vand.u32 4294901760, %v17019_v8  ;;  %v17075_v38 = vsub.f32 %v784_v29, %v17021_v21  ;;  %v17095_v60 = vand.u32 4294901760, %v797_v41 }
 0x28c   :  { %11686 = vmatprep.subr.mxu0 %v21946_v45  ;;  %11719 = vmatprep.subr.mxu1 %v16505_v36  ;;  %v20851_v36 = vand.u32 4294901760, %v17006_v47  ;;  %21953 = vst [vmem:[#allocation36_spill] sm:$0xff] %v17080_v50  ;;  %v780_v45 = vld [vmem:[%s20411_s3 + $0x640] sm:$0xff]  ;;  %v17092_v29 = vsub.f32 %v16985_v30, %v20848_v42  ;;  %v779_v42 = vld [vmem:[%s20411_s3 + $0x638] sm:$0xff]  ;;  %v17127_v16 = vsub.f32 %v798_v11, %v17063_v43  ;;  %v21964_v11 = vld [vmem:[#allocation27_spill] sm:$0xff]  ;;  %v21981_v8 = vand.u32 4294901760, %v17034_v55 }
 0x28d   :  { %11687 = vmatpush3.msra.mxu0 %v21947_v27  ;;  %11720 = vmatpush3.msra.mxu1 %v16530_v3  ;;  %v21951_v3 = vand.u32 4294901760, %v16658_v52  ;;  %21955 = vst [vmem:[#allocation39_spill] sm:$0xff] %v17095_v60  ;;  %v796_v27 = vld [vmem:[%s20411_s3 + $0x6c0] sm:$0xff]  ;;  %v17129_v56 = vand.u32 4294901760, %v780_v45  ;;  %v21965_v12 = vand.u32 4294901760, %v21964_v11  ;;  %v21983_v55 = vand.u32 4294901760, %v17049_v37 }
 0x28e   :  { %11688 = vmatprep.subr.mxu0 %v21949_v23  ;;  %11721 = vmatprep.subr.mxu1 %v16557_v13  ;;  %v21954_v13 = vand.u32 4294901760, %v16671_v32  ;;  %v17105_v23 = vsub.f32 %v783_v53, %v17051_v14  ;;  %v17123_v53 = vsub.f32 %v17006_v47, %v20851_v36  ;;  %21960 = vst [vmem:[#allocation34_spill] sm:$0xff] %v17127_v16  ;;  %v17139_v36 = vand.u32 4294901760, %v796_v27 }
 0x28f   :  { %11689 = vmatpush3.msra.mxu0 %v21951_v3  ;;  %11722 = vmatpush3.msra.mxu1 %v16574_v15  ;;  %v21956_v15 = vand.u32 4294901760, %v16681_v46  ;;  %v17107_v3 = vand.u32 4294901760, %v781_v34  ;;  %v21959_v46 = vand.u32 4294901760, %v16690_v7  ;;  %v20856_v7 = vand.u32 4294901760, %v17075_v38 }
 0x290   :  { %11690 = vmatprep.subr.mxu0 %v21954_v13  ;;  %11723 = vmatprep.subr.mxu1 %v16594_v1  ;;  %21957 = vst [vmem:[#allocation29_spill] sm:$0xff] %v17105_v23  ;;  %v795_v13 = vld [vmem:[%s20411_s3 + $0x6b8] sm:$0xff]  ;;  %v456_v1 = vsel %vm432_vm1, %v17011_v54, %v455_v39  ;;  %v21961_v39 = vand.u32 4294901760, %v16703_v18  ;;  %21963 = vst [vmem:[#allocation13_spill] sm:$0xff] %v17139_v36  ;;  %v17145_v32 = vsub.f32 %v797_v41, %v17095_v60 }
 0x291   :  { %11691 = vmatpush3.msra.mxu0 %v21956_v15  ;;  %21958 = vst [vmem:[#allocation37_spill] sm:$0xff] %v17107_v3  ;;  %11724 = vmatpush3.msra.mxu1 %v16613_v2  ;;  %v20854_v15 = vand.u32 4294901760, %v17061_v31  ;;  %v20855_v2 = vand.u32 4294901760, %v17078_v19  ;;  %v17149_v18 = vand.u32 4294901760, %v779_v42  ;;  %v20857_v41 = vand.u32 4294901760, %v17105_v23 }
 0x292   :  { %11692 = vmatprep.subr.mxu0 %v21959_v46  ;;  %11725 = vmatprep.subr.mxu1 %v16626_v25  ;;  %v17137_v46 = vsub.f32 %v782_v58, %v17080_v50  ;;  %21966 = vst [vmem:[#allocation9_spill] sm:$0xff] %v17145_v32  ;;  %v17147_v25 = vand.u32 4294901760, %v795_v13  ;;  %v21967_v58 = vand.u32 4294901760, %v16721_v28  ;;  %v17164_v11 = vsub.f32 %v781_v34, %v17107_v3  ;;  %v794_v34 = vld [vmem:[%s20411_s3 + $0x6b0] sm:$0xff] }
 0x293   :  { %11693 = vmatpush3.msra.mxu0 %v21961_v39  ;;  %11726 = vmatpush3.msra.mxu1 %v16636_v49  ;;  %v457_v39 = vsel %vm434_vm2, %v17011_v54, %v456_v1  ;;  %v21969_v1 = vand.u32 4294901760, %v16736_v20  ;;  %v17173_v28 = vsub.f32 %v17061_v31, %v20854_v15  ;;  %v17188_v20 = vsub.f32 %v17075_v38, %v20856_v7 }
 0x294   :  { %21962 = vst [vmem:[#allocation12_spill] sm:$0xff] %v17137_v46  ;;  %11694 = vmatprep.subr.mxu0 %v21965_v12  ;;  %11727 = vmatprep.subr.mxu1 %v16649_v10  ;;  %v17160_v12 = vsub.f32 %v17037_v48, %v20853_v57  ;;  %21968 = vst [vmem:[#allocation43_spill] sm:$0xff] %v17164_v11  ;;  %v17177_v57 = vsub.f32 %v780_v45, %v17129_v56  ;;  %v21973_v10 = vld [vmem:[#allocation11_spill] sm:$0xff]  ;;  %v17222_v7 = vand.u32 4294901760, %v794_v34 }
 0x295   :  { %11695 = vmatpush3.msra.mxu0 %v21967_v58  ;;  %11728 = vmatpush3.msra.mxu1 %v16660_v22  ;;  %v20858_v58 = vand.u32 4294901760, %v17127_v16  ;;  %v21971_v22 = vand.u32 4294901760, %v16744_v35  ;;  %v17192_v15 = vsub.f32 %v796_v27, %v17139_v36  ;;  %v458_v45 = vsel %vm436_vm3, %v17011_v54, %v457_v39  ;;  %v778_v54 = vld [vmem:[%s20411_s3 + $0x630] sm:$0xff] }
 0x296   :  { %11696 = vmatprep.subr.mxu0 %v21969_v1  ;;  %21970 = vst [vmem:[#allocation32_spill] sm:$0xff] %v17177_v57  ;;  %11729 = vmatprep.subr.mxu1 %v16673_v33  ;;  %v20859_v1 = vand.u32 4294901760, %v17137_v46  ;;  %v17201_v33 = vsub.f32 %v17078_v19, %v20855_v2  ;;  %v20860_v35 = vand.u32 4294901760, %v17145_v32  ;;  %v17208_v27 = vsub.f32 %v795_v13, %v17147_v25  ;;  %v21976_v39 = vld [vmem:[#allocation8_spill] sm:$0xff]  ;;  %v21977_v13 = vld [vmem:[#allocation23_spill] sm:$0xff] }
 0x297   :  { %11697 = vmatpush3.msra.mxu0 %v21971_v22  ;;  %21972 = vst [vmem:[#allocation17_spill] sm:$0xff] %v17192_v15  ;;  %5985 = vmatprep.mubr.f32.mxu0 %v21973_v10  ;;  %v17205_v22 = vsub.f32 %v779_v42, %v17149_v18  ;;  %v17219_v2 = vsub.f32 %v17105_v23, %v20857_v41  ;;  %v6346_v49 = vand.u32 4294901760, %v17173_v28  ;;  %v793_v41 = vld [vmem:[%s20411_s3 + $0x6a8] sm:$0xff]  ;;  %v17236_v52 = vmul.f32 0.125, %v458_v45  ;;  %v792_v42 = vld [vmem:[%s20411_s3 + $0x6a0] sm:$0xff] }
 0x298   :  { %11730 = vmatpush3.msra.mxu1 %v16683_v44  ;;  %21975 = vst [vmem:[#allocation24_spill] sm:$0xff] %v17208_v27  ;;  %5987 = vmatmul.mubr.f32.vlgmr.msra.gmra.mxu0 %v21976_v39  ;;  %v6227_v44 = vand.u32 4294901760, %v17160_v12  ;;  %v17244_v28 = vsub.f32 %v17137_v46, %v20859_v1  ;;  %v17247_v12 = vand.u32 4294901760, %v778_v54  ;;  %v777_v45 = vld [vmem:[%s20411_s3 + $0x628] sm:$0xff]  ;;  %v776_v1 = vld [vmem:[%s20411_s3 + $0x620] sm:$0xff]  ;;  %v21985_v37 = vand.u32 4294901760, %v17092_v29 }
 0x299   :  { %21974 = vst [vmem:[#allocation30_spill] sm:$0xff] %v17205_v22  ;;  %11731 = vmatprep.subr.mxu1 %v16692_v0  ;;  %11736 = vmatprep.subr.mxu0 %v16921_v59  ;;  %v17230_v0 = vsub.f32 %v17127_v16, %v20858_v58  ;;  %21978 = vst [vmem:[#allocation19_spill] sm:$0xff] %v17236_v52  ;;  %v17277_v58 = vsub.f32 %v794_v34, %v17222_v7  ;;  %v791_v34 = vld [vmem:[%s20411_s3 + $0x698] sm:$0xff]  ;;  %v17312_v16 = vand.u32 4294901760, %v792_v42  ;;  %v790_v29 = vld [vmem:[%s20411_s3 + $0x690] sm:$0xff] }
 0x29a   :  { %11732 = vmatpush3.msra.mxu1 %v21977_v13  ;;  %6089 = vmatprep.mubr.f32.mxu1 %v21973_v10  ;;  %v6234_v13 = vand.u32 4294901760, %v17188_v20  ;;  %v6353_v10 = vand.u32 4294901760, %v17201_v33  ;;  %v17258_v20 = vsub.f32 %v17145_v32, %v20860_v35  ;;  %v6241_v33 = vand.u32 4294901760, %v17219_v2  ;;  %v772_v23 = vld [vmem:[%s20411_s3 + $0x600] sm:$0xff] }
 0x29b   :  { %11737 = vmatpush3.msra.mxu0 %v16926_v61  ;;  %6091 = vmatmul.mubr.f32.vlgmr.msra.gmra.mxu1 %v21976_v39  ;;  %v21979_v39 = vand.u32 4294901760, %v17164_v11  ;;  %v17274_v32 = vand.u32 4294901760, %v793_v41  ;;  %21980 = vst [vmem:[#allocation18_spill] sm:$0xff] %v17277_v58  ;;  %v21982_v2 = vand.u32 4294901760, %v17177_v57  ;;  %v17298_v46 = vrot.slane %v17236_v52, %v21917_v5  ;;  %v775_v5 = vld [vmem:[%s20411_s3 + $0x618] sm:$0xff] }
 0x29c   :  { %11738 = vmatprep.subr.mxu0 %v16931_v26  ;;  %11771 = vmatprep.subr.mxu1 %v6325_v24  ;;  %v6360_v24 = vand.u32 4294901760, %v17230_v0  ;;  %v6248_v0 = vand.u32 4294901760, %v17244_v28  ;;  %v6367_v28 = vand.u32 4294901760, %v17258_v20 }
 0x29d   :  { %11739 = vmatpush3.msra.mxu0 %v16956_v51  ;;  %v17272_v35 = vsub.f32 %v17164_v11, %v21979_v39  ;;  %11772 = vmatpush3.msra.mxu1 %v21981_v8  ;;  %v17289_v39 = vsub.f32 %v17177_v57, %v21982_v2  ;;  %v17291_v11 = vand.u32 4294901760, %v777_v45  ;;  %v21984_v8 = vand.u32 4294901760, %v17192_v15 }
 0x29e   :  { %11740 = vmatprep.subr.mxu0 %v16970_v62  ;;  %11773 = vmatprep.subr.mxu1 %v21983_v55  ;;  %v17310_v57 = vsub.f32 %v778_v54, %v17247_v12  ;;  %v21986_v55 = vand.u32 4294901760, %v17208_v27  ;;  %v21987_v54 = vand.u32 4294901760, %v17205_v22 }
 0x29f   :  { %11741 = vmatpush3.msra.mxu0 %v16988_v9  ;;  %v17307_v2 = vsub.f32 %v17192_v15, %v21984_v8  ;;  %11774 = vmatpush3.msra.mxu1 %v21985_v37  ;;  %v17331_v15 = vand.u32 4294901760, %v776_v1  ;;  %v21988_v37 = vand.u32 4294901760, %v17123_v53  ;;  %v6255_v20 = vand.u32 4294901760, %v17272_v35 }
 0x2a0   :  { %11742 = vmatprep.subr.mxu0 %v17003_v6  ;;  %v17324_v8 = vsub.f32 %v17208_v27, %v21986_v55  ;;  %v17329_v52 = vsub.f32 %v17205_v22, %v21987_v54  ;;  %v17342_v27 = vsub.f32 %v793_v41, %v17274_v32  ;;  %v17344_v54 = vand.u32 4294901760, %v791_v34  ;;  %v774_v22 = vld [vmem:[%s20411_s3 + $0x610] sm:$0xff]  ;;  %v789_v41 = vld [vmem:[%s20411_s3 + $0x688] sm:$0xff] }
 0x2a1   :  { %11775 = vmatprep.subr.mxu1 %v21988_v37  ;;  %11743 = vmatpush3.msra.mxu0 %v17021_v21  ;;  %v6262_v53 = vand.u32 4294901760, %v17289_v39  ;;  %v17352_v37 = vsub.f32 %v777_v45, %v17291_v11  ;;  %v17354_v35 = vand.u32 4294901760, %v775_v5  ;;  %v906_v55 = vcombine.high %v17298_v46, %v17298_v46  ;;  %v773_v21 = vld [vmem:[%s20411_s3 + $0x608] sm:$0xff] }
 0x2a2   :  { %11776 = vmatpush3.msra.mxu1 %v6227_v44  ;;  %11744 = vmatprep.subr.mxu0 %v17023_v17  ;;  %v6374_v44 = vand.u32 4294901760, %v17307_v2  ;;  %v17365_v39 = vsub.f32 %v792_v42, %v17312_v16  ;;  %v17367_v45 = vand.u32 4294901760, %v790_v29  ;;  %v17376_v2 = vsub.f32 %v776_v1, %v17331_v15  ;;  %v788_v42 = vld [vmem:[%s20411_s3 + $0x680] sm:$0xff] }
 0x2a3   :  { %11777 = vmatprep.subr.mxu1 %v6346_v49  ;;  %11745 = vmatpush3.msra.mxu0 %v17051_v14  ;;  %v6381_v49 = vand.u32 4294901760, %v17324_v8  ;;  %v6269_v14 = vand.u32 4294901760, %v17329_v52  ;;  %v17378_v17 = vand.u32 4294901760, %v774_v22  ;;  %v17389_v52 = vsub.f32 %v791_v34, %v17344_v54 }
 0x2a4   :  { %21989 = vst [vmem:[#allocation42_spill] sm:$0xff] %v17367_v45  ;;  %11778 = vmatpush3.msra.mxu1 %v6234_v13  ;;  %11746 = vmatprep.subr.mxu0 %v17063_v43  ;;  %v21991_v13 = vand.u32 4294901760, %v17277_v58  ;;  %v17391_v1 = vand.u32 4294901760, %v789_v41  ;;  %v17403_v8 = vand.u32 4294901760, %v906_v55  ;;  %v17423_v34 = vand.u32 4294901760, %v772_v23 }
 0x2a5   :  { %21990 = vst [vmem:[#allocation7_spill] sm:$0xff] %v17378_v17  ;;  %11779 = vmatprep.subr.mxu1 %v6353_v10  ;;  %11747 = vmatpush3.msra.mxu0 %v17080_v50  ;;  %v17399_v50 = vsub.f32 %v775_v5, %v17354_v35  ;;  %v21998_v5 = vand.u32 4294901760, %v17310_v57  ;;  %v21999_v6 = vand.u32 4294901760, %v17342_v27 }
 0x2a6   :  { %v6387_v43 = vsub.f32 %v17277_v58, %v21991_v13  ;;  %21992 = vst [vmem:[#allocation28_spill] sm:$0xff] %v17391_v1  ;;  %11780 = vmatpush3.msra.mxu1 %v6241_v33  ;;  %11748 = vmatprep.subr.mxu0 %v17095_v60  ;;  %v17401_v13 = vand.u32 4294901760, %v773_v21  ;;  %21994 = vst [vmem:[#allocation20_spill] sm:$0xff] %v17403_v8  ;;  %v17408_v58 = vsub.f32 %v790_v29, %v17367_v45 }
 0x2a7   :  { %11781 = vmatprep.subr.mxu1 %v6360_v24  ;;  %11749 = vmatpush3.msra.mxu0 %v17107_v3  ;;  %v17410_v33 = vand.u32 4294901760, %v788_v42  ;;  %v17413_v60 = vand.u32 4294901760, %v17298_v46  ;;  %v6275_v10 = vsub.f32 %v17310_v57, %v21998_v5  ;;  %v17421_v3 = vsub.f32 %v774_v22, %v17378_v17 }
 0x2a8   :  { %21993 = vst [vmem:[#allocation31_spill] sm:$0xff] %v17401_v13  ;;  %21995 = vst [vmem:[#allocation16_spill] sm:$0xff] %v17408_v58  ;;  %11782 = vmatpush3.msra.mxu1 %v6248_v0  ;;  %11750 = vmatprep.subr.mxu0 %v17139_v36  ;;  %v6388_v29 = vand.u32 4294901760, %v6387_v43  ;;  %v6394_v0 = vsub.f32 %v17342_v27, %v21999_v6  ;;  %v17431_v19 = vsub.f32 %v789_v41, %v17391_v1 }
 0x2a9   :  { %21996 = vst [vmem:[#allocation25_spill] sm:$0xff] %v17410_v33  ;;  %21997 = vst [vmem:[#allocation38_spill] sm:$0xff] %v17413_v60  ;;  %11783 = vmatprep.subr.mxu1 %v6367_v28  ;;  %11751 = vmatpush3.msra.mxu0 %v17129_v56  ;;  %v22000_v22 = vand.u32 4294901760, %v17352_v37  ;;  %v17439_v43 = vsub.f32 %v773_v21, %v17401_v13  ;;  %v17442_v24 = vsub.f32 %v906_v55, %v17403_v8 }
 0x2aa   :  { %11784 = vmatpush3.msra.mxu1 %v6255_v20  ;;  %11752 = vmatprep.subr.mxu0 %v17147_v25  ;;  %v22002_v6 = vand.u32 4294901760, %v17365_v39  ;;  %v17454_v28 = vsub.f32 %v788_v42, %v17410_v33  ;;  %v6276_v21 = vand.u32 4294901760, %v6275_v10  ;;  %v22003_v55 = vand.u32 4294901760, %v17376_v2 }
 0x2ab   :  { %v6282_v5 = vsub.f32 %v17352_v37, %v22000_v22  ;;  %22001 = vst [vmem:[#allocation21_spill] sm:$0xff] %v17442_v24  ;;  %11785 = vmatprep.subr.mxu1 %v6374_v44  ;;  %11753 = vmatpush3.msra.mxu0 %v17149_v18  ;;  %v17451_v22 = vsub.f32 %v17298_v46, %v17413_v60  ;;  %v6395_v46 = vand.u32 4294901760, %v6394_v0  ;;  %v22005_v42 = vand.u32 4294901760, %v17389_v52 }
 0x2ac   :  { %v6401_v20 = vsub.f32 %v17365_v39, %v22002_v6  ;;  %11786 = vmatpush3.msra.mxu1 %v6262_v53  ;;  %11754 = vmatprep.subr.mxu0 %v17222_v7  ;;  %v6289_v44 = vsub.f32 %v17376_v2, %v22003_v55  ;;  %v17462_v6 = vsub.f32 %v772_v23, %v17423_v34  ;;  %v22006_v55 = vand.u32 4294901760, %v17399_v50 }
 0x2ad   :  { %11787 = vmatprep.subr.mxu1 %v6381_v49  ;;  %11755 = vmatpush3.msra.mxu0 %v17247_v12  ;;  %v6408_v53 = vsub.f32 %v17389_v52, %v22005_v42  ;;  %v6283_v10 = vand.u32 4294901760, %v6282_v5  ;;  %v22007_v42 = vand.u32 4294901760, %v17408_v58  ;;  %v22008_v23 = vand.u32 4294901760, %v17421_v3 }
 0x2ae   :  { %22004 = vst [vmem:[#allocation10_spill] sm:$0xff] %v17462_v6  ;;  %11788 = vmatpush3.msra.mxu1 %v6269_v14  ;;  %11756 = vmatprep.subr.mxu0 %v17274_v32  ;;  %v6296_v36 = vsub.f32 %v17399_v50, %v22006_v55  ;;  %v6402_v0 = vand.u32 4294901760, %v6401_v20  ;;  %v6290_v55 = vand.u32 4294901760, %v6289_v44  ;;  %v22010_v44 = vand.u32 4294901760, %v17442_v24 }
 0x2af   :  { %11789 = vmatprep.subr.mxu1 %v6388_v29  ;;  %11757 = vmatpush3.msra.mxu0 %v17291_v11  ;;  %v6415_v41 = vsub.f32 %v17408_v58, %v22007_v42  ;;  %v6303_v49 = vsub.f32 %v17421_v3, %v22008_v23  ;;  %v6409_v20 = vand.u32 4294901760, %v6408_v53  ;;  %v22009_v42 = vand.u32 4294901760, %v17431_v19 }
 0x2b0   :  { %11790 = vmatpush3.msra.mxu1 %v6276_v21  ;;  %11758 = vmatprep.subr.mxu0 %v17312_v16  ;;  %v6297_v21 = vand.u32 4294901760, %v6296_v36  ;;  %v6195_v5 = vsub.f32 %v17442_v24, %v22010_v44  ;;  %v22011_v23 = vand.u32 4294901760, %v17439_v43  ;;  %v22012_v53 = vand.u32 4294901760, %v17451_v22 }
 0x2b1   :  { %11791 = vmatprep.subr.mxu1 %v6395_v46  ;;  %11759 = vmatpush3.msra.mxu0 %v17331_v15  ;;  %v6422_v14 = vsub.f32 %v17431_v19, %v22009_v42  ;;  %v6416_v46 = vand.u32 4294901760, %v6415_v41  ;;  %v6304_v44 = vand.u32 4294901760, %v6303_v49  ;;  %v22014_v24 = vand.u32 4294901760, %v17462_v6 }
 0x2b2   :  { %11792 = vmatpush3.msra.mxu1 %v6283_v10  ;;  %11760 = vmatprep.subr.mxu0 %v17344_v54  ;;  %v6310_v29 = vsub.f32 %v17439_v43, %v22011_v23  ;;  %v6201_v42 = vsub.f32 %v17451_v22, %v22012_v53  ;;  %v22013_v10 = vand.u32 4294901760, %v17454_v28 }
 0x2b3   :  { %11793 = vmatprep.subr.mxu1 %v6402_v0  ;;  %11761 = vmatpush3.msra.mxu0 %v17354_v35  ;;  %v6317_v23 = vsub.f32 %v17462_v6, %v22014_v24  ;;  %v6423_v41 = vand.u32 4294901760, %v6422_v14  ;;  %v6196_v0 = vand.u32 4294901760, %v6195_v5  ;;  %v22015_v24 = vld [vmem:[#allocation26_spill] sm:$0xff]  ;;  %v22016_v14 = vld [vmem:[#allocation15_spill] sm:$0xff]  ;;  %v22017_v5 = vld [vmem:[#allocation29_spill] sm:$0xff] }
 0x2b4   :  { %v6429_v36 = vsub.f32 %v17454_v28, %v22013_v10  ;;  %11794 = vmatpush3.msra.mxu1 %v6290_v55  ;;  %11762 = vmatprep.subr.mxu0 %v17367_v45  ;;  %v6311_v53 = vand.u32 4294901760, %v6310_v29  ;;  %v6202_v55 = vand.u32 4294901760, %v6201_v42  ;;  %v22018_v29 = vld [vmem:[#allocation40_spill] sm:$0xff]  ;;  %v22022_v42 = vld [vmem:[#allocation6_spill] sm:$0xff] }
 0x2b5   :  { %11795 = vmatprep.subr.mxu1 %v6409_v20  ;;  %11763 = vmatpush3.msra.mxu0 %v17378_v17  ;;  %v6318_v49 = vand.u32 4294901760, %v6317_v23  ;;  %v22019_v20 = vld [vmem:[#allocation34_spill] sm:$0xff]  ;;  %v22025_v23 = vld [vmem:[#allocation43_spill] sm:$0xff] }
 0x2b6   :  { %11796 = vmatpush3.msra.mxu1 %v6297_v21  ;;  %11764 = vmatprep.subr.mxu0 %v17391_v1  ;;  %v6430_v10 = vand.u32 4294901760, %v6429_v36  ;;  %v22020_v21 = vld [vmem:[#allocation33_spill] sm:$0xff] }
 0x2b7   :  { %11797 = vmatprep.subr.mxu1 %v6416_v46  ;;  %11765 = vmatpush3.msra.mxu0 %v17401_v13  ;;  %v22021_v46 = vld [vmem:[#allocation12_spill] sm:$0xff]  ;;  %v22023_v36 = vld [vmem:[#allocation9_spill] sm:$0xff] }
 0x2b8   :  { %11798 = vmatpush3.msra.mxu1 %v6304_v44  ;;  %11766 = vmatprep.subr.mxu0 %v17410_v33  ;;  %v22024_v44 = vld [vmem:[#allocation14_spill] sm:$0xff] }
 0x2b9   :  { %11799 = vmatprep.subr.mxu1 %v6423_v41  ;;  %11767 = vmatpush3.msra.mxu0 %v17423_v34  ;;  %v22026_v41 = vld [vmem:[#allocation36_spill] sm:$0xff] }
 0x2ba   :  { %6197 = vmatprep.mubr.f32.mxu0 %v6196_v0  ;;  %11800 = vmatpush3.msra.mxu1 %v6311_v53  ;;  %v22027_v0 = vld [vmem:[#allocation17_spill] sm:$0xff]  ;;  %v22028_v53 = vld [vmem:[#allocation39_spill] sm:$0xff] }
 0x2bb   :  { %6203 = vmatmul.mubr.f32.vlgmr.msra.gmra.mxu0 %v6202_v55  ;;  %11801 = vmatprep.subr.mxu1 %v6430_v10  ;;  %v22029_v55 = vld [vmem:[#allocation32_spill] sm:$0xff]  ;;  %v22030_v10 = vld [vmem:[#allocation37_spill] sm:$0xff] }
 0x2bc   :  { %11806 = vmatprep.subr.mxu0 %v16945_v63  ;;  %11802 = vmatpush3.msra.mxu1 %v6318_v49  ;;  %v22031_v49 = vld [vmem:[#allocation24_spill] sm:$0xff] }
 0x2bd   :  { %6433 = vmatprep.mubr.f32.mxu1 %v17403_v8  ;;  %11807 = vmatpush3.msra.mxu0 %v16954_v4  ;;  %v22033_v8 = vld [vmem:[#allocation30_spill] sm:$0xff] }
 0x2be   :  { %6435 = vmatmul.mubr.f32.vlgmr.msra.gmra.mxu1 %v17413_v60  ;;  %11808 = vmatprep.subr.mxu0 %v16962_v40  ;;  %v22032_v60 = vld [vmem:[#allocation13_spill] sm:$0xff] }
 0x2bf   :  { %11841 = vmatprep.subr.mxu1 %v16921_v59  ;;  %11809 = vmatpush3.msra.mxu0 %v16985_v30 }
 0x2c0   :  { %11842 = vmatpush3.msra.mxu1 %v16926_v61  ;;  %11810 = vmatprep.subr.mxu0 %v17006_v47 }
 0x2c1   :  { %11843 = vmatprep.subr.mxu1 %v16931_v26  ;;  %11811 = vmatpush3.msra.mxu0 %v17037_v48 }
 0x2c2   :  { %11844 = vmatpush3.msra.mxu1 %v16956_v51  ;;  %11812 = vmatprep.subr.mxu0 %v17061_v31 }
 0x2c3   :  { %11845 = vmatprep.subr.mxu1 %v16970_v62  ;;  %11813 = vmatpush3.msra.mxu0 %v17075_v38 }
 0x2c4   :  { %11846 = vmatpush3.msra.mxu1 %v16988_v9  ;;  %11814 = vmatprep.subr.mxu0 %v22015_v24 }
 0x2c5   :  { %11847 = vmatprep.subr.mxu1 %v22016_v14  ;;  %11815 = vmatpush3.msra.mxu0 %v22017_v5 }
 0x2c6   :  { %11848 = vmatpush3.msra.mxu1 %v22018_v29  ;;  %11816 = vmatprep.subr.mxu0 %v22019_v20 }
 0x2c7   :  { %11849 = vmatprep.subr.mxu1 %v22020_v21  ;;  %11817 = vmatpush3.msra.mxu0 %v22021_v46 }
 0x2c8   :  { %11850 = vmatpush3.msra.mxu1 %v22022_v42  ;;  %11818 = vmatprep.subr.mxu0 %v22023_v36 }
 0x2c9   :  { %11851 = vmatprep.subr.mxu1 %v22024_v44  ;;  %11819 = vmatpush3.msra.mxu0 %v22025_v23  ;;  %v22034_v44 = vld [vmem:[#allocation18_spill] sm:$0xff] }
 0x2ca   :  { %11852 = vmatpush3.msra.mxu1 %v22026_v41  ;;  %11820 = vmatprep.subr.mxu0 %v22027_v0 }
 0x2cb   :  { %11853 = vmatprep.subr.mxu1 %v22028_v53  ;;  %11821 = vmatpush3.msra.mxu0 %v22029_v55 }
 0x2cc   :  { %11854 = vmatpush3.msra.mxu1 %v22030_v10  ;;  %11822 = vmatprep.subr.mxu0 %v22031_v49 }
 0x2cd   :  { %11855 = vmatprep.subr.mxu1 %v22032_v60  ;;  %11823 = vmatpush3.msra.mxu0 %v22033_v8 }
 0x2ce   :  { %11856 = vmatpush3.msra.mxu1 %v17129_v56  ;;  %11824 = vmatprep.subr.mxu0 %v22034_v44 }
 0x2cf   :  { %11857 = vmatprep.subr.mxu1 %v17147_v25  ;;  %11825 = vmatpush3.msra.mxu0 %v17310_v57 }
 0x2d0   :  { %11858 = vmatpush3.msra.mxu1 %v17149_v18  ;;  %11826 = vmatprep.subr.mxu0 %v17342_v27 }
 0x2d1   :  { %11859 = vmatprep.subr.mxu1 %v17222_v7  ;;  %11827 = vmatpush3.msra.mxu0 %v17352_v37 }
 0x2d2   :  { %11860 = vmatpush3.msra.mxu1 %v17247_v12  ;;  %11828 = vmatprep.subr.mxu0 %v17365_v39 }
 0x2d3   :  { %11861 = vmatprep.subr.mxu1 %v17274_v32  ;;  %11829 = vmatpush3.msra.mxu0 %v17376_v2 }
 0x2d4   :  { %11862 = vmatpush3.msra.mxu1 %v17291_v11  ;;  %11830 = vmatprep.subr.mxu0 %v17389_v52 }
 0x2d5   :  { %11863 = vmatprep.subr.mxu1 %v17312_v16  ;;  %11831 = vmatpush3.msra.mxu0 %v17399_v50 }
 0x2d6   :  { %11864 = vmatpush3.msra.mxu1 %v17331_v15  ;;  %11832 = vmatprep.subr.mxu0 %v17408_v58  ;;  %v22035_v58 = vld [vmem:[#allocation21_spill] sm:$0xff] }
 0x2d7   :  { %11865 = vmatprep.subr.mxu1 %v17344_v54  ;;  %11833 = vmatpush3.msra.mxu0 %v17421_v3 }
 0x2d8   :  { %11866 = vmatpush3.msra.mxu1 %v17354_v35  ;;  %11834 = vmatprep.subr.mxu0 %v17431_v19 }
 0x2d9   :  { %11867 = vmatprep.subr.mxu1 %v17367_v45  ;;  %11835 = vmatpush3.msra.mxu0 %v17439_v43  ;;  %v22036_v45 = vand.u32 4294901760, %v16945_v63  ;;  %v22042_v63 = vand.u32 4294901760, %v17006_v47 }
 0x2da   :  { %11868 = vmatpush3.msra.mxu1 %v17378_v17  ;;  %11836 = vmatprep.subr.mxu0 %v17454_v28  ;;  %v22037_v17 = vand.u32 4294901760, %v22035_v58 }
 0x2db   :  { %11869 = vmatprep.subr.mxu1 %v17391_v1  ;;  %11837 = vmatpush3.msra.mxu0 %v17462_v6  ;;  %v22038_v1 = vand.u32 4294901760, %v16954_v4  ;;  %v22039_v6 = vand.u32 4294901760, %v17451_v22  ;;  %v22043_v4 = vand.u32 4294901760, %v17037_v48  ;;  %v22049_v48 = vand.u32 4294901760, %v22021_v46 }
 0x2dc   :  { %6570 = vmatprep.mubr.f32.mxu0 %v22035_v58  ;;  %11870 = vmatpush3.msra.mxu1 %v17401_v13  ;;  %v22040_v13 = vand.u32 4294901760, %v16962_v40  ;;  %v835_v40 = vld [vmem:[%s20411_s3 + $0x7f8] sm:$0xff] }
 0x2dd   :  { %6573 = vmatmul.mubr.f32.vlgmr.msra.gmra.mxu0 %v17451_v22  ;;  %11871 = vmatprep.subr.mxu1 %v17410_v33  ;;  %v22041_v33 = vand.u32 4294901760, %v16985_v30  ;;  %v22046_v30 = vand.u32 4294901760, %v22015_v24  ;;  %v17615_v47 = vand.u32 4294901760, %v835_v40 }
 0x2de   :  { %11876 = vmatprep.subr.mxu0 %v22036_v45  ;;  %11872 = vmatpush3.msra.mxu1 %v17423_v34 }
 0x2df   :  { %6677 = vmatprep.mubr.f32.mxu1 %v22037_v17  ;;  %11877 = vmatpush3.msra.mxu0 %v22038_v1  ;;  %v17640_v45 = vsub.f32 %v835_v40, %v17615_v47  ;;  %v833_v1 = vld [vmem:[%s20411_s3 + $0x7e8] sm:$0xff] }
 0x2e0   :  { %6681 = vmatmul.mubr.f32.vlgmr.msra.gmra.mxu1 %v22039_v6  ;;  %11878 = vmatprep.subr.mxu0 %v22040_v13  ;;  %v22051_v13 = vld [vmem:[#allocation14_spill] sm:$0xff]  ;;  %v22053_v6 = vand.u32 4294901760, %v22027_v0 }
 0x2e1   :  { %11911 = vmatprep.subr.mxu1 %v16921_v59  ;;  %11879 = vmatpush3.msra.mxu0 %v22041_v33  ;;  %v22044_v59 = vand.u32 4294901760, %v17061_v31  ;;  %v818_v31 = vld [vmem:[%s20411_s3 + $0x770] sm:$0xff]  ;;  %v22052_v33 = vand.u32 4294901760, %v22025_v23  ;;  %v20923_v46 = vand.u32 4294901760, %v17640_v45  ;;  %v22056_v23 = vand.u32 4294901760, %v22033_v8  ;;  %v815_v8 = vld [vmem:[%s20411_s3 + $0x758] sm:$0xff] }
 0x2e2   :  { %11912 = vmatpush3.msra.mxu1 %v16926_v61  ;;  %11880 = vmatprep.subr.mxu0 %v22042_v63  ;;  %v819_v61 = vld [vmem:[%s20411_s3 + $0x778] sm:$0xff]  ;;  %v17654_v24 = vand.u32 4294901760, %v818_v31 }
 0x2e3   :  { %11913 = vmatprep.subr.mxu1 %v16931_v26  ;;  %11881 = vmatpush3.msra.mxu0 %v22043_v4  ;;  %v22045_v26 = vand.u32 4294901760, %v17075_v38  ;;  %v17620_v17 = vand.u32 4294901760, %v819_v61  ;;  %v22050_v38 = vand.u32 4294901760, %v22023_v36  ;;  %v816_v36 = vld [vmem:[%s20411_s3 + $0x760] sm:$0xff]  ;;  %v22061_v4 = vand.u32 4294901760, %v17342_v27 }
 0x2e4   :  { %11914 = vmatpush3.msra.mxu1 %v16956_v51  ;;  %11882 = vmatprep.subr.mxu0 %v22044_v59  ;;  %v22047_v51 = vand.u32 4294901760, %v22017_v5  ;;  %v22054_v5 = vand.u32 4294901760, %v22029_v55  ;;  %v22057_v55 = vand.u32 4294901760, %v22034_v44  ;;  %v830_v44 = vld [vmem:[%s20411_s3 + $0x7d0] sm:$0xff] }
 0x2e5   :  { %11915 = vmatprep.subr.mxu1 %v16970_v62  ;;  %11883 = vmatpush3.msra.mxu0 %v22045_v26  ;;  %v834_v62 = vld [vmem:[%s20411_s3 + $0x7f0] sm:$0xff]  ;;  %v17649_v22 = vsub.f32 %v819_v61, %v17620_v17  ;;  %v17733_v26 = vand.u32 4294901760, %v815_v8 }
 0x2e6   :  { %11916 = vmatpush3.msra.mxu1 %v16988_v9  ;;  %11884 = vmatprep.subr.mxu0 %v22046_v30  ;;  %v22048_v9 = vand.u32 4294901760, %v22019_v20  ;;  %v17637_v58 = vand.u32 4294901760, %v834_v62  ;;  %v832_v20 = vld [vmem:[%s20411_s3 + $0x7e0] sm:$0xff]  ;;  %v814_v59 = vld [vmem:[%s20411_s3 + $0x750] sm:$0xff]  ;;  %v829_v30 = vld [vmem:[%s20411_s3 + $0x7c8] sm:$0xff] }
 0x2e7   :  { %11917 = vmatprep.subr.mxu1 %v22016_v14  ;;  %11885 = vmatpush3.msra.mxu0 %v22047_v51  ;;  %v817_v14 = vld [vmem:[%s20411_s3 + $0x768] sm:$0xff]  ;;  %22064 = vst [vmem:[#allocation11_spill] sm:$0xff] %v17733_v26 }
 0x2e8   :  { %11918 = vmatpush3.msra.mxu1 %v22018_v29  ;;  %11886 = vmatprep.subr.mxu0 %v22048_v9  ;;  %v17662_v29 = vand.u32 4294901760, %v833_v1  ;;  %v17681_v0 = vand.u32 4294901760, %v817_v14  ;;  %v813_v9 = vld [vmem:[%s20411_s3 + $0x748] sm:$0xff] }
 0x2e9   :  { %11919 = vmatprep.subr.mxu1 %v22020_v21  ;;  %11887 = vmatpush3.msra.mxu0 %v22049_v48  ;;  %v22055_v21 = vand.u32 4294901760, %v22031_v49  ;;  %v22059_v49 = vand.u32 4294901760, %v17310_v57  ;;  %v22067_v48 = vand.u32 4294901760, %v17376_v2 }
 0x2ea   :  { %11920 = vmatpush3.msra.mxu1 %v22022_v42  ;;  %11888 = vmatprep.subr.mxu0 %v22050_v38  ;;  %v17672_v42 = vsub.f32 %v834_v62, %v17637_v58  ;;  %v17701_v63 = vsub.f32 %v833_v1, %v17662_v29  ;;  %v17731_v61 = vsub.f32 %v817_v14, %v17681_v0  ;;  %v17745_v62 = vand.u32 4294901760, %v830_v44  ;;  %v812_v38 = vld [vmem:[%s20411_s3 + $0x740] sm:$0xff] }
 0x2eb   :  { %11921 = vmatprep.subr.mxu1 %v22051_v13  ;;  %11889 = vmatpush3.msra.mxu0 %v22052_v33  ;;  %v22069_v1 = vand.u32 4294901760, %v17389_v52  ;;  %v17774_v33 = vand.u32 4294901760, %v829_v30  ;;  %v809_v52 = vld [vmem:[%s20411_s3 + $0x728] sm:$0xff] }
 0x2ec   :  { %11922 = vmatpush3.msra.mxu1 %v22026_v41  ;;  %11890 = vmatprep.subr.mxu0 %v22053_v6  ;;  %v20922_v41 = vand.u32 4294901760, %v17649_v22  ;;  %v20920_v57 = vand.u32 4294901760, %v17672_v42  ;;  %22066 = vst [vmem:[#allocation8_spill] sm:$0xff] %v17745_v62  ;;  %v828_v6 = vld [vmem:[%s20411_s3 + $0x7c0] sm:$0xff]  ;;  %v20916_v14 = vand.u32 4294901760, %v17731_v61 }
 0x2ed   :  { %11923 = vmatprep.subr.mxu1 %v22028_v53  ;;  %11891 = vmatpush3.msra.mxu0 %v22054_v5  ;;  %v831_v53 = vld [vmem:[%s20411_s3 + $0x7d8] sm:$0xff]  ;;  %22071 = vst [vmem:[#allocation15_spill] sm:$0xff] %v17774_v33  ;;  %v17785_v5 = vsub.f32 %v815_v8, %v17733_v26  ;;  %v17807_v8 = vand.u32 4294901760, %v812_v38 }
 0x2ee   :  { %11924 = vmatpush3.msra.mxu1 %v22030_v10  ;;  %11892 = vmatprep.subr.mxu0 %v22055_v21  ;;  %v17690_v10 = vsub.f32 %v818_v31, %v17654_v24  ;;  %v17717_v40 = vand.u32 4294901760, %v831_v53  ;;  %v17728_v27 = vsub.f32 %v17649_v22, %v20922_v41  ;;  %v17757_v31 = vand.u32 4294901760, %v814_v59  ;;  %v827_v21 = vld [vmem:[%s20411_s3 + $0x7b8] sm:$0xff]  ;;  %v22097_v41 = vld [vmem:[#allocation38_spill] sm:$0xff] }
 0x2ef   :  { %11925 = vmatprep.subr.mxu1 %v22032_v60  ;;  %11893 = vmatpush3.msra.mxu0 %v22056_v23  ;;  %v17692_v60 = vand.u32 4294901760, %v832_v20  ;;  %v17769_v2 = vsub.f32 %v17672_v42, %v20920_v57  ;;  %22073 = vst [vmem:[#allocation29_spill] sm:$0xff] %v17785_v5  ;;  %v22094_v57 = vld [vmem:[#allocation31_spill] sm:$0xff] }
 0x2f0   :  { %11926 = vmatpush3.msra.mxu1 %v17129_v56  ;;  %11894 = vmatprep.subr.mxu0 %v22057_v55  ;;  %v17703_v56 = vand.u32 4294901760, %v816_v36  ;;  %22062 = vst [vmem:[#allocation27_spill] sm:$0xff] %v17717_v40  ;;  %22068 = vst [vmem:[#allocation23_spill] sm:$0xff] %v17757_v31  ;;  %v17772_v13 = vsub.f32 %v831_v53, %v17717_v40  ;;  %v17805_v55 = vsub.f32 %v830_v44, %v17745_v62 }
 0x2f1   :  { %22058 = vst [vmem:[#allocation22_spill] sm:$0xff] %v17692_v60  ;;  %11927 = vmatprep.subr.mxu1 %v17147_v25  ;;  %11895 = vmatpush3.msra.mxu0 %v22059_v49  ;;  %v17714_v25 = vsub.f32 %v17640_v45, %v20923_v46  ;;  %v17743_v51 = vsub.f32 %v832_v20, %v17692_v60  ;;  %v17787_v20 = vand.u32 4294901760, %v813_v9  ;;  %v22078_v49 = vand.u32 4294901760, %v17421_v3 }
 0x2f2   :  { %22060 = vst [vmem:[#allocation35_spill] sm:$0xff] %v17703_v56  ;;  %11928 = vmatpush3.msra.mxu1 %v17149_v18  ;;  %11896 = vmatprep.subr.mxu0 %v22061_v4  ;;  %v22063_v18 = vand.u32 4294901760, %v17352_v37  ;;  %v20919_v37 = vand.u32 4294901760, %v17690_v10  ;;  %22070 = vst [vmem:[#allocation26_spill] sm:$0xff] %v17772_v13  ;;  %v22081_v44 = vand.u32 4294901760, %v17431_v19  ;;  %v20924_v3 = vand.u32 4294901760, %v17772_v13 }
 0x2f3   :  { %11929 = vmatprep.subr.mxu1 %v17222_v7  ;;  %v22065_v7 = vand.u32 4294901760, %v17365_v39  ;;  %v17755_v39 = vsub.f32 %v816_v36, %v17703_v56  ;;  %22074 = vst [vmem:[#allocation40_spill] sm:$0xff] %v17787_v20  ;;  %v20917_v53 = vand.u32 4294901760, %v17743_v51  ;;  %22077 = vst [vmem:[#allocation34_spill] sm:$0xff] %v17805_v55  ;;  %v17841_v19 = vsub.f32 %v17731_v61, %v20916_v14 }
 0x2f4   :  { %11897 = vmatpush3.msra.mxu0 %v22063_v18  ;;  %11930 = vmatpush3.msra.mxu1 %v17247_v12  ;;  %v20918_v12 = vand.u32 4294901760, %v17701_v63  ;;  %v17801_v23 = vsub.f32 %v17690_v10, %v20919_v37  ;;  %v17819_v18 = vsub.f32 %v814_v59, %v17757_v31  ;;  %v22084_v59 = vand.u32 4294901760, %v17439_v43  ;;  %v22093_v37 = vld [vmem:[#allocation20_spill] sm:$0xff]  ;;  %v22099_v43 = vld [vmem:[#allocation19_spill] sm:$0xff] }
 0x2f5   :  { %11898 = vmatprep.subr.mxu0 %v22065_v7  ;;  %11931 = vmatprep.subr.mxu1 %v17274_v32  ;;  %v7187_v32 = vand.u32 4294901760, %v17714_v25  ;;  %v20921_v4 = vand.u32 4294901760, %v17755_v39  ;;  %v17821_v7 = vand.u32 4294901760, %v828_v6  ;;  %v7089_v46 = vand.u32 4294901760, %v17841_v19 }
 0x2f6   :  { %11899 = vmatpush3.msra.mxu0 %v22067_v48  ;;  %11932 = vmatpush3.msra.mxu1 %v17291_v11  ;;  %v22072_v11 = vand.u32 4294901760, %v17399_v50  ;;  %v22075_v50 = vld [vmem:[#allocation16_spill] sm:$0xff]  ;;  %22079 = vst [vmem:[#allocation33_spill] sm:$0xff] %v17819_v18  ;;  %v17830_v48 = vand.u32 4294901760, %v827_v21  ;;  %v22101_v25 = vand.u32 4294901760, %v17728_v27  ;;  %v22104_v27 = vand.u32 4294901760, %v17769_v2 }
 0x2f7   :  { %11900 = vmatprep.subr.mxu0 %v22069_v1  ;;  %11933 = vmatprep.subr.mxu1 %v17312_v16  ;;  %v811_v16 = vld [vmem:[%s20411_s3 + $0x738] sm:$0xff]  ;;  %v22076_v36 = vand.u32 4294901760, %v22075_v50  ;;  %22080 = vst [vmem:[#allocation12_spill] sm:$0xff] %v17821_v7  ;;  %v891_v50 = vcombine.high %v22099_v43, %v22099_v43  ;;  %v808_v43 = vld [vmem:[%s20411_s3 + $0x720] sm:$0xff]  ;;  %v22106_v2 = vand.u32 4294901760, %v17801_v23  ;;  %v822_v23 = vld [vmem:[%s20411_s3 + $0x790] sm:$0xff] }
 0x2f8   :  { %11901 = vmatpush3.msra.mxu0 %v22072_v11  ;;  %11934 = vmatpush3.msra.mxu1 %v17331_v15  ;;  %v17815_v15 = vsub.f32 %v17701_v63, %v20918_v12  ;;  %v17832_v1 = vand.u32 4294901760, %v811_v16  ;;  %v22083_v11 = vld [vmem:[#allocation42_spill] sm:$0xff]  ;;  %v20927_v12 = vand.u32 4294901760, %v17819_v18 }
 0x2f9   :  { %11902 = vmatprep.subr.mxu0 %v22076_v36  ;;  %11935 = vmatprep.subr.mxu1 %v17344_v54  ;;  %v17828_v54 = vsub.f32 %v829_v30, %v17774_v33  ;;  %v17845_v30 = vsub.f32 %v813_v9, %v17787_v20  ;;  %v22086_v36 = vld [vmem:[#allocation7_spill] sm:$0xff] }
 0x2fa   :  { %11903 = vmatpush3.msra.mxu0 %v22078_v49  ;;  %11936 = vmatpush3.msra.mxu1 %v17354_v35  ;;  %v20925_v35 = vand.u32 4294901760, %v17785_v5  ;;  %v22087_v49 = vand.u32 4294901760, %v17454_v28  ;;  %v826_v9 = vld [vmem:[%s20411_s3 + $0x7b0] sm:$0xff]  ;;  %v22090_v28 = vld [vmem:[#allocation10_spill] sm:$0xff] }
 0x2fb   :  { %11904 = vmatprep.subr.mxu0 %v22081_v44  ;;  %22082 = vst [vmem:[#allocation6_spill] sm:$0xff] %v17828_v54  ;;  %11937 = vmatprep.subr.mxu1 %v22083_v11  ;;  %22085 = vst [vmem:[#allocation9_spill] sm:$0xff] %v17845_v30  ;;  %v17854_v44 = vsub.f32 %v17743_v51, %v20917_v53  ;;  %v20926_v11 = vand.u32 4294901760, %v17805_v55  ;;  %v17870_v53 = vsub.f32 %v17755_v39, %v20921_v4 }
 0x2fc   :  { %11905 = vmatpush3.msra.mxu0 %v22084_v59  ;;  %11938 = vmatpush3.msra.mxu1 %v22086_v36  ;;  %v17858_v59 = vsub.f32 %v812_v38, %v17807_v8  ;;  %v22089_v36 = vld [vmem:[#allocation28_spill] sm:$0xff]  ;;  %v17874_v38 = vsub.f32 %v828_v6, %v17821_v7  ;;  %v17888_v4 = vsub.f32 %v827_v21, %v17830_v48  ;;  %v17902_v14 = vand.u32 4294901760, %v826_v9 }
 0x2fd   :  { %11906 = vmatprep.subr.mxu0 %v22087_v49  ;;  %11939 = vmatprep.subr.mxu1 %v22089_v36  ;;  %v22091_v49 = vand.u32 4294901760, %v22090_v28  ;;  %v17881_v36 = vsub.f32 %v17772_v13, %v20924_v3  ;;  %v20928_v28 = vand.u32 4294901760, %v17828_v54  ;;  %v810_v6 = vld [vmem:[%s20411_s3 + $0x730] sm:$0xff]  ;;  %v17899_v3 = vsub.f32 %v17785_v5, %v20925_v35  ;;  %v825_v35 = vld [vmem:[%s20411_s3 + $0x7a8] sm:$0xff]  ;;  %v804_v5 = vld [vmem:[%s20411_s3 + $0x700] sm:$0xff] }
 0x2fe   :  { %22088 = vst [vmem:[#allocation43_spill] sm:$0xff] %v17858_v59  ;;  %22092 = vst [vmem:[#allocation36_spill] sm:$0xff] %v17874_v38  ;;  %6847 = vmatprep.mubr.f32.mxu0 %v22093_v37  ;;  %11940 = vmatpush3.msra.mxu1 %v22094_v57  ;;  %v22098_v57 = vld [vmem:[#allocation25_spill] sm:$0xff]  ;;  %v7208_v21 = vand.u32 4294901760, %v17854_v44  ;;  %v17924_v44 = vsub.f32 %v17819_v18, %v20927_v12  ;;  %v17927_v19 = vand.u32 4294901760, %v810_v6 }
 0x2ff   :  { %11907 = vmatpush3.msra.mxu0 %v22091_v49  ;;  %v17885_v49 = vsub.f32 %v811_v16, %v17832_v1  ;;  %22096 = vst [vmem:[#allocation39_spill] sm:$0xff] %v17888_v4  ;;  %11941 = vmatprep.subr.mxu1 %v22098_v57  ;;  %v20929_v16 = vand.u32 4294901760, %v17845_v30  ;;  %v17910_v57 = vsub.f32 %v17805_v55, %v20926_v11  ;;  %v824_v11 = vld [vmem:[%s20411_s3 + $0x7a0] sm:$0xff] }
 0x300   :  { %6849 = vmatmul.mubr.f32.vlgmr.msra.gmra.mxu0 %v22097_v41  ;;  %11946 = vmatprep.subr.mxu0 %v17615_v47  ;;  %v17957_v12 = vsub.f32 %v826_v9, %v17902_v14  ;;  %v823_v9 = vld [vmem:[%s20411_s3 + $0x798] sm:$0xff]  ;;  %v17991_v55 = vand.u32 4294901760, %v824_v11 }
 0x301   :  { %22095 = vst [vmem:[#allocation17_spill] sm:$0xff] %v17885_v49  ;;  %11942 = vmatpush3.msra.mxu1 %v17423_v34  ;;  %6951 = vmatprep.mubr.f32.mxu1 %v22093_v37  ;;  %v7096_v34 = vand.u32 4294901760, %v17870_v53  ;;  %v7215_v37 = vand.u32 4294901760, %v17881_v36  ;;  %v17938_v53 = vsub.f32 %v17828_v54, %v20928_v28  ;;  %v17952_v36 = vsub.f32 %v17845_v30, %v20929_v16  ;;  %v22103_v54 = vld [vmem:[#allocation41_spill] sm:$0xff] }
 0x302   :  { %11947 = vmatpush3.msra.mxu0 %v17620_v17  ;;  %6953 = vmatmul.mubr.f32.vlgmr.msra.gmra.mxu1 %v22097_v41  ;;  %v7103_v41 = vand.u32 4294901760, %v17899_v3  ;;  %v17954_v28 = vand.u32 4294901760, %v825_v35  ;;  %22100 = vst [vmem:[#allocation32_spill] sm:$0xff] %v17957_v12  ;;  %v22102_v3 = vand.u32 4294901760, %v17858_v59  ;;  %v17971_v30 = vand.u32 4294901760, %v809_v52 }
 0x303   :  { %11948 = vmatprep.subr.mxu0 %v17637_v58  ;;  %11981 = vmatprep.subr.mxu1 %v7187_v32  ;;  %v7222_v32 = vand.u32 4294901760, %v17910_v57  ;;  %v17977_v18 = vrot.slane %v891_v50, %v22103_v54  ;;  %v7110_v57 = vand.u32 4294901760, %v17924_v44  ;;  %v807_v50 = vld [vmem:[%s20411_s3 + $0x718] sm:$0xff]  ;;  %v7229_v44 = vand.u32 4294901760, %v17938_v53 }
 0x304   :  { %11949 = vmatpush3.msra.mxu0 %v17654_v24  ;;  %11982 = vmatpush3.msra.mxu1 %v22101_v25  ;;  %v17969_v16 = vsub.f32 %v17858_v59, %v22102_v3  ;;  %v22105_v25 = vand.u32 4294901760, %v17874_v38  ;;  %v17989_v59 = vsub.f32 %v810_v6, %v17927_v19  ;;  %v22108_v6 = vand.u32 4294901760, %v17885_v49 }
 0x305   :  { %11950 = vmatprep.subr.mxu0 %v17662_v29  ;;  %11983 = vmatprep.subr.mxu1 %v22104_v27  ;;  %v22107_v27 = vand.u32 4294901760, %v17888_v4  ;;  %v7117_v53 = vand.u32 4294901760, %v17952_v36  ;;  %v18033_v36 = vand.u32 4294901760, %v807_v50 }
 0x306   :  { %11951 = vmatpush3.msra.mxu0 %v17681_v0  ;;  %v17986_v3 = vsub.f32 %v17874_v38, %v22105_v25  ;;  %11984 = vmatpush3.msra.mxu1 %v22106_v2  ;;  %v18008_v54 = vsub.f32 %v17885_v49, %v22108_v6  ;;  %v18010_v38 = vand.u32 4294901760, %v808_v43  ;;  %v22109_v2 = vand.u32 4294901760, %v17815_v15  ;;  %v806_v49 = vld [vmem:[%s20411_s3 + $0x710] sm:$0xff] }
 0x307   :  { %11952 = vmatprep.subr.mxu0 %v17692_v60  ;;  %v18003_v25 = vsub.f32 %v17888_v4, %v22107_v27  ;;  %v18021_v4 = vsub.f32 %v825_v35, %v17954_v28  ;;  %v18023_v6 = vand.u32 4294901760, %v823_v9  ;;  %v7124_v15 = vand.u32 4294901760, %v17969_v16  ;;  %v821_v35 = vld [vmem:[%s20411_s3 + $0x788] sm:$0xff] }
 0x308   :  { %11985 = vmatprep.subr.mxu1 %v22109_v2  ;;  %11953 = vmatpush3.msra.mxu0 %v17703_v56  ;;  %v18031_v2 = vsub.f32 %v809_v52, %v17971_v30  ;;  %v907_v27 = vcombine.high %v17977_v18, %v17977_v18  ;;  %v18044_v16 = vsub.f32 %v824_v11, %v17991_v55  ;;  %v18046_v52 = vand.u32 4294901760, %v822_v23  ;;  %v805_v56 = vld [vmem:[%s20411_s3 + $0x708] sm:$0xff]  ;;  %v820_v11 = vld [vmem:[%s20411_s3 + $0x780] sm:$0xff] }
 0x309   :  { %11986 = vmatpush3.msra.mxu1 %v7089_v46  ;;  %11954 = vmatprep.subr.mxu0 %v17717_v40  ;;  %v7236_v46 = vand.u32 4294901760, %v17986_v3  ;;  %v18055_v3 = vsub.f32 %v808_v43, %v18010_v38  ;;  %v18057_v40 = vand.u32 4294901760, %v806_v49  ;;  %v18070_v43 = vand.u32 4294901760, %v821_v35 }
 0x30a   :  { %11987 = vmatprep.subr.mxu1 %v7208_v21  ;;  %11955 = vmatpush3.msra.mxu0 %v17733_v26  ;;  %22110 = vst [vmem:[#allocation37_spill] sm:$0xff] %v18046_v52  ;;  %v7243_v21 = vand.u32 4294901760, %v18003_v25  ;;  %v7131_v26 = vand.u32 4294901760, %v18008_v54  ;;  %v18068_v54 = vsub.f32 %v823_v9, %v18023_v6  ;;  %v18082_v25 = vand.u32 4294901760, %v907_v27 }
 0x30b   :  { %11988 = vmatpush3.msra.mxu1 %v7096_v34  ;;  %11956 = vmatprep.subr.mxu0 %v17745_v62  ;;  %22111 = vst [vmem:[#allocation24_spill] sm:$0xff] %v18057_v40  ;;  %v22112_v34 = vand.u32 4294901760, %v17957_v12  ;;  %22113 = vst [vmem:[#allocation13_spill] sm:$0xff] %v18070_v43  ;;  %v18102_v9 = vand.u32 4294901760, %v804_v5  ;;  %v22120_v60 = vand.u32 4294901760, %v18021_v4  ;;  %v18110_v13 = vsub.f32 %v821_v35, %v18070_v43 }
 0x30c   :  { %11989 = vmatprep.subr.mxu1 %v7215_v37  ;;  %11957 = vmatpush3.msra.mxu0 %v17757_v31  ;;  %v18078_v31 = vsub.f32 %v807_v50, %v18033_v36  ;;  %22115 = vst [vmem:[#allocation18_spill] sm:$0xff] %v18082_v25  ;;  %v22119_v50 = vand.u32 4294901760, %v17989_v59 }
 0x30d   :  { %v7249_v62 = vsub.f32 %v17957_v12, %v22112_v34  ;;  %11990 = vmatpush3.msra.mxu1 %v7103_v41  ;;  %11958 = vmatprep.subr.mxu0 %v17774_v33  ;;  %v18080_v34 = vand.u32 4294901760, %v805_v56  ;;  %v18087_v12 = vsub.f32 %v822_v23, %v18046_v52  ;;  %v18089_v41 = vand.u32 4294901760, %v820_v11 }
 0x30e   :  { %11991 = vmatprep.subr.mxu1 %v7222_v32  ;;  %11959 = vmatpush3.msra.mxu0 %v17787_v20  ;;  %v18092_v33 = vand.u32 4294901760, %v17977_v18  ;;  %v7137_v37 = vsub.f32 %v17989_v59, %v22119_v50  ;;  %v18100_v20 = vsub.f32 %v806_v49, %v18057_v40  ;;  %v22121_v49 = vand.u32 4294901760, %v18031_v2 }
 0x30f   :  { %22114 = vst [vmem:[#allocation30_spill] sm:$0xff] %v18080_v34  ;;  %22116 = vst [vmem:[#allocation21_spill] sm:$0xff] %v18087_v12  ;;  %11992 = vmatpush3.msra.mxu1 %v7110_v57  ;;  %11960 = vmatprep.subr.mxu0 %v17821_v7  ;;  %v7250_v23 = vand.u32 4294901760, %v7249_v62  ;;  %v7256_v57 = vsub.f32 %v18021_v4, %v22120_v60  ;;  %v18118_v62 = vsub.f32 %v805_v56, %v18080_v34 }
 0x310   :  { %22117 = vst [vmem:[#allocation14_spill] sm:$0xff] %v18089_v41  ;;  %22118 = vst [vmem:[#allocation16_spill] sm:$0xff] %v18092_v33  ;;  %11993 = vmatprep.subr.mxu1 %v7229_v44  ;;  %11961 = vmatpush3.msra.mxu0 %v17807_v8  ;;  %v7144_v50 = vsub.f32 %v18031_v2, %v22121_v49  ;;  %v18121_v32 = vsub.f32 %v907_v27, %v18082_v25  ;;  %v22123_v60 = vand.u32 4294901760, %v18044_v16 }
 0x311   :  { %11994 = vmatpush3.msra.mxu1 %v7117_v53  ;;  %11962 = vmatprep.subr.mxu0 %v17830_v48  ;;  %v18130_v49 = vsub.f32 %v17977_v18, %v18092_v33  ;;  %v18133_v44 = vsub.f32 %v820_v11, %v18089_v41  ;;  %v7138_v56 = vand.u32 4294901760, %v7137_v37  ;;  %v22124_v27 = vand.u32 4294901760, %v18055_v3 }
 0x312   :  { %22122 = vst [vmem:[#allocation42_spill] sm:$0xff] %v18121_v32  ;;  %11995 = vmatprep.subr.mxu1 %v7236_v46  ;;  %11963 = vmatpush3.msra.mxu0 %v17832_v1  ;;  %v7263_v53 = vsub.f32 %v18044_v16, %v22123_v60  ;;  %v18141_v60 = vsub.f32 %v804_v5, %v18102_v9  ;;  %v7257_v18 = vand.u32 4294901760, %v7256_v57  ;;  %v22126_v11 = vand.u32 4294901760, %v18068_v54 }
 0x313   :  { %11996 = vmatpush3.msra.mxu1 %v7124_v15  ;;  %11964 = vmatprep.subr.mxu0 %v17902_v14  ;;  %v7151_v46 = vsub.f32 %v18055_v3, %v22124_v27  ;;  %v7145_v37 = vand.u32 4294901760, %v7144_v50  ;;  %v22127_v27 = vand.u32 4294901760, %v18078_v31  ;;  %v22129_v5 = vand.u32 4294901760, %v18100_v20 }
 0x314   :  { %22125 = vst [vmem:[#allocation7_spill] sm:$0xff] %v18141_v60  ;;  %11997 = vmatprep.subr.mxu1 %v7243_v21  ;;  %11965 = vmatpush3.msra.mxu0 %v17927_v19  ;;  %v7270_v15 = vsub.f32 %v18068_v54, %v22126_v11  ;;  %v7264_v57 = vand.u32 4294901760, %v7263_v53  ;;  %v22128_v11 = vand.u32 4294901760, %v18087_v12 }
 0x315   :  { %11998 = vmatpush3.msra.mxu1 %v7131_v26  ;;  %11966 = vmatprep.subr.mxu0 %v17954_v28  ;;  %v7158_v7 = vsub.f32 %v18078_v31, %v22127_v27  ;;  %v7152_v27 = vand.u32 4294901760, %v7151_v46  ;;  %v7165_v21 = vsub.f32 %v18100_v20, %v22129_v5  ;;  %v22131_v46 = vand.u32 4294901760, %v18121_v32 }
 0x316   :  { %11999 = vmatprep.subr.mxu1 %v7250_v23  ;;  %11967 = vmatpush3.msra.mxu0 %v17971_v30  ;;  %v7277_v35 = vsub.f32 %v18087_v12, %v22128_v11  ;;  %v7271_v53 = vand.u32 4294901760, %v7270_v15  ;;  %v22130_v11 = vand.u32 4294901760, %v18110_v13  ;;  %v22132_v5 = vand.u32 4294901760, %v18118_v62 }
 0x317   :  { %12000 = vmatpush3.msra.mxu1 %v7138_v56  ;;  %11968 = vmatprep.subr.mxu0 %v17991_v55  ;;  %v7159_v56 = vand.u32 4294901760, %v7158_v7  ;;  %v7057_v50 = vsub.f32 %v18121_v32, %v22131_v46  ;;  %v22133_v15 = vand.u32 4294901760, %v18130_v49  ;;  %v7166_v46 = vand.u32 4294901760, %v7165_v21 }
 0x318   :  { %12001 = vmatprep.subr.mxu1 %v7257_v18  ;;  %11969 = vmatpush3.msra.mxu0 %v18010_v38  ;;  %v7284_v26 = vsub.f32 %v18110_v13, %v22130_v11  ;;  %v7172_v23 = vsub.f32 %v18118_v62, %v22132_v5  ;;  %v7278_v18 = vand.u32 4294901760, %v7277_v35  ;;  %v22135_v32 = vand.u32 4294901760, %v18141_v60 }
 0x319   :  { %12002 = vmatpush3.msra.mxu1 %v7145_v37  ;;  %11970 = vmatprep.subr.mxu0 %v18023_v6  ;;  %v7063_v11 = vsub.f32 %v18130_v49, %v22133_v15  ;;  %v22134_v37 = vand.u32 4294901760, %v18133_v44 }
 0x31a   :  { %12003 = vmatprep.subr.mxu1 %v7264_v57  ;;  %11971 = vmatpush3.msra.mxu0 %v18033_v36  ;;  %v7179_v5 = vsub.f32 %v18141_v60, %v22135_v32  ;;  %v7285_v35 = vand.u32 4294901760, %v7284_v26  ;;  %v7058_v57 = vand.u32 4294901760, %v7057_v50  ;;  %v7173_v15 = vand.u32 4294901760, %v7172_v23  ;;  %v22136_v32 = vld [vmem:[#allocation26_spill] sm:$0xff]  ;;  %v22138_v50 = vld [vmem:[#allocation29_spill] sm:$0xff]  ;;  %v22139_v23 = vld [vmem:[#allocation35_spill] sm:$0xff] }
 0x31b   :  { %v7291_v7 = vsub.f32 %v18133_v44, %v22134_v37  ;;  %12004 = vmatpush3.msra.mxu1 %v7152_v27  ;;  %11972 = vmatprep.subr.mxu0 %v18046_v52  ;;  %v7064_v27 = vand.u32 4294901760, %v7063_v11  ;;  %v22137_v26 = vld [vmem:[#allocation22_spill] sm:$0xff]  ;;  %v22143_v11 = vld [vmem:[#allocation11_spill] sm:$0xff] }
 0x31c   :  { %12005 = vmatprep.subr.mxu1 %v7271_v53  ;;  %11973 = vmatpush3.msra.mxu0 %v18057_v40  ;;  %v7180_v21 = vand.u32 4294901760, %v7179_v5  ;;  %v22140_v53 = vld [vmem:[#allocation34_spill] sm:$0xff]  ;;  %v22146_v5 = vld [vmem:[#allocation9_spill] sm:$0xff] }
 0x31d   :  { %12006 = vmatpush3.msra.mxu1 %v7159_v56  ;;  %11974 = vmatprep.subr.mxu0 %v18070_v43  ;;  %v7292_v37 = vand.u32 4294901760, %v7291_v7  ;;  %v22141_v56 = vld [vmem:[#allocation27_spill] sm:$0xff]  ;;  %v22144_v7 = vld [vmem:[#allocation6_spill] sm:$0xff] }
 0x31e   :  { %12007 = vmatprep.subr.mxu1 %v7278_v18  ;;  %11975 = vmatpush3.msra.mxu0 %v18080_v34  ;;  %v22142_v18 = vld [vmem:[#allocation33_spill] sm:$0xff] }
 0x31f   :  { %12008 = vmatpush3.msra.mxu1 %v7166_v46  ;;  %11976 = vmatprep.subr.mxu0 %v18089_v41  ;;  %v22145_v46 = vld [vmem:[#allocation8_spill] sm:$0xff] }
 0x320   :  { %12009 = vmatprep.subr.mxu1 %v7285_v35  ;;  %11977 = vmatpush3.msra.mxu0 %v18102_v9  ;;  %v22147_v35 = vld [vmem:[#allocation23_spill] sm:$0xff] }
 0x321   :  { %7059 = vmatprep.mubr.f32.mxu0 %v7058_v57  ;;  %12010 = vmatpush3.msra.mxu1 %v7173_v15  ;;  %v22148_v57 = vld [vmem:[#allocation36_spill] sm:$0xff]  ;;  %v22149_v15 = vld [vmem:[#allocation15_spill] sm:$0xff] }
 0x322   :  { %7065 = vmatmul.mubr.f32.vlgmr.msra.gmra.mxu0 %v7064_v27  ;;  %12011 = vmatprep.subr.mxu1 %v7292_v37  ;;  %v22150_v27 = vld [vmem:[#allocation43_spill] sm:$0xff]  ;;  %v22151_v37 = vld [vmem:[#allocation40_spill] sm:$0xff] }
 0x323   :  { %12016 = vmatprep.subr.mxu0 %v17640_v45  ;;  %12012 = vmatpush3.msra.mxu1 %v7180_v21  ;;  %v22152_v21 = vld [vmem:[#allocation39_spill] sm:$0xff] }
 0x324   :  { %7295 = vmatprep.mubr.f32.mxu1 %v18082_v25  ;;  %12017 = vmatpush3.msra.mxu0 %v17649_v22  ;;  %v22154_v25 = vld [vmem:[#allocation17_spill] sm:$0xff] }
 0x325   :  { %7297 = vmatmul.mubr.f32.vlgmr.msra.gmra.mxu1 %v18092_v33  ;;  %12018 = vmatprep.subr.mxu0 %v17672_v42  ;;  %v22153_v33 = vld [vmem:[#allocation12_spill] sm:$0xff] }
 0x326   :  { %12051 = vmatprep.subr.mxu1 %v17615_v47  ;;  %12019 = vmatpush3.msra.mxu0 %v17690_v10 }
 0x327   :  { %12052 = vmatpush3.msra.mxu1 %v17620_v17  ;;  %12020 = vmatprep.subr.mxu0 %v17701_v63 }
 0x328   :  { %12053 = vmatprep.subr.mxu1 %v17637_v58  ;;  %12021 = vmatpush3.msra.mxu0 %v17731_v61 }
 0x329   :  { %12054 = vmatpush3.msra.mxu1 %v17654_v24  ;;  %12022 = vmatprep.subr.mxu0 %v17743_v51 }
 0x32a   :  { %12055 = vmatprep.subr.mxu1 %v17662_v29  ;;  %12023 = vmatpush3.msra.mxu0 %v17755_v39 }
 0x32b   :  { %12056 = vmatpush3.msra.mxu1 %v17681_v0  ;;  %12024 = vmatprep.subr.mxu0 %v22136_v32 }
 0x32c   :  { %12057 = vmatprep.subr.mxu1 %v22137_v26  ;;  %12025 = vmatpush3.msra.mxu0 %v22138_v50 }
 0x32d   :  { %12058 = vmatpush3.msra.mxu1 %v22139_v23  ;;  %12026 = vmatprep.subr.mxu0 %v22140_v53 }
 0x32e   :  { %12059 = vmatprep.subr.mxu1 %v22141_v56  ;;  %12027 = vmatpush3.msra.mxu0 %v22142_v18 }
 0x32f   :  { %12060 = vmatpush3.msra.mxu1 %v22143_v11  ;;  %12028 = vmatprep.subr.mxu0 %v22144_v7 }
 0x330   :  { %12061 = vmatprep.subr.mxu1 %v22145_v46  ;;  %12029 = vmatpush3.msra.mxu0 %v22146_v5  ;;  %v22155_v46 = vld [vmem:[#allocation32_spill] sm:$0xff] }
 0x331   :  { %12062 = vmatpush3.msra.mxu1 %v22147_v35  ;;  %12030 = vmatprep.subr.mxu0 %v22148_v57 }
 0x332   :  { %12063 = vmatprep.subr.mxu1 %v22149_v15  ;;  %12031 = vmatpush3.msra.mxu0 %v22150_v27 }
 0x333   :  { %12064 = vmatpush3.msra.mxu1 %v22151_v37  ;;  %12032 = vmatprep.subr.mxu0 %v22152_v21 }
 0x334   :  { %12065 = vmatprep.subr.mxu1 %v22153_v33  ;;  %12033 = vmatpush3.msra.mxu0 %v22154_v25 }
 0x335   :  { %12066 = vmatpush3.msra.mxu1 %v17807_v8  ;;  %12034 = vmatprep.subr.mxu0 %v22155_v46 }
 0x336   :  { %12067 = vmatprep.subr.mxu1 %v17830_v48  ;;  %12035 = vmatpush3.msra.mxu0 %v17989_v59 }
 0x337   :  { %12068 = vmatpush3.msra.mxu1 %v17832_v1  ;;  %12036 = vmatprep.subr.mxu0 %v18021_v4 }
 0x338   :  { %12069 = vmatprep.subr.mxu1 %v17902_v14  ;;  %12037 = vmatpush3.msra.mxu0 %v18031_v2 }
 0x339   :  { %12070 = vmatpush3.msra.mxu1 %v17927_v19  ;;  %12038 = vmatprep.subr.mxu0 %v18044_v16 }
 0x33a   :  { %12071 = vmatprep.subr.mxu1 %v17954_v28  ;;  %12039 = vmatpush3.msra.mxu0 %v18055_v3 }
 0x33b   :  { %12072 = vmatpush3.msra.mxu1 %v17971_v30  ;;  %12040 = vmatprep.subr.mxu0 %v18068_v54 }
 0x33c   :  { %12073 = vmatprep.subr.mxu1 %v17991_v55  ;;  %12041 = vmatpush3.msra.mxu0 %v18078_v31 }
 0x33d   :  { %12074 = vmatpush3.msra.mxu1 %v18010_v38  ;;  %12042 = vmatprep.subr.mxu0 %v18087_v12  ;;  %v22156_v12 = vld [vmem:[#allocation42_spill] sm:$0xff] }
 0x33e   :  { %12075 = vmatprep.subr.mxu1 %v18023_v6  ;;  %12043 = vmatpush3.msra.mxu0 %v18100_v20 }
 0x33f   :  { %12076 = vmatpush3.msra.mxu1 %v18033_v36  ;;  %12044 = vmatprep.subr.mxu0 %v18110_v13 }
 0x340   :  { %12077 = vmatprep.subr.mxu1 %v18046_v52  ;;  %12045 = vmatpush3.msra.mxu0 %v18118_v62  ;;  %v22157_v52 = vand.u32 4294901760, %v17640_v45  ;;  %v22163_v45 = vand.u32 4294901760, %v17701_v63 }
 0x341   :  { %12078 = vmatpush3.msra.mxu1 %v18057_v40  ;;  %12046 = vmatprep.subr.mxu0 %v18133_v44  ;;  %v22158_v40 = vand.u32 4294901760, %v22156_v12 }
 0x342   :  { %12079 = vmatprep.subr.mxu1 %v18070_v43  ;;  %12047 = vmatpush3.msra.mxu0 %v18141_v60  ;;  %v22159_v43 = vand.u32 4294901760, %v17649_v22  ;;  %v22160_v60 = vand.u32 4294901760, %v18130_v49  ;;  %v22164_v22 = vand.u32 4294901760, %v17731_v61  ;;  %v22170_v61 = vand.u32 4294901760, %v22142_v18 }
 0x343   :  { %7432 = vmatprep.mubr.f32.mxu0 %v22156_v12  ;;  %12080 = vmatpush3.msra.mxu1 %v18080_v34  ;;  %v22161_v34 = vand.u32 4294901760, %v17672_v42  ;;  %v515_v42 = vld [vmem:[%s20410_s2 + $0xf8] sm:$0xff] }
 0x344   :  { %7435 = vmatmul.mubr.f32.vlgmr.msra.gmra.mxu0 %v18130_v49  ;;  %12081 = vmatprep.subr.mxu1 %v18089_v41  ;;  %v22162_v41 = vand.u32 4294901760, %v17690_v10  ;;  %v22167_v10 = vand.u32 4294901760, %v22136_v32  ;;  %v18294_v63 = vand.u32 4294901760, %v515_v42  ;;  %v22174_v49 = vand.u32 4294901760, %v22148_v57  ;;  %v511_v57 = vld [vmem:[%s20410_s2 + $0xd8] sm:$0xff] }
 0x345   :  { %12086 = vmatprep.subr.mxu0 %v22157_v52  ;;  %12082 = vmatpush3.msra.mxu1 %v18102_v9  ;;  %v498_v52 = vld [vmem:[%s20410_s2 + $0x70] sm:$0xff]  ;;  %v22175_v32 = vand.u32 4294901760, %v22150_v27 }
 0x346   :  { %7539 = vmatprep.mubr.f32.mxu1 %v22158_v40  ;;  %12087 = vmatpush3.msra.mxu0 %v22159_v43  ;;  %v22172_v43 = vld [vmem:[#allocation8_spill] sm:$0xff] }
 0x347   :  { %7543 = vmatmul.mubr.f32.vlgmr.msra.gmra.mxu1 %v22160_v60  ;;  %12088 = vmatprep.subr.mxu0 %v22161_v34  ;;  %v22173_v34 = vand.u32 4294901760, %v22146_v5  ;;  %v513_v60 = vld [vmem:[%s20410_s2 + $0xe8] sm:$0xff] }
 0x348   :  { %12121 = vmatprep.subr.mxu1 %v17615_v47  ;;  %12089 = vmatpush3.msra.mxu0 %v22162_v41  ;;  %v22165_v47 = vand.u32 4294901760, %v17743_v51  ;;  %v22171_v51 = vand.u32 4294901760, %v22144_v7  ;;  %v22177_v7 = vand.u32 4294901760, %v22154_v25  ;;  %v22180_v25 = vand.u32 4294901760, %v17989_v59 }
 0x349   :  { %12122 = vmatpush3.msra.mxu1 %v17620_v17  ;;  %12090 = vmatprep.subr.mxu0 %v22163_v45  ;;  %v499_v17 = vld [vmem:[%s20410_s2 + $0x78] sm:$0xff]  ;;  %v22182_v45 = vand.u32 4294901760, %v18021_v4 }
 0x34a   :  { %12123 = vmatprep.subr.mxu1 %v17637_v58  ;;  %12091 = vmatpush3.msra.mxu0 %v22164_v22  ;;  %v22166_v58 = vand.u32 4294901760, %v17755_v39  ;;  %v18299_v40 = vand.u32 4294901760, %v499_v17  ;;  %v18316_v39 = vsub.f32 %v515_v42, %v18294_v63  ;;  %v18393_v22 = vand.u32 4294901760, %v511_v57  ;;  %v494_v42 = vld [vmem:[%s20410_s2 + $0x50] sm:$0xff] }
 0x34b   :  { %12124 = vmatpush3.msra.mxu1 %v17654_v24  ;;  %12092 = vmatprep.subr.mxu0 %v22165_v47  ;;  %v22168_v24 = vand.u32 4294901760, %v22138_v50  ;;  %v497_v50 = vld [vmem:[%s20410_s2 + $0x68] sm:$0xff] }
 0x34c   :  { %12125 = vmatprep.subr.mxu1 %v17662_v29  ;;  %12093 = vmatpush3.msra.mxu0 %v22166_v58  ;;  %v514_v29 = vld [vmem:[%s20410_s2 + $0xf0] sm:$0xff]  ;;  %v18325_v41 = vsub.f32 %v499_v17, %v18299_v40  ;;  %v18366_v27 = vand.u32 4294901760, %v497_v50  ;;  %22183 = vst [vmem:[#allocation20_spill] sm:$0xff] %v18393_v22  ;;  %v509_v58 = vld [vmem:[%s20410_s2 + $0xc8] sm:$0xff] }
 0x34d   :  { %12126 = vmatpush3.msra.mxu1 %v17681_v0  ;;  %12094 = vmatprep.subr.mxu0 %v22167_v10  ;;  %v22169_v0 = vand.u32 4294901760, %v22140_v53  ;;  %v18313_v12 = vand.u32 4294901760, %v514_v29  ;;  %v22176_v53 = vand.u32 4294901760, %v22152_v21 }
 0x34e   :  { %12127 = vmatprep.subr.mxu1 %v22137_v26  ;;  %12095 = vmatpush3.msra.mxu0 %v22168_v24  ;;  %v18336_v26 = vand.u32 4294901760, %v498_v52  ;;  %v20990_v5 = vand.u32 4294901760, %v18325_v41 }
 0x34f   :  { %12128 = vmatpush3.msra.mxu1 %v22139_v23  ;;  %12096 = vmatprep.subr.mxu0 %v22169_v0  ;;  %v512_v23 = vld [vmem:[%s20410_s2 + $0xe0] sm:$0xff]  ;;  %v18349_v18 = vsub.f32 %v514_v29, %v18313_v12  ;;  %v493_v29 = vld [vmem:[%s20410_s2 + $0x48] sm:$0xff]  ;;  %v22188_v0 = vand.u32 4294901760, %v18055_v3 }
 0x350   :  { %12129 = vmatprep.subr.mxu1 %v22141_v56  ;;  %12097 = vmatpush3.msra.mxu0 %v22170_v61  ;;  %v20991_v56 = vand.u32 4294901760, %v18316_v39  ;;  %v18377_v21 = vsub.f32 %v498_v52, %v18336_v26  ;;  %v18404_v4 = vsub.f32 %v18325_v41, %v20990_v5  ;;  %v18435_v61 = vand.u32 4294901760, %v494_v42 }
 0x351   :  { %12130 = vmatpush3.msra.mxu1 %v22143_v11  ;;  %12098 = vmatprep.subr.mxu0 %v22171_v51  ;;  %v496_v11 = vld [vmem:[%s20410_s2 + $0x60] sm:$0xff]  ;;  %v20988_v59 = vand.u32 4294901760, %v18349_v18  ;;  %v22190_v52 = vand.u32 4294901760, %v18068_v54 }
 0x352   :  { %12131 = vmatprep.subr.mxu1 %v22172_v43  ;;  %12099 = vmatpush3.msra.mxu0 %v22173_v34  ;;  %22189 = vst [vmem:[#allocation25_spill] sm:$0xff] %v18435_v61  ;;  %v492_v51 = vld [vmem:[%s20410_s2 + $0x40] sm:$0xff]  ;;  %v18450_v43 = vsub.f32 %v511_v57, %v18393_v22  ;;  %v18452_v34 = vand.u32 4294901760, %v509_v58 }
 0x353   :  { %12132 = vmatpush3.msra.mxu1 %v22147_v35  ;;  %12100 = vmatprep.subr.mxu0 %v22174_v49  ;;  %v18358_v35 = vand.u32 4294901760, %v513_v60  ;;  %v18447_v3 = vsub.f32 %v18349_v18, %v20988_v59  ;;  %v508_v49 = vld [vmem:[%s20410_s2 + $0xc0] sm:$0xff] }
 0x354   :  { %12133 = vmatprep.subr.mxu1 %v22149_v15  ;;  %12101 = vmatpush3.msra.mxu0 %v22175_v32  ;;  %v22178_v15 = vand.u32 4294901760, %v22155_v46  ;;  %v510_v46 = vld [vmem:[%s20410_s2 + $0xd0] sm:$0xff]  ;;  %22191 = vst [vmem:[#allocation19_spill] sm:$0xff] %v18450_v43  ;;  %22192 = vst [vmem:[#allocation26_spill] sm:$0xff] %v18452_v34  ;;  %v504_v54 = vld [vmem:[%s20410_s2 + $0xa0] sm:$0xff] }
 0x355   :  { %12134 = vmatpush3.msra.mxu1 %v22151_v37  ;;  %12102 = vmatprep.subr.mxu0 %v22176_v53  ;;  %v18368_v37 = vand.u32 4294901760, %v512_v23  ;;  %v18407_v47 = vsub.f32 %v513_v60, %v18358_v35  ;;  %v18423_v24 = vand.u32 4294901760, %v510_v46 }
 0x356   :  { %12135 = vmatprep.subr.mxu1 %v22153_v33  ;;  %12103 = vmatpush3.msra.mxu0 %v22177_v7  ;;  %v495_v33 = vld [vmem:[%s20410_s2 + $0x58] sm:$0xff] }
 0x357   :  { %12136 = vmatpush3.msra.mxu1 %v17807_v8  ;;  %12104 = vmatprep.subr.mxu0 %v22178_v15  ;;  %22179 = vst [vmem:[#allocation28_spill] sm:$0xff] %v18368_v37  ;;  %v18379_v8 = vand.u32 4294901760, %v496_v11  ;;  %v18409_v17 = vand.u32 4294901760, %v495_v33  ;;  %v18421_v10 = vsub.f32 %v512_v23, %v18368_v37  ;;  %22187 = vst [vmem:[#allocation38_spill] sm:$0xff] %v18423_v24  ;;  %v20985_v60 = vand.u32 4294901760, %v18407_v47  ;;  %v507_v23 = vld [vmem:[%s20410_s2 + $0xb8] sm:$0xff] }
 0x358   :  { %12137 = vmatprep.subr.mxu1 %v17830_v48  ;;  %12105 = vmatpush3.msra.mxu0 %v22180_v25  ;;  %v18390_v48 = vsub.f32 %v18316_v39, %v20991_v56  ;;  %v18479_v57 = vsub.f32 %v510_v46, %v18423_v24  ;;  %v18481_v15 = vand.u32 4294901760, %v492_v51  ;;  %v22202_v46 = vand.u32 4294901760, %v18110_v13 }
 0x359   :  { %22181 = vst [vmem:[#allocation10_spill] sm:$0xff] %v18379_v8  ;;  %12138 = vmatpush3.msra.mxu1 %v17832_v1  ;;  %12106 = vmatprep.subr.mxu0 %v22182_v45  ;;  %v22184_v1 = vand.u32 4294901760, %v18031_v2  ;;  %22185 = vst [vmem:[#allocation31_spill] sm:$0xff] %v18409_v17  ;;  %v18418_v2 = vsub.f32 %v497_v50, %v18366_v27  ;;  %v18463_v32 = vsub.f32 %v495_v33, %v18409_v17 }
 0x35a   :  { %12139 = vmatprep.subr.mxu1 %v17902_v14  ;;  %v22186_v14 = vand.u32 4294901760, %v18044_v16  ;;  %v18433_v16 = vsub.f32 %v496_v11, %v18379_v8  ;;  %v18465_v50 = vand.u32 4294901760, %v493_v29  ;;  %v20983_v7 = vand.u32 4294901760, %v18421_v10  ;;  %22198 = vst [vmem:[#allocation35_spill] sm:$0xff] %v18479_v57 }
 0x35b   :  { %12107 = vmatpush3.msra.mxu0 %v22184_v1  ;;  %12140 = vmatpush3.msra.mxu1 %v17927_v19  ;;  %v20986_v19 = vand.u32 4294901760, %v18377_v21  ;;  %22194 = vst [vmem:[#allocation22_spill] sm:$0xff] %v18463_v32  ;;  %v20984_v11 = vand.u32 4294901760, %v18418_v2  ;;  %v22199_v33 = vand.u32 4294901760, %v18100_v20  ;;  %v18493_v45 = vsub.f32 %v494_v42, %v18435_v61 }
 0x35c   :  { %12108 = vmatprep.subr.mxu0 %v22186_v14  ;;  %12141 = vmatprep.subr.mxu1 %v17954_v28  ;;  %v8082_v28 = vand.u32 4294901760, %v18390_v48  ;;  %22195 = vst [vmem:[#allocation29_spill] sm:$0xff] %v18465_v50  ;;  %v20987_v25 = vand.u32 4294901760, %v18433_v16  ;;  %v18495_v1 = vand.u32 4294901760, %v508_v49  ;;  %v20989_v20 = vand.u32 4294901760, %v18450_v43 }
 0x35d   :  { %12109 = vmatpush3.msra.mxu0 %v22188_v0  ;;  %12142 = vmatpush3.msra.mxu1 %v17971_v30  ;;  %v22193_v30 = vand.u32 4294901760, %v18078_v31  ;;  %v22196_v31 = vld [vmem:[#allocation21_spill] sm:$0xff]  ;;  %22200 = vst [vmem:[#allocation34_spill] sm:$0xff] %v18493_v45  ;;  %v18504_v14 = vand.u32 4294901760, %v507_v23  ;;  %v22205_v42 = vand.u32 4294901760, %v18118_v62  ;;  %v18515_v13 = vsub.f32 %v18407_v47, %v20985_v60  ;;  %v22214_v60 = vld [vmem:[#allocation18_spill] sm:$0xff] }
 0x35e   :  { %12110 = vmatprep.subr.mxu0 %v22190_v52  ;;  %12143 = vmatprep.subr.mxu1 %v17991_v55  ;;  %v491_v55 = vld [vmem:[%s20410_s2 + $0x38] sm:$0xff]  ;;  %v22197_v53 = vand.u32 4294901760, %v22196_v31  ;;  %22201 = vst [vmem:[#allocation27_spill] sm:$0xff] %v18495_v1  ;;  %v18527_v62 = vsub.f32 %v18418_v2, %v20984_v11  ;;  %v20994_v11 = vand.u32 4294901760, %v18493_v45  ;;  %v22222_v48 = vand.u32 4294901760, %v18404_v4 }
 0x35f   :  { %12111 = vmatpush3.msra.mxu0 %v22193_v30  ;;  %12144 = vmatpush3.msra.mxu1 %v18010_v38  ;;  %v18489_v38 = vsub.f32 %v18377_v21, %v20986_v19  ;;  %v18506_v0 = vand.u32 4294901760, %v491_v55  ;;  %v22204_v52 = vld [vmem:[#allocation37_spill] sm:$0xff]  ;;  %v22207_v31 = vld [vmem:[#allocation24_spill] sm:$0xff]  ;;  %v22215_v19 = vld [vmem:[#allocation30_spill] sm:$0xff]  ;;  %v8096_v59 = vand.u32 4294901760, %v18515_v13  ;;  %v22225_v4 = vand.u32 4294901760, %v18447_v3 }
 0x360   :  { %12112 = vmatprep.subr.mxu0 %v22197_v53  ;;  %12145 = vmatprep.subr.mxu1 %v18023_v6  ;;  %v18502_v6 = vsub.f32 %v509_v58, %v18452_v34  ;;  %v18519_v58 = vsub.f32 %v493_v29, %v18465_v50  ;;  %v22208_v53 = vand.u32 4294901760, %v18133_v44  ;;  %v18536_v29 = vsub.f32 %v492_v51, %v18481_v15  ;;  %v506_v44 = vld [vmem:[%s20410_s2 + $0xb0] sm:$0xff]  ;;  %v489_v30 = vld [vmem:[%s20410_s2 + $0x28] sm:$0xff] }
 0x361   :  { %12113 = vmatpush3.msra.mxu0 %v22199_v33  ;;  %12146 = vmatpush3.msra.mxu1 %v18033_v36  ;;  %v20992_v36 = vand.u32 4294901760, %v18463_v32  ;;  %v18532_v33 = vsub.f32 %v18421_v10, %v20983_v7  ;;  %v18548_v7 = vsub.f32 %v18433_v16, %v20987_v25  ;;  %v18552_v51 = vsub.f32 %v508_v49, %v18495_v1  ;;  %v490_v49 = vld [vmem:[%s20410_s2 + $0x30] sm:$0xff] }
 0x362   :  { %12114 = vmatprep.subr.mxu0 %v22202_v46  ;;  %22203 = vst [vmem:[#allocation33_spill] sm:$0xff] %v18502_v6  ;;  %12147 = vmatprep.subr.mxu1 %v22204_v52  ;;  %22206 = vst [vmem:[#allocation11_spill] sm:$0xff] %v18519_v58  ;;  %v20993_v46 = vand.u32 4294901760, %v18479_v57  ;;  %v22210_v52 = vld [vmem:[#allocation13_spill] sm:$0xff]  ;;  %v22218_v25 = vld [vmem:[#allocation16_spill] sm:$0xff]  ;;  %v18580_v5 = vand.u32 4294901760, %v506_v44 }
 0x363   :  { %12115 = vmatpush3.msra.mxu0 %v22205_v42  ;;  %12148 = vmatpush3.msra.mxu1 %v22207_v31  ;;  %22209 = vst [vmem:[#allocation6_spill] sm:$0xff] %v18536_v29  ;;  %v22211_v42 = vld [vmem:[#allocation7_spill] sm:$0xff]  ;;  %22213 = vst [vmem:[#allocation9_spill] sm:$0xff] %v18552_v51  ;;  %v8103_v56 = vand.u32 4294901760, %v18532_v33  ;;  %v488_v33 = vld [vmem:[%s20410_s2 + $0x20] sm:$0xff] }
 0x364   :  { %12116 = vmatprep.subr.mxu0 %v22208_v53  ;;  %12149 = vmatprep.subr.mxu1 %v22210_v52  ;;  %v22212_v31 = vand.u32 4294901760, %v22211_v42  ;;  %v7977_v53 = vand.u32 4294901760, %v18489_v38  ;;  %v18559_v52 = vsub.f32 %v18450_v43, %v20989_v20  ;;  %v20995_v38 = vand.u32 4294901760, %v18502_v6 }
 0x365   :  { %7709 = vmatprep.mubr.f32.mxu0 %v22214_v60  ;;  %12150 = vmatpush3.msra.mxu1 %v22215_v19  ;;  %v18563_v42 = vsub.f32 %v491_v55, %v18506_v0  ;;  %v22219_v19 = vld [vmem:[#allocation14_spill] sm:$0xff]  ;;  %v18577_v20 = vsub.f32 %v18463_v32, %v20992_v36  ;;  %v20996_v55 = vand.u32 4294901760, %v18519_v58  ;;  %v18589_v13 = vsub.f32 %v18479_v57, %v20993_v46 }
 0x366   :  { %12117 = vmatpush3.msra.mxu0 %v22212_v31  ;;  %v18566_v31 = vsub.f32 %v507_v23, %v18504_v14  ;;  %12151 = vmatprep.subr.mxu1 %v22219_v19  ;;  %v7984_v23 = vand.u32 4294901760, %v18527_v62  ;;  %v505_v36 = vld [vmem:[%s20410_s2 + $0xa8] sm:$0xff]  ;;  %v18601_v62 = vsub.f32 %v18493_v45, %v20994_v11  ;;  %v18604_v46 = vand.u32 4294901760, %v490_v49  ;;  %v484_v32 = vld [vmem:[%s20410_s2] sm:$0xff] }
 0x367   :  { %22216 = vst [vmem:[#allocation23_spill] sm:$0xff] %v18563_v42  ;;  %7711 = vmatmul.mubr.f32.vlgmr.msra.gmra.mxu0 %v22218_v25  ;;  %12156 = vmatprep.subr.mxu0 %v18294_v63  ;;  %v18620_v11 = vsub.f32 %v18502_v6, %v20995_v38  ;;  %v18636_v38 = vand.u32 4294901760, %v505_v36  ;;  %v18639_v19 = vsub.f32 %v506_v44, %v18580_v5  ;;  %v503_v44 = vld [vmem:[%s20410_s2 + $0x98] sm:$0xff]  ;;  %v18674_v57 = vand.u32 4294901760, %v504_v54 }
 0x368   :  { %22217 = vst [vmem:[#allocation36_spill] sm:$0xff] %v18566_v31  ;;  %12152 = vmatpush3.msra.mxu1 %v18102_v9  ;;  %7813 = vmatprep.mubr.f32.mxu1 %v22214_v60  ;;  %v7991_v9 = vand.u32 4294901760, %v18548_v7  ;;  %v18612_v60 = vld [vmem:[%s20408_s0] sm:$0xff]  ;;  %v8110_v7 = vand.u32 4294901760, %v18559_v52  ;;  %v18634_v52 = vsub.f32 %v18519_v58, %v20996_v55  ;;  %v18653_v58 = vand.u32 4294901760, %v489_v30 }
 0x369   :  { %12157 = vmatpush3.msra.mxu0 %v18299_v40  ;;  %22220 = vst [vmem:[#allocation15_spill] sm:$0xff] %v18612_v60  ;;  %7815 = vmatmul.mubr.f32.vlgmr.msra.gmra.mxu1 %v22218_v25  ;;  %v7998_v25 = vand.u32 4294901760, %v18577_v20  ;;  %22221 = vst [vmem:[#allocation43_spill] sm:$0xff] %v18639_v19  ;;  %v22223_v20 = vand.u32 4294901760, %v18536_v29  ;;  %v22224_v6 = vld [vmem:[#allocation41_spill] sm:$0xff]  ;;  %v8124_v3 = vand.u32 4294901760, %v18620_v11 }
 0x36a   :  { %12158 = vmatprep.subr.mxu0 %v18313_v12  ;;  %12191 = vmatprep.subr.mxu1 %v8082_v28  ;;  %v8117_v28 = vand.u32 4294901760, %v18589_v13  ;;  %v18660_v45 = vrot.slane %v18612_v60, %v22224_v6  ;;  %v8005_v13 = vand.u32 4294901760, %v18601_v62  ;;  %v487_v6 = vld [vmem:[%s20410_s2 + $0x18] sm:$0xff]  ;;  %v22227_v62 = vand.u32 4294901760, %v18566_v31 }
 0x36b   :  { %12159 = vmatpush3.msra.mxu0 %v18336_v26  ;;  %12192 = vmatpush3.msra.mxu1 %v22222_v48  ;;  %v18651_v55 = vsub.f32 %v18536_v29, %v22223_v20  ;;  %v22226_v48 = vand.u32 4294901760, %v18552_v51  ;;  %v18672_v29 = vsub.f32 %v490_v49, %v18604_v46  ;;  %v18691_v60 = vand.u32 4294901760, %v488_v33 }
 0x36c   :  { %12160 = vmatprep.subr.mxu0 %v18358_v35  ;;  %12193 = vmatprep.subr.mxu1 %v22225_v4  ;;  %v18684_v4 = vsub.f32 %v18566_v31, %v22227_v62  ;;  %v8012_v11 = vand.u32 4294901760, %v18634_v52  ;;  %v18700_v62 = vsub.f32 %v505_v36, %v18636_v38  ;;  %v18702_v31 = vand.u32 4294901760, %v503_v44  ;;  %v501_v36 = vld [vmem:[%s20410_s2 + $0x88] sm:$0xff] }
 0x36d   :  { %12161 = vmatpush3.msra.mxu0 %v18366_v27  ;;  %v18669_v20 = vsub.f32 %v18552_v51, %v22226_v48  ;;  %12194 = vmatpush3.msra.mxu1 %v7977_v53  ;;  %v22228_v48 = vand.u32 4294901760, %v18563_v42  ;;  %v502_v53 = vld [vmem:[%s20410_s2 + $0x90] sm:$0xff]  ;;  %v18712_v52 = vand.u32 4294901760, %v487_v6  ;;  %v7837_v51 = vcombine.high %v18660_v45, %v18660_v45 }
 0x36e   :  { %12162 = vmatprep.subr.mxu0 %v18368_v37  ;;  %12195 = vmatprep.subr.mxu1 %v8096_v59  ;;  %v8019_v59 = vand.u32 4294901760, %v18651_v55  ;;  %v18723_v55 = vsub.f32 %v504_v54, %v18674_v57  ;;  %v500_v54 = vld [vmem:[%s20410_s2 + $0x80] sm:$0xff]  ;;  %v22239_v37 = vand.u32 4294901760, %v18700_v62 }
 0x36f   :  { %v18689_v49 = vsub.f32 %v18563_v42, %v22228_v48  ;;  %12163 = vmatpush3.msra.mxu0 %v18379_v8  ;;  %v486_v48 = vld [vmem:[%s20410_s2 + $0x10] sm:$0xff]  ;;  %12196 = vmatpush3.msra.mxu1 %v7984_v23  ;;  %v18710_v42 = vsub.f32 %v489_v30, %v18653_v58  ;;  %v8131_v23 = vand.u32 4294901760, %v18669_v20  ;;  %v18725_v30 = vand.u32 4294901760, %v502_v53  ;;  %v485_v8 = vld [vmem:[%s20410_s2 + $0x8] sm:$0xff] }
 0x370   :  { %12164 = vmatprep.subr.mxu0 %v18393_v22  ;;  %12197 = vmatprep.subr.mxu1 %v8103_v56  ;;  %v8138_v56 = vand.u32 4294901760, %v18684_v4  ;;  %v18734_v20 = vsub.f32 %v488_v33, %v18691_v60  ;;  %v18736_v22 = vand.u32 4294901760, %v486_v48  ;;  %v18749_v33 = vand.u32 4294901760, %v501_v36 }
 0x371   :  { %12165 = vmatpush3.msra.mxu0 %v18409_v17  ;;  %22229 = vst [vmem:[#allocation40_spill] sm:$0xff] %v18725_v30  ;;  %12198 = vmatpush3.msra.mxu1 %v7991_v9  ;;  %v8026_v17 = vand.u32 4294901760, %v18689_v49  ;;  %v22231_v9 = vand.u32 4294901760, %v18639_v19  ;;  %v18747_v49 = vsub.f32 %v503_v44, %v18702_v31  ;;  %v18761_v4 = vand.u32 4294901760, %v7837_v51 }
 0x372   :  { %12166 = vmatprep.subr.mxu0 %v18423_v24  ;;  %22230 = vst [vmem:[#allocation39_spill] sm:$0xff] %v18736_v22  ;;  %12199 = vmatprep.subr.mxu1 %v8110_v7  ;;  %22232 = vst [vmem:[#allocation12_spill] sm:$0xff] %v18749_v33  ;;  %v18781_v44 = vand.u32 4294901760, %v484_v32  ;;  %v18789_v43 = vsub.f32 %v501_v36, %v18749_v33 }
 0x373   :  { %12167 = vmatpush3.msra.mxu0 %v18435_v61  ;;  %v8144_v24 = vsub.f32 %v18639_v19, %v22231_v9  ;;  %12200 = vmatpush3.msra.mxu1 %v7998_v25  ;;  %v18757_v61 = vsub.f32 %v487_v6, %v18712_v52  ;;  %v18759_v9 = vand.u32 4294901760, %v485_v8  ;;  %22234 = vst [vmem:[#allocation32_spill] sm:$0xff] %v18761_v4  ;;  %v18768_v25 = vand.u32 4294901760, %v500_v54 }
 0x374   :  { %12168 = vmatprep.subr.mxu0 %v18452_v34  ;;  %12201 = vmatprep.subr.mxu1 %v8117_v28  ;;  %v18766_v19 = vsub.f32 %v502_v53, %v18725_v30  ;;  %v18771_v34 = vand.u32 4294901760, %v18660_v45  ;;  %v22238_v6 = vand.u32 4294901760, %v18672_v29  ;;  %v18800_v28 = vsub.f32 %v7837_v51, %v18761_v4 }
 0x375   :  { %22233 = vst [vmem:[#allocation17_spill] sm:$0xff] %v18759_v9  ;;  %12169 = vmatpush3.msra.mxu0 %v18465_v50  ;;  %22236 = vst [vmem:[#allocation8_spill] sm:$0xff] %v18768_v25  ;;  %12202 = vmatpush3.msra.mxu1 %v8005_v13  ;;  %v18779_v50 = vsub.f32 %v486_v48, %v18736_v22  ;;  %v8145_v53 = vand.u32 4294901760, %v8144_v24  ;;  %v8151_v13 = vsub.f32 %v18700_v62, %v22239_v37 }
 0x376   :  { %22235 = vst [vmem:[#allocation42_spill] sm:$0xff] %v18766_v19  ;;  %22237 = vst [vmem:[#allocation21_spill] sm:$0xff] %v18771_v34  ;;  %12170 = vmatprep.subr.mxu0 %v18495_v1  ;;  %v8032_v7 = vsub.f32 %v18672_v29, %v22238_v6  ;;  %12203 = vmatprep.subr.mxu1 %v8124_v3  ;;  %v22240_v48 = vand.u32 4294901760, %v18710_v42  ;;  %v18797_v24 = vsub.f32 %v485_v8, %v18759_v9 }
 0x377   :  { %12171 = vmatpush3.msra.mxu0 %v18481_v15  ;;  %12204 = vmatpush3.msra.mxu1 %v8012_v11  ;;  %22241 = vst [vmem:[#allocation37_spill] sm:$0xff] %v18800_v28  ;;  %v22242_v37 = vand.u32 4294901760, %v18723_v55  ;;  %v18812_v3 = vsub.f32 %v500_v54, %v18768_v25  ;;  %v22243_v51 = vand.u32 4294901760, %v18734_v20  ;;  %v22245_v54 = vand.u32 4294901760, %v18747_v49 }
 0x378   :  { %12172 = vmatprep.subr.mxu0 %v18504_v14  ;;  %v8039_v6 = vsub.f32 %v18710_v42, %v22240_v48  ;;  %12205 = vmatprep.subr.mxu1 %v8131_v23  ;;  %v18809_v48 = vsub.f32 %v18660_v45, %v18771_v34  ;;  %v8033_v8 = vand.u32 4294901760, %v8032_v7  ;;  %v8152_v45 = vand.u32 4294901760, %v8151_v13 }
 0x379   :  { %12173 = vmatpush3.msra.mxu0 %v18506_v0  ;;  %v8158_v11 = vsub.f32 %v18723_v55, %v22242_v37  ;;  %12206 = vmatpush3.msra.mxu1 %v8019_v59  ;;  %v8046_v23 = vsub.f32 %v18734_v20, %v22243_v51  ;;  %v18820_v37 = vsub.f32 %v484_v32, %v18781_v44  ;;  %v22246_v51 = vand.u32 4294901760, %v18757_v61 }
 0x37a   :  { %12174 = vmatprep.subr.mxu0 %v18580_v5  ;;  %12207 = vmatprep.subr.mxu1 %v8138_v56  ;;  %v8165_v59 = vsub.f32 %v18747_v49, %v22245_v54  ;;  %v8040_v7 = vand.u32 4294901760, %v8039_v6  ;;  %v22247_v54 = vand.u32 4294901760, %v18766_v19  ;;  %v22248_v32 = vand.u32 4294901760, %v18779_v50 }
 0x37b   :  { %22244 = vst [vmem:[#allocation24_spill] sm:$0xff] %v18820_v37  ;;  %12175 = vmatpush3.msra.mxu0 %v18604_v46  ;;  %12208 = vmatpush3.msra.mxu1 %v8026_v17  ;;  %v8053_v1 = vsub.f32 %v18757_v61, %v22246_v51  ;;  %v8159_v13 = vand.u32 4294901760, %v8158_v11  ;;  %v8047_v51 = vand.u32 4294901760, %v8046_v23  ;;  %v22250_v23 = vand.u32 4294901760, %v18800_v28 }
 0x37c   :  { %12176 = vmatprep.subr.mxu0 %v18636_v38  ;;  %12209 = vmatprep.subr.mxu1 %v8145_v53  ;;  %v8172_v36 = vsub.f32 %v18766_v19, %v22247_v54  ;;  %v8060_v56 = vsub.f32 %v18779_v50, %v22248_v32  ;;  %v8166_v11 = vand.u32 4294901760, %v8165_v59  ;;  %v22249_v54 = vand.u32 4294901760, %v18789_v43 }
 0x37d   :  { %12177 = vmatpush3.msra.mxu0 %v18653_v58  ;;  %12210 = vmatpush3.msra.mxu1 %v8033_v8  ;;  %v8054_v8 = vand.u32 4294901760, %v8053_v1  ;;  %v7952_v6 = vsub.f32 %v18800_v28, %v22250_v23  ;;  %v22251_v32 = vand.u32 4294901760, %v18797_v24  ;;  %v22252_v59 = vand.u32 4294901760, %v18809_v48 }
 0x37e   :  { %12178 = vmatprep.subr.mxu0 %v18674_v57  ;;  %12211 = vmatprep.subr.mxu1 %v8152_v45  ;;  %v8179_v17 = vsub.f32 %v18789_v43, %v22249_v54  ;;  %v8173_v45 = vand.u32 4294901760, %v8172_v36  ;;  %v8061_v23 = vand.u32 4294901760, %v8060_v56  ;;  %v22254_v28 = vand.u32 4294901760, %v18820_v37 }
 0x37f   :  { %12179 = vmatpush3.msra.mxu0 %v18691_v60  ;;  %12212 = vmatpush3.msra.mxu1 %v8040_v7  ;;  %v8067_v53 = vsub.f32 %v18797_v24, %v22251_v32  ;;  %v7958_v54 = vsub.f32 %v18809_v48, %v22252_v59  ;;  %v22253_v7 = vand.u32 4294901760, %v18812_v3 }
 0x380   :  { %12180 = vmatprep.subr.mxu0 %v18702_v31  ;;  %12213 = vmatprep.subr.mxu1 %v8159_v13  ;;  %v8074_v32 = vsub.f32 %v18820_v37, %v22254_v28  ;;  %v8180_v36 = vand.u32 4294901760, %v8179_v17  ;;  %v7953_v13 = vand.u32 4294901760, %v7952_v6  ;;  %v22255_v28 = vld [vmem:[#allocation19_spill] sm:$0xff]  ;;  %v22256_v17 = vld [vmem:[#allocation28_spill] sm:$0xff]  ;;  %v22257_v6 = vld [vmem:[#allocation22_spill] sm:$0xff] }
 0x381   :  { %12181 = vmatpush3.msra.mxu0 %v18712_v52  ;;  %v8186_v1 = vsub.f32 %v18812_v3, %v22253_v7  ;;  %12214 = vmatpush3.msra.mxu1 %v8047_v51  ;;  %v8068_v59 = vand.u32 4294901760, %v8067_v53  ;;  %v7959_v51 = vand.u32 4294901760, %v7958_v54  ;;  %v22258_v53 = vld [vmem:[#allocation10_spill] sm:$0xff]  ;;  %v22262_v54 = vld [vmem:[#allocation31_spill] sm:$0xff] }
 0x382   :  { %12182 = vmatprep.subr.mxu0 %v18725_v30  ;;  %12215 = vmatprep.subr.mxu1 %v8166_v11  ;;  %v8075_v56 = vand.u32 4294901760, %v8074_v32  ;;  %v22259_v11 = vld [vmem:[#allocation35_spill] sm:$0xff] }
 0x383   :  { %12183 = vmatpush3.msra.mxu0 %v18736_v22  ;;  %12216 = vmatpush3.msra.mxu1 %v8054_v8  ;;  %v8187_v7 = vand.u32 4294901760, %v8186_v1  ;;  %v22260_v8 = vld [vmem:[#allocation20_spill] sm:$0xff]  ;;  %v22263_v1 = vld [vmem:[#allocation33_spill] sm:$0xff]  ;;  %v22265_v32 = vld [vmem:[#allocation11_spill] sm:$0xff] }
 0x384   :  { %12184 = vmatprep.subr.mxu0 %v18749_v33  ;;  %12217 = vmatprep.subr.mxu1 %v8173_v45  ;;  %v22261_v45 = vld [vmem:[#allocation34_spill] sm:$0xff] }
 0x385   :  { %12185 = vmatpush3.msra.mxu0 %v18759_v9  ;;  %12218 = vmatpush3.msra.mxu1 %v8061_v23  ;;  %v22264_v23 = vld [vmem:[#allocation38_spill] sm:$0xff] }
 0x386   :  { %12186 = vmatprep.subr.mxu0 %v18768_v25  ;;  %12219 = vmatprep.subr.mxu1 %v8180_v36  ;;  %v22266_v36 = vld [vmem:[#allocation25_spill] sm:$0xff] }
 0x387   :  { %12187 = vmatpush3.msra.mxu0 %v18781_v44  ;;  %7954 = vmatprep.mubr.f32.mxu0 %v7953_v13  ;;  %v22267_v13 = vld [vmem:[#allocation9_spill] sm:$0xff] }
 0x388   :  { %12220 = vmatpush3.msra.mxu1 %v8068_v59  ;;  %7960 = vmatmul.mubr.f32.vlgmr.msra.gmra.mxu0 %v7959_v51  ;;  %v22268_v59 = vld [vmem:[#allocation26_spill] sm:$0xff] }
 0x389   :  { %12221 = vmatprep.subr.mxu1 %v8187_v7  ;;  %12226 = vmatprep.subr.mxu0 %v18316_v39  ;;  %v22269_v51 = vld [vmem:[#allocation6_spill] sm:$0xff]  ;;  %v22270_v7 = vld [vmem:[#allocation29_spill] sm:$0xff] }
 0x38a   :  { %12222 = vmatpush3.msra.mxu1 %v8075_v56  ;;  %8190 = vmatprep.mubr.f32.mxu1 %v18761_v4  ;;  %v22271_v56 = vld [vmem:[#allocation36_spill] sm:$0xff]  ;;  %v22273_v4 = vld [vmem:[#allocation23_spill] sm:$0xff] }
 0x38b   :  { %12227 = vmatpush3.msra.mxu0 %v18325_v41  ;;  %8192 = vmatmul.mubr.f32.vlgmr.msra.gmra.mxu1 %v18771_v34  ;;  %v22272_v34 = vld [vmem:[#allocation27_spill] sm:$0xff] }
 0x38c   :  { %12228 = vmatprep.subr.mxu0 %v18349_v18  ;;  %12261 = vmatprep.subr.mxu1 %v18294_v63 }
 0x38d   :  { %12229 = vmatpush3.msra.mxu0 %v18377_v21  ;;  %12262 = vmatpush3.msra.mxu1 %v18299_v40 }
 0x38e   :  { %12230 = vmatprep.subr.mxu0 %v18407_v47  ;;  %12263 = vmatprep.subr.mxu1 %v18313_v12 }
 0x38f   :  { %12231 = vmatpush3.msra.mxu0 %v18418_v2  ;;  %12264 = vmatpush3.msra.mxu1 %v18336_v26 }
 0x390   :  { %12232 = vmatprep.subr.mxu0 %v18421_v10  ;;  %12265 = vmatprep.subr.mxu1 %v18358_v35 }
 0x391   :  { %12233 = vmatpush3.msra.mxu0 %v18433_v16  ;;  %12266 = vmatpush3.msra.mxu1 %v18366_v27 }
 0x392   :  { %12234 = vmatprep.subr.mxu0 %v22255_v28  ;;  %12267 = vmatprep.subr.mxu1 %v22256_v17 }
 0x393   :  { %12235 = vmatpush3.msra.mxu0 %v22257_v6  ;;  %12268 = vmatpush3.msra.mxu1 %v22258_v53 }
 0x394   :  { %12236 = vmatprep.subr.mxu0 %v22259_v11  ;;  %12269 = vmatprep.subr.mxu1 %v22260_v8 }
 0x395   :  { %12237 = vmatpush3.msra.mxu0 %v22261_v45  ;;  %12270 = vmatpush3.msra.mxu1 %v22262_v54 }
 0x396   :  { %12238 = vmatprep.subr.mxu0 %v22263_v1  ;;  %12271 = vmatprep.subr.mxu1 %v22264_v23  ;;  %v22274_v23 = vld [vmem:[#allocation43_spill] sm:$0xff] }
 0x397   :  { %12239 = vmatpush3.msra.mxu0 %v22265_v32  ;;  %12272 = vmatpush3.msra.mxu1 %v22266_v36 }
 0x398   :  { %12240 = vmatprep.subr.mxu0 %v22267_v13  ;;  %12273 = vmatprep.subr.mxu1 %v22268_v59 }
 0x399   :  { %12241 = vmatpush3.msra.mxu0 %v22269_v51  ;;  %12274 = vmatpush3.msra.mxu1 %v22270_v7 }
 0x39a   :  { %12242 = vmatprep.subr.mxu0 %v22271_v56  ;;  %12275 = vmatprep.subr.mxu1 %v22272_v34 }
 0x39b   :  { %12243 = vmatpush3.msra.mxu0 %v22273_v4  ;;  %12276 = vmatpush3.msra.mxu1 %v18481_v15 }
 0x39c   :  { %12244 = vmatprep.subr.mxu0 %v22274_v23  ;;  %12277 = vmatprep.subr.mxu1 %v18504_v14 }
 0x39d   :  { %12245 = vmatpush3.msra.mxu0 %v18672_v29  ;;  %12278 = vmatpush3.msra.mxu1 %v18506_v0 }
 0x39e   :  { %12246 = vmatprep.subr.mxu0 %v18700_v62  ;;  %12279 = vmatprep.subr.mxu1 %v18580_v5 }
 0x39f   :  { %12247 = vmatpush3.msra.mxu0 %v18710_v42  ;;  %12280 = vmatpush3.msra.mxu1 %v18604_v46 }
 0x3a0   :  { %12248 = vmatprep.subr.mxu0 %v18723_v55  ;;  %12281 = vmatprep.subr.mxu1 %v18636_v38 }
 0x3a1   :  { %12249 = vmatpush3.msra.mxu0 %v18734_v20  ;;  %12282 = vmatpush3.msra.mxu1 %v18653_v58 }
 0x3a2   :  { %12250 = vmatprep.subr.mxu0 %v18747_v49  ;;  %12283 = vmatprep.subr.mxu1 %v18674_v57 }
 0x3a3   :  { %12251 = vmatpush3.msra.mxu0 %v18757_v61  ;;  %12284 = vmatpush3.msra.mxu1 %v18691_v60 }
 0x3a4   :  { %12252 = vmatprep.subr.mxu0 %v18766_v19  ;;  %12285 = vmatprep.subr.mxu1 %v18702_v31  ;;  %v22275_v19 = vld [vmem:[#allocation37_spill] sm:$0xff] }
 0x3a5   :  { %12253 = vmatpush3.msra.mxu0 %v18779_v50  ;;  %12286 = vmatpush3.msra.mxu1 %v18712_v52 }
 0x3a6   :  { %12254 = vmatprep.subr.mxu0 %v18789_v43  ;;  %12287 = vmatprep.subr.mxu1 %v18725_v30  ;;  %v22276_v30 = vand.u32 4294901760, %v18316_v39  ;;  %v22282_v39 = vand.u32 4294901760, %v18407_v47 }
 0x3a7   :  { %12255 = vmatpush3.msra.mxu0 %v18797_v24  ;;  %12288 = vmatpush3.msra.mxu1 %v18736_v22  ;;  %v22277_v22 = vand.u32 4294901760, %v22275_v19 }
 0x3a8   :  { %12256 = vmatprep.subr.mxu0 %v18812_v3  ;;  %12289 = vmatprep.subr.mxu1 %v18749_v33  ;;  %v22278_v33 = vand.u32 4294901760, %v18325_v41  ;;  %v22283_v41 = vand.u32 4294901760, %v18418_v2  ;;  %v22289_v2 = vand.u32 4294901760, %v22261_v45 }
 0x3a9   :  { %12257 = vmatpush3.msra.mxu0 %v18820_v37  ;;  %8327 = vmatprep.mubr.f32.mxu0 %v22275_v19  ;;  %v22279_v37 = vand.u32 4294901760, %v18809_v48 }
 0x3aa   :  { %12290 = vmatpush3.msra.mxu1 %v18759_v9  ;;  %8330 = vmatmul.mubr.f32.vlgmr.msra.gmra.mxu0 %v18809_v48  ;;  %v22280_v9 = vand.u32 4294901760, %v18349_v18  ;;  %v547_v18 = vld [vmem:[%s20410_s2 + $0x1f8] sm:$0xff] }
 0x3ab   :  { %12291 = vmatprep.subr.mxu1 %v18768_v25  ;;  %12296 = vmatprep.subr.mxu0 %v22276_v30  ;;  %v22281_v25 = vand.u32 4294901760, %v18377_v21  ;;  %v22286_v21 = vand.u32 4294901760, %v22255_v28 }
 0x3ac   :  { %12292 = vmatpush3.msra.mxu1 %v18781_v44  ;;  %8434 = vmatprep.mubr.f32.mxu1 %v22277_v22  ;;  %v18973_v22 = vand.u32 4294901760, %v547_v18 }
 0x3ad   :  { %12297 = vmatpush3.msra.mxu0 %v22278_v33  ;;  %8438 = vmatmul.mubr.f32.vlgmr.msra.gmra.mxu1 %v22279_v37  ;;  %v545_v33 = vld [vmem:[%s20410_s2 + $0x1e8] sm:$0xff]  ;;  %v22293_v37 = vand.u32 4294901760, %v22267_v13 }
 0x3ae   :  { %12298 = vmatprep.subr.mxu0 %v22280_v9  ;;  %12331 = vmatprep.subr.mxu1 %v18294_v63  ;;  %v22284_v63 = vand.u32 4294901760, %v18421_v10  ;;  %v530_v10 = vld [vmem:[%s20410_s2 + $0x170] sm:$0xff]  ;;  %v18998_v30 = vsub.f32 %v547_v18, %v18973_v22  ;;  %v22291_v9 = vld [vmem:[#allocation38_spill] sm:$0xff] }
 0x3af   :  { %12299 = vmatpush3.msra.mxu0 %v22281_v25  ;;  %12332 = vmatpush3.msra.mxu1 %v18299_v40  ;;  %v531_v40 = vld [vmem:[%s20410_s2 + $0x178] sm:$0xff]  ;;  %v22292_v25 = vand.u32 4294901760, %v22265_v32  ;;  %v19012_v28 = vand.u32 4294901760, %v530_v10  ;;  %v22296_v32 = vand.u32 4294901760, %v22273_v4 }
 0x3b0   :  { %12300 = vmatprep.subr.mxu0 %v22282_v39  ;;  %12333 = vmatprep.subr.mxu1 %v18313_v12  ;;  %v22285_v12 = vand.u32 4294901760, %v18433_v16  ;;  %v18978_v47 = vand.u32 4294901760, %v531_v40  ;;  %v22290_v16 = vand.u32 4294901760, %v22263_v1  ;;  %v21058_v45 = vand.u32 4294901760, %v18998_v30  ;;  %v528_v1 = vld [vmem:[%s20410_s2 + $0x160] sm:$0xff]  ;;  %v527_v4 = vld [vmem:[%s20410_s2 + $0x158] sm:$0xff] }
 0x3b1   :  { %12301 = vmatpush3.msra.mxu0 %v22283_v41  ;;  %12334 = vmatpush3.msra.mxu1 %v18336_v26  ;;  %v22287_v26 = vand.u32 4294901760, %v22257_v6  ;;  %v22294_v6 = vand.u32 4294901760, %v22269_v51  ;;  %v22297_v51 = vand.u32 4294901760, %v22274_v23  ;;  %v542_v23 = vld [vmem:[%s20410_s2 + $0x1d0] sm:$0xff]  ;;  %v22301_v41 = vand.u32 4294901760, %v18700_v62 }
 0x3b2   :  { %12302 = vmatprep.subr.mxu0 %v22284_v63  ;;  %12335 = vmatprep.subr.mxu1 %v18358_v35  ;;  %v546_v35 = vld [vmem:[%s20410_s2 + $0x1f0] sm:$0xff]  ;;  %v19007_v48 = vsub.f32 %v531_v40, %v18978_v47 }
 0x3b3   :  { %12303 = vmatpush3.msra.mxu0 %v22285_v12  ;;  %12336 = vmatpush3.msra.mxu1 %v18366_v27  ;;  %v22288_v27 = vand.u32 4294901760, %v22259_v11  ;;  %v18995_v19 = vand.u32 4294901760, %v546_v35  ;;  %v544_v11 = vld [vmem:[%s20410_s2 + $0x1e0] sm:$0xff]  ;;  %v526_v63 = vld [vmem:[%s20410_s2 + $0x150] sm:$0xff]  ;;  %v19091_v12 = vand.u32 4294901760, %v527_v4 }
 0x3b4   :  { %12304 = vmatprep.subr.mxu0 %v22286_v21  ;;  %12337 = vmatprep.subr.mxu1 %v22256_v17  ;;  %v529_v17 = vld [vmem:[%s20410_s2 + $0x168] sm:$0xff] }
 0x3b5   :  { %12305 = vmatpush3.msra.mxu0 %v22287_v26  ;;  %12338 = vmatpush3.msra.mxu1 %v22258_v53  ;;  %v19020_v53 = vand.u32 4294901760, %v545_v33  ;;  %v19039_v13 = vand.u32 4294901760, %v529_v17  ;;  %22304 = vst [vmem:[#allocation30_spill] sm:$0xff] %v19091_v12  ;;  %v541_v21 = vld [vmem:[%s20410_s2 + $0x1c8] sm:$0xff] }
 0x3b6   :  { %12306 = vmatprep.subr.mxu0 %v22288_v27  ;;  %12339 = vmatprep.subr.mxu1 %v22260_v8  ;;  %v22295_v8 = vand.u32 4294901760, %v22271_v56  ;;  %v22299_v56 = vand.u32 4294901760, %v18672_v29  ;;  %v525_v27 = vld [vmem:[%s20410_s2 + $0x148] sm:$0xff] }
 0x3b7   :  { %12307 = vmatpush3.msra.mxu0 %v22289_v2  ;;  %12340 = vmatpush3.msra.mxu1 %v22262_v54  ;;  %v19030_v54 = vsub.f32 %v546_v35, %v18995_v19  ;;  %v19059_v39 = vsub.f32 %v545_v33, %v19020_v53  ;;  %v19089_v40 = vsub.f32 %v529_v17, %v19039_v13  ;;  %v19103_v35 = vand.u32 4294901760, %v542_v23 }
 0x3b8   :  { %12308 = vmatprep.subr.mxu0 %v22290_v16  ;;  %12341 = vmatprep.subr.mxu1 %v22291_v9  ;;  %v22307_v2 = vand.u32 4294901760, %v18734_v20  ;;  %v524_v16 = vld [vmem:[%s20410_s2 + $0x140] sm:$0xff]  ;;  %v22309_v33 = vand.u32 4294901760, %v18747_v49  ;;  %v521_v49 = vld [vmem:[%s20410_s2 + $0x128] sm:$0xff] }
 0x3b9   :  { %12309 = vmatpush3.msra.mxu0 %v22292_v25  ;;  %12342 = vmatpush3.msra.mxu1 %v22266_v36  ;;  %v21057_v36 = vand.u32 4294901760, %v19007_v48  ;;  %v21055_v29 = vand.u32 4294901760, %v19030_v54  ;;  %22306 = vst [vmem:[#allocation16_spill] sm:$0xff] %v19103_v35  ;;  %v19132_v25 = vand.u32 4294901760, %v541_v21  ;;  %v21051_v17 = vand.u32 4294901760, %v19089_v40 }
 0x3ba   :  { %12310 = vmatprep.subr.mxu0 %v22293_v37  ;;  %12343 = vmatprep.subr.mxu1 %v22268_v59  ;;  %v543_v59 = vld [vmem:[%s20410_s2 + $0x1d8] sm:$0xff]  ;;  %v540_v37 = vld [vmem:[%s20410_s2 + $0x1c0] sm:$0xff] }
 0x3bb   :  { %12311 = vmatpush3.msra.mxu0 %v22294_v6  ;;  %12344 = vmatpush3.msra.mxu1 %v22270_v7  ;;  %v19048_v7 = vsub.f32 %v530_v10, %v19012_v28  ;;  %v19075_v18 = vand.u32 4294901760, %v543_v59  ;;  %v19086_v62 = vsub.f32 %v19007_v48, %v21057_v36  ;;  %v19115_v10 = vand.u32 4294901760, %v526_v63  ;;  %22311 = vst [vmem:[#allocation28_spill] sm:$0xff] %v19132_v25  ;;  %v22337_v36 = vld [vmem:[#allocation21_spill] sm:$0xff] }
 0x3bc   :  { %12312 = vmatprep.subr.mxu0 %v22295_v8  ;;  %12345 = vmatprep.subr.mxu1 %v22272_v34  ;;  %v19050_v34 = vand.u32 4294901760, %v544_v11  ;;  %v19127_v20 = vsub.f32 %v19030_v54, %v21055_v29  ;;  %v19143_v6 = vsub.f32 %v527_v4, %v19091_v12  ;;  %v539_v8 = vld [vmem:[%s20410_s2 + $0x1b8] sm:$0xff]  ;;  %v19165_v4 = vand.u32 4294901760, %v524_v16 }
 0x3bd   :  { %12313 = vmatpush3.msra.mxu0 %v22296_v32  ;;  %12346 = vmatpush3.msra.mxu1 %v18481_v15  ;;  %v19061_v15 = vand.u32 4294901760, %v528_v1  ;;  %22302 = vst [vmem:[#allocation18_spill] sm:$0xff] %v19075_v18  ;;  %22308 = vst [vmem:[#allocation14_spill] sm:$0xff] %v19115_v10  ;;  %v19130_v9 = vsub.f32 %v543_v59, %v19075_v18  ;;  %v22334_v29 = vld [vmem:[#allocation17_spill] sm:$0xff] }
 0x3be   :  { %12314 = vmatprep.subr.mxu0 %v22297_v51  ;;  %22298 = vst [vmem:[#allocation13_spill] sm:$0xff] %v19050_v34  ;;  %12347 = vmatprep.subr.mxu1 %v18504_v14  ;;  %v19072_v14 = vsub.f32 %v18998_v30, %v21058_v45  ;;  %v19101_v26 = vsub.f32 %v544_v11, %v19050_v34  ;;  %22313 = vst [vmem:[#allocation22_spill] sm:$0xff] %v19143_v6  ;;  %v19145_v11 = vand.u32 4294901760, %v525_v27 }
 0x3bf   :  { %12315 = vmatpush3.msra.mxu0 %v22299_v56  ;;  %22300 = vst [vmem:[#allocation7_spill] sm:$0xff] %v19061_v15  ;;  %12348 = vmatpush3.msra.mxu1 %v18506_v0  ;;  %v22303_v0 = vand.u32 4294901760, %v18710_v42  ;;  %v21054_v42 = vand.u32 4294901760, %v19048_v7  ;;  %22310 = vst [vmem:[#allocation19_spill] sm:$0xff] %v19130_v9  ;;  %v19163_v51 = vsub.f32 %v542_v23, %v19103_v35  ;;  %v22318_v56 = vand.u32 4294901760, %v18779_v50 }
 0x3c0   :  { %12316 = vmatprep.subr.mxu0 %v22301_v41  ;;  %12349 = vmatprep.subr.mxu1 %v18580_v5  ;;  %v22305_v5 = vand.u32 4294901760, %v18723_v55  ;;  %v19113_v55 = vsub.f32 %v528_v1, %v19061_v15  ;;  %22314 = vst [vmem:[#allocation10_spill] sm:$0xff] %v19145_v11  ;;  %v21052_v59 = vand.u32 4294901760, %v19101_v26  ;;  %v22321_v23 = vand.u32 4294901760, %v18789_v43 }
 0x3c1   :  { %12317 = vmatpush3.msra.mxu0 %v22303_v0  ;;  %12350 = vmatpush3.msra.mxu1 %v18604_v46  ;;  %v21053_v46 = vand.u32 4294901760, %v19059_v39  ;;  %v19159_v32 = vsub.f32 %v19048_v7, %v21054_v42  ;;  %22317 = vst [vmem:[#allocation35_spill] sm:$0xff] %v19163_v51  ;;  %v19177_v0 = vsub.f32 %v526_v63, %v19115_v10  ;;  %v21059_v50 = vand.u32 4294901760, %v19130_v9  ;;  %v22333_v42 = vld [vmem:[#allocation32_spill] sm:$0xff] }
 0x3c2   :  { %12318 = vmatprep.subr.mxu0 %v22305_v5  ;;  %12351 = vmatprep.subr.mxu1 %v18636_v38  ;;  %v8944_v38 = vand.u32 4294901760, %v19072_v14  ;;  %v21056_v41 = vand.u32 4294901760, %v19113_v55  ;;  %v19179_v5 = vand.u32 4294901760, %v540_v37  ;;  %v22324_v63 = vand.u32 4294901760, %v18797_v24  ;;  %v22339_v24 = vld [vmem:[#allocation15_spill] sm:$0xff] }
 0x3c3   :  { %12319 = vmatpush3.msra.mxu0 %v22307_v2  ;;  %12352 = vmatpush3.msra.mxu1 %v18653_v58  ;;  %v22312_v58 = vand.u32 4294901760, %v18757_v61  ;;  %v22315_v61 = vld [vmem:[#allocation42_spill] sm:$0xff]  ;;  %22319 = vst [vmem:[#allocation20_spill] sm:$0xff] %v19177_v0  ;;  %v19188_v2 = vand.u32 4294901760, %v539_v8  ;;  %v19199_v43 = vsub.f32 %v19089_v40, %v21051_v17  ;;  %v22341_v14 = vand.u32 4294901760, %v19086_v62 }
 0x3c4   :  { %12320 = vmatprep.subr.mxu0 %v22309_v33  ;;  %12353 = vmatprep.subr.mxu1 %v18674_v57  ;;  %v523_v57 = vld [vmem:[%s20410_s2 + $0x138] sm:$0xff]  ;;  %v22316_v1 = vand.u32 4294901760, %v22315_v61  ;;  %22320 = vst [vmem:[#allocation34_spill] sm:$0xff] %v19179_v5  ;;  %v7822_v61 = vcombine.high %v22339_v24, %v22339_v24  ;;  %v520_v24 = vld [vmem:[%s20410_s2 + $0x120] sm:$0xff]  ;;  %v22344_v62 = vand.u32 4294901760, %v19127_v20  ;;  %v22346_v20 = vand.u32 4294901760, %v19159_v32 }
 0x3c5   :  { %12321 = vmatpush3.msra.mxu0 %v22312_v58  ;;  %12354 = vmatpush3.msra.mxu1 %v18691_v60  ;;  %v19173_v60 = vsub.f32 %v19059_v39, %v21053_v46  ;;  %v19190_v33 = vand.u32 4294901760, %v523_v57  ;;  %v22323_v58 = vld [vmem:[#allocation40_spill] sm:$0xff]  ;;  %v21062_v46 = vand.u32 4294901760, %v19177_v0  ;;  %v8846_v45 = vand.u32 4294901760, %v19199_v43 }
 0x3c6   :  { %12322 = vmatprep.subr.mxu0 %v22316_v1  ;;  %12355 = vmatprep.subr.mxu1 %v18702_v31  ;;  %v19186_v31 = vsub.f32 %v541_v21, %v19132_v25  ;;  %v19203_v21 = vsub.f32 %v525_v27, %v19145_v11  ;;  %v22326_v1 = vld [vmem:[#allocation39_spill] sm:$0xff] }
 0x3c7   :  { %12323 = vmatpush3.msra.mxu0 %v22318_v56  ;;  %12356 = vmatpush3.msra.mxu1 %v18712_v52  ;;  %v21060_v52 = vand.u32 4294901760, %v19143_v6  ;;  %v22327_v56 = vand.u32 4294901760, %v18812_v3  ;;  %v538_v27 = vld [vmem:[%s20410_s2 + $0x1b0] sm:$0xff] }
 0x3c8   :  { %12324 = vmatprep.subr.mxu0 %v22321_v23  ;;  %22322 = vst [vmem:[#allocation31_spill] sm:$0xff] %v19186_v31  ;;  %12357 = vmatprep.subr.mxu1 %v22323_v58  ;;  %22325 = vst [vmem:[#allocation33_spill] sm:$0xff] %v19203_v21  ;;  %v19212_v23 = vsub.f32 %v19101_v26, %v21052_v59  ;;  %v21061_v58 = vand.u32 4294901760, %v19163_v51  ;;  %v22330_v3 = vld [vmem:[#allocation24_spill] sm:$0xff]  ;;  %v19228_v59 = vsub.f32 %v19113_v55, %v21056_v41 }
 0x3c9   :  { %12325 = vmatpush3.msra.mxu0 %v22324_v63  ;;  %12358 = vmatpush3.msra.mxu1 %v22326_v1  ;;  %v19216_v63 = vsub.f32 %v524_v16, %v19165_v4  ;;  %v22329_v1 = vld [vmem:[#allocation12_spill] sm:$0xff]  ;;  %v19232_v16 = vsub.f32 %v540_v37, %v19179_v5  ;;  %v19246_v41 = vsub.f32 %v539_v8, %v19188_v2  ;;  %v19260_v17 = vand.u32 4294901760, %v538_v27 }
 0x3ca   :  { %12326 = vmatprep.subr.mxu0 %v22327_v56  ;;  %12359 = vmatprep.subr.mxu1 %v22329_v1  ;;  %v22331_v56 = vand.u32 4294901760, %v22330_v3  ;;  %v19239_v1 = vsub.f32 %v19130_v9, %v21059_v50  ;;  %v21063_v3 = vand.u32 4294901760, %v19186_v31  ;;  %v522_v37 = vld [vmem:[%s20410_s2 + $0x130] sm:$0xff]  ;;  %v19257_v50 = vsub.f32 %v19143_v6, %v21060_v52  ;;  %v537_v52 = vld [vmem:[%s20410_s2 + $0x1a8] sm:$0xff]  ;;  %v516_v6 = vld [vmem:[%s20410_s2 + $0x100] sm:$0xff] }
 0x3cb   :  { %22328 = vst [vmem:[#allocation11_spill] sm:$0xff] %v19216_v63  ;;  %22332 = vst [vmem:[#allocation25_spill] sm:$0xff] %v19232_v16  ;;  %8604 = vmatprep.mubr.f32.mxu0 %v22333_v42  ;;  %12360 = vmatpush3.msra.mxu1 %v22334_v29  ;;  %v22338_v29 = vld [vmem:[#allocation8_spill] sm:$0xff]  ;;  %v8965_v8 = vand.u32 4294901760, %v19212_v23  ;;  %v19282_v23 = vsub.f32 %v19177_v0, %v21062_v46  ;;  %v19285_v43 = vand.u32 4294901760, %v522_v37 }
 0x3cc   :  { %12327 = vmatpush3.msra.mxu0 %v22331_v56  ;;  %v19243_v56 = vsub.f32 %v523_v57, %v19190_v33  ;;  %22336 = vst [vmem:[#allocation26_spill] sm:$0xff] %v19246_v41  ;;  %12361 = vmatprep.subr.mxu1 %v22338_v29  ;;  %v21064_v57 = vand.u32 4294901760, %v19203_v21  ;;  %v19268_v29 = vsub.f32 %v19163_v51, %v21061_v58  ;;  %v536_v58 = vld [vmem:[%s20410_s2 + $0x1a0] sm:$0xff]  ;;  %v534_v32 = vld [vmem:[%s20410_s2 + $0x190] sm:$0xff] }
 0x3cd   :  { %8606 = vmatmul.mubr.f32.vlgmr.msra.gmra.mxu0 %v22337_v36  ;;  %12366 = vmatprep.subr.mxu0 %v18973_v22  ;;  %v19315_v46 = vsub.f32 %v538_v27, %v19260_v17  ;;  %v535_v27 = vld [vmem:[%s20410_s2 + $0x198] sm:$0xff]  ;;  %v19349_v51 = vand.u32 4294901760, %v536_v58 }
 0x3ce   :  { %22335 = vst [vmem:[#allocation9_spill] sm:$0xff] %v19243_v56  ;;  %12362 = vmatpush3.msra.mxu1 %v18781_v44  ;;  %8708 = vmatprep.mubr.f32.mxu1 %v22333_v42  ;;  %v8853_v44 = vand.u32 4294901760, %v19228_v59  ;;  %v8972_v42 = vand.u32 4294901760, %v19239_v1  ;;  %v19296_v59 = vsub.f32 %v19186_v31, %v21063_v3  ;;  %v19310_v1 = vsub.f32 %v19203_v21, %v21064_v57  ;;  %v22343_v31 = vld [vmem:[#allocation41_spill] sm:$0xff] }
 0x3cf   :  { %12367 = vmatpush3.msra.mxu0 %v18978_v47  ;;  %8710 = vmatmul.mubr.f32.vlgmr.msra.gmra.mxu1 %v22337_v36  ;;  %v8860_v36 = vand.u32 4294901760, %v19257_v50  ;;  %v19312_v3 = vand.u32 4294901760, %v537_v52  ;;  %22340 = vst [vmem:[#allocation6_spill] sm:$0xff] %v19315_v46  ;;  %v22342_v50 = vand.u32 4294901760, %v19216_v63  ;;  %v19329_v21 = vand.u32 4294901760, %v521_v49 }
 0x3d0   :  { %12368 = vmatprep.subr.mxu0 %v18995_v19  ;;  %12401 = vmatprep.subr.mxu1 %v8944_v38  ;;  %v8979_v38 = vand.u32 4294901760, %v19268_v29  ;;  %v19335_v0 = vrot.slane %v7822_v61, %v22343_v31  ;;  %v8867_v29 = vand.u32 4294901760, %v19282_v23  ;;  %v519_v31 = vld [vmem:[%s20410_s2 + $0x118] sm:$0xff]  ;;  %v8986_v61 = vand.u32 4294901760, %v19296_v59 }
 0x3d1   :  { %12369 = vmatpush3.msra.mxu0 %v19012_v28  ;;  %12402 = vmatpush3.msra.mxu1 %v22341_v14  ;;  %v19327_v57 = vsub.f32 %v19216_v63, %v22342_v50  ;;  %v22345_v14 = vand.u32 4294901760, %v19232_v16  ;;  %v19347_v63 = vsub.f32 %v522_v37, %v19285_v43  ;;  %v22347_v23 = vand.u32 4294901760, %v19246_v41 }
 0x3d2   :  { %12370 = vmatprep.subr.mxu0 %v19020_v53  ;;  %12403 = vmatprep.subr.mxu1 %v22344_v62  ;;  %v22348_v37 = vand.u32 4294901760, %v19243_v56  ;;  %v8874_v59 = vand.u32 4294901760, %v19310_v1  ;;  %v19391_v1 = vand.u32 4294901760, %v519_v31 }
 0x3d3   :  { %12371 = vmatpush3.msra.mxu0 %v19039_v13  ;;  %v19344_v50 = vsub.f32 %v19232_v16, %v22345_v14  ;;  %12404 = vmatpush3.msra.mxu1 %v22346_v20  ;;  %v19361_v62 = vsub.f32 %v19246_v41, %v22347_v23  ;;  %v19368_v16 = vand.u32 4294901760, %v520_v24  ;;  %v22349_v20 = vand.u32 4294901760, %v19173_v60 }
 0x3d4   :  { %12372 = vmatprep.subr.mxu0 %v19050_v34  ;;  %v19366_v14 = vsub.f32 %v19243_v56, %v22348_v37  ;;  %v19379_v41 = vsub.f32 %v537_v52, %v19312_v3  ;;  %v19381_v37 = vand.u32 4294901760, %v535_v27  ;;  %v518_v56 = vld [vmem:[%s20410_s2 + $0x110] sm:$0xff]  ;;  %v8881_v60 = vand.u32 4294901760, %v19327_v57  ;;  %v533_v52 = vld [vmem:[%s20410_s2 + $0x188] sm:$0xff] }
 0x3d5   :  { %12405 = vmatprep.subr.mxu1 %v22349_v20  ;;  %12373 = vmatpush3.msra.mxu0 %v19061_v15  ;;  %v19389_v20 = vsub.f32 %v521_v49, %v19329_v21  ;;  %v7838_v23 = vcombine.high %v19335_v0, %v19335_v0  ;;  %v19402_v57 = vsub.f32 %v536_v58, %v19349_v51  ;;  %v19404_v49 = vand.u32 4294901760, %v534_v32  ;;  %v517_v15 = vld [vmem:[%s20410_s2 + $0x108] sm:$0xff]  ;;  %v532_v58 = vld [vmem:[%s20410_s2 + $0x180] sm:$0xff] }
 0x3d6   :  { %12406 = vmatpush3.msra.mxu1 %v8846_v45  ;;  %12374 = vmatprep.subr.mxu0 %v19075_v18  ;;  %v8993_v45 = vand.u32 4294901760, %v19344_v50  ;;  %v19413_v50 = vsub.f32 %v520_v24, %v19368_v16  ;;  %v19415_v18 = vand.u32 4294901760, %v518_v56  ;;  %v19428_v24 = vand.u32 4294901760, %v533_v52 }
 0x3d7   :  { %12407 = vmatprep.subr.mxu1 %v8965_v8  ;;  %12375 = vmatpush3.msra.mxu0 %v19091_v12  ;;  %22350 = vst [vmem:[#allocation29_spill] sm:$0xff] %v19404_v49  ;;  %v9000_v8 = vand.u32 4294901760, %v19361_v62  ;;  %v8888_v12 = vand.u32 4294901760, %v19366_v14  ;;  %v19426_v14 = vsub.f32 %v535_v27, %v19381_v37  ;;  %v19440_v62 = vand.u32 4294901760, %v7838_v23 }
 0x3d8   :  { %12408 = vmatpush3.msra.mxu1 %v8853_v44  ;;  %12376 = vmatprep.subr.mxu0 %v19103_v35  ;;  %22351 = vst [vmem:[#allocation36_spill] sm:$0xff] %v19415_v18  ;;  %v22352_v44 = vand.u32 4294901760, %v19315_v46  ;;  %22353 = vst [vmem:[#allocation27_spill] sm:$0xff] %v19428_v24  ;;  %v19460_v27 = vand.u32 4294901760, %v516_v6  ;;  %v22360_v34 = vand.u32 4294901760, %v19379_v41  ;;  %v19468_v9 = vsub.f32 %v533_v52, %v19428_v24 }
 0x3d9   :  { %12409 = vmatprep.subr.mxu1 %v8972_v42  ;;  %12377 = vmatpush3.msra.mxu0 %v19115_v10  ;;  %v19436_v10 = vsub.f32 %v519_v31, %v19391_v1  ;;  %22355 = vst [vmem:[#allocation43_spill] sm:$0xff] %v19440_v62  ;;  %v22359_v31 = vand.u32 4294901760, %v19347_v63 }
 0x3da   :  { %v9006_v35 = vsub.f32 %v19315_v46, %v22352_v44  ;;  %12410 = vmatpush3.msra.mxu1 %v8860_v36  ;;  %12378 = vmatprep.subr.mxu0 %v19132_v25  ;;  %v19438_v44 = vand.u32 4294901760, %v517_v15  ;;  %v19445_v46 = vsub.f32 %v534_v32, %v19404_v49  ;;  %v19447_v36 = vand.u32 4294901760, %v532_v58 }
 0x3db   :  { %12411 = vmatprep.subr.mxu1 %v8979_v38  ;;  %12379 = vmatpush3.msra.mxu0 %v19145_v11  ;;  %v19450_v25 = vand.u32 4294901760, %v19335_v0  ;;  %v8894_v42 = vsub.f32 %v19347_v63, %v22359_v31  ;;  %v19458_v11 = vsub.f32 %v518_v56, %v19415_v18  ;;  %v22361_v56 = vand.u32 4294901760, %v19389_v20 }
 0x3dc   :  { %22354 = vst [vmem:[#allocation23_spill] sm:$0xff] %v19438_v44  ;;  %22356 = vst [vmem:[#allocation37_spill] sm:$0xff] %v19445_v46  ;;  %12412 = vmatpush3.msra.mxu1 %v8867_v29  ;;  %12380 = vmatprep.subr.mxu0 %v19179_v5  ;;  %v9007_v32 = vand.u32 4294901760, %v9006_v35  ;;  %v9013_v29 = vsub.f32 %v19379_v41, %v22360_v34  ;;  %v19476_v35 = vsub.f32 %v517_v15, %v19438_v44 }
 0x3dd   :  { %22357 = vst [vmem:[#allocation38_spill] sm:$0xff] %v19447_v36  ;;  %22358 = vst [vmem:[#allocation42_spill] sm:$0xff] %v19450_v25  ;;  %12413 = vmatprep.subr.mxu1 %v8986_v61  ;;  %12381 = vmatpush3.msra.mxu0 %v19165_v4  ;;  %v8901_v31 = vsub.f32 %v19389_v20, %v22361_v56  ;;  %v19479_v38 = vsub.f32 %v7838_v23, %v19440_v62  ;;  %v22363_v34 = vand.u32 4294901760, %v19402_v57 }
 0x3de   :  { %12414 = vmatpush3.msra.mxu1 %v8874_v59  ;;  %12382 = vmatprep.subr.mxu0 %v19188_v2  ;;  %v19488_v56 = vsub.f32 %v19335_v0, %v19450_v25  ;;  %v19491_v61 = vsub.f32 %v532_v58, %v19447_v36  ;;  %v8895_v15 = vand.u32 4294901760, %v8894_v42  ;;  %v22364_v23 = vand.u32 4294901760, %v19413_v50 }
 0x3df   :  { %22362 = vst [vmem:[#allocation40_spill] sm:$0xff] %v19479_v38  ;;  %12415 = vmatprep.subr.mxu1 %v8993_v45  ;;  %12383 = vmatpush3.msra.mxu0 %v19190_v33  ;;  %v9020_v59 = vsub.f32 %v19402_v57, %v22363_v34  ;;  %v19499_v34 = vsub.f32 %v516_v6, %v19460_v27  ;;  %v9014_v0 = vand.u32 4294901760, %v9013_v29  ;;  %v22366_v58 = vand.u32 4294901760, %v19426_v14 }
 0x3e0   :  { %12416 = vmatpush3.msra.mxu1 %v8881_v60  ;;  %12384 = vmatprep.subr.mxu0 %v19260_v17  ;;  %v8908_v45 = vsub.f32 %v19413_v50, %v22364_v23  ;;  %v8902_v42 = vand.u32 4294901760, %v8901_v31  ;;  %v22367_v23 = vand.u32 4294901760, %v19436_v10  ;;  %v22369_v6 = vand.u32 4294901760, %v19458_v11 }
 0x3e1   :  { %22365 = vst [vmem:[#allocation39_spill] sm:$0xff] %v19499_v34  ;;  %12417 = vmatprep.subr.mxu1 %v9000_v8  ;;  %12385 = vmatpush3.msra.mxu0 %v19285_v43  ;;  %v9027_v60 = vsub.f32 %v19426_v14, %v22366_v58  ;;  %v9021_v29 = vand.u32 4294901760, %v9020_v59  ;;  %v22368_v58 = vand.u32 4294901760, %v19445_v46 }
 0x3e2   :  { %12418 = vmatpush3.msra.mxu1 %v8888_v12  ;;  %12386 = vmatprep.subr.mxu0 %v19312_v3  ;;  %v8915_v5 = vsub.f32 %v19436_v10, %v22367_v23  ;;  %v8909_v23 = vand.u32 4294901760, %v8908_v45  ;;  %v8922_v8 = vsub.f32 %v19458_v11, %v22369_v6  ;;  %v22371_v45 = vand.u32 4294901760, %v19479_v38 }
 0x3e3   :  { %12419 = vmatprep.subr.mxu1 %v9007_v32  ;;  %12387 = vmatpush3.msra.mxu0 %v19329_v21  ;;  %v9034_v52 = vsub.f32 %v19445_v46, %v22368_v58  ;;  %v9028_v59 = vand.u32 4294901760, %v9027_v60  ;;  %v22370_v58 = vand.u32 4294901760, %v19468_v9  ;;  %v22372_v6 = vand.u32 4294901760, %v19476_v35 }
 0x3e4   :  { %12420 = vmatpush3.msra.mxu1 %v8895_v15  ;;  %12388 = vmatprep.subr.mxu0 %v19349_v51  ;;  %v8916_v15 = vand.u32 4294901760, %v8915_v5  ;;  %v8814_v31 = vsub.f32 %v19479_v38, %v22371_v45  ;;  %v22373_v60 = vand.u32 4294901760, %v19488_v56  ;;  %v8923_v45 = vand.u32 4294901760, %v8922_v8 }
 0x3e5   :  { %12421 = vmatprep.subr.mxu1 %v9014_v0  ;;  %12389 = vmatpush3.msra.mxu0 %v19368_v16  ;;  %v9041_v12 = vsub.f32 %v19468_v9, %v22370_v58  ;;  %v8929_v32 = vsub.f32 %v19476_v35, %v22372_v6  ;;  %v9035_v0 = vand.u32 4294901760, %v9034_v52  ;;  %v22375_v38 = vand.u32 4294901760, %v19499_v34 }
 0x3e6   :  { %12422 = vmatpush3.msra.mxu1 %v8902_v42  ;;  %12390 = vmatprep.subr.mxu0 %v19381_v37  ;;  %v8820_v58 = vsub.f32 %v19488_v56, %v22373_v60  ;;  %v22374_v42 = vand.u32 4294901760, %v19491_v61 }
 0x3e7   :  { %12423 = vmatprep.subr.mxu1 %v9021_v29  ;;  %12391 = vmatpush3.msra.mxu0 %v19391_v1  ;;  %v8936_v6 = vsub.f32 %v19499_v34, %v22375_v38  ;;  %v9042_v52 = vand.u32 4294901760, %v9041_v12  ;;  %v8815_v29 = vand.u32 4294901760, %v8814_v31  ;;  %v8930_v60 = vand.u32 4294901760, %v8929_v32  ;;  %v22376_v38 = vld [vmem:[#allocation19_spill] sm:$0xff]  ;;  %v22377_v12 = vld [vmem:[#allocation13_spill] sm:$0xff]  ;;  %v22378_v31 = vld [vmem:[#allocation22_spill] sm:$0xff] }
 0x3e8   :  { %v9048_v5 = vsub.f32 %v19491_v61, %v22374_v42  ;;  %12424 = vmatpush3.msra.mxu1 %v8909_v23  ;;  %12392 = vmatprep.subr.mxu0 %v19404_v49  ;;  %v8821_v23 = vand.u32 4294901760, %v8820_v58  ;;  %v22379_v32 = vld [vmem:[#allocation7_spill] sm:$0xff]  ;;  %v22383_v58 = vld [vmem:[#allocation30_spill] sm:$0xff] }
 0x3e9   :  { %12425 = vmatprep.subr.mxu1 %v9028_v59  ;;  %12393 = vmatpush3.msra.mxu0 %v19415_v18  ;;  %v8937_v8 = vand.u32 4294901760, %v8936_v6  ;;  %v22380_v59 = vld [vmem:[#allocation35_spill] sm:$0xff]  ;;  %v22386_v6 = vld [vmem:[#allocation33_spill] sm:$0xff] }
 0x3ea   :  { %12426 = vmatpush3.msra.mxu1 %v8916_v15  ;;  %12394 = vmatprep.subr.mxu0 %v19428_v24  ;;  %v9049_v42 = vand.u32 4294901760, %v9048_v5  ;;  %v22381_v15 = vld [vmem:[#allocation18_spill] sm:$0xff]  ;;  %v22384_v5 = vld [vmem:[#allocation31_spill] sm:$0xff] }
 0x3eb   :  { %12427 = vmatprep.subr.mxu1 %v9035_v0  ;;  %12395 = vmatpush3.msra.mxu0 %v19438_v44  ;;  %v22382_v0 = vld [vmem:[#allocation20_spill] sm:$0xff] }
 0x3ec   :  { %12428 = vmatpush3.msra.mxu1 %v8923_v45  ;;  %12396 = vmatprep.subr.mxu0 %v19447_v36  ;;  %v22385_v45 = vld [vmem:[#allocation16_spill] sm:$0xff] }
 0x3ed   :  { %12429 = vmatprep.subr.mxu1 %v9042_v52  ;;  %12397 = vmatpush3.msra.mxu0 %v19460_v27  ;;  %v22387_v52 = vld [vmem:[#allocation14_spill] sm:$0xff] }
 0x3ee   :  { %8816 = vmatprep.mubr.f32.mxu0 %v8815_v29  ;;  %12430 = vmatpush3.msra.mxu1 %v8930_v60  ;;  %v22388_v29 = vld [vmem:[#allocation25_spill] sm:$0xff]  ;;  %v22389_v60 = vld [vmem:[#allocation28_spill] sm:$0xff] }
 0x3ef   :  { %8822 = vmatmul.mubr.f32.vlgmr.msra.gmra.mxu0 %v8821_v23  ;;  %12431 = vmatprep.subr.mxu1 %v9049_v42  ;;  %v22390_v23 = vld [vmem:[#allocation11_spill] sm:$0xff]  ;;  %v22391_v42 = vld [vmem:[#allocation10_spill] sm:$0xff] }
 0x3f0   :  { %12436 = vmatprep.subr.mxu0 %v18998_v30  ;;  %12432 = vmatpush3.msra.mxu1 %v8937_v8  ;;  %v22392_v8 = vld [vmem:[#allocation26_spill] sm:$0xff] }
 0x3f1   :  { %9052 = vmatprep.mubr.f32.mxu1 %v19440_v62  ;;  %12437 = vmatpush3.msra.mxu0 %v19007_v48  ;;  %v22394_v62 = vld [vmem:[#allocation9_spill] sm:$0xff] }
 0x3f2   :  { %9054 = vmatmul.mubr.f32.vlgmr.msra.gmra.mxu1 %v19450_v25  ;;  %12438 = vmatprep.subr.mxu0 %v19030_v54  ;;  %v22393_v25 = vld [vmem:[#allocation34_spill] sm:$0xff] }
 0x3f3   :  { %12471 = vmatprep.subr.mxu1 %v18973_v22  ;;  %12439 = vmatpush3.msra.mxu0 %v19048_v7 }
 0x3f4   :  { %12472 = vmatpush3.msra.mxu1 %v18978_v47  ;;  %12440 = vmatprep.subr.mxu0 %v19059_v39 }
 0x3f5   :  { %12473 = vmatprep.subr.mxu1 %v18995_v19  ;;  %12441 = vmatpush3.msra.mxu0 %v19089_v40 }
 0x3f6   :  { %12474 = vmatpush3.msra.mxu1 %v19012_v28  ;;  %12442 = vmatprep.subr.mxu0 %v19101_v26 }
 0x3f7   :  { %12475 = vmatprep.subr.mxu1 %v19020_v53  ;;  %12443 = vmatpush3.msra.mxu0 %v19113_v55 }
 0x3f8   :  { %12476 = vmatpush3.msra.mxu1 %v19039_v13  ;;  %12444 = vmatprep.subr.mxu0 %v22376_v38 }
 0x3f9   :  { %12477 = vmatprep.subr.mxu1 %v22377_v12  ;;  %12445 = vmatpush3.msra.mxu0 %v22378_v31 }
 0x3fa   :  { %12478 = vmatpush3.msra.mxu1 %v22379_v32  ;;  %12446 = vmatprep.subr.mxu0 %v22380_v59 }
 0x3fb   :  { %12479 = vmatprep.subr.mxu1 %v22381_v15  ;;  %12447 = vmatpush3.msra.mxu0 %v22382_v0 }
 0x3fc   :  { %12480 = vmatpush3.msra.mxu1 %v22383_v58  ;;  %12448 = vmatprep.subr.mxu0 %v22384_v5 }
 0x3fd   :  { %12481 = vmatprep.subr.mxu1 %v22385_v45  ;;  %12449 = vmatpush3.msra.mxu0 %v22386_v6  ;;  %v22395_v45 = vld [vmem:[#allocation6_spill] sm:$0xff] }
 0x3fe   :  { %12482 = vmatpush3.msra.mxu1 %v22387_v52  ;;  %12450 = vmatprep.subr.mxu0 %v22388_v29 }
 0x3ff   :  { %12483 = vmatprep.subr.mxu1 %v22389_v60  ;;  %12451 = vmatpush3.msra.mxu0 %v22390_v23 }
 0x400   :  { %12484 = vmatpush3.msra.mxu1 %v22391_v42  ;;  %12452 = vmatprep.subr.mxu0 %v22392_v8 }
 0x401   :  { %12485 = vmatprep.subr.mxu1 %v22393_v25  ;;  %12453 = vmatpush3.msra.mxu0 %v22394_v62 }
 0x402   :  { %12486 = vmatpush3.msra.mxu1 %v19165_v4  ;;  %12454 = vmatprep.subr.mxu0 %v22395_v45 }
 0x403   :  { %12487 = vmatprep.subr.mxu1 %v19188_v2  ;;  %12455 = vmatpush3.msra.mxu0 %v19347_v63 }
 0x404   :  { %12488 = vmatpush3.msra.mxu1 %v19190_v33  ;;  %12456 = vmatprep.subr.mxu0 %v19379_v41 }
 0x405   :  { %12489 = vmatprep.subr.mxu1 %v19260_v17  ;;  %12457 = vmatpush3.msra.mxu0 %v19389_v20 }
 0x406   :  { %12490 = vmatpush3.msra.mxu1 %v19285_v43  ;;  %12458 = vmatprep.subr.mxu0 %v19402_v57 }
 0x407   :  { %12491 = vmatprep.subr.mxu1 %v19312_v3  ;;  %12459 = vmatpush3.msra.mxu0 %v19413_v50 }
 0x408   :  { %12492 = vmatpush3.msra.mxu1 %v19329_v21  ;;  %12460 = vmatprep.subr.mxu0 %v19426_v14 }
 0x409   :  { %12493 = vmatprep.subr.mxu1 %v19349_v51  ;;  %12461 = vmatpush3.msra.mxu0 %v19436_v10 }
 0x40a   :  { %12494 = vmatpush3.msra.mxu1 %v19368_v16  ;;  %12462 = vmatprep.subr.mxu0 %v19445_v46  ;;  %v22396_v46 = vld [vmem:[#allocation40_spill] sm:$0xff] }
 0x40b   :  { %12495 = vmatprep.subr.mxu1 %v19381_v37  ;;  %12463 = vmatpush3.msra.mxu0 %v19458_v11 }
 0x40c   :  { %12496 = vmatpush3.msra.mxu1 %v19391_v1  ;;  %12464 = vmatprep.subr.mxu0 %v19468_v9 }
 0x40d   :  { %12497 = vmatprep.subr.mxu1 %v19404_v49  ;;  %12465 = vmatpush3.msra.mxu0 %v19476_v35  ;;  %v22397_v49 = vand.u32 4294901760, %v18998_v30  ;;  %v22403_v30 = vand.u32 4294901760, %v19059_v39 }
 0x40e   :  { %12498 = vmatpush3.msra.mxu1 %v19415_v18  ;;  %12466 = vmatprep.subr.mxu0 %v19491_v61  ;;  %v22398_v18 = vand.u32 4294901760, %v22396_v46 }
 0x40f   :  { %12499 = vmatprep.subr.mxu1 %v19428_v24  ;;  %12467 = vmatpush3.msra.mxu0 %v19499_v34  ;;  %v22399_v24 = vand.u32 4294901760, %v19007_v48  ;;  %v22400_v34 = vand.u32 4294901760, %v19488_v56  ;;  %v22404_v48 = vand.u32 4294901760, %v19089_v40  ;;  %v22410_v40 = vand.u32 4294901760, %v22382_v0  ;;  %v576_v0 = vld [vmem:[%s20410_s2 + $0x2e0] sm:$0xff] }
 0x410   :  { %9189 = vmatprep.mubr.f32.mxu0 %v22396_v46  ;;  %12500 = vmatpush3.msra.mxu1 %v19438_v44  ;;  %v22401_v44 = vand.u32 4294901760, %v19030_v54  ;;  %v579_v54 = vld [vmem:[%s20410_s2 + $0x2f8] sm:$0xff] }
 0x411   :  { %9192 = vmatmul.mubr.f32.vlgmr.msra.gmra.mxu0 %v19488_v56  ;;  %12501 = vmatprep.subr.mxu1 %v19447_v36  ;;  %v22402_v36 = vand.u32 4294901760, %v19048_v7  ;;  %v22407_v7 = vand.u32 4294901760, %v22376_v38  ;;  %v19652_v39 = vand.u32 4294901760, %v579_v54  ;;  %v22414_v56 = vand.u32 4294901760, %v22388_v29  ;;  %v575_v29 = vld [vmem:[%s20410_s2 + $0x2d8] sm:$0xff] }
 0x412   :  { %12506 = vmatprep.subr.mxu0 %v22397_v49  ;;  %12502 = vmatpush3.msra.mxu1 %v19460_v27  ;;  %v562_v49 = vld [vmem:[%s20410_s2 + $0x270] sm:$0xff]  ;;  %v22415_v38 = vand.u32 4294901760, %v22390_v23 }
 0x413   :  { %9296 = vmatprep.mubr.f32.mxu1 %v22398_v18  ;;  %12507 = vmatpush3.msra.mxu0 %v22399_v24  ;;  %v22412_v24 = vld [vmem:[#allocation16_spill] sm:$0xff] }
 0x414   :  { %9300 = vmatmul.mubr.f32.vlgmr.msra.gmra.mxu1 %v22400_v34  ;;  %12508 = vmatprep.subr.mxu0 %v22401_v44  ;;  %v22413_v44 = vand.u32 4294901760, %v22386_v6  ;;  %v577_v34 = vld [vmem:[%s20410_s2 + $0x2e8] sm:$0xff] }
 0x415   :  { %12541 = vmatprep.subr.mxu1 %v18973_v22  ;;  %12509 = vmatpush3.msra.mxu0 %v22402_v36  ;;  %v22405_v22 = vand.u32 4294901760, %v19101_v26  ;;  %v22411_v26 = vand.u32 4294901760, %v22384_v5  ;;  %v22417_v5 = vand.u32 4294901760, %v22394_v62  ;;  %v22419_v62 = vand.u32 4294901760, %v19347_v63 }
 0x416   :  { %12542 = vmatpush3.msra.mxu1 %v18978_v47  ;;  %12510 = vmatprep.subr.mxu0 %v22403_v30  ;;  %v563_v47 = vld [vmem:[%s20410_s2 + $0x278] sm:$0xff]  ;;  %v558_v30 = vld [vmem:[%s20410_s2 + $0x250] sm:$0xff] }
 0x417   :  { %12543 = vmatprep.subr.mxu1 %v18995_v19  ;;  %12511 = vmatpush3.msra.mxu0 %v22404_v48  ;;  %v22406_v19 = vand.u32 4294901760, %v19113_v55  ;;  %v19657_v18 = vand.u32 4294901760, %v563_v47  ;;  %v19674_v55 = vsub.f32 %v579_v54, %v19652_v39  ;;  %v19754_v54 = vand.u32 4294901760, %v575_v29 }
 0x418   :  { %12544 = vmatpush3.msra.mxu1 %v19012_v28  ;;  %12512 = vmatprep.subr.mxu0 %v22405_v22  ;;  %v22408_v28 = vand.u32 4294901760, %v22378_v31  ;;  %v561_v31 = vld [vmem:[%s20410_s2 + $0x268] sm:$0xff]  ;;  %v22424_v22 = vand.u32 4294901760, %v19389_v20 }
 0x419   :  { %12545 = vmatprep.subr.mxu1 %v19020_v53  ;;  %12513 = vmatpush3.msra.mxu0 %v22406_v19  ;;  %v578_v53 = vld [vmem:[%s20410_s2 + $0x2f0] sm:$0xff]  ;;  %v19683_v36 = vsub.f32 %v563_v47, %v19657_v18  ;;  %v19724_v23 = vand.u32 4294901760, %v561_v31  ;;  %22423 = vst [vmem:[#allocation32_spill] sm:$0xff] %v19754_v54  ;;  %v573_v19 = vld [vmem:[%s20410_s2 + $0x2c8] sm:$0xff] }
 0x41a   :  { %12546 = vmatpush3.msra.mxu1 %v19039_v13  ;;  %12514 = vmatprep.subr.mxu0 %v22407_v7  ;;  %v22409_v13 = vand.u32 4294901760, %v22380_v59  ;;  %v19671_v46 = vand.u32 4294901760, %v578_v53  ;;  %v21127_v59 = vand.u32 4294901760, %v19674_v55 }
 0x41b   :  { %12547 = vmatprep.subr.mxu1 %v22377_v12  ;;  %12515 = vmatpush3.msra.mxu0 %v22408_v28  ;;  %v19694_v12 = vand.u32 4294901760, %v562_v49  ;;  %v21125_v6 = vand.u32 4294901760, %v19683_v36  ;;  %v19776_v20 = vsub.f32 %v561_v31, %v19724_v23  ;;  %v19780_v28 = vand.u32 4294901760, %v558_v30 }
 0x41c   :  { %12548 = vmatpush3.msra.mxu1 %v22379_v32  ;;  %12516 = vmatprep.subr.mxu0 %v22409_v13  ;;  %v22416_v32 = vand.u32 4294901760, %v22392_v8  ;;  %v19735_v8 = vand.u32 4294901760, %v576_v0  ;;  %v19751_v63 = vsub.f32 %v19674_v55, %v21127_v59  ;;  %v22429_v13 = vand.u32 4294901760, %v19413_v50  ;;  %v569_v59 = vld [vmem:[%s20410_s2 + $0x2a8] sm:$0xff] }
 0x41d   :  { %12549 = vmatprep.subr.mxu1 %v22381_v15  ;;  %12517 = vmatpush3.msra.mxu0 %v22410_v40  ;;  %v19704_v15 = vsub.f32 %v578_v53, %v19671_v46  ;;  %22428 = vst [vmem:[#allocation8_spill] sm:$0xff] %v19780_v28  ;;  %v557_v53 = vld [vmem:[%s20410_s2 + $0x248] sm:$0xff] }
 0x41e   :  { %12550 = vmatpush3.msra.mxu1 %v22383_v58  ;;  %12518 = vmatprep.subr.mxu0 %v22411_v26  ;;  %v560_v58 = vld [vmem:[%s20410_s2 + $0x260] sm:$0xff]  ;;  %22420 = vst [vmem:[#allocation12_spill] sm:$0xff] %v19735_v8  ;;  %v19793_v40 = vsub.f32 %v576_v0, %v19735_v8  ;;  %v19823_v31 = vand.u32 4294901760, %v557_v53 }
 0x41f   :  { %12551 = vmatprep.subr.mxu1 %v22412_v24  ;;  %12519 = vmatpush3.msra.mxu0 %v22413_v44  ;;  %v21123_v48 = vand.u32 4294901760, %v19704_v15  ;;  %v556_v26 = vld [vmem:[%s20410_s2 + $0x240] sm:$0xff]  ;;  %v19808_v24 = vsub.f32 %v575_v29, %v19754_v54  ;;  %v19810_v44 = vand.u32 4294901760, %v573_v19 }
 0x420   :  { %12552 = vmatpush3.msra.mxu1 %v22387_v52  ;;  %12520 = vmatprep.subr.mxu0 %v22414_v56  ;;  %v19716_v52 = vand.u32 4294901760, %v577_v34  ;;  %v572_v56 = vld [vmem:[%s20410_s2 + $0x2c0] sm:$0xff]  ;;  %22435 = vst [vmem:[#allocation13_spill] sm:$0xff] %v19823_v31 }
 0x421   :  { %12553 = vmatprep.subr.mxu1 %v22389_v60  ;;  %12521 = vmatpush3.msra.mxu0 %v22415_v38  ;;  %v22418_v60 = vand.u32 4294901760, %v22395_v45  ;;  %v574_v45 = vld [vmem:[%s20410_s2 + $0x2d0] sm:$0xff]  ;;  %v19805_v50 = vsub.f32 %v19704_v15, %v21123_v48  ;;  %22431 = vst [vmem:[#allocation15_spill] sm:$0xff] %v19808_v24  ;;  %22432 = vst [vmem:[#allocation41_spill] sm:$0xff] %v19810_v44 }
 0x422   :  { %12554 = vmatpush3.msra.mxu1 %v22391_v42  ;;  %12522 = vmatprep.subr.mxu0 %v22416_v32  ;;  %v19733_v42 = vsub.f32 %v562_v49, %v19694_v12  ;;  %v19778_v7 = vand.u32 4294901760, %v574_v45  ;;  %v22430_v49 = vand.u32 4294901760, %v19426_v14  ;;  %v571_v32 = vld [vmem:[%s20410_s2 + $0x2b8] sm:$0xff] }
 0x423   :  { %12555 = vmatprep.subr.mxu1 %v22393_v25  ;;  %12523 = vmatpush3.msra.mxu0 %v22417_v5  ;;  %v559_v25 = vld [vmem:[%s20410_s2 + $0x258] sm:$0xff]  ;;  %v19836_v5 = vsub.f32 %v558_v30, %v19780_v28 }
 0x424   :  { %12556 = vmatpush3.msra.mxu1 %v19165_v4  ;;  %12524 = vmatprep.subr.mxu0 %v22418_v60  ;;  %v19737_v4 = vand.u32 4294901760, %v560_v58  ;;  %v19767_v47 = vand.u32 4294901760, %v559_v25  ;;  %22427 = vst [vmem:[#allocation21_spill] sm:$0xff] %v19778_v7  ;;  %v19839_v29 = vsub.f32 %v574_v45, %v19778_v7  ;;  %v19841_v60 = vand.u32 4294901760, %v556_v26 }
 0x425   :  { %12557 = vmatprep.subr.mxu1 %v19188_v2  ;;  %12525 = vmatpush3.msra.mxu0 %v22419_v62  ;;  %v22422_v2 = vand.u32 4294901760, %v19379_v41  ;;  %v19765_v41 = vsub.f32 %v577_v34, %v19716_v52  ;;  %22438 = vst [vmem:[#allocation22_spill] sm:$0xff] %v19836_v5  ;;  %v21122_v62 = vand.u32 4294901760, %v19793_v40  ;;  %v22442_v45 = vand.u32 4294901760, %v19468_v9 }
 0x426   :  { %22421 = vst [vmem:[#allocation24_spill] sm:$0xff] %v19737_v4  ;;  %12558 = vmatpush3.msra.mxu1 %v19190_v33  ;;  %v19762_v33 = vsub.f32 %v19683_v36, %v21125_v6  ;;  %22425 = vst [vmem:[#allocation17_spill] sm:$0xff] %v19767_v47  ;;  %v19821_v38 = vsub.f32 %v559_v25, %v19767_v47  ;;  %v22440_v25 = vand.u32 4294901760, %v19458_v11 }
 0x427   :  { %12526 = vmatprep.subr.mxu0 %v22422_v2  ;;  %12559 = vmatprep.subr.mxu1 %v19260_v17  ;;  %v22426_v17 = vand.u32 4294901760, %v19402_v57  ;;  %v19790_v57 = vsub.f32 %v560_v58, %v19737_v4  ;;  %v21119_v34 = vand.u32 4294901760, %v19765_v41  ;;  %v21118_v58 = vand.u32 4294901760, %v19776_v20  ;;  %22439 = vst [vmem:[#allocation7_spill] sm:$0xff] %v19839_v29 }
 0x428   :  { %12527 = vmatpush3.msra.mxu0 %v22424_v22  ;;  %12560 = vmatpush3.msra.mxu1 %v19285_v43  ;;  %v21120_v43 = vand.u32 4294901760, %v19733_v42  ;;  %v9694_v14 = vand.u32 4294901760, %v19762_v33  ;;  %22434 = vst [vmem:[#allocation19_spill] sm:$0xff] %v19821_v38  ;;  %v19853_v2 = vand.u32 4294901760, %v572_v56  ;;  %v19860_v11 = vsub.f32 %v573_v19, %v19810_v44 }
 0x429   :  { %12528 = vmatprep.subr.mxu0 %v22426_v17  ;;  %12561 = vmatprep.subr.mxu1 %v19312_v3  ;;  %v9806_v3 = vand.u32 4294901760, %v19751_v63  ;;  %v21121_v30 = vand.u32 4294901760, %v19790_v57  ;;  %v19862_v22 = vand.u32 4294901760, %v571_v32  ;;  %v19873_v9 = vsub.f32 %v19765_v41, %v21119_v34 }
 0x42a   :  { %12529 = vmatpush3.msra.mxu0 %v22429_v13  ;;  %12562 = vmatpush3.msra.mxu1 %v19329_v21  ;;  %v22433_v21 = vand.u32 4294901760, %v19436_v10  ;;  %v22436_v10 = vld [vmem:[#allocation37_spill] sm:$0xff]  ;;  %22441 = vst [vmem:[#allocation35_spill] sm:$0xff] %v19853_v2  ;;  %22443 = vst [vmem:[#allocation18_spill] sm:$0xff] %v19860_v11  ;;  %v19877_v19 = vsub.f32 %v557_v53, %v19823_v31  ;;  %v570_v53 = vld [vmem:[%s20410_s2 + $0x2b0] sm:$0xff]  ;;  %v19910_v34 = vsub.f32 %v572_v56, %v19853_v2 }
 0x42b   :  { %12530 = vmatprep.subr.mxu0 %v22430_v49  ;;  %12563 = vmatprep.subr.mxu1 %v19349_v51  ;;  %v555_v51 = vld [vmem:[%s20410_s2 + $0x238] sm:$0xff]  ;;  %v22437_v0 = vand.u32 4294901760, %v22436_v10  ;;  %v22445_v49 = vand.u32 4294901760, %v19476_v35  ;;  %v19885_v35 = vsub.f32 %v19776_v20, %v21118_v58  ;;  %v19902_v58 = vsub.f32 %v19793_v40, %v21122_v62  ;;  %v554_v56 = vld [vmem:[%s20410_s2 + $0x230] sm:$0xff]  ;;  %v22458_v62 = vld [vmem:[#allocation42_spill] sm:$0xff] }
 0x42c   :  { %12531 = vmatpush3.msra.mxu0 %v22433_v21  ;;  %12564 = vmatpush3.msra.mxu1 %v19368_v16  ;;  %v19849_v16 = vsub.f32 %v19733_v42, %v21120_v43  ;;  %v19864_v17 = vand.u32 4294901760, %v555_v51  ;;  %v22444_v13 = vld [vmem:[#allocation29_spill] sm:$0xff]  ;;  %22446 = vst [vmem:[#allocation20_spill] sm:$0xff] %v19877_v19  ;;  %v22447_v10 = vld [vmem:[#allocation36_spill] sm:$0xff]  ;;  %22453 = vst [vmem:[#allocation31_spill] sm:$0xff] %v19910_v34  ;;  %v9820_v48 = vand.u32 4294901760, %v19873_v9 }
 0x42d   :  { %12532 = vmatprep.subr.mxu0 %v22437_v0  ;;  %12565 = vmatprep.subr.mxu1 %v19381_v37  ;;  %v21124_v37 = vand.u32 4294901760, %v19808_v24  ;;  %v22448_v0 = vand.u32 4294901760, %v19491_v61  ;;  %v22451_v61 = vld [vmem:[#allocation39_spill] sm:$0xff]  ;;  %v19938_v6 = vand.u32 4294901760, %v570_v53  ;;  %v19962_v21 = vand.u32 4294901760, %v554_v56 }
 0x42e   :  { %12533 = vmatpush3.msra.mxu0 %v22440_v25  ;;  %12566 = vmatpush3.msra.mxu1 %v19391_v1  ;;  %v21126_v1 = vand.u32 4294901760, %v19821_v38  ;;  %v21128_v25 = vand.u32 4294901760, %v19839_v29  ;;  %v22454_v43 = vld [vmem:[#allocation43_spill] sm:$0xff]  ;;  %v22462_v33 = vand.u32 4294901760, %v19805_v50 }
 0x42f   :  { %12534 = vmatprep.subr.mxu0 %v22442_v45  ;;  %12567 = vmatprep.subr.mxu1 %v22444_v13  ;;  %v21129_v45 = vand.u32 4294901760, %v19836_v5  ;;  %v19890_v13 = vsub.f32 %v556_v26, %v19841_v60  ;;  %v19907_v26 = vsub.f32 %v19790_v57, %v21121_v30  ;;  %v19924_v30 = vsub.f32 %v571_v32, %v19862_v22  ;;  %v20031_v50 = vld.sshfl [vmem:[%s20408_s0 + $0x8] sm:$0x33 pattern:$0x76325410] }
 0x430   :  { %12535 = vmatpush3.msra.mxu0 %v22445_v49  ;;  %12568 = vmatpush3.msra.mxu1 %v22447_v10  ;;  %v22450_v49 = vld [vmem:[#allocation27_spill] sm:$0xff]  ;;  %v22452_v10 = vand.u32 4294901760, %v22451_v61  ;;  %v21130_v61 = vand.u32 4294901760, %v19860_v11  ;;  %v9708_v32 = vand.u32 4294901760, %v19885_v35 }
 0x431   :  { %12536 = vmatprep.subr.mxu0 %v22448_v0  ;;  %22449 = vst [vmem:[#allocation30_spill] sm:$0xff] %v19890_v13  ;;  %12569 = vmatprep.subr.mxu1 %v22450_v49  ;;  %v9701_v0 = vand.u32 4294901760, %v19849_v16  ;;  %v22455_v49 = vld [vmem:[#allocation23_spill] sm:$0xff]  ;;  %v19917_v16 = vsub.f32 %v19808_v24, %v21124_v37  ;;  %22457 = vst [vmem:[#allocation14_spill] sm:$0xff] %v19924_v30  ;;  %v19935_v37 = vsub.f32 %v19821_v38, %v21126_v1  ;;  %v568_v1 = vld [vmem:[%s20410_s2 + $0x2a0] sm:$0xff] }
 0x432   :  { %12537 = vmatpush3.msra.mxu0 %v22452_v10  ;;  %9466 = vmatprep.mubr.f32.mxu0 %v22454_v43  ;;  %v19921_v10 = vsub.f32 %v555_v51, %v19864_v17  ;;  %v21131_v51 = vand.u32 4294901760, %v19877_v19  ;;  %v19951_v9 = vsub.f32 %v19836_v5, %v21129_v45  ;;  %v9715_v35 = vand.u32 4294901760, %v19907_v26  ;;  %v553_v45 = vld [vmem:[%s20410_s2 + $0x228] sm:$0xff]  ;;  %v552_v26 = vld [vmem:[%s20410_s2 + $0x220] sm:$0xff] }
 0x433   :  { %12570 = vmatpush3.msra.mxu1 %v22455_v49  ;;  %9468 = vmatmul.mubr.f32.vlgmr.msra.gmra.mxu0 %v22458_v62  ;;  %v22459_v49 = vld [vmem:[#allocation38_spill] sm:$0xff]  ;;  %v20045_v5 = vand.u32 4294901760, %v552_v26 }
 0x434   :  { %22456 = vst [vmem:[#allocation33_spill] sm:$0xff] %v19921_v10  ;;  %12571 = vmatprep.subr.mxu1 %v22459_v49  ;;  %12576 = vmatprep.subr.mxu0 %v19652_v39  ;;  %v19946_v49 = vsub.f32 %v19839_v29, %v21128_v25  ;;  %v19992_v25 = vsub.f32 %v570_v53, %v19938_v6  ;;  %v20007_v53 = vand.u32 4294901760, %v553_v45  ;;  %v548_v38 = vld [vmem:[%s20410_s2 + $0x200] sm:$0xff] }
 0x435   :  { %12572 = vmatpush3.msra.mxu1 %v19460_v27  ;;  %9570 = vmatprep.mubr.f32.mxu1 %v22454_v43  ;;  %v9827_v27 = vand.u32 4294901760, %v19902_v58  ;;  %v9834_v43 = vand.u32 4294901760, %v19917_v16  ;;  %v19973_v58 = vsub.f32 %v19860_v11, %v21130_v61  ;;  %v19987_v16 = vsub.f32 %v19877_v19, %v21131_v51  ;;  %v567_v19 = vld [vmem:[%s20410_s2 + $0x298] sm:$0xff] }
 0x436   :  { %12577 = vmatpush3.msra.mxu0 %v19657_v18  ;;  %9572 = vmatmul.mubr.f32.vlgmr.msra.gmra.mxu1 %v22458_v62  ;;  %v9722_v62 = vand.u32 4294901760, %v19935_v37  ;;  %v19989_v61 = vand.u32 4294901760, %v569_v59  ;;  %22460 = vst [vmem:[#allocation25_spill] sm:$0xff] %v19992_v25  ;;  %v9841_v63 = vand.u32 4294901760, %v19946_v49  ;;  %v22461_v37 = vand.u32 4294901760, %v19890_v13 }
 0x437   :  { %12578 = vmatprep.subr.mxu0 %v19671_v46  ;;  %12611 = vmatprep.subr.mxu1 %v9806_v3  ;;  %v20021_v3 = vsub.f32 %v554_v56, %v19962_v21  ;;  %v7846_v29 = vcombine.high %v20031_v50, %v20031_v50 }
 0x438   :  { %12579 = vmatpush3.msra.mxu0 %v19694_v12  ;;  %12612 = vmatpush3.msra.mxu1 %v9694_v14  ;;  %v20005_v51 = vsub.f32 %v19890_v13, %v22461_v37  ;;  %v22463_v14 = vand.u32 4294901760, %v19910_v34  ;;  %v20023_v37 = vand.u32 4294901760, %v568_v1  ;;  %v551_v13 = vld [vmem:[%s20410_s2 + $0x218] sm:$0xff] }
 0x439   :  { %12580 = vmatprep.subr.mxu0 %v19716_v52  ;;  %12613 = vmatprep.subr.mxu1 %v22462_v33  ;;  %v9848_v33 = vand.u32 4294901760, %v19973_v58  ;;  %v9736_v58 = vand.u32 4294901760, %v19987_v16  ;;  %v20066_v16 = vand.u32 4294901760, %v551_v13 }
 0x43a   :  { %12581 = vmatpush3.msra.mxu0 %v19724_v23  ;;  %v20018_v49 = vsub.f32 %v19910_v34, %v22463_v14  ;;  %12614 = vmatpush3.msra.mxu1 %v9701_v0  ;;  %v22464_v14 = vand.u32 4294901760, %v19924_v30  ;;  %v22465_v34 = vand.u32 4294901760, %v19921_v10  ;;  %v566_v0 = vld [vmem:[%s20410_s2 + $0x290] sm:$0xff] }
 0x43b   :  { %12582 = vmatprep.subr.mxu0 %v19735_v8  ;;  %12615 = vmatprep.subr.mxu1 %v9820_v48  ;;  %v9743_v48 = vand.u32 4294901760, %v20005_v51  ;;  %v20077_v51 = vsub.f32 %v568_v1, %v20023_v37  ;;  %v564_v1 = vld [vmem:[%s20410_s2 + $0x280] sm:$0xff] }
 0x43c   :  { %v20038_v56 = vsub.f32 %v19924_v30, %v22464_v14  ;;  %v20043_v11 = vsub.f32 %v19921_v10, %v22465_v34  ;;  %12583 = vmatpush3.msra.mxu0 %v19737_v4  ;;  %v20054_v14 = vsub.f32 %v569_v59, %v19989_v61  ;;  %v20056_v30 = vand.u32 4294901760, %v567_v19  ;;  %v550_v34 = vld [vmem:[%s20410_s2 + $0x210] sm:$0xff]  ;;  %12616 = vmatpush3.msra.mxu1 %v9708_v32  ;;  %v565_v59 = vld [vmem:[%s20410_s2 + $0x288] sm:$0xff] }
 0x43d   :  { %12584 = vmatprep.subr.mxu0 %v19754_v54  ;;  %v20064_v10 = vsub.f32 %v553_v45, %v20007_v53  ;;  %12617 = vmatprep.subr.mxu1 %v9827_v27  ;;  %v9855_v32 = vand.u32 4294901760, %v20018_v49  ;;  %v20079_v45 = vand.u32 4294901760, %v566_v0  ;;  %v549_v4 = vld [vmem:[%s20410_s2 + $0x208] sm:$0xff]  ;;  %v20088_v49 = vsub.f32 %v552_v26, %v20045_v5 }
 0x43e   :  { %12585 = vmatpush3.msra.mxu0 %v19767_v47  ;;  %12618 = vmatpush3.msra.mxu1 %v9715_v35  ;;  %v9862_v27 = vand.u32 4294901760, %v20038_v56  ;;  %v9750_v47 = vand.u32 4294901760, %v20043_v11  ;;  %v20090_v54 = vand.u32 4294901760, %v550_v34  ;;  %v22468_v35 = vand.u32 4294901760, %v19992_v25 }
 0x43f   :  { %22466 = vst [vmem:[#allocation28_spill] sm:$0xff] %v20079_v45  ;;  %12586 = vmatprep.subr.mxu0 %v19778_v7  ;;  %12619 = vmatprep.subr.mxu1 %v9834_v43  ;;  %v20101_v11 = vsub.f32 %v567_v19, %v20056_v30  ;;  %v20103_v26 = vand.u32 4294901760, %v565_v59  ;;  %v20115_v56 = vand.u32 4294901760, %v7846_v29  ;;  %v22476_v43 = vand.u32 4294901760, %v20021_v3 }
 0x440   :  { %22467 = vst [vmem:[#allocation11_spill] sm:$0xff] %v20090_v54  ;;  %12587 = vmatpush3.msra.mxu0 %v19780_v28  ;;  %v9868_v7 = vsub.f32 %v19992_v25, %v22468_v35  ;;  %12620 = vmatpush3.msra.mxu1 %v9722_v62  ;;  %v20111_v28 = vsub.f32 %v551_v13, %v20066_v16  ;;  %v20113_v35 = vand.u32 4294901760, %v549_v4  ;;  %v20122_v62 = vand.u32 4294901760, %v564_v1 }
 0x441   :  { %22469 = vst [vmem:[#allocation10_spill] sm:$0xff] %v20103_v26  ;;  %12588 = vmatprep.subr.mxu0 %v19810_v44  ;;  %22471 = vst [vmem:[#allocation34_spill] sm:$0xff] %v20115_v56  ;;  %12621 = vmatprep.subr.mxu1 %v9841_v63  ;;  %v20120_v25 = vsub.f32 %v566_v0, %v20079_v45  ;;  %v20125_v44 = vand.u32 4294901760, %v20031_v50  ;;  %v22475_v13 = vand.u32 4294901760, %v19951_v9  ;;  %v20137_v0 = vand.u32 4294901760, %v548_v38 }
 0x442   :  { %22470 = vst [vmem:[#allocation26_spill] sm:$0xff] %v20113_v35  ;;  %12589 = vmatpush3.msra.mxu0 %v19823_v31  ;;  %22473 = vst [vmem:[#allocation6_spill] sm:$0xff] %v20122_v62  ;;  %v9756_v63 = vsub.f32 %v20021_v3, %v22476_v43  ;;  %v20135_v19 = vsub.f32 %v550_v34, %v20090_v54  ;;  %v9869_v8 = vand.u32 4294901760, %v9868_v7  ;;  %v22477_v9 = vand.u32 4294901760, %v20054_v14 }
 0x443   :  { %22472 = vst [vmem:[#allocation9_spill] sm:$0xff] %v20120_v25  ;;  %22474 = vst [vmem:[#allocation40_spill] sm:$0xff] %v20125_v44  ;;  %12622 = vmatpush3.msra.mxu1 %v22475_v13  ;;  %12590 = vmatprep.subr.mxu0 %v19853_v2  ;;  %v20145_v24 = vsub.f32 %v565_v59, %v20103_v26  ;;  %v22478_v34 = vand.u32 4294901760, %v20064_v10  ;;  %v20153_v7 = vsub.f32 %v549_v4, %v20113_v35 }
 0x444   :  { %12623 = vmatprep.subr.mxu1 %v9848_v33  ;;  %12591 = vmatpush3.msra.mxu0 %v19841_v60  ;;  %v9875_v13 = vsub.f32 %v20054_v14, %v22477_v9  ;;  %v20156_v31 = vsub.f32 %v7846_v29, %v20115_v56  ;;  %v22480_v59 = vand.u32 4294901760, %v20077_v51  ;;  %v20168_v33 = vsub.f32 %v564_v1, %v20122_v62 }
 0x445   :  { %12624 = vmatpush3.msra.mxu1 %v9736_v58  ;;  %12592 = vmatprep.subr.mxu0 %v19862_v22  ;;  %v9763_v43 = vsub.f32 %v20064_v10, %v22478_v34  ;;  %v20165_v34 = vsub.f32 %v20031_v50, %v20125_v44  ;;  %v9757_v4 = vand.u32 4294901760, %v9756_v63  ;;  %v22481_v29 = vand.u32 4294901760, %v20088_v49 }
 0x446   :  { %22479 = vst [vmem:[#allocation16_spill] sm:$0xff] %v20156_v31  ;;  %12625 = vmatprep.subr.mxu1 %v9855_v32  ;;  %12593 = vmatpush3.msra.mxu0 %v19864_v17  ;;  %v9882_v58 = vsub.f32 %v20077_v51, %v22480_v59  ;;  %v20176_v59 = vsub.f32 %v548_v38, %v20137_v0  ;;  %v9876_v50 = vand.u32 4294901760, %v9875_v13  ;;  %v22483_v1 = vand.u32 4294901760, %v20101_v11 }
 0x447   :  { %12626 = vmatpush3.msra.mxu1 %v9743_v48  ;;  %12594 = vmatprep.subr.mxu0 %v19938_v6  ;;  %v9770_v32 = vsub.f32 %v20088_v49, %v22481_v29  ;;  %v9764_v63 = vand.u32 4294901760, %v9763_v43  ;;  %v22484_v29 = vand.u32 4294901760, %v20111_v28  ;;  %v22486_v38 = vand.u32 4294901760, %v20135_v19 }
 0x448   :  { %22482 = vst [vmem:[#allocation37_spill] sm:$0xff] %v20176_v59  ;;  %12627 = vmatprep.subr.mxu1 %v9862_v27  ;;  %12595 = vmatpush3.msra.mxu0 %v19962_v21  ;;  %v9889_v48 = vsub.f32 %v20101_v11, %v22483_v1  ;;  %v9883_v13 = vand.u32 4294901760, %v9882_v58  ;;  %v22485_v1 = vand.u32 4294901760, %v20120_v25 }
 0x449   :  { %12628 = vmatpush3.msra.mxu1 %v9750_v47  ;;  %12596 = vmatprep.subr.mxu0 %v19989_v61  ;;  %v9777_v2 = vsub.f32 %v20111_v28, %v22484_v29  ;;  %v9771_v29 = vand.u32 4294901760, %v9770_v32  ;;  %v9784_v27 = vsub.f32 %v20135_v19, %v22486_v38  ;;  %v22488_v32 = vand.u32 4294901760, %v20156_v31 }
 0x44a   :  { %12629 = vmatprep.subr.mxu1 %v9869_v8  ;;  %12597 = vmatpush3.msra.mxu0 %v20007_v53  ;;  %v9896_v9 = vsub.f32 %v20120_v25, %v22485_v1  ;;  %v9890_v58 = vand.u32 4294901760, %v9889_v48  ;;  %v22487_v1 = vand.u32 4294901760, %v20145_v24  ;;  %v22489_v38 = vand.u32 4294901760, %v20153_v7 }
 0x44b   :  { %12630 = vmatpush3.msra.mxu1 %v9757_v4  ;;  %12598 = vmatprep.subr.mxu0 %v20023_v37  ;;  %v9778_v4 = vand.u32 4294901760, %v9777_v2  ;;  %v9676_v43 = vsub.f32 %v20156_v31, %v22488_v32  ;;  %v22490_v48 = vand.u32 4294901760, %v20165_v34  ;;  %v9785_v32 = vand.u32 4294901760, %v9784_v27 }
 0x44c   :  { %12631 = vmatprep.subr.mxu1 %v9876_v50  ;;  %12599 = vmatpush3.msra.mxu0 %v20045_v5  ;;  %v9903_v47 = vsub.f32 %v20145_v24, %v22487_v1  ;;  %v9791_v8 = vsub.f32 %v20153_v7, %v22489_v38  ;;  %v9897_v50 = vand.u32 4294901760, %v9896_v9  ;;  %v22492_v31 = vand.u32 4294901760, %v20176_v59 }
 0x44d   :  { %12632 = vmatpush3.msra.mxu1 %v9764_v63  ;;  %12600 = vmatprep.subr.mxu0 %v20056_v30  ;;  %v9682_v1 = vsub.f32 %v20165_v34, %v22490_v48  ;;  %v22491_v63 = vand.u32 4294901760, %v20168_v33 }
 0x44e   :  { %12633 = vmatprep.subr.mxu1 %v9883_v13  ;;  %12601 = vmatpush3.msra.mxu0 %v20066_v16  ;;  %v9798_v38 = vsub.f32 %v20176_v59, %v22492_v31  ;;  %v9904_v9 = vand.u32 4294901760, %v9903_v47  ;;  %v9677_v13 = vand.u32 4294901760, %v9676_v43  ;;  %v9792_v48 = vand.u32 4294901760, %v9791_v8  ;;  %v22493_v31 = vld [vmem:[#allocation15_spill] sm:$0xff]  ;;  %v22494_v47 = vld [vmem:[#allocation12_spill] sm:$0xff] }
 0x44f   :  { %v9910_v2 = vsub.f32 %v20168_v33, %v22491_v63  ;;  %12634 = vmatpush3.msra.mxu1 %v9771_v29  ;;  %12602 = vmatprep.subr.mxu0 %v20079_v45  ;;  %v9683_v29 = vand.u32 4294901760, %v9682_v1  ;;  %v22495_v43 = vld [vmem:[#allocation19_spill] sm:$0xff]  ;;  %v22496_v8 = vld [vmem:[#allocation24_spill] sm:$0xff]  ;;  %v22500_v1 = vld [vmem:[#allocation17_spill] sm:$0xff] }
 0x450   :  { %12635 = vmatprep.subr.mxu1 %v9890_v58  ;;  %12603 = vmatpush3.msra.mxu0 %v20090_v54  ;;  %v9799_v27 = vand.u32 4294901760, %v9798_v38  ;;  %v22497_v58 = vld [vmem:[#allocation7_spill] sm:$0xff]  ;;  %v22503_v38 = vld [vmem:[#allocation20_spill] sm:$0xff] }
 0x451   :  { %12636 = vmatpush3.msra.mxu1 %v9778_v4  ;;  %12604 = vmatprep.subr.mxu0 %v20103_v26  ;;  %v9911_v63 = vand.u32 4294901760, %v9910_v2  ;;  %v22498_v4 = vld [vmem:[#allocation32_spill] sm:$0xff]  ;;  %v22501_v2 = vld [vmem:[#allocation18_spill] sm:$0xff] }
 0x452   :  { %12637 = vmatprep.subr.mxu1 %v9897_v50  ;;  %12605 = vmatpush3.msra.mxu0 %v20113_v35  ;;  %v22499_v50 = vld [vmem:[#allocation22_spill] sm:$0xff] }
 0x453   :  { %12638 = vmatpush3.msra.mxu1 %v9785_v32  ;;  %12606 = vmatprep.subr.mxu0 %v20122_v62  ;;  %v22502_v32 = vld [vmem:[#allocation21_spill] sm:$0xff] }
 0x454   :  { %12639 = vmatprep.subr.mxu1 %v9904_v9  ;;  %12607 = vmatpush3.msra.mxu0 %v20137_v0  ;;  %v22504_v9 = vld [vmem:[#allocation8_spill] sm:$0xff] }
 0x455   :  { %9678 = vmatprep.mubr.f32.mxu0 %v9677_v13  ;;  %12640 = vmatpush3.msra.mxu1 %v9792_v48  ;;  %v22505_v13 = vld [vmem:[#allocation31_spill] sm:$0xff]  ;;  %v22506_v48 = vld [vmem:[#allocation41_spill] sm:$0xff] }
 0x456   :  { %9684 = vmatmul.mubr.f32.vlgmr.msra.gmra.mxu0 %v9683_v29  ;;  %12641 = vmatprep.subr.mxu1 %v9911_v63  ;;  %v22507_v29 = vld [vmem:[#allocation30_spill] sm:$0xff]  ;;  %v22508_v63 = vld [vmem:[#allocation13_spill] sm:$0xff] }
 0x457   :  { %12646 = vmatprep.subr.mxu0 %v19674_v55  ;;  %12642 = vmatpush3.msra.mxu1 %v9799_v27  ;;  %v22509_v27 = vld [vmem:[#allocation14_spill] sm:$0xff] }
 0x458   :  { %9914 = vmatprep.mubr.f32.mxu1 %v20115_v56  ;;  %12647 = vmatpush3.msra.mxu0 %v19683_v36  ;;  %v22511_v56 = vld [vmem:[#allocation33_spill] sm:$0xff] }
 0x459   :  { %9916 = vmatmul.mubr.f32.vlgmr.msra.gmra.mxu1 %v20125_v44  ;;  %12648 = vmatprep.subr.mxu0 %v19704_v15  ;;  %v22510_v44 = vld [vmem:[#allocation35_spill] sm:$0xff] }
 0x45a   :  { %12681 = vmatprep.subr.mxu1 %v19652_v39  ;;  %12649 = vmatpush3.msra.mxu0 %v19733_v42 }
 0x45b   :  { %12682 = vmatpush3.msra.mxu1 %v19657_v18  ;;  %12650 = vmatprep.subr.mxu0 %v19765_v41 }
 0x45c   :  { %12683 = vmatprep.subr.mxu1 %v19671_v46  ;;  %12651 = vmatpush3.msra.mxu0 %v19776_v20 }
 0x45d   :  { %12684 = vmatpush3.msra.mxu1 %v19694_v12  ;;  %12652 = vmatprep.subr.mxu0 %v19793_v40 }
 0x45e   :  { %12685 = vmatprep.subr.mxu1 %v19716_v52  ;;  %12653 = vmatpush3.msra.mxu0 %v19790_v57 }
 0x45f   :  { %12686 = vmatpush3.msra.mxu1 %v19724_v23  ;;  %12654 = vmatprep.subr.mxu0 %v22493_v31 }
 0x460   :  { %12687 = vmatprep.subr.mxu1 %v22494_v47  ;;  %12655 = vmatpush3.msra.mxu0 %v22495_v43 }
 0x461   :  { %12688 = vmatpush3.msra.mxu1 %v22496_v8  ;;  %12656 = vmatprep.subr.mxu0 %v22497_v58 }
 0x462   :  { %12689 = vmatprep.subr.mxu1 %v22498_v4  ;;  %12657 = vmatpush3.msra.mxu0 %v22499_v50 }
 0x463   :  { %12690 = vmatpush3.msra.mxu1 %v22500_v1  ;;  %12658 = vmatprep.subr.mxu0 %v22501_v2 }
 0x464   :  { %12691 = vmatprep.subr.mxu1 %v22502_v32  ;;  %12659 = vmatpush3.msra.mxu0 %v22503_v38  ;;  %v22512_v32 = vld [vmem:[#allocation25_spill] sm:$0xff] }
 0x465   :  { %12692 = vmatpush3.msra.mxu1 %v22504_v9  ;;  %12660 = vmatprep.subr.mxu0 %v22505_v13 }
 0x466   :  { %12693 = vmatprep.subr.mxu1 %v22506_v48  ;;  %12661 = vmatpush3.msra.mxu0 %v22507_v29 }
 0x467   :  { %12694 = vmatpush3.msra.mxu1 %v22508_v63  ;;  %12662 = vmatprep.subr.mxu0 %v22509_v27 }
 0x468   :  { %12695 = vmatprep.subr.mxu1 %v22510_v44  ;;  %12663 = vmatpush3.msra.mxu0 %v22511_v56 }
 0x469   :  { %12696 = vmatpush3.msra.mxu1 %v19841_v60  ;;  %12664 = vmatprep.subr.mxu0 %v22512_v32 }
 0x46a   :  { %12697 = vmatprep.subr.mxu1 %v19862_v22  ;;  %12665 = vmatpush3.msra.mxu0 %v20021_v3 }
 0x46b   :  { %12698 = vmatpush3.msra.mxu1 %v19864_v17  ;;  %12666 = vmatprep.subr.mxu0 %v20054_v14 }
 0x46c   :  { %12699 = vmatprep.subr.mxu1 %v19938_v6  ;;  %12667 = vmatpush3.msra.mxu0 %v20064_v10 }
 0x46d   :  { %12700 = vmatpush3.msra.mxu1 %v19962_v21  ;;  %12668 = vmatprep.subr.mxu0 %v20077_v51 }
 0x46e   :  { %12701 = vmatprep.subr.mxu1 %v19989_v61  ;;  %12669 = vmatpush3.msra.mxu0 %v20088_v49 }
 0x46f   :  { %12702 = vmatpush3.msra.mxu1 %v20007_v53  ;;  %12670 = vmatprep.subr.mxu0 %v20101_v11 }
 0x470   :  { %12703 = vmatprep.subr.mxu1 %v20023_v37  ;;  %12671 = vmatpush3.msra.mxu0 %v20111_v28 }
 0x471   :  { %12704 = vmatpush3.msra.mxu1 %v20045_v5  ;;  %12672 = vmatprep.subr.mxu0 %v20120_v25  ;;  %v22513_v25 = vld [vmem:[#allocation16_spill] sm:$0xff] }
 0x472   :  { %12705 = vmatprep.subr.mxu1 %v20056_v30  ;;  %12673 = vmatpush3.msra.mxu0 %v20135_v19 }
 0x473   :  { %12706 = vmatpush3.msra.mxu1 %v20066_v16  ;;  %12674 = vmatprep.subr.mxu0 %v20145_v24 }
 0x474   :  { %12707 = vmatprep.subr.mxu1 %v20079_v45  ;;  %12675 = vmatpush3.msra.mxu0 %v20153_v7  ;;  %v22514_v45 = vand.u32 4294901760, %v19674_v55  ;;  %v22520_v55 = vand.u32 4294901760, %v19765_v41  ;;  %v22531_v41 = vand.u32 4294901760, %v22505_v13 }
 0x475   :  { %12708 = vmatpush3.msra.mxu1 %v20090_v54  ;;  %12676 = vmatprep.subr.mxu0 %v20168_v33  ;;  %v22515_v54 = vand.u32 4294901760, %v22513_v25 }
 0x476   :  { %12709 = vmatprep.subr.mxu1 %v20103_v26  ;;  %12677 = vmatpush3.msra.mxu0 %v20176_v59  ;;  %v22516_v26 = vand.u32 4294901760, %v19683_v36  ;;  %v22517_v59 = vand.u32 4294901760, %v20165_v34  ;;  %v22521_v36 = vand.u32 4294901760, %v19776_v20  ;;  %v22532_v20 = vand.u32 4294901760, %v22507_v29 }
 0x477   :  { %10051 = vmatprep.mubr.f32.mxu0 %v22513_v25  ;;  %12710 = vmatpush3.msra.mxu1 %v20113_v35  ;;  %v22518_v35 = vand.u32 4294901760, %v19704_v15  ;;  %v22522_v15 = vand.u32 4294901760, %v19793_v40  ;;  %v22534_v40 = vand.u32 4294901760, %v22511_v56  ;;  %v22535_v25 = vand.u32 4294901760, %v22512_v32  ;;  %v22552_v56 = vld [vmem:[#allocation37_spill] sm:$0xff] }
 0x478   :  { %10054 = vmatmul.mubr.f32.vlgmr.msra.gmra.mxu0 %v20165_v34  ;;  %12711 = vmatprep.subr.mxu1 %v20122_v62  ;;  %v22519_v62 = vand.u32 4294901760, %v19733_v42  ;;  %v22529_v42 = vld [vmem:[#allocation21_spill] sm:$0xff] }
 0x479   :  { %12716 = vmatprep.subr.mxu0 %v22514_v45  ;;  %12712 = vmatpush3.msra.mxu1 %v20137_v0  ;;  %v22536_v45 = vand.u32 4294901760, %v20021_v3  ;;  %v10508_v3 = vpop.f32.mrf.mxu0 }
 0x47a   :  { %10158 = vmatprep.mubr.f32.mxu1 %v22515_v54  ;;  %12717 = vmatpush3.msra.mxu0 %v22516_v26  ;;  %v22530_v54 = vand.u32 4294901760, %v22503_v38  ;;  %v22537_v26 = vand.u32 4294901760, %v20054_v14  ;;  %v22550_v14 = vand.u32 4294901760, %v20168_v33 }
 0x47b   :  { %10162 = vmatmul.mubr.f32.vlgmr.msra.gmra.mxu1 %v22517_v59  ;;  %12718 = vmatprep.subr.mxu0 %v22518_v35 }
 0x47c   :  { %12751 = vmatprep.subr.mxu1 %v19652_v39  ;;  %12719 = vmatpush3.msra.mxu0 %v22519_v62  ;;  %v22523_v39 = vand.u32 4294901760, %v19790_v57  ;;  %v22533_v57 = vand.u32 4294901760, %v22509_v27  ;;  %v22557_v62 = vld [vmem:[#allocation6_spill] sm:$0xff] }
 0x47d   :  { %12752 = vmatpush3.msra.mxu1 %v19657_v18  ;;  %12720 = vmatprep.subr.mxu0 %v22520_v55  ;;  %v22524_v18 = vand.u32 4294901760, %v22493_v31 }
 0x47e   :  { %12753 = vmatprep.subr.mxu1 %v19671_v46  ;;  %12721 = vmatpush3.msra.mxu0 %v22521_v36  ;;  %v22525_v46 = vand.u32 4294901760, %v22495_v43 }
 0x47f   :  { %12754 = vmatpush3.msra.mxu1 %v19694_v12  ;;  %12722 = vmatprep.subr.mxu0 %v22522_v15  ;;  %v22526_v12 = vand.u32 4294901760, %v22497_v58 }
 0x480   :  { %12755 = vmatprep.subr.mxu1 %v19716_v52  ;;  %12723 = vmatpush3.msra.mxu0 %v22523_v39  ;;  %v22527_v52 = vand.u32 4294901760, %v22499_v50 }
 0x481   :  { %12756 = vmatpush3.msra.mxu1 %v19724_v23  ;;  %12724 = vmatprep.subr.mxu0 %v22524_v18  ;;  %v22528_v23 = vand.u32 4294901760, %v22501_v2 }
 0x482   :  { %12757 = vmatprep.subr.mxu1 %v22494_v47  ;;  %12725 = vmatpush3.msra.mxu0 %v22525_v46 }
 0x483   :  { %12758 = vmatpush3.msra.mxu1 %v22496_v8  ;;  %12726 = vmatprep.subr.mxu0 %v22526_v12 }
 0x484   :  { %12759 = vmatprep.subr.mxu1 %v22498_v4  ;;  %12727 = vmatpush3.msra.mxu0 %v22527_v52 }
 0x485   :  { %12760 = vmatpush3.msra.mxu1 %v22500_v1  ;;  %12728 = vmatprep.subr.mxu0 %v22528_v23 }
 0x486   :  { %12761 = vmatprep.subr.mxu1 %v22529_v42  ;;  %12729 = vmatpush3.msra.mxu0 %v22530_v54 }
 0x487   :  { %12762 = vmatpush3.msra.mxu1 %v22504_v9  ;;  %12730 = vmatprep.subr.mxu0 %v22531_v41 }
 0x488   :  { %12763 = vmatprep.subr.mxu1 %v22506_v48  ;;  %12731 = vmatpush3.msra.mxu0 %v22532_v20 }
 0x489   :  { %12764 = vmatpush3.msra.mxu1 %v22508_v63  ;;  %12732 = vmatprep.subr.mxu0 %v22533_v57 }
 0x48a   :  { %12765 = vmatprep.subr.mxu1 %v22510_v44  ;;  %12733 = vmatpush3.msra.mxu0 %v22534_v40  ;;  %v22538_v44 = vand.u32 4294901760, %v20064_v10 }
 0x48b   :  { %12766 = vmatpush3.msra.mxu1 %v19841_v60  ;;  %12734 = vmatprep.subr.mxu0 %v22535_v25  ;;  %v22539_v60 = vand.u32 4294901760, %v20077_v51  ;;  %v10543_v51 = vpop.f32.mrf.mxu1 }
 0x48c   :  { %12767 = vmatprep.subr.mxu1 %v19862_v22  ;;  %12735 = vmatpush3.msra.mxu0 %v22536_v45  ;;  %v22540_v22 = vand.u32 4294901760, %v20088_v49  ;;  %v22551_v49 = vld [vmem:[#allocation10_spill] sm:$0xff] }
 0x48d   :  { %12768 = vmatpush3.msra.mxu1 %v19864_v17  ;;  %12736 = vmatprep.subr.mxu0 %v22537_v26  ;;  %v22541_v17 = vand.u32 4294901760, %v20101_v11  ;;  %v22553_v11 = vand.u32 4294901760, %v22552_v56  ;;  %v10544_v33 = vpop.f32.mrf.mxu1 }
 0x48e   :  { %12769 = vmatprep.subr.mxu1 %v19938_v6  ;;  %12737 = vmatpush3.msra.mxu0 %v22538_v44  ;;  %v22542_v6 = vand.u32 4294901760, %v20111_v28  ;;  %v22548_v28 = vand.u32 4294901760, %v20153_v7  ;;  %v10545_v31 = vadd.f32 %v10544_v33, %v10543_v51 }
 0x48f   :  { %12770 = vmatpush3.msra.mxu1 %v19962_v21  ;;  %12738 = vmatprep.subr.mxu0 %v22539_v60  ;;  %v22543_v21 = vld [vmem:[#allocation9_spill] sm:$0xff]  ;;  %v10613_v34 = vpop.f32.mrf.mxu1 }
 0x490   :  { %12771 = vmatprep.subr.mxu1 %v19989_v61  ;;  %12739 = vmatpush3.msra.mxu0 %v22540_v22  ;;  %v22544_v10 = vand.u32 4294901760, %v22543_v21  ;;  %v22545_v61 = vand.u32 4294901760, %v20135_v19  ;;  %v22556_v19 = vld [vmem:[#allocation40_spill] sm:$0xff] }
 0x491   :  { %12772 = vmatpush3.msra.mxu1 %v20007_v53  ;;  %12740 = vmatprep.subr.mxu0 %v22541_v17  ;;  %v22546_v53 = vand.u32 4294901760, %v20145_v24  ;;  %v22555_v24 = vld [vmem:[#allocation26_spill] sm:$0xff]  ;;  %v10614_v8 = vpop.f32.mrf.mxu1 }
 0x492   :  { %12773 = vmatprep.subr.mxu1 %v20023_v37  ;;  %12741 = vmatpush3.msra.mxu0 %v22542_v6  ;;  %v22547_v37 = vld [vmem:[#allocation28_spill] sm:$0xff]  ;;  %v10615_v2 = vadd.f32 %v10614_v8, %v10613_v34 }
 0x493   :  { %12774 = vmatpush3.msra.mxu1 %v20045_v5  ;;  %12742 = vmatprep.subr.mxu0 %v22544_v10  ;;  %v22549_v5 = vld [vmem:[#allocation11_spill] sm:$0xff]  ;;  %v10683_v50 = vpop.f32.mrf.mxu1 }
 0x494   :  { %12775 = vmatprep.subr.mxu1 %v20056_v30  ;;  %12743 = vmatpush3.msra.mxu0 %v22545_v61  ;;  %v10509_v30 = vpop.f32.mrf.mxu0 }
 0x495   :  { %12776 = vmatpush3.msra.mxu1 %v20066_v16  ;;  %12744 = vmatprep.subr.mxu0 %v22546_v53  ;;  %v22554_v16 = vld [vmem:[#allocation34_spill] sm:$0xff]  ;;  %v10510_v59 = vadd.f32 %v10509_v30, %v10508_v3 }
 0x496   :  { %12777 = vmatprep.subr.mxu1 %v22547_v37  ;;  %12745 = vmatpush3.msra.mxu0 %v22548_v28  ;;  %v10578_v35 = vpop.f32.mrf.mxu0 }
 0x497   :  { %12778 = vmatpush3.msra.mxu1 %v22549_v5  ;;  %12746 = vmatprep.subr.mxu0 %v22550_v14  ;;  %v1265_v58 = vadd.f32 %v10545_v31, %v10510_v59 }
 0x498   :  { %12779 = vmatprep.subr.mxu1 %v22551_v49  ;;  %12747 = vmatpush3.msra.mxu0 %v22553_v11  ;;  %v10579_v7 = vpop.f32.mrf.mxu0 }
 0x499   :  { %10328 = vmatprep.mubr.f32.mxu0 %v22554_v16  ;;  %12780 = vmatpush3.msra.mxu1 %v22555_v24  ;;  %v10580_v43 = vadd.f32 %v10579_v7, %v10578_v35 }
 0x49a   :  { %10330 = vmatmul.mubr.f32.vlgmr.msra.gmra.mxu0 %v22556_v19  ;;  %12781 = vmatprep.subr.mxu1 %v22557_v62  ;;  %v10648_v47 = vpop.f32.mrf.mxu0 }
 0x49b   :  { %12782 = vmatpush3.msra.mxu1 %v20137_v0  ;;  %10432 = vmatprep.mubr.f32.mxu1 %v22554_v16  ;;  %v1403_v1 = vadd.f32 %v10580_v43, %v1265_v58  ;;  %v10684_v0 = vpop.f32.mrf.mxu1 }
 0x49c   :  { %10434 = vmatmul.mubr.f32.vlgmr.msra.gmra.mxu1 %v22556_v19  ;;  %v10649_v4 = vpop.f32.mrf.mxu0  ;;  %v10685_v63 = vadd.f32 %v10684_v0, %v10683_v50 }
 0x49d   :  { %v10650_v38 = vadd.f32 %v10649_v4, %v10648_v47  ;;  %v1511_v9 = vadd.f32 %v10615_v2, %v1403_v1  ;;  %v10753_v48 = vpop.f32.mrf.mxu1 }
 0x49e   :  { %v10718_v32 = vpop.f32.mrf.mxu0 }
 0x49f   :  { %v1679_v29 = vadd.f32 %v10650_v38, %v1511_v9  ;;  %v10754_v36 = vpop.f32.mrf.mxu1 }
 0x4a0   :  { %v10719_v13 = vpop.f32.mrf.mxu0  ;;  %v10755_v12 = vadd.f32 %v10754_v36, %v10753_v48 }
 0x4a1   :  { %v10720_v55 = vadd.f32 %v10719_v13, %v10718_v32  ;;  %v1783_v15 = vadd.f32 %v10685_v63, %v1679_v29  ;;  %v10823_v18 = vpop.f32.mrf.mxu1 }
 0x4a2   :  { %v10788_v27 = vpop.f32.mrf.mxu0 }
 0x4a3   :  { %v1895_v46 = vadd.f32 %v10720_v55, %v1783_v15  ;;  %v10824_v42 = vpop.f32.mrf.mxu1 }
 0x4a4   :  { %v10789_v39 = vpop.f32.mrf.mxu0  ;;  %v10825_v40 = vadd.f32 %v10824_v42, %v10823_v18 }
 0x4a5   :  { %v10790_v23 = vadd.f32 %v10789_v39, %v10788_v27  ;;  %v2127_v54 = vadd.f32 %v10755_v12, %v1895_v46  ;;  %v10893_v20 = vpop.f32.mrf.mxu1 }
 0x4a6   :  { %v10858_v52 = vpop.f32.mrf.mxu0 }
 0x4a7   :  { %v2265_v57 = vadd.f32 %v10790_v23, %v2127_v54  ;;  %v10894_v26 = vpop.f32.mrf.mxu1 }
 0x4a8   :  { %v10859_v41 = vpop.f32.mrf.mxu0  ;;  %v10895_v6 = vadd.f32 %v10894_v26, %v10893_v20 }
 0x4a9   :  { %v10860_v45 = vadd.f32 %v10859_v41, %v10858_v52  ;;  %v2373_v44 = vadd.f32 %v10825_v40, %v2265_v57  ;;  %v10963_v22 = vpop.f32.mrf.mxu1 }
 0x4aa   :  { %v10928_v25 = vpop.f32.mrf.mxu0 }
 0x4ab   :  { %v2541_v17 = vadd.f32 %v10860_v45, %v2373_v44  ;;  %v10964_v3 = vpop.f32.mrf.mxu1 }
 0x4ac   :  { %v10929_v60 = vpop.f32.mrf.mxu0  ;;  %v10965_v5 = vadd.f32 %v10964_v3, %v10963_v22 }
 0x4ad   :  { %v10930_v10 = vadd.f32 %v10929_v60, %v10928_v25  ;;  %v2645_v61 = vadd.f32 %v10895_v6, %v2541_v17  ;;  %v11033_v37 = vpop.f32.mrf.mxu1 }
 0x4ae   :  { %v10998_v21 = vpop.f32.mrf.mxu0 }
 0x4af   :  { %v2757_v28 = vadd.f32 %v10930_v10, %v2645_v61  ;;  %v11034_v30 = vpop.f32.mrf.mxu1 }
 0x4b0   :  { %v10999_v53 = vpop.f32.mrf.mxu0  ;;  %v11035_v24 = vadd.f32 %v11034_v30, %v11033_v37 }
 0x4b1   :  { %v11000_v51 = vadd.f32 %v10999_v53, %v10998_v21  ;;  %v2989_v49 = vadd.f32 %v10965_v5, %v2757_v28  ;;  %v11103_v11 = vpop.f32.mrf.mxu1 }
 0x4b2   :  { %v11068_v14 = vpop.f32.mrf.mxu0 }
 0x4b3   :  { %v3127_v16 = vadd.f32 %v11000_v51, %v2989_v49  ;;  %v11104_v62 = vpop.f32.mrf.mxu1 }
 0x4b4   :  { %v11069_v56 = vpop.f32.mrf.mxu0  ;;  %v11105_v31 = vadd.f32 %v11104_v62, %v11103_v11 }
 0x4b5   :  { %v11070_v19 = vadd.f32 %v11069_v56, %v11068_v14  ;;  %v3235_v33 = vadd.f32 %v11035_v24, %v3127_v16  ;;  %v11173_v34 = vpop.f32.mrf.mxu1 }
 0x4b6   :  { %v11138_v35 = vpop.f32.mrf.mxu0 }
 0x4b7   :  { %v3403_v59 = vadd.f32 %v11070_v19, %v3235_v33  ;;  %v11174_v8 = vpop.f32.mrf.mxu1 }
 0x4b8   :  { %v11139_v7 = vpop.f32.mrf.mxu0  ;;  %v11175_v2 = vadd.f32 %v11174_v8, %v11173_v34 }
 0x4b9   :  { %v11140_v43 = vadd.f32 %v11139_v7, %v11138_v35  ;;  %v3507_v58 = vadd.f32 %v11105_v31, %v3403_v59  ;;  %v11243_v50 = vpop.f32.mrf.mxu1 }
 0x4ba   :  { %v11208_v47 = vpop.f32.mrf.mxu0 }
 0x4bb   :  { %v3619_v1 = vadd.f32 %v11140_v43, %v3507_v58  ;;  %v11244_v0 = vpop.f32.mrf.mxu1 }
 0x4bc   :  { %v11209_v4 = vpop.f32.mrf.mxu0  ;;  %v11245_v63 = vadd.f32 %v11244_v0, %v11243_v50 }
 0x4bd   :  { %v11210_v38 = vadd.f32 %v11209_v4, %v11208_v47  ;;  %v3851_v9 = vadd.f32 %v11175_v2, %v3619_v1  ;;  %v11313_v48 = vpop.f32.mrf.mxu1 }
 0x4be   :  { %v11278_v32 = vpop.f32.mrf.mxu0 }
 0x4bf   :  { %v3989_v29 = vadd.f32 %v11210_v38, %v3851_v9  ;;  %v11314_v36 = vpop.f32.mrf.mxu1 }
 0x4c0   :  { %v11279_v13 = vpop.f32.mrf.mxu0  ;;  %v11315_v12 = vadd.f32 %v11314_v36, %v11313_v48 }
 0x4c1   :  { %v11280_v55 = vadd.f32 %v11279_v13, %v11278_v32  ;;  %v4097_v15 = vadd.f32 %v11245_v63, %v3989_v29  ;;  %v11383_v18 = vpop.f32.mrf.mxu1 }
 0x4c2   :  { %v11348_v27 = vpop.f32.mrf.mxu0 }
 0x4c3   :  { %v4265_v46 = vadd.f32 %v11280_v55, %v4097_v15  ;;  %v11384_v42 = vpop.f32.mrf.mxu1 }
 0x4c4   :  { %v11349_v39 = vpop.f32.mrf.mxu0  ;;  %v11385_v40 = vadd.f32 %v11384_v42, %v11383_v18 }
 0x4c5   :  { %v11350_v23 = vadd.f32 %v11349_v39, %v11348_v27  ;;  %v4369_v54 = vadd.f32 %v11315_v12, %v4265_v46  ;;  %v11453_v20 = vpop.f32.mrf.mxu1 }
 0x4c6   :  { %v11418_v52 = vpop.f32.mrf.mxu0 }
 0x4c7   :  { %v4481_v57 = vadd.f32 %v11350_v23, %v4369_v54  ;;  %v11454_v26 = vpop.f32.mrf.mxu1 }
 0x4c8   :  { %v11419_v41 = vpop.f32.mrf.mxu0  ;;  %v11455_v6 = vadd.f32 %v11454_v26, %v11453_v20 }
 0x4c9   :  { %v11420_v45 = vadd.f32 %v11419_v41, %v11418_v52  ;;  %v4713_v44 = vadd.f32 %v11385_v40, %v4481_v57  ;;  %v11523_v22 = vpop.f32.mrf.mxu1 }
 0x4ca   :  { %v11488_v25 = vpop.f32.mrf.mxu0 }
 0x4cb   :  { %v4851_v17 = vadd.f32 %v11420_v45, %v4713_v44  ;;  %v11524_v3 = vpop.f32.mrf.mxu1 }
 0x4cc   :  { %v11489_v60 = vpop.f32.mrf.mxu0  ;;  %v11525_v5 = vadd.f32 %v11524_v3, %v11523_v22 }
 0x4cd   :  { %v11490_v10 = vadd.f32 %v11489_v60, %v11488_v25  ;;  %v4959_v61 = vadd.f32 %v11455_v6, %v4851_v17  ;;  %v11593_v37 = vpop.f32.mrf.mxu1 }
 0x4ce   :  { %v11558_v21 = vpop.f32.mrf.mxu0 }
 0x4cf   :  { %v5127_v28 = vadd.f32 %v11490_v10, %v4959_v61  ;;  %v11594_v30 = vpop.f32.mrf.mxu1 }
 0x4d0   :  { %v11559_v53 = vpop.f32.mrf.mxu0  ;;  %v11595_v24 = vadd.f32 %v11594_v30, %v11593_v37 }
 0x4d1   :  { %v11560_v51 = vadd.f32 %v11559_v53, %v11558_v21  ;;  %v5231_v49 = vadd.f32 %v11525_v5, %v5127_v28  ;;  %v11663_v11 = vpop.f32.mrf.mxu1 }
 0x4d2   :  { %v11628_v14 = vpop.f32.mrf.mxu0 }
 0x4d3   :  { %v5343_v16 = vadd.f32 %v11560_v51, %v5231_v49  ;;  %v11664_v62 = vpop.f32.mrf.mxu1 }
 0x4d4   :  { %v11629_v56 = vpop.f32.mrf.mxu0  ;;  %v11665_v31 = vadd.f32 %v11664_v62, %v11663_v11 }
 0x4d5   :  { %v11630_v19 = vadd.f32 %v11629_v56, %v11628_v14  ;;  %v5575_v33 = vadd.f32 %v11595_v24, %v5343_v16  ;;  %v11733_v34 = vpop.f32.mrf.mxu1 }
 0x4d6   :  { %v11698_v35 = vpop.f32.mrf.mxu0 }
 0x4d7   :  { %v5713_v59 = vadd.f32 %v11630_v19, %v5575_v33  ;;  %v11734_v8 = vpop.f32.mrf.mxu1 }
 0x4d8   :  { %v11699_v7 = vpop.f32.mrf.mxu0  ;;  %v11735_v2 = vadd.f32 %v11734_v8, %v11733_v34 }
 0x4d9   :  { %v11700_v43 = vadd.f32 %v11699_v7, %v11698_v35  ;;  %v5821_v58 = vadd.f32 %v11665_v31, %v5713_v59  ;;  %v11803_v50 = vpop.f32.mrf.mxu1 }
 0x4da   :  { %v11768_v47 = vpop.f32.mrf.mxu0 }
 0x4db   :  { %v5989_v1 = vadd.f32 %v11700_v43, %v5821_v58  ;;  %v11804_v0 = vpop.f32.mrf.mxu1 }
 0x4dc   :  { %v11769_v4 = vpop.f32.mrf.mxu0  ;;  %v11805_v63 = vadd.f32 %v11804_v0, %v11803_v50 }
 0x4dd   :  { %v11770_v38 = vadd.f32 %v11769_v4, %v11768_v47  ;;  %v6093_v9 = vadd.f32 %v11735_v2, %v5989_v1  ;;  %v11873_v48 = vpop.f32.mrf.mxu1 }
 0x4de   :  { %v11838_v32 = vpop.f32.mrf.mxu0 }
 0x4df   :  { %v6205_v29 = vadd.f32 %v11770_v38, %v6093_v9  ;;  %v11874_v36 = vpop.f32.mrf.mxu1 }
 0x4e0   :  { %v11839_v13 = vpop.f32.mrf.mxu0  ;;  %v11875_v12 = vadd.f32 %v11874_v36, %v11873_v48 }
 0x4e1   :  { %v11840_v55 = vadd.f32 %v11839_v13, %v11838_v32  ;;  %v6437_v15 = vadd.f32 %v11805_v63, %v6205_v29  ;;  %v11943_v18 = vpop.f32.mrf.mxu1 }
 0x4e2   :  { %v11908_v27 = vpop.f32.mrf.mxu0 }
 0x4e3   :  { %v6575_v46 = vadd.f32 %v11840_v55, %v6437_v15  ;;  %v11944_v42 = vpop.f32.mrf.mxu1 }
 0x4e4   :  { %v11909_v39 = vpop.f32.mrf.mxu0  ;;  %v11945_v40 = vadd.f32 %v11944_v42, %v11943_v18 }
 0x4e5   :  { %v11910_v23 = vadd.f32 %v11909_v39, %v11908_v27  ;;  %v6683_v54 = vadd.f32 %v11875_v12, %v6575_v46  ;;  %v12013_v20 = vpop.f32.mrf.mxu1 }
 0x4e6   :  { %v11978_v52 = vpop.f32.mrf.mxu0 }
 0x4e7   :  { %v6851_v57 = vadd.f32 %v11910_v23, %v6683_v54  ;;  %v12014_v26 = vpop.f32.mrf.mxu1 }
 0x4e8   :  { %v11979_v41 = vpop.f32.mrf.mxu0  ;;  %v12015_v6 = vadd.f32 %v12014_v26, %v12013_v20 }
 0x4e9   :  { %v11980_v45 = vadd.f32 %v11979_v41, %v11978_v52  ;;  %v6955_v44 = vadd.f32 %v11945_v40, %v6851_v57  ;;  %v12083_v22 = vpop.f32.mrf.mxu1 }
 0x4ea   :  { %v12048_v25 = vpop.f32.mrf.mxu0 }
 0x4eb   :  { %v7067_v17 = vadd.f32 %v11980_v45, %v6955_v44  ;;  %v12084_v3 = vpop.f32.mrf.mxu1 }
 0x4ec   :  { %v12049_v60 = vpop.f32.mrf.mxu0  ;;  %v12085_v5 = vadd.f32 %v12084_v3, %v12083_v22 }
 0x4ed   :  { %v12050_v10 = vadd.f32 %v12049_v60, %v12048_v25  ;;  %v7299_v61 = vadd.f32 %v12015_v6, %v7067_v17  ;;  %v12153_v37 = vpop.f32.mrf.mxu1 }
 0x4ee   :  { %v12118_v21 = vpop.f32.mrf.mxu0 }
 0x4ef   :  { %v7437_v28 = vadd.f32 %v12050_v10, %v7299_v61  ;;  %v12154_v30 = vpop.f32.mrf.mxu1 }
 0x4f0   :  { %v12119_v53 = vpop.f32.mrf.mxu0  ;;  %v12155_v24 = vadd.f32 %v12154_v30, %v12153_v37 }
 0x4f1   :  { %v12120_v51 = vadd.f32 %v12119_v53, %v12118_v21  ;;  %v7545_v49 = vadd.f32 %v12085_v5, %v7437_v28  ;;  %v12223_v11 = vpop.f32.mrf.mxu1 }
 0x4f2   :  { %v12188_v14 = vpop.f32.mrf.mxu0 }
 0x4f3   :  { %v7713_v16 = vadd.f32 %v12120_v51, %v7545_v49  ;;  %v12224_v62 = vpop.f32.mrf.mxu1 }
 0x4f4   :  { %v12189_v56 = vpop.f32.mrf.mxu0  ;;  %v12225_v31 = vadd.f32 %v12224_v62, %v12223_v11 }
 0x4f5   :  { %v12190_v19 = vadd.f32 %v12189_v56, %v12188_v14  ;;  %v7817_v33 = vadd.f32 %v12155_v24, %v7713_v16  ;;  %v12293_v34 = vpop.f32.mrf.mxu1 }
 0x4f6   :  { %v12258_v35 = vpop.f32.mrf.mxu0 }
 0x4f7   :  { %v7962_v59 = vadd.f32 %v12190_v19, %v7817_v33  ;;  %v12294_v8 = vpop.f32.mrf.mxu1 }
 0x4f8   :  { %v12259_v7 = vpop.f32.mrf.mxu0  ;;  %v12295_v2 = vadd.f32 %v12294_v8, %v12293_v34  ;;  %v10475_v34 = vld [vmem:[%s20412_s4] ss:$0 sm:$0xff]  ;;  %s12793_s4 = scalar_lea.vmem %s10467_s20, 32 }
 0x4f9   :  { %v12260_v43 = vadd.f32 %v12259_v7, %v12258_v35  ;;  %v8194_v58 = vadd.f32 %v12225_v31, %v7962_v59  ;;  %v12363_v50 = vpop.f32.mrf.mxu1  ;;  %p12794_p0 = scmp.ne.s32.totalorder %s10467_s20, %s12793_s4  ;;  %p12799_p2 = scmp.lt.s32.totalorder %s12793_s4, %s12793_s4 }
 0x4fa   :  { %v12328_v47 = vpop.f32.mrf.mxu0 }
 0x4fb   :  { %v8332_v1 = vadd.f32 %v12260_v43, %v8194_v58  ;;  %v12364_v0 = vpop.f32.mrf.mxu1  ;;  %p12800_p3 = por %p12799_p2, %p12798_p1 }
 0x4fc   :  { %v12329_v4 = vpop.f32.mrf.mxu0  ;;  %v12365_v63 = vadd.f32 %v12364_v0, %v12363_v50 }
 0x4fd   :  { %v12330_v38 = vadd.f32 %v12329_v4, %v12328_v47  ;;  %v8440_v9 = vadd.f32 %v12295_v2, %v8332_v1  ;;  %v12433_v48 = vpop.f32.mrf.mxu1  ;;  %p12801_p4 = pnand %p12800_p3, %p12794_p0 }
 0x4fe   :  { %v12398_v32 = vpop.f32.mrf.mxu0 }
 0x4ff   :  { %v8608_v29 = vadd.f32 %v12330_v38, %v8440_v9  ;;  %v12434_v36 = vpop.f32.mrf.mxu1 }
 0x500   :  { %v12399_v13 = vpop.f32.mrf.mxu0  ;;  %v12435_v12 = vadd.f32 %v12434_v36, %v12433_v48 }
 0x501   :  { %v12400_v55 = vadd.f32 %v12399_v13, %v12398_v32  ;;  %v8712_v15 = vadd.f32 %v12365_v63, %v8608_v29  ;;  %v12503_v18 = vpop.f32.mrf.mxu1 }
 0x502   :  { %v12468_v27 = vpop.f32.mrf.mxu0 }
 0x503   :  { %v8824_v46 = vadd.f32 %v12400_v55, %v8712_v15  ;;  %v12504_v42 = vpop.f32.mrf.mxu1 }
 0x504   :  { %v12469_v39 = vpop.f32.mrf.mxu0  ;;  %v12505_v40 = vadd.f32 %v12504_v42, %v12503_v18 }
 0x505   :  { %v12470_v23 = vadd.f32 %v12469_v39, %v12468_v27  ;;  %v9056_v54 = vadd.f32 %v12435_v12, %v8824_v46  ;;  %v12573_v20 = vpop.f32.mrf.mxu1 }
 0x506   :  { %v12538_v52 = vpop.f32.mrf.mxu0 }
 0x507   :  { %v9194_v57 = vadd.f32 %v12470_v23, %v9056_v54  ;;  %v12574_v26 = vpop.f32.mrf.mxu1 }
 0x508   :  { %v12539_v41 = vpop.f32.mrf.mxu0  ;;  %v12575_v6 = vadd.f32 %v12574_v26, %v12573_v20 }
 0x509   :  { %v12540_v45 = vadd.f32 %v12539_v41, %v12538_v52  ;;  %v9302_v44 = vadd.f32 %v12505_v40, %v9194_v57 }
 0x50b   :  { %v9470_v17 = vadd.f32 %v12540_v45, %v9302_v44 }
 0x50d   :  { %v9574_v61 = vadd.f32 %v12575_v6, %v9470_v17 }
 0x516   :  { %v12608_v25 = vpop.f32.mrf.mxu0 }
 0x518   :  { %v12609_v60 = vpop.f32.mrf.mxu0 }
 0x519   :  { %v12643_v22 = vpop.f32.mrf.mxu1  ;;  %v12610_v10 = vadd.f32 %v12609_v60, %v12608_v25 }
 0x51b   :  { %v12644_v3 = vpop.f32.mrf.mxu1  ;;  %v9686_v28 = vadd.f32 %v12610_v10, %v9574_v61 }
 0x51c   :  { %v12645_v5 = vadd.f32 %v12644_v3, %v12643_v22 }
 0x51e   :  { %v9918_v30 = vadd.f32 %v12645_v5, %v9686_v28 }
 0x538   :  { %v12678_v21 = vpop.f32.mrf.mxu0 }
 0x53a   :  { %v12679_v53 = vpop.f32.mrf.mxu0 }
 0x53b   :  { %v12713_v37 = vpop.f32.mrf.mxu1  ;;  %v12680_v14 = vadd.f32 %v12679_v53, %v12678_v21 }
 0x53d   :  { %v12714_v51 = vpop.f32.mrf.mxu1  ;;  %v10056_v49 = vadd.f32 %v12680_v14, %v9918_v30 }
 0x53e   :  { %v12715_v56 = vadd.f32 %v12714_v51, %v12713_v37 }
 0x540   :  { %v10164_v35 = vadd.f32 %v12715_v56, %v10056_v49 }
 0x55a   :  { %v12748_v11 = vpop.f32.mrf.mxu0 }
 0x55c   :  { %v12749_v16 = vpop.f32.mrf.mxu0  ;;  %v12783_v24 = vpop.f32.mrf.mxu1 }
 0x55d   :  { %v12750_v19 = vadd.f32 %v12749_v16, %v12748_v11 }
 0x55e   :  { %v12784_v62 = vpop.f32.mrf.mxu1 }
 0x55f   :  { %v10332_v33 = vadd.f32 %v12750_v19, %v10164_v35  ;;  %v12785_v7 = vadd.f32 %v12784_v62, %v12783_v24 }
 0x561   :  { %v10436_v59 = vadd.f32 %v12785_v7, %v10332_v33 }
 0x563   :  { %v10446_v31 = vadd.f32 %v10475_v34, %v10436_v59 }
 0x565   :  { %v10448_v47 = vsel %vm10447_vm4, %v10446_v31, -inf }
 0x566   :  { %10449 = vmax.xlane.f32.xlu0 %v10448_v47 }
 0x5ef   :  { %v10450_v43 = vpop.xlane.xlu0 %10449 }
 0x5f0   :  { %v10451_v8 = vsub.f32 %v10446_v31, %v10450_v43 }
 0x5f2   :  { %v10452_v58 = vmul.f32 1.442695, %v10451_v8 }
 0x5f4   :  { %12789 = vpow2.f32 %v10452_v58 }
 0x601   :  { %v12790_v4 = vpop.eup %12789 }
 0x602   :  { %v10454_v50 = vsel %vm10447_vm4, %v12790_v4, 0.0 }
 0x603   :  { %10455 = vadd.xlane.f32.xlu0 %v10454_v50 }
 0x68c   :  { %v10456_v1 = vpop.xlane.xlu0 %10455 }
 0x68d   :  { %12791 = vrcp.f32 %v10456_v1 }
 0x69a   :  { %v12792_v2 = vpop.eup %12791 }
 0x69b   :  { %v10458_v32 = vmul.f32 %v12792_v2, %v12790_v4 }
 0x69d   :  { %10459 = vst.msk [vmem:[#allocation3] sm:$0x3] %vm10447_vm4, %v10458_v32 }
 0x69e   :  { %12804 = shalt.err (!%p12801_p4)
}
 0x69f   :  { %10469 = dma.vmem_to_hbm [thread:$0]  %s10467_s20, 32, %s20413_s5, [#allocation4]  }
 0x6a0   :  { %12813 = dma.done.wait [#allocation4], 32  }
 0x6a1   :  { %12814 = vsyncadd [#allocation4], 4294967264 }
 0x6a2   :  { %10473 = vsyncpa [#allocation4], 1 }

</bundles_post_ra>
